<compile_context>
chip_gen: v5e
topology: v5e:2x2
jax: 0.10.0
libtpu: 0.0.40
codegen_flags: <defaults>
</compile_context>

<pallas_src>
import functools

import jax
import jax.numpy as jnp
from jax.experimental import pallas as pl
from jax.experimental.pallas import tpu as pltpu

NEG_SLOPE = 0.1
LANE = 128
ROW_CHUNK = 512          # rows per in-kernel chunk: f32 acc = 512*128*4 = 256 KB (bounded)
VMEM_FALLBACK = 64 * 1024 * 1024


def _round_up(x, m):
    return ((x + m - 1) // m) * m


def _vmem_limit_bytes():
    """Generation-aware scoped VMEM budget (~3/4 of physical: 96 MiB v5e/v6e, 48 MiB v7x)."""
    try:
        cap = pltpu.get_tpu_info().vmem_capacity_bytes
        if cap:
            return int(cap * 3 // 4)
    except Exception:
        pass
    return VMEM_FALLBACK


# ----------------------------------------------------------------------------
# Fused kernel: n residual blocks, activation resident in VMEM across blocks.
#   act (padded-flat, bf16)  --1x1 conv + BN + leaky-->  h (padded-flat, bf16)
#   h --(9 taps concat along K, one matmul) 3x3 conv + BN + leaky + residual--> act
# ----------------------------------------------------------------------------
def _resblock_stack_kernel(x_ref, mask_ref, w1_ref, w2_ref, s1_ref, b1_ref,
                           s2_ref, b2_ref, o_ref, act_ref, h_ref,
                           *, H, W, lead, trail, n_blocks, chunk):
    Wp = W + 2                       # row stride of the padded-flat spatial layout
    Mp_r, _ = act_ref.shape          # padded-flat rows (rounded to a multiple of 16)
    F = h_ref.shape[1]
    k = pl.program_id(1)             # residual-block index (sequential carry axis)

    # Fresh image: load the (already halo/channel padded, flattened) input activation.
    @pl.when(k == 0)
    def _():
        act_ref[...] = x_ref[0]

    # Guard rows of the tap buffer must be zero (they are only ever read for outputs that
    # get masked away, but NaNs from uninitialized VMEM would poison 0*NaN).  They are never
    # overwritten, but zeroing is done every step (cheap) so megacore partitioning of the
    # parallel batch axis stays correct (each core's scratch starts uninitialized).
    h_ref[0:lead, :] = jnp.zeros((lead, F), jnp.bfloat16)
    h_ref[lead + Mp_r:lead + Mp_r + trail, :] = jnp.zeros((trail, F), jnp.bfloat16)

    w1 = w1_ref[0]                   # (C_p, F_p) bf16
    s1, b1 = s1_ref[0], b1_ref[0]    # (1, F_p) f32 folded-BN affine

    # ---- Stage 1: 1x1 conv + BN + LeakyReLU.  Spatial-halo rows are forced to zero by the
    #      interior mask so they act as the 3x3 conv's zero padding (no HBM pad op needed). ----
    for base in range(0, Mp_r, chunk):
        m = min(chunk, Mp_r - base)
        a = act_ref[base:base + m, :]
        y = jnp.dot(a, w1, preferred_element_type=jnp.float32) * s1 + b1
        y = jnp.maximum(y, NEG_SLOPE * y)                     # LeakyReLU(0.1)
        h_ref[lead + base:lead + base + m, :] = (
            y.astype(jnp.bfloat16) * mask_ref[base:base + m, :])

    w2 = w2_ref[0]                   # (9*F_p, C_p) bf16 (taps pre-concatenated along K)
    s2, b2 = s2_ref[0], b2_ref[0]    # (1, C_p) f32

    # ---- Stage 2: 3x3 conv as ONE big-K matmul per row chunk (9 taps concatenated along K),
    #      folded BN + LeakyReLU, residual add (bf16), halo rows re-masked to zero so the
    #      carried activation keeps valid zero padding for the next block. ----
    for base in range(0, Mp_r, chunk):
        m = min(chunk, Mp_r - base)
        # output position r (padded-flat) pulls tap (dy, dx) from h at r - (Wp+1) + dy*Wp + dx;
        # in h_ref coordinates the buffer is offset by `lead` so all starts are >= 0.
        off = lead + base - (Wp + 1)
        lhs = jnp.concatenate(
            [h_ref[off + dy * Wp + dx:off + dy * Wp + dx + m, :]
             for dy in range(3) for dx in range(3)], axis=-1)            # (m, 9*F_p)
        y = jnp.dot(lhs, w2, preferred_element_type=jnp.float32) * s2 + b2
        y = jnp.maximum(y, NEG_SLOPE * y)                                 # LeakyReLU(0.1)
        new = (y.astype(jnp.bfloat16) + act_ref[base:base + m, :]) \
            * mask_ref[base:base + m, :]                                  # residual AFTER act
        act_ref[base:base + m, :] = new

    # Only the final block's activation goes back to HBM (lane-dense (Mp_r, C_p) store).
    @pl.when(k == n_blocks - 1)
    def _():
        o_ref[0] = act_ref[...]


def _stack_kernel_call(x_flat, mask, params, *, H, W):
    """x_flat: (B, Mp_r, C_p) bf16 padded-flat input; mask: (Mp_r, 1) bf16 interior mask."""
    B, Mp_r, C_p = x_flat.shape
    n, _, F_p = params["w1"].shape
    Wp = W + 2
    lead = _round_up(Wp + 1, 16)     # zero guard rows before/after the tap buffer, 16-aligned
    trail = _round_up(Wp + 1, 16)

    kernel = functools.partial(_resblock_stack_kernel, H=H, W=W, lead=lead, trail=trail,
                               n_blocks=n, chunk=ROW_CHUNK)

    return pl.pallas_call(
        kernel,
        out_shape=jax.ShapeDtypeStruct((B, Mp_r, C_p), jnp.bfloat16),
        grid_spec=pltpu.PrefetchScalarGridSpec(
            num_scalar_prefetch=0,
            grid=(B, n),
            in_specs=[
                pl.BlockSpec((1, Mp_r, C_p), lambda b, k: (b, 0, 0)),      # input activation
                pl.BlockSpec((Mp_r, 1), lambda b, k: (0, 0)),              # interior mask
                pl.BlockSpec((1, C_p, F_p), lambda b, k: (k, 0, 0)),       # 1x1 weights (per block)
                pl.BlockSpec((1, 9 * F_p, C_p), lambda b, k: (k, 0, 0)),   # 3x3 tap-concat weights
                pl.BlockSpec((1, 1, F_p), lambda b, k: (k, 0, 0)),         # folded BN scale (1x1)
                pl.BlockSpec((1, 1, F_p), lambda b, k: (k, 0, 0)),         # folded BN bias  (1x1)
                pl.BlockSpec((1, 1, C_p), lambda b, k: (k, 0, 0)),         # folded BN scale (3x3)
                pl.BlockSpec((1, 1, C_p), lambda b, k: (k, 0, 0)),         # folded BN bias  (3x3)
            ],
            out_specs=pl.BlockSpec((1, Mp_r, C_p), lambda b, k: (b, 0, 0)),
            scratch_shapes=[
                pltpu.VMEM((Mp_r, C_p), jnp.bfloat16),                     # activation carry / residual
                pltpu.VMEM((lead + Mp_r + trail, F_p), jnp.bfloat16),      # padded-flat 1x1 output h
            ],
        ),
        compiler_params=pltpu.CompilerParams(
            dimension_semantics=("parallel", "arbitrary"),   # batch parallel, block carry sequential
            vmem_limit_bytes=_vmem_limit_bytes()),
    )(x_flat, mask, params["w1"], params["w2"], params["s1"], params["b1"],
      params["s2"], params["b2"])


# ----------------------------------------------------------------------------
# Forward pass (mirrors StackResidualBlock.forward); public interface is NCHW f32.
# ----------------------------------------------------------------------------
def stack_residual_block_forward(params, x_nchw):
    B, C, H, W = x_nchw.shape
    _, C_p, _ = params["w1"].shape
    Wp = W + 2
    Mp = (H + 2) * Wp
    Mp_r = _round_up(Mp, 16)

    # One-time layout transform for the WHOLE stack (not per block): NCHW -> NHWC bf16,
    # 1-pixel spatial halo + channel pad to C_p, flatten spatial, pad rows to 16.
    x = jnp.transpose(x_nchw, (0, 2, 3, 1)).astype(jnp.bfloat16)
    x = jnp.pad(x, ((0, 0), (1, 1), (1, 1), (0, C_p - C)))
    x = x.reshape(B, Mp, C_p)
    if Mp_r != Mp:
        x = jnp.pad(x, ((0, 0), (0, Mp_r - Mp), (0, 0)))

    # Interior mask over padded-flat rows: 1 inside the H x W image, 0 on the halo/tail rows.
    r = jnp.arange(Mp_r)
    row, col = r // Wp, r % Wp
    mask = (((row >= 1) & (row <= H) & (col >= 1) & (col <= W) & (r < Mp))
            .astype(jnp.bfloat16).reshape(Mp_r, 1))

    out = _stack_kernel_call(x, mask, params, H=H, W=W)

    # One-time inverse transform: drop halo/tail rows, channel padding, back to NCHW f32.
    y = out[:, :Mp, :].reshape(B, H + 2, W + 2, C_p)[:, 1:H + 1, 1:W + 1, :C]
    return jnp.transpose(y.astype(jnp.float32), (0, 3, 1, 2))


# ----------------------------------------------------------------------------
# Parameters (synthetic, deterministic; mirrors Conv2dUnit shapes, eval-mode BN folding)
# ----------------------------------------------------------------------------
def _fold_bn(key, cout):
    g_, b_, m_, v_ = jax.random.split(key, 4)
    gamma = 0.01 * jax.random.normal(g_, (cout,), jnp.float32)
    beta = 0.01 * jax.random.normal(b_, (cout,), jnp.float32)
    mean = 0.01 * jax.random.normal(m_, (cout,), jnp.float32)
    # TODO(synk): the reference inits running_var ~ N(0, 0.01) which can be negative and is
    # invalid for eval-mode BN folding; a positive synthetic running_var is used instead.
    var = jax.random.uniform(v_, (cout,), jnp.float32, 0.5, 1.5)
    scale = gamma / jnp.sqrt(var + 1e-5)
    bias = beta - mean * scale
    return scale, bias


def _make_conv_unit(key, cin, cout, k):
    kw, kbn = jax.random.split(key)
    w = 0.01 * jax.random.normal(kw, (k, k, cin, cout), jnp.float32)   # HWIO
    scale, bias = _fold_bn(kbn, cout)
    return {"w": w, "scale": scale, "bias": bias}


def init_stack_residual_params(key, input_dim, filters, n):
    assert input_dim == 2 * filters, "residual add requires input_dim == 2*filters"
    C_p = _round_up(input_dim, LANE)
    F_p = _round_up(filters, LANE)
    keys = jax.random.split(key, 2 * n)
    ref_blocks = []
    w1l, w2l, s1l, b1l, s2l, b2l = [], [], [], [], [], []
    for i in range(n):
        c1 = _make_conv_unit(keys[2 * i], input_dim, filters, 1)
        c2 = _make_conv_unit(keys[2 * i + 1], filters, 2 * filters, 3)
        ref_blocks.append({"c1": c1, "c2": c2})

        w1p = jnp.zeros((C_p, F_p), jnp.float32).at[:input_dim, :filters].set(c1["w"][0, 0])
        w2p = jnp.zeros((3, 3, F_p, C_p), jnp.float32).at[:, :, :filters, :input_dim].set(c2["w"])
        w1l.append(w1p.astype(jnp.bfloat16))
        w2l.append(w2p.reshape(9 * F_p, C_p).astype(jnp.bfloat16))   # taps pre-concatenated on K
        s1l.append(jnp.zeros((F_p,), jnp.float32).at[:filters].set(c1["scale"]))
        b1l.append(jnp.zeros((F_p,), jnp.float32).at[:filters].set(c1["bias"]))
        s2l.append(jnp.zeros((C_p,), jnp.float32).at[:input_dim].set(c2["scale"]))
        b2l.append(jnp.zeros((C_p,), jnp.float32).at[:input_dim].set(c2["bias"]))

    kernel_params = {
        "w1": jnp.stack(w1l),                   # (n, C_p, F_p)   bf16
        "w2": jnp.stack(w2l),                   # (n, 9*F_p, C_p) bf16
        "s1": jnp.stack(s1l)[:, None, :],       # (n, 1, F_p)     f32
        "b1": jnp.stack(b1l)[:, None, :],
        "s2": jnp.stack(s2l)[:, None, :],       # (n, 1, C_p)     f32
        "b2": jnp.stack(b2l)[:, None, :],
    }
    return kernel_params, ref_blocks


# ----------------------------------------------------------------------------
# Pure-JAX reference (f32) for correctness checking
# ----------------------------------------------------------------------------
def _ref_conv_bn_leaky(x, w, scale, bias, pad):
    y = jax.lax.conv_general_dilated(
        x, w, window_strides=(1, 1), padding=[(pad, pad), (pad, pad)],
        dimension_numbers=("NHWC", "HWIO", "NHWC"))
    y = y * scale + bias
    return jnp.maximum(y, NEG_SLOPE * y)


def _ref_forward(ref_blocks, x_nchw):
    x = jnp.transpose(x_nchw, (0, 2, 3, 1))
    for bp in ref_blocks:
        r = x
        h = _ref_conv_bn_leaky(x, bp["c1"]["w"], bp["c1"]["scale"], bp["c1"]["bias"], 0)
        y = _ref_conv_bn_leaky(h, bp["c2"]["w"], bp["c2"]["scale"], bp["c2"]["bias"], 1)
        x = y + r
    return jnp.transpose(x, (0, 3, 1, 2))


if __name__ == "__main__":
    B, input_dim, H, W = 2, 64, 16, 16
    filters, n_blocks = 32, 2            # StackResidualBlock(input_dim=64, filters=32, n=2)

    key = jax.random.PRNGKey(0)
    pkey, xkey = jax.random.split(key)
    params, ref_blocks = init_stack_residual_params(pkey, input_dim, filters, n_blocks)
    x = jax.random.normal(xkey, (B, input_dim, H, W), jnp.float32)

    fwd = jax.jit(stack_residual_block_forward)
    out = fwd(params, x)
    jax.block_until_ready(out)

    assert out.shape == (B, input_dim, H, W), out.shape
    assert bool(jnp.isfinite(out).all())

    ref = _ref_forward(ref_blocks, x)
    max_err = float(jnp.max(jnp.abs(out - ref)))
    assert max_err < 6e-2, f"max abs error vs f32 reference: {max_err}"

    print("KERNEL_OK")
</pallas_src>

<mosaic_0001>
module attributes {stable_mosaic.version = 11 : i64} {
  func.func @_resblock_stack_kernel(%arg0: i32, %arg1: i32, %arg2: memref<1x336x128xbf16, #tpu.memory_space<vmem>>, %arg3: memref<336x1xbf16, #tpu.memory_space<vmem>>, %arg4: memref<1x128x128xbf16, #tpu.memory_space<vmem>>, %arg5: memref<1x1152x128xbf16, #tpu.memory_space<vmem>>, %arg6: memref<1x1x128xf32, #tpu.memory_space<vmem>>, %arg7: memref<1x1x128xf32, #tpu.memory_space<vmem>>, %arg8: memref<1x1x128xf32, #tpu.memory_space<vmem>>, %arg9: memref<1x1x128xf32, #tpu.memory_space<vmem>>, %arg10: memref<1x336x128xbf16, #tpu.memory_space<vmem>>, %arg11: memref<336x128xbf16, #tpu.memory_space<vmem>>, %arg12: memref<400x128xbf16, #tpu.memory_space<vmem>>) attributes {dimension_semantics = [#tpu.dimension_semantics<parallel>, #tpu.dimension_semantics<arbitrary>], iteration_bounds = array<i64: 2, 2>, scalar_prefetch = 0 : i64, scratch_operands = 2 : i64, tpu.core_type = #tpu.core_type<tc>, window_params = [{transform_indices = @transform_0, window_bounds = array<i64: 1, 336, 128>}, {pipeline_mode = #tpu.pipeline_mode<synchronous>, transform_indices = @transform_1, window_bounds = array<i64: 336, 1>}, {transform_indices = @transform_2, window_bounds = array<i64: 1, 128, 128>}, {transform_indices = @transform_3, window_bounds = array<i64: 1, 1152, 128>}, {transform_indices = @transform_4, window_bounds = array<i64: 1, 1, 128>}, {transform_indices = @transform_5, window_bounds = array<i64: 1, 1, 128>}, {transform_indices = @transform_6, window_bounds = array<i64: 1, 1, 128>}, {transform_indices = @transform_7, window_bounds = array<i64: 1, 1, 128>}, {transform_indices = @transform_8, window_bounds = array<i64: 1, 336, 128>}]} {
    %c0_i32 = arith.constant 0 : i32
    %0 = arith.cmpi eq, %arg1, %c0_i32 : i32
    %1 = arith.extui %0 : i1 to i32
    %c0_i32_0 = arith.constant 0 : i32
    %2 = arith.cmpi ne, %1, %c0_i32_0 : i32
    scf.if %2 {
      %c0_48 = arith.constant 0 : index
      %c0_49 = arith.constant 0 : index
      %c0_50 = arith.constant 0 : index
      %61 = vector.load %arg2[%c0_48, %c0_49, %c0_50] : memref<1x336x128xbf16, #tpu.memory_space<vmem>>, vector<1x336x128xbf16>
      %62 = vector.shape_cast %61 : vector<1x336x128xbf16> to vector<336x128xbf16>
      %c0_51 = arith.constant 0 : index
      %c0_52 = arith.constant 0 : index
      %63 = vector.load %arg11[%c0_51, %c0_52] : memref<336x128xbf16, #tpu.memory_space<vmem>>, vector<336x128xbf16>
      tpu.vector_store %arg11[%c0_51, %c0_52], %62 {strides = array<i32>} : memref<336x128xbf16, #tpu.memory_space<vmem>>, vector<336x128xbf16>,
    } else {
    }
    %cst = arith.constant 0.000000e+00 : bf16
    %3 = vector.broadcast %cst : bf16 to vector<32x128xbf16>
    %c0 = arith.constant 0 : index
    %c0_1 = arith.constant 0 : index
    %4 = vector.load %arg12[%c0, %c0_1] : memref<400x128xbf16, #tpu.memory_space<vmem>>, vector<32x128xbf16>
    tpu.vector_store %arg12[%c0, %c0_1], %3 {strides = array<i32>} : memref<400x128xbf16, #tpu.memory_space<vmem>>, vector<32x128xbf16>,
    %cst_2 = arith.constant 0.000000e+00 : bf16
    %5 = vector.broadcast %cst_2 : bf16 to vector<32x128xbf16>
    %c368 = arith.constant 368 : index
    %c0_3 = arith.constant 0 : index
    %6 = vector.load %arg12[%c368, %c0_3] : memref<400x128xbf16, #tpu.memory_space<vmem>>, vector<32x128xbf16>
    tpu.vector_store %arg12[%c368, %c0_3], %5 {strides = array<i32>} : memref<400x128xbf16, #tpu.memory_space<vmem>>, vector<32x128xbf16>,
    %c0_4 = arith.constant 0 : index
    %c0_5 = arith.constant 0 : index
    %c0_6 = arith.constant 0 : index
    %7 = vector.load %arg4[%c0_4, %c0_5, %c0_6] : memref<1x128x128xbf16, #tpu.memory_space<vmem>>, vector<1x128x128xbf16>
    %8 = vector.shape_cast %7 : vector<1x128x128xbf16> to vector<128x128xbf16>
    %c0_7 = arith.constant 0 : index
    %c0_8 = arith.constant 0 : index
    %c0_9 = arith.constant 0 : index
    %9 = vector.load %arg6[%c0_7, %c0_8, %c0_9] : memref<1x1x128xf32, #tpu.memory_space<vmem>>, vector<1x1x128xf32>
    %10 = vector.shape_cast %9 : vector<1x1x128xf32> to vector<1x128xf32>
    %c0_10 = arith.constant 0 : index
    %c0_11 = arith.constant 0 : index
    %c0_12 = arith.constant 0 : index
    %11 = vector.load %arg7[%c0_10, %c0_11, %c0_12] : memref<1x1x128xf32, #tpu.memory_space<vmem>>, vector<1x1x128xf32>
    %12 = vector.shape_cast %11 : vector<1x1x128xf32> to vector<1x128xf32>
    %c0_13 = arith.constant 0 : index
    %c0_14 = arith.constant 0 : index
    %13 = vector.load %arg11[%c0_13, %c0_14] : memref<336x128xbf16, #tpu.memory_space<vmem>>, vector<336x128xbf16>
    %cst_15 = arith.constant dense<0.000000e+00> : vector<336x128xf32>
    %14 = tpu.matmul %13, %8, %cst_15 {dimension_numbers = #tpu.dot_dimension_numbers<[1], [0], [0], [1], [0, 0, 1, 1], [], []>} : vector<336x128xbf16>, vector<128x128xbf16>, vector<336x128xf32> -> vector<336x128xf32>
    %15 = vector.broadcast %10 : vector<1x128xf32> to vector<336x128xf32>
    %16 = arith.mulf %14, %15 : vector<336x128xf32>
    %17 = vector.broadcast %12 : vector<1x128xf32> to vector<336x128xf32>
    %18 = arith.addf %16, %17 : vector<336x128xf32>
    %cst_16 = arith.constant 1.000000e-01 : f32
    %19 = vector.broadcast %cst_16 : f32 to vector<336x128xf32>
    %20 = arith.mulf %19, %18 : vector<336x128xf32>
    %21 = arith.maximumf %18, %20 : vector<336x128xf32>
    %22 = arith.truncf %21 : vector<336x128xf32> to vector<336x128xbf16>
    %c0_17 = arith.constant 0 : index
    %c0_18 = arith.constant 0 : index
    %23 = vector.load %arg3[%c0_17, %c0_18] : memref<336x1xbf16, #tpu.memory_space<vmem>>, vector<336x1xbf16>
    %24 = vector.broadcast %23 : vector<336x1xbf16> to vector<336x128xbf16>
    %25 = arith.mulf %22, %24 : vector<336x128xbf16>
    %c32 = arith.constant 32 : index
    %c0_19 = arith.constant 0 : index
    %26 = vector.load %arg12[%c32, %c0_19] : memref<400x128xbf16, #tpu.memory_space<vmem>>, vector<336x128xbf16>
    tpu.vector_store %arg12[%c32, %c0_19], %25 {strides = array<i32>} : memref<400x128xbf16, #tpu.memory_space<vmem>>, vector<336x128xbf16>,
    %c0_20 = arith.constant 0 : index
    %c0_21 = arith.constant 0 : index
    %c0_22 = arith.constant 0 : index
    %27 = vector.load %arg5[%c0_20, %c0_21, %c0_22] : memref<1x1152x128xbf16, #tpu.memory_space<vmem>>, vector<1x1152x128xbf16>
    %28 = vector.shape_cast %27 : vector<1x1152x128xbf16> to vector<1152x128xbf16>
    %c0_23 = arith.constant 0 : index
    %c0_24 = arith.constant 0 : index
    %c0_25 = arith.constant 0 : index
    %29 = vector.load %arg8[%c0_23, %c0_24, %c0_25] : memref<1x1x128xf32, #tpu.memory_space<vmem>>, vector<1x1x128xf32>
    %30 = vector.shape_cast %29 : vector<1x1x128xf32> to vector<1x128xf32>
    %c0_26 = arith.constant 0 : index
    %c0_27 = arith.constant 0 : index
    %c0_28 = arith.constant 0 : index
    %31 = vector.load %arg9[%c0_26, %c0_27, %c0_28] : memref<1x1x128xf32, #tpu.memory_space<vmem>>, vector<1x1x128xf32>
    %32 = vector.shape_cast %31 : vector<1x1x128xf32> to vector<1x128xf32>
    %c13 = arith.constant 13 : index
    %c0_29 = arith.constant 0 : index
    %33 = vector.load %arg12[%c13, %c0_29] : memref<400x128xbf16, #tpu.memory_space<vmem>>, vector<336x128xbf16>
    %c14 = arith.constant 14 : index
    %c0_30 = arith.constant 0 : index
    %34 = vector.load %arg12[%c14, %c0_30] : memref<400x128xbf16, #tpu.memory_space<vmem>>, vector<336x128xbf16>
    %c15 = arith.constant 15 : index
    %c0_31 = arith.constant 0 : index
    %35 = vector.load %arg12[%c15, %c0_31] : memref<400x128xbf16, #tpu.memory_space<vmem>>, vector<336x128xbf16>
    %c31 = arith.constant 31 : index
    %c0_32 = arith.constant 0 : index
    %36 = vector.load %arg12[%c31, %c0_32] : memref<400x128xbf16, #tpu.memory_space<vmem>>, vector<336x128xbf16>
    %c32_33 = arith.constant 32 : index
    %c0_34 = arith.constant 0 : index
    %37 = vector.load %arg12[%c32_33, %c0_34] : memref<400x128xbf16, #tpu.memory_space<vmem>>, vector<336x128xbf16>
    %c33 = arith.constant 33 : index
    %c0_35 = arith.constant 0 : index
    %38 = vector.load %arg12[%c33, %c0_35] : memref<400x128xbf16, #tpu.memory_space<vmem>>, vector<336x128xbf16>
    %c49 = arith.constant 49 : index
    %c0_36 = arith.constant 0 : index
    %39 = vector.load %arg12[%c49, %c0_36] : memref<400x128xbf16, #tpu.memory_space<vmem>>, vector<336x128xbf16>
    %c50 = arith.constant 50 : index
    %c0_37 = arith.constant 0 : index
    %40 = vector.load %arg12[%c50, %c0_37] : memref<400x128xbf16, #tpu.memory_space<vmem>>, vector<336x128xbf16>
    %c51 = arith.constant 51 : index
    %c0_38 = arith.constant 0 : index
    %41 = vector.load %arg12[%c51, %c0_38] : memref<400x128xbf16, #tpu.memory_space<vmem>>, vector<336x128xbf16>
    %42 = tpu.concatenate %33, %34, %35, %36, %37, %38, %39, %40, %41 in 1 : vector<336x128xbf16>, vector<336x128xbf16>, vector<336x128xbf16>, vector<336x128xbf16>, vector<336x128xbf16>, vector<336x128xbf16>, vector<336x128xbf16>, vector<336x128xbf16>, vector<336x128xbf16> -> vector<336x1152xbf16>
    %cst_39 = arith.constant dense<0.000000e+00> : vector<336x128xf32>
    %43 = tpu.matmul %42, %28, %cst_39 {dimension_numbers = #tpu.dot_dimension_numbers<[1], [0], [0], [1], [0, 0, 1, 1], [], []>} : vector<336x1152xbf16>, vector<1152x128xbf16>, vector<336x128xf32> -> vector<336x128xf32>
    %44 = vector.broadcast %30 : vector<1x128xf32> to vector<336x128xf32>
    %45 = arith.mulf %43, %44 : vector<336x128xf32>
    %46 = vector.broadcast %32 : vector<1x128xf32> to vector<336x128xf32>
    %47 = arith.addf %45, %46 : vector<336x128xf32>
    %cst_40 = arith.constant 1.000000e-01 : f32
    %48 = vector.broadcast %cst_40 : f32 to vector<336x128xf32>
    %49 = arith.mulf %48, %47 : vector<336x128xf32>
    %50 = arith.maximumf %47, %49 : vector<336x128xf32>
    %51 = arith.truncf %50 : vector<336x128xf32> to vector<336x128xbf16>
    %c0_41 = arith.constant 0 : index
    %c0_42 = arith.constant 0 : index
    %52 = vector.load %arg11[%c0_41, %c0_42] : memref<336x128xbf16, #tpu.memory_space<vmem>>, vector<336x128xbf16>
    %53 = arith.addf %51, %52 : vector<336x128xbf16>
    %c0_43 = arith.constant 0 : index
    %c0_44 = arith.constant 0 : index
    %54 = vector.load %arg3[%c0_43, %c0_44] : memref<336x1xbf16, #tpu.memory_space<vmem>>, vector<336x1xbf16>
    %55 = vector.broadcast %54 : vector<336x1xbf16> to vector<336x128xbf16>
    %56 = arith.mulf %53, %55 : vector<336x128xbf16>
    %c0_45 = arith.constant 0 : index
    %c0_46 = arith.constant 0 : index
    %57 = vector.load %arg11[%c0_45, %c0_46] : memref<336x128xbf16, #tpu.memory_space<vmem>>, vector<336x128xbf16>
    tpu.vector_store %arg11[%c0_45, %c0_46], %56 {strides = array<i32>} : memref<336x128xbf16, #tpu.memory_space<vmem>>, vector<336x128xbf16>,
    %c1_i32 = arith.constant 1 : i32
    %58 = arith.cmpi eq, %arg1, %c1_i32 : i32
    %59 = arith.extui %58 : i1 to i32
    %c0_i32_47 = arith.constant 0 : i32
    %60 = arith.cmpi ne, %59, %c0_i32_47 : i32
    scf.if %60 {
      %c0_48 = arith.constant 0 : index
      %c0_49 = arith.constant 0 : index
      %61 = vector.load %arg11[%c0_48, %c0_49] : memref<336x128xbf16, #tpu.memory_space<vmem>>, vector<336x128xbf16>
      %c0_50 = arith.constant 0 : index
      %c0_51 = arith.constant 0 : index
      %c0_52 = arith.constant 0 : index
      %62 = vector.load %arg10[%c0_50, %c0_51, %c0_52] : memref<1x336x128xbf16, #tpu.memory_space<vmem>>, vector<1x336x128xbf16>
      %63 = vector.shape_cast %62 : vector<1x336x128xbf16> to vector<336x128xbf16>
      %64 = vector.shape_cast %61 : vector<336x128xbf16> to vector<1x336x128xbf16>
      tpu.vector_store %arg10[%c0_50, %c0_51, %c0_52], %64 {strides = array<i32>} : memref<1x336x128xbf16, #tpu.memory_space<vmem>>, vector<1x336x128xbf16>,
    } else {
    }
    return
  }
  func.func @transform_0(%arg0: i32, %arg1: i32) -> (i32, i32, i32) {
    %c0_i32 = arith.constant 0 : i32
    %c0_i32_0 = arith.constant 0 : i32
    %c0_i32_1 = arith.constant 0 : i32
    return %arg0, %c0_i32, %c0_i32_0 : i32, i32, i32
  }
  func.func @transform_1(%arg0: i32, %arg1: i32) -> (i32, i32) {
    %c0_i32 = arith.constant 0 : i32
    %c0_i32_0 = arith.constant 0 : i32
    %c0_i32_1 = arith.constant 0 : i32
    return %c0_i32, %c0_i32_0 : i32, i32
  }
  func.func @transform_2(%arg0: i32, %arg1: i32) -> (i32, i32, i32) {
    %c0_i32 = arith.constant 0 : i32
    %c0_i32_0 = arith.constant 0 : i32
    %c0_i32_1 = arith.constant 0 : i32
    return %arg1, %c0_i32, %c0_i32_0 : i32, i32, i32
  }
  func.func @transform_3(%arg0: i32, %arg1: i32) -> (i32, i32, i32) {
    %c0_i32 = arith.constant 0 : i32
    %c0_i32_0 = arith.constant 0 : i32
    %c0_i32_1 = arith.constant 0 : i32
    return %arg1, %c0_i32, %c0_i32_0 : i32, i32, i32
  }
  func.func @transform_4(%arg0: i32, %arg1: i32) -> (i32, i32, i32) {
    %c0_i32 = arith.constant 0 : i32
    %c0_i32_0 = arith.constant 0 : i32
    %c0_i32_1 = arith.constant 0 : i32
    return %arg1, %c0_i32, %c0_i32_0 : i32, i32, i32
  }
  func.func @transform_5(%arg0: i32, %arg1: i32) -> (i32, i32, i32) {
    %c0_i32 = arith.constant 0 : i32
    %c0_i32_0 = arith.constant 0 : i32
    %c0_i32_1 = arith.constant 0 : i32
    return %arg1, %c0_i32, %c0_i32_0 : i32, i32, i32
  }
  func.func @transform_6(%arg0: i32, %arg1: i32) -> (i32, i32, i32) {
    %c0_i32 = arith.constant 0 : i32
    %c0_i32_0 = arith.constant 0 : i32
    %c0_i32_1 = arith.constant 0 : i32
    return %arg1, %c0_i32, %c0_i32_0 : i32, i32, i32
  }
  func.func @transform_7(%arg0: i32, %arg1: i32) -> (i32, i32, i32) {
    %c0_i32 = arith.constant 0 : i32
    %c0_i32_0 = arith.constant 0 : i32
    %c0_i32_1 = arith.constant 0 : i32
    return %arg1, %c0_i32, %c0_i32_0 : i32, i32, i32
  }
  func.func @transform_8(%arg0: i32, %arg1: i32) -> (i32, i32, i32) {
    %c0_i32 = arith.constant 0 : i32
    %c0_i32_0 = arith.constant 0 : i32
    %c0_i32_1 = arith.constant 0 : i32
    return %arg0, %c0_i32, %c0_i32_0 : i32, i32, i32
  }
}

</mosaic_0001>

<bundles_post_ra>
// kernel: stack_residual_block_forward.1
= control target key start
LH: loop header
LB: loop body
LE: loop exit
PB: predicated region body
PF: predicated region fallthrough
CT: control target
= control target key end

     0   :  { %s8197_s27 = smov 0   ;;  %s8199_s28 = smov 0   ;;  %s11533_s0 = inlined_call_operand.vmem [shape: bf16[2,336,128], index: 0, kind: input, shape index: {}]   ;;  %s11534_s1 = inlined_call_operand.vmem [shape: bf16[336,1], index: 1, kind: input, shape index: {}]   ;;  %s11535_s2 = inlined_call_operand.vmem [shape: bf16[2,128,128], index: 2, kind: input, shape index: {}]   ;;  %s11536_s3 = inlined_call_operand.vmem [shape: bf16[2,1152,128], index: 3, kind: input, shape index: {}]   ;;  %s11537_s4 = inlined_call_operand.vmem [shape: f32[2,1,128], index: 4, kind: input, shape index: {}]   ;;  %s11538_s5 = inlined_call_operand.vmem [shape: f32[2,1,128], index: 5, kind: input, shape index: {}]   ;;  %s11539_s6 = inlined_call_operand.vmem [shape: f32[2,1,128], index: 6, kind: input, shape index: {}]   ;;  %s11540_s7 = inlined_call_operand.vmem [shape: f32[2,1,128], index: 7, kind: input, shape index: {}]   ;;  %s11541_s8 = inlined_call_operand.vmem [shape: bf16[2,336,128], index: 8, kind: output, shape index: {}]  }
   0x1   :  { %11627 = sst [smem:[#allocation121_spill]] %s11533_s0  ;;  %s8201_s29 = smov 0  }
   0x2   :  { %s8203_s30 = smov 0   ;;  %s8205_s9 = smov 0  }
   0x3 LB: > { %s27_s10 = sadd.s32 1, %s8140_s29  ;;  %s30_s11 = sadd.s32 1, %s8144_s30  ;;  %s8148_s9 = sphi %s8205_s9, %s18_s9   ;;  %s8144_s30 = sphi %s8203_s30, %s12083_s30   ;;  %s8140_s29 = sphi %s8201_s29, %s12082_s29   ;;  %s8136_s28 = sphi %s8199_s28, %s12081_s28   ;;  %s8132_s27 = sphi %s8197_s27, %s12080_s27  }
   0x4   : > { %p28_p0 = scmp.ge.s32.totalorder %s27_s10, 2  ;;  %p6900_p1 = scmp.ge.s32.totalorder %s8148_s9, 1 }
   0x5   : > { %p326_p2 = scmp.lt.s32.totalorder %s8148_s9, 5 }
   0x6   : > { %s12085_s10 = smov (%p28_p0, %s27_s10), 0  ;;  %s12087_s11 = smov (!%p28_p0, %s30_s11), %s8144_s30 }
   0x7   : > { %11628 = sst [smem:[#allocation4_spill]] %s12085_s10  ;;  %p327_p3 = pnand %p6900_p1, %p326_p2 }
   0x8   : > { %p32_p4 = scmp.ge.s32.totalorder %s12087_s11, 2 }
   0x9   : > { %330 = sbr.rel (%p327_p3) target bundleno = 1418 (0x58a), region = 52 }
   0xa   : > { %s12089_s11 = smov (%p32_p4, %s12087_s11), 0 }
   0xb   : > { %11629 = sst [smem:[#allocation5_spill]] %s12089_s11 }
   0xe   : > { %p382_p5 = scmp.lt.s32.totalorder %s8136_s28, 1  ;;  %p387_p6 = scmp.lt.s32.totalorder %s8132_s27, 1 }
   0xf   : > { %s11630_s0 = sld [smem:[#allocation121_spill]]  ;;  %p6906_p7 = scmp.ne.s32.totalorder %s8132_s27, 0 }
  0x10   : > { %s12091_s28 = smov (!%p382_p5, %s8136_s28), 1 }
  0x11   : > { %s388_s12 = scalar_select %p387_p6, %s8132_s27, 1 }
  0x12   : > { %s8028_s13 = smul.u32 168, %s12091_s28 }
  0x13   : > { %s7318_s14 = sshll.u32 %s388_s12, 6  ;;  %s8029_s15 = smul.u32 576, %s388_s12 }
  0x14   : > { %s8239_s21 = scalar_lea.vmem %s11535_s2, %s7318_s14  ;;  %s8249_s28 = scalar_lea.vmem %s11537_s4, %s388_s12 }
  0x15   : > { %s8234_s18 = scalar_lea.vmem %s11630_s0, %s8028_s13  ;;  %s8244_s24 = scalar_lea.vmem %s11536_s3, %s8029_s15 }
  0x16   : > { %s8254_s16 = scalar_lea.vmem %s11538_s5, %s388_s12  ;;  %s8259_s14 = scalar_lea.vmem %s11539_s6, %s388_s12 }
  0x17   : > { %s8264_s15 = scalar_lea.vmem %s11540_s7, %s388_s12  ;;  %s8269_s25 = scalar_lea.vmem %s11541_s8, %s8028_s13 }
  0x18   : > { %418 = sbr.rel (%p6906_p7) target bundleno = 51 (0x33), region = 56 }
  0x1d   : > { %v419_v0 = vld [vmem:[%s8234_s18] sm:$0xff]   ;;  %v421_v1 = vld [vmem:[%s8234_s18 + $0x8] sm:$0xff]   ;;  %v423_v2 = vld [vmem:[%s8234_s18 + $0x10] sm:$0xff]  }
  0x1e   : > { %461 = vst [vmem:[#allocation2] sm:$0xff] %v419_v0   ;;  %v425_v3 = vld [vmem:[%s8234_s18 + $0x18] sm:$0xff]   ;;  %v427_v4 = vld [vmem:[%s8234_s18 + $0x20] sm:$0xff]   ;;  %v429_v5 = vld [vmem:[%s8234_s18 + $0x28] sm:$0xff]  }
  0x1f   : > { %463 = vst [vmem:[#allocation2 + $0x8] sm:$0xff] %v421_v1   ;;  %v431_v6 = vld [vmem:[%s8234_s18 + $0x30] sm:$0xff]   ;;  %v433_v7 = vld [vmem:[%s8234_s18 + $0x38] sm:$0xff]   ;;  %v435_v8 = vld [vmem:[%s8234_s18 + $0x40] sm:$0xff]  }
  0x20   : > { %465 = vst [vmem:[#allocation2 + $0x10] sm:$0xff] %v423_v2   ;;  %v437_v9 = vld [vmem:[%s8234_s18 + $0x48] sm:$0xff]   ;;  %v439_v10 = vld [vmem:[%s8234_s18 + $0x50] sm:$0xff]   ;;  %v441_v11 = vld [vmem:[%s8234_s18 + $0x58] sm:$0xff]  }
  0x21   : > { %467 = vst [vmem:[#allocation2 + $0x18] sm:$0xff] %v425_v3   ;;  %v443_v12 = vld [vmem:[%s8234_s18 + $0x60] sm:$0xff]   ;;  %v445_v13 = vld [vmem:[%s8234_s18 + $0x68] sm:$0xff]   ;;  %v447_v14 = vld [vmem:[%s8234_s18 + $0x70] sm:$0xff]  }
  0x22   : > { %469 = vst [vmem:[#allocation2 + $0x20] sm:$0xff] %v427_v4   ;;  %v449_v15 = vld [vmem:[%s8234_s18 + $0x78] sm:$0xff]   ;;  %v451_v16 = vld [vmem:[%s8234_s18 + $0x80] sm:$0xff]   ;;  %v453_v17 = vld [vmem:[%s8234_s18 + $0x88] sm:$0xff]  }
  0x23   : > { %471 = vst [vmem:[#allocation2 + $0x28] sm:$0xff] %v429_v5   ;;  %v455_v18 = vld [vmem:[%s8234_s18 + $0x90] sm:$0xff]   ;;  %v457_v19 = vld [vmem:[%s8234_s18 + $0x98] sm:$0xff]   ;;  %v459_v20 = vld [vmem:[%s8234_s18 + $0xa0] sm:$0xff]  }
  0x24   : > { %473 = vst [vmem:[#allocation2 + $0x30] sm:$0xff] %v431_v6  }
  0x25   : > { %475 = vst [vmem:[#allocation2 + $0x38] sm:$0xff] %v433_v7  }
  0x26   : > { %477 = vst [vmem:[#allocation2 + $0x40] sm:$0xff] %v435_v8  }
  0x27   : > { %479 = vst [vmem:[#allocation2 + $0x48] sm:$0xff] %v437_v9  }
  0x28   : > { %481 = vst [vmem:[#allocation2 + $0x50] sm:$0xff] %v439_v10  }
  0x29   : > { %483 = vst [vmem:[#allocation2 + $0x58] sm:$0xff] %v441_v11  }
  0x2a   : > { %485 = vst [vmem:[#allocation2 + $0x60] sm:$0xff] %v443_v12  }
  0x2b   : > { %487 = vst [vmem:[#allocation2 + $0x68] sm:$0xff] %v445_v13  }
  0x2c   : > { %489 = vst [vmem:[#allocation2 + $0x70] sm:$0xff] %v447_v14  }
  0x2d   : > { %491 = vst [vmem:[#allocation2 + $0x78] sm:$0xff] %v449_v15  }
  0x2e   : > { %493 = vst [vmem:[#allocation2 + $0x80] sm:$0xff] %v451_v16  }
  0x2f   : > { %495 = vst [vmem:[#allocation2 + $0x88] sm:$0xff] %v453_v17  }
  0x30   : > { %497 = vst [vmem:[#allocation2 + $0x90] sm:$0xff] %v455_v18  }
  0x31   : > { %499 = vst [vmem:[#allocation2 + $0x98] sm:$0xff] %v457_v19  }
  0x32   : > { %501 = vst [vmem:[#allocation2 + $0xa0] sm:$0xff] %v459_v20  }
  0x33 PF: > { %v1093_v21 = vld [vmem:[%s11534_s1 + $0x48] sm:$0xf]  ;;  %v1075_v22 = vld [vmem:[%s11534_s1] sm:$0xf]  ;;  %v7326_v23 = vld [vmem:[%s8239_s21 + $0x38] sm:$0xff]  ;;  %v8150_v24 = vmov 0  }
  0x34   : > { %8073 = vset.pattern.permute.xlu1 %v8150_v24  ;;  %8072 = vset.pattern.permute.xlu0 %v8150_v24  ;;  %504 = vst [vmem:[#allocation3 + $0x4] sm:$0xf] %v8150_v24  ;;  %v7325_v25 = vld [vmem:[%s8239_s21 + $0x30] sm:$0xff]  ;;  %v1094_v27 = vld [vmem:[%s11534_s1 + $0x4c] sm:$0xf]  ;;  %v7323_v31 = vld [vmem:[%s8239_s21 + $0x20] sm:$0xff] }
  0x35   : > { %1281 = vperm.xlu1 %8073, %v1093_v21   ;;  %1119 = vperm.xlu0 %8072, %v1075_v22   ;;  %505 = vst [vmem:[#allocation3 + $0x8] sm:$0xf] %v8150_v24  ;;  %v1095_v26 = vld [vmem:[%s11534_s1 + $0x50] sm:$0xf]  ;;  %v1076_v28 = vld [vmem:[%s11534_s1 + $0x4] sm:$0xf] }
  0x36   : > { %745 = vmatpush.bf16.msra.mxu0 %v7326_v23  ;;  %7976 = vmatpush.bf16.msra.mxu2 %v7326_v23  ;;  %506 = vst [vmem:[#allocation3 + $0xc] sm:$0xf] %v8150_v24  ;;  %v7324_v29 = vld [vmem:[%s8239_s21 + $0x28] sm:$0xff]  ;;  %v1096_v30 = vld [vmem:[%s11534_s1 + $0x54] sm:$0xf]  ;;  %v7322_v34 = vld [vmem:[%s8239_s21 + $0x18] sm:$0xff] }
  0x37   : > { %8074 = vset.pattern.permute.xlu2 %v8150_v24  ;;  %507 = vst [vmem:[#allocation3 + $0xb8] sm:$0xf] %v8150_v24  ;;  %v1098_v32 = vld [vmem:[%s11534_s1 + $0x5c] sm:$0xf]  ;;  %v1097_v33 = vld [vmem:[%s11534_s1 + $0x58] sm:$0xf] }
  0x38   : > { %1299 = vperm.xlu2 %8074, %v1095_v26   ;;  %508 = vst [vmem:[#allocation3 + $0xbc] sm:$0xf] %v8150_v24  ;;  %v1077_v35 = vld [vmem:[%s11534_s1 + $0x8] sm:$0xf]  ;;  %v7321_v36 = vld [vmem:[%s8239_s21 + $0x10] sm:$0xff]  ;;  %v7319_v41 = vld [vmem:[%s8239_s21] sm:$0xff] }
  0x39   : > { %509 = vst [vmem:[#allocation3 + $0xc0] sm:$0xf] %v8150_v24  ;;  %v1099_v37 = vld [vmem:[%s11534_s1 + $0x60] sm:$0xf]  ;;  %v1078_v38 = vld [vmem:[%s11534_s1 + $0xc] sm:$0xf] }
  0x3a   : > { %746 = vmatpush.bf16.msra.mxu0 %v7325_v25  ;;  %7977 = vmatpush.bf16.msra.mxu2 %v7325_v25  ;;  %v7320_v39 = vld [vmem:[%s8239_s21 + $0x8] sm:$0xff]  ;;  %v1100_v40 = vld [vmem:[%s11534_s1 + $0x64] sm:$0xf]  ;;  %v7338_v43 = vld [vmem:[#allocation2 + $0x58] sm:$0xff]  ;;  %vm2676_vm0 = vsmask.f32 5376 }
  0x3b   : > { %v7327_v42 = vld [vmem:[#allocation2] sm:$0xff]  ;;  %v1080_v44 = vld [vmem:[%s11534_s1 + $0x14] sm:$0xf]  ;;  %v1079_v45 = vld [vmem:[%s11534_s1 + $0x10] sm:$0xf]  ;;  %vm2195_vm2 = vcmask 1046528  }
  0x3c   : > { %v1101_v46 = vld [vmem:[%s11534_s1 + $0x68] sm:$0xf]  ;;  %v1081_v47 = vld [vmem:[%s11534_s1 + $0x18] sm:$0xf]  ;;  %v1102_v48 = vld [vmem:[%s11534_s1 + $0x6c] sm:$0xf] }
  0x3d   : > { %1290 = vperm.xlu1 %8073, %v1094_v27   ;;  %1128 = vperm.xlu0 %8072, %v1076_v28   ;;  %v1082_v49 = vld [vmem:[%s11534_s1 + $0x1c] sm:$0xf]  ;;  %v7328_v50 = vld [vmem:[#allocation2 + $0x8] sm:$0xff]  ;;  %v7339_v51 = vld [vmem:[#allocation2 + $0x60] sm:$0xff]  ;;  %vm2016_vm1 = vsmask.f32 7424 }
  0x3e   : > { %747 = vmatpush.bf16.msra.mxu0 %v7324_v29  ;;  %7978 = vmatpush.bf16.msra.mxu2 %v7324_v29  ;;  %v1104_v52 = vld [vmem:[%s11534_s1 + $0x74] sm:$0xf]  ;;  %v1103_v53 = vld [vmem:[%s11534_s1 + $0x70] sm:$0xf]  ;;  %v1083_v54 = vld [vmem:[%s11534_s1 + $0x20] sm:$0xf] }
  0x3f   : > { %v1105_v55 = vld [vmem:[%s11534_s1 + $0x78] sm:$0xf]  ;;  %v1084_v56 = vld [vmem:[%s11534_s1 + $0x24] sm:$0xf]  ;;  %v1106_v57 = vld [vmem:[%s11534_s1 + $0x7c] sm:$0xf] }
  0x40   : > { %1308 = vperm.xlu2 %8074, %v1096_v30   ;;  %v7329_v58 = vld [vmem:[#allocation2 + $0x10] sm:$0xff]  ;;  %v7340_v59 = vld [vmem:[#allocation2 + $0x68] sm:$0xff]  ;;  %v1107_v62 = vld [vmem:[%s11534_s1 + $0x80] sm:$0xf]  ;;  %vm2275_vm3 = vsmask.f32 2304 }
  0x41   : > { %v1086_v60 = vld [vmem:[%s11534_s1 + $0x2c] sm:$0xf]  ;;  %v1085_v61 = vld [vmem:[%s11534_s1 + $0x28] sm:$0xf]  ;;  %v1087_v63 = vld [vmem:[%s11534_s1 + $0x30] sm:$0xf] }
  0x42   : > { %748 = vmatpush.bf16.msra.mxu0 %v7323_v31  ;;  %7979 = vmatpush.bf16.msra.mxu2 %v7323_v31  ;;  %v1108_v0 = vld [vmem:[%s11534_s1 + $0x84] sm:$0xf]  ;;  %v1088_v1 = vld [vmem:[%s11534_s1 + $0x34] sm:$0xf]  ;;  %v7330_v2 = vld [vmem:[#allocation2 + $0x18] sm:$0xff]  ;;  %vm2467_vm5 = vcmask 1041408  }
  0x43   : > { %v7341_v3 = vld [vmem:[#allocation2 + $0x70] sm:$0xff]  ;;  %v1110_v4 = vld [vmem:[%s11534_s1 + $0x8c] sm:$0xf]  ;;  %v1109_v5 = vld [vmem:[%s11534_s1 + $0x88] sm:$0xf]  ;;  %vm2632_vm6 = vcmask 1040384  }
  0x44   : > { %v1089_v6 = vld [vmem:[%s11534_s1 + $0x38] sm:$0xf]  ;;  %v1111_v7 = vld [vmem:[%s11534_s1 + $0x90] sm:$0xf]  ;;  %v1090_v8 = vld [vmem:[%s11534_s1 + $0x3c] sm:$0xf] }
  0x45   : > { %1326 = vperm.xlu1 %8073, %v1098_v32   ;;  %1317 = vperm.xlu0 %8072, %v1097_v33   ;;  %v1112_v9 = vld [vmem:[%s11534_s1 + $0x94] sm:$0xf]  ;;  %v7331_v10 = vld [vmem:[#allocation2 + $0x20] sm:$0xff]  ;;  %v7342_v11 = vld [vmem:[#allocation2 + $0x78] sm:$0xff]  ;;  %vm2526_vm4 = vsmask.f32 1280 }
  0x46   : > { %749 = vmatpush.bf16.msra.mxu0 %v7322_v34  ;;  %7980 = vmatpush.bf16.msra.mxu2 %v7322_v34  ;;  %v1092_v12 = vld [vmem:[%s11534_s1 + $0x44] sm:$0xf]  ;;  %v1091_v13 = vld [vmem:[%s11534_s1 + $0x40] sm:$0xf]  ;;  %v1113_v14 = vld [vmem:[%s11534_s1 + $0x98] sm:$0xf] }
  0x47   : > { %v1115_v15 = vld [vmem:[%s11534_s1 + $0xa0] sm:$0xf]  ;;  %v1114_v16 = vld [vmem:[%s11534_s1 + $0x9c] sm:$0xf]  ;;  %v1116_v17 = vld [vmem:[%s11534_s1 + $0xa4] sm:$0xf] }
  0x48   : > { %1137 = vperm.xlu2 %8074, %v1077_v35   ;;  %v7332_v18 = vld [vmem:[#allocation2 + $0x28] sm:$0xff]  ;;  %v7343_v19 = vld [vmem:[#allocation2 + $0x80] sm:$0xff]  ;;  %v6056_v23 = vld [vmem:[%s11534_s1 + $0x10] sm:$0xf]  ;;  %p7315_p8 = scmp.ne.s32.totalorder %s8132_s27, 1 }
  0x49   : > { %v6053_v20 = vld [vmem:[%s11534_s1 + $0x4] sm:$0xf]  ;;  %v6052_v21 = vld [vmem:[%s11534_s1] sm:$0xf]  ;;  %v6054_v22 = vld [vmem:[%s11534_s1 + $0x8] sm:$0xf] }
  0x4a   : > { %750 = vmatpush.bf16.msra.mxu0 %v7321_v36  ;;  %7981 = vmatpush.bf16.msra.mxu2 %v7321_v36  ;;  %v6055_v24 = vld [vmem:[%s11534_s1 + $0xc] sm:$0xf]  ;;  %v6057_v25 = vld [vmem:[%s11534_s1 + $0x14] sm:$0xf]  ;;  %v6059_v28 = vld [vmem:[%s11534_s1 + $0x1c] sm:$0xf] }
  0x4b   : > { %v7333_v26 = vld [vmem:[#allocation2 + $0x30] sm:$0xff]  ;;  %v7344_v27 = vld [vmem:[#allocation2 + $0x88] sm:$0xff]  ;;  %v6058_v29 = vld [vmem:[%s11534_s1 + $0x18] sm:$0xf] }
  0x4c   : > { %v6060_v30 = vld [vmem:[%s11534_s1 + $0x20] sm:$0xf]  ;;  %v7355_v31 = vld [vmem:[%s8244_s24 + $0x38] sm:$0xff]  ;;  %v7354_v32 = vld [vmem:[%s8244_s24 + $0x30] sm:$0xff] }
  0x4d   : > { %1335 = vperm.xlu1 %8073, %v1099_v37   ;;  %1146 = vperm.xlu0 %8072, %v1078_v38   ;;  %v6062_v33 = vld [vmem:[%s11534_s1 + $0x28] sm:$0xf]  ;;  %v6061_v34 = vld [vmem:[%s11534_s1 + $0x24] sm:$0xf]  ;;  %v6063_v35 = vld [vmem:[%s11534_s1 + $0x2c] sm:$0xf] }
  0x4e   : > { %751 = vmatpush.bf16.msra.mxu0 %v7320_v39  ;;  %7982 = vmatpush.bf16.msra.mxu2 %v7320_v39  ;;  %v7353_v36 = vld [vmem:[%s8244_s24 + $0x28] sm:$0xff]  ;;  %v7334_v37 = vld [vmem:[#allocation2 + $0x38] sm:$0xff]  ;;  %v7345_v38 = vld [vmem:[#allocation2 + $0x90] sm:$0xff] }
  0x4f   : > { %4600 = vmatpush.bf16.msra.mxu1 %v7355_v31  ;;  %7984 = vmatpush.bf16.msra.mxu3 %v7355_v31  ;;  %v7352_v39 = vld [vmem:[%s8244_s24 + $0x20] sm:$0xff] }
  0x50   : > { %1344 = vperm.xlu2 %8074, %v1100_v40   ;;  %v6065_v40 = vld [vmem:[%s11534_s1 + $0x34] sm:$0xf] }
  0x52   : > { %752 = vmatpush.bf16.msra.mxu0 %v7319_v41  ;;  %7983 = vmatpush.bf16.msra.mxu2 %v7319_v41  ;;  %v6064_v41 = vld [vmem:[%s11534_s1 + $0x30] sm:$0xf] }
  0x53   : > { %4601 = vmatpush.bf16.msra.mxu1 %v7354_v32  ;;  %7985 = vmatpush.bf16.msra.mxu3 %v7354_v32 }
  0x55   : > { %753 = vmatmul.bf16.vlgmr.msra.gmra.mxu0 %v7327_v42  ;;  %808 = vmatmul.bf16.vlgmr.msra.gmra.mxu2 %v7338_v43  ;;  %v6066_v42 = vld [vmem:[%s11534_s1 + $0x38] sm:$0xf] }
  0x56   : > { %1164 = vperm.xlu1 %8073, %v1080_v44   ;;  %1155 = vperm.xlu0 %8072, %v1079_v45   ;;  %v7351_v43 = vld [vmem:[%s8244_s24 + $0x18] sm:$0xff]  ;;  %v7350_v44 = vld [vmem:[%s8244_s24 + $0x10] sm:$0xff]  ;;  %v6068_v45 = vld [vmem:[%s11534_s1 + $0x40] sm:$0xf] }
  0x57   : > { %4602 = vmatpush.bf16.msra.mxu1 %v7353_v36  ;;  %7986 = vmatpush.bf16.msra.mxu3 %v7353_v36 }
  0x58   : > { %1353 = vperm.xlu2 %8074, %v1101_v46   ;;  %v6067_v46 = vld [vmem:[%s11534_s1 + $0x3c] sm:$0xf] }
  0x5b   : > { %4603 = vmatpush.bf16.msra.mxu1 %v7352_v39  ;;  %7987 = vmatpush.bf16.msra.mxu3 %v7352_v39 }
  0x5e   : > { %1173 = vperm.xlu1 %8073, %v1081_v47   ;;  %1362 = vperm.xlu0 %8072, %v1102_v48  }
  0x5f   : > { %4604 = vmatpush.bf16.msra.mxu1 %v7351_v43  ;;  %7988 = vmatpush.bf16.msra.mxu3 %v7351_v43 }
  0x60   : > { %1182 = vperm.xlu2 %8074, %v1082_v49   ;;  %v6069_v49 = vld [vmem:[%s11534_s1 + $0x44] sm:$0xf] }
  0x63   : > { %4605 = vmatpush.bf16.msra.mxu1 %v7350_v44  ;;  %7989 = vmatpush.bf16.msra.mxu3 %v7350_v44 }
  0x65   : > { %758 = vmatmul.bf16.gmra.mxu0 %v7328_v50  ;;  %813 = vmatmul.bf16.gmra.mxu2 %v7339_v51  ;;  %v7349_v51 = vld [vmem:[%s8244_s24 + $0x8] sm:$0xff] }
  0x66   : > { %1380 = vperm.xlu1 %8073, %v1104_v52   ;;  %1371 = vperm.xlu0 %8072, %v1103_v53   ;;  %v8495_v52 = vld [vmem:[%s8249_s28] ss:$0 sm:$0xff]  ;;  %v7363_v53 = vld [vmem:[%s8244_s24 + $0x78] sm:$0xff] }
  0x67   : > { %4606 = vmatpush.bf16.msra.mxu1 %v7349_v51  ;;  %4714 = vmatpush.bf16.msrb.mxu2 %v7363_v53 }
  0x68   : > { %1191 = vperm.xlu2 %8074, %v1083_v54   ;;  %v8499_v54 = vld [vmem:[%s8254_s16] ss:$0 sm:$0xff]  ;;  %7990 = vmatpush.bf16.msra.mxu3 %v7349_v51 }
  0x6e   : > { %1389 = vperm.xlu1 %8073, %v1105_v55   ;;  %1200 = vperm.xlu0 %8072, %v1084_v56   ;;  %v7335_v55 = vld [vmem:[#allocation2 + $0x40] sm:$0xff]  ;;  %v7346_v56 = vld [vmem:[#allocation2 + $0x98] sm:$0xff] }
  0x70   : > { %1398 = vperm.xlu2 %8074, %v1106_v57  }
  0x75   : > { %763 = vmatmul.bf16.gmra.mxu0 %v7329_v58  ;;  %818 = vmatmul.bf16.gmra.mxu2 %v7340_v59  ;;  %v7348_v58 = vld [vmem:[%s8244_s24] sm:$0xff] }
  0x76   : > { %1218 = vperm.xlu1 %8073, %v1086_v60   ;;  %1209 = vperm.xlu0 %8072, %v1085_v61   ;;  %v6071_v60 = vld [vmem:[%s11534_s1 + $0x4c] sm:$0xf]  ;;  %v6070_v61 = vld [vmem:[%s11534_s1 + $0x48] sm:$0xf] }
  0x77   : > { %4607 = vmatpush.bf16.msra.mxu1 %v7348_v58  ;;  %7991 = vmatpush.bf16.msra.mxu3 %v7348_v58  ;;  %v6078_v58 = vld [vmem:[%s11534_s1 + $0x68] sm:$0xf] }
  0x78   : > { %1407 = vperm.xlu2 %8074, %v1107_v62   ;;  %v7362_v62 = vld [vmem:[%s8244_s24 + $0x70] sm:$0xff] }
  0x79   : > { %4715 = vmatpush.bf16.msrb.mxu2 %v7362_v62 }
  0x7e   : > { %1227 = vperm.xlu1 %8073, %v1087_v63   ;;  %1416 = vperm.xlu0 %8072, %v1108_v0   ;;  %v6072_v0 = vld [vmem:[%s11534_s1 + $0x50] sm:$0xf] }
  0x80   : > { %1236 = vperm.xlu2 %8074, %v1088_v1   ;;  %v8151_v1 = vmov 839922192  }
  0x85   : > { %768 = vmatmul.bf16.gmra.mxu0 %v7330_v2  ;;  %823 = vmatmul.bf16.gmra.mxu2 %v7341_v3  ;;  %v1123_v2 = vunpack.c.l.s4 %v8151_v1 }
  0x86   : > { %1434 = vperm.xlu1 %8073, %v1110_v4   ;;  %1425 = vperm.xlu0 %8072, %v1109_v5  }
  0x88   : > { %1245 = vperm.xlu2 %8074, %v1089_v6  }
  0x8e   : > { %1443 = vperm.xlu1 %8073, %v1111_v7   ;;  %1254 = vperm.xlu0 %8072, %v1090_v8   ;;  %v7361_v7 = vld [vmem:[%s8244_s24 + $0x68] sm:$0xff] }
  0x8f   : > { %4716 = vmatpush.bf16.msrb.mxu2 %v7361_v7 }
  0x90   : > { %1452 = vperm.xlu2 %8074, %v1112_v9   ;;  %v8519_v9 = vunpack.c.0.s8 %v1123_v2  ;;  %v7358_v2 = vld [vmem:[%s8244_s24 + $0x50] sm:$0xff] }
  0x92   : > { %v8484_v47 = vpop.permute.xlu2 %1299  ;;  %11631 = vst [vmem:[#allocation6_spill] sm:$0xff] %v8519_v9 }
  0x95   : > { %773 = vmatmul.bf16.gmra.mxu0 %v7331_v10  ;;  %828 = vmatmul.bf16.gmra.mxu2 %v7342_v11 }
  0x96   : > { %1272 = vperm.xlu1 %8073, %v1092_v12   ;;  %1263 = vperm.xlu0 %8072, %v1091_v13  }
  0x98   : > { %1461 = vperm.xlu2 %8074, %v1113_v14   ;;  %v6074_v14 = vld [vmem:[%s11534_s1 + $0x58] sm:$0xf] }
  0x9a   : > { %v8514_v3 = vpop.permute.xlu2 %1308 }
  0x9e   : > { %1479 = vperm.xlu1 %8073, %v1115_v15   ;;  %1470 = vperm.xlu0 %8072, %v1114_v16   ;;  %v6073_v15 = vld [vmem:[%s11534_s1 + $0x54] sm:$0xf]  ;;  %v7379_v16 = vld [vmem:[%s8244_s24 + $0xf8] sm:$0xff] }
  0x9f   : > { %4942 = vmatpush.bf16.msrb.mxu0 %v7379_v16  ;;  %v6080_v16 = vld [vmem:[%s11534_s1 + $0x70] sm:$0xf] }
  0xa0   : > { %1488 = vperm.xlu2 %8074, %v1116_v17  }
  0xa5   : > { %778 = vmatmul.bf16.gmra.mxu0 %v7332_v18  ;;  %833 = vmatmul.bf16.gmra.mxu2 %v7343_v19  ;;  %v6075_v19 = vld [vmem:[%s11534_s1 + $0x5c] sm:$0xf] }
  0xa6   : > { %6105 = vperm.xlu1 %8073, %v6053_v20   ;;  %6096 = vperm.xlu0 %8072, %v6052_v21  }
  0xa7   : > { %v8486_v48 = vpop.permute.xlu1 %1281  ;;  %v8491_v50 = vpop.permute.xlu0 %1119 }
  0xa8   : > { %6114 = vperm.xlu2 %8074, %v6054_v22   ;;  %v1125_v20 = vperm.slane %v8491_v50, %v8519_v9  ;;  %v7377_v50 = vld [vmem:[%s8244_s24 + $0xe8] sm:$0xff] }
  0xae   : > { %6132 = vperm.xlu1 %8073, %v6056_v23   ;;  %6123 = vperm.xlu0 %8072, %v6055_v24  }
  0xaf   : > { %v8516_v4 = vpop.permute.xlu1 %1290  ;;  %v1129_v6 = vpop.permute.xlu0 %1128 }
  0xb0   : > { %6141 = vperm.xlu2 %8074, %v6057_v25   ;;  %v1134_v21 = vperm.slane %v1129_v6, %v8519_v9  ;;  %v7360_v25 = vld [vmem:[%s8244_s24 + $0x60] sm:$0xff] }
  0xb1   : > { %4717 = vmatpush.bf16.msrb.mxu2 %v7360_v25  ;;  %v7357_v25 = vld [vmem:[%s8244_s24 + $0x48] sm:$0xff] }
  0xb2   : > { %v1538_v36 = vunpack.c.l.bf16 %v1134_v21 }
  0xb5   : > { %783 = vmatmul.bf16.gmra.mxu0 %v7333_v26  ;;  %838 = vmatmul.bf16.gmra.mxu2 %v7344_v27  ;;  %v7378_v26 = vld [vmem:[%s8244_s24 + $0xf0] sm:$0xff]  ;;  %v8540_v27 = vpop.permute.xlu2 %1137 }
  0xb6   : > { %6159 = vperm.xlu1 %8073, %v6059_v28   ;;  %6150 = vperm.xlu0 %8072, %v6058_v29   ;;  %v1851_v29 = vld [vmem:[#allocation3 + $0x4] sm:$0xc] }
  0xb7   : > { %4943 = vmatpush.bf16.msrb.mxu0 %v7378_v26 }
  0xb8   : > { %6168 = vperm.xlu2 %8074, %v6060_v30   ;;  %v1327_v30 = vpop.permute.xlu1 %1326 }
  0xbb   : > { %4944 = vmatpush.bf16.msrb.mxu0 %v7377_v50 }
  0xbe   : > { %6186 = vperm.xlu1 %8073, %v6062_v33   ;;  %6177 = vperm.xlu0 %8072, %v6061_v34   ;;  %v7336_v33 = vld [vmem:[#allocation2 + $0x48] sm:$0xff]  ;;  %v7347_v34 = vld [vmem:[#allocation2 + $0xa0] sm:$0xff] }
  0xc0   : > { %6195 = vperm.xlu2 %8074, %v6063_v35   ;;  %v1537_v35 = vunpack.c.l.bf16 %v1125_v20  ;;  %v8581_v26 = vpop.permute.xlu1 %1335 }
  0xc5   : > { %788 = vmatmul.bf16.gmra.mxu0 %v7334_v37  ;;  %843 = vmatmul.bf16.gmra.mxu2 %v7345_v38  ;;  %v1318_v37 = vpop.permute.xlu0 %1317 }
  0xc6   : > { %6213 = vperm.xlu1 %8073, %v6065_v40   ;;  %6204 = vperm.xlu0 %8072, %v6064_v41   ;;  %v6077_v40 = vld [vmem:[%s11534_s1 + $0x64] sm:$0xf]  ;;  %v8546_v41 = vld [vmem:[#allocation3 + $0x8] sm:$0xff]   ;;  %v1323_v51 = vperm.slane %v1318_v37, %v8519_v9 }
  0xc7   : > { %v6081_v37 = vld [vmem:[%s11534_s1 + $0x74] sm:$0xf] }
  0xc8   : > { %6222 = vperm.xlu2 %8074, %v6066_v42   ;;  %v1559_v6 = vunpack.c.l.bf16 %v1323_v51 }
  0xce   : > { %6240 = vperm.xlu1 %8073, %v6068_v45   ;;  %6231 = vperm.xlu0 %8072, %v6067_v46   ;;  %v6076_v45 = vld [vmem:[%s11534_s1 + $0x60] sm:$0xf]  ;;  %v1948_v46 = vunpack.c.l.b16 %v1851_v29 }
  0xd0   : > { %6249 = vperm.xlu2 %8074, %v6069_v49   ;;  %v7359_v49 = vld [vmem:[%s8244_s24 + $0x58] sm:$0xff] }
  0xd1   : > { %4718 = vmatpush.bf16.msrb.mxu2 %v7359_v49 }
  0xd2   : > { %v754_v57 = vpop.f32.mrf.mxu0 }
  0xd3   : > { %v862_v59 = vmul.f32 %v8495_v52, %v754_v57 }
  0xd5   : > { %v907_v63 = vadd.f32 %v8499_v54, %v862_v59  ;;  %793 = vmatmul.bf16.gmra.mxu0 %v7335_v55  ;;  %848 = vmatmul.bf16.gmra.mxu2 %v7346_v56  ;;  %v7528_v59 = vunpack.c.l.b16 %v8546_v41 }
  0xd6   : > { %6267 = vperm.xlu1 %8073, %v6071_v60   ;;  %6258 = vperm.xlu0 %8072, %v6070_v61   ;;  %v1332_v60 = vperm.slane %v1327_v30, %v8519_v9 }
  0xd7   : > { %v949_v5 = vmul.f32 0.1, %v907_v63  ;;  %v1991_v1 = vpack.c.b16 %v7528_v59, %v1948_v46  ;;  %4719 = vmatpush.bf16.msrb.mxu2 %v7358_v2  ;;  %v7356_v46 = vld [vmem:[%s8244_s24 + $0x40] sm:$0xff] }
  0xd8   : > { %6276 = vperm.xlu2 %8074, %v6072_v0   ;;  %v809_v8 = vpop.f32.mrf.mxu2 }
  0xd9   : > { %v884_v10 = vmul.f32 %v8495_v52, %v809_v8  ;;  %v991_v12 = vmax.f32 %v907_v63, %v949_v5  ;;  %v7376_v5 = vld [vmem:[%s8244_s24 + $0xe0] sm:$0xff] }
  0xda   : > { %v756_v11 = vpop.f32.mrf.mxu0  ;;  %4945 = vmatpush.bf16.msrb.mxu0 %v7376_v5 }
  0xdb   : > { %v863_v13 = vmul.f32 %v8495_v52, %v756_v11  ;;  %v929_v17 = vadd.f32 %v8499_v54, %v884_v10  ;;  %v1033_v23 = vpack.c.bf16 %v991_v12, %v991_v12  ;;  %v1560_v12 = vunpack.c.l.bf16 %v1332_v60  ;;  %4720 = vmatpush.bf16.msrb.mxu2 %v7357_v25  ;;  %v7374_v60 = vld [vmem:[%s8244_s24 + $0xd0] sm:$0xff] }
  0xdd   : > { %v908_v18 = vadd.f32 %v8499_v54, %v863_v13  ;;  %v971_v22 = vmul.f32 0.1, %v929_v17  ;;  %v1495_v42 = vunpack.c.l.bf16 %v1033_v23  ;;  %v2678_v23 = vshrl.u32 %v1991_v1, 16 }
  0xde   : > { %6294 = vperm.xlu1 %8073, %v6074_v14   ;;  %6285 = vperm.xlu0 %8072, %v6073_v15  }
  0xdf   : > { %v950_v24 = vmul.f32 0.1, %v908_v18  ;;  %v1013_v28 = vmax.f32 %v929_v17, %v971_v22  ;;  %v1579_v62 = vmul.f32 %v1537_v35, %v1495_v42  ;;  %v7529_v17 = vunpack.c.h.b16 %v8546_v41  ;;  %v6079_v22 = vld [vmem:[%s11534_s1 + $0x6c] sm:$0xf]  ;;  %4721 = vmatpush.bf16.msrb.mxu2 %v7356_v46  ;;  %v6084_v41 = vld [vmem:[%s11534_s1 + $0x80] sm:$0xf] }
  0xe0   : > { %6303 = vperm.xlu2 %8074, %v6075_v19   ;;  %v811_v32 = vpop.f32.mrf.mxu2  ;;  %v8573_v19 = vpop.permute.xlu2 %1344  ;;  %v6085_v46 = vld [vmem:[%s11534_s1 + $0x84] sm:$0xf] }
  0xe1   : > { %v992_v31 = vmax.f32 %v908_v18, %v950_v24  ;;  %v885_v38 = vmul.f32 %v8495_v52, %v811_v32  ;;  %v1055_v53 = vpack.c.bf16 %v1013_v28, %v1013_v28  ;;  %v1894_v18 = vld [vmem:[#allocation3 + $0x4] sm:$0x8]  ;;  %v2681_v24 = vshll.u32 %v1991_v1, 16  ;;  %v1147_v28 = vpop.permute.xlu0 %1146 }
  0xe2   : > { %v759_v39 = vpop.f32.mrf.mxu0  ;;  %v1152_v35 = vperm.slane %v1147_v28, %v8519_v9  ;;  %v2014_v42 = vunpack.c.l.b16 %v1894_v18 }
  0xe3   : > { %v1034_v43 = vpack.c.bf16 %v992_v31, %v992_v31  ;;  %v864_v44 = vmul.f32 %v8495_v52, %v759_v39  ;;  %v930_v55 = vadd.f32 %v8499_v54, %v885_v38  ;;  %v1517_v7 = vunpack.c.l.bf16 %v1055_v53 }
  0xe5   : > { %v1496_v56 = vunpack.c.l.bf16 %v1034_v43  ;;  %v909_v57 = vadd.f32 %v8499_v54, %v864_v44  ;;  %798 = vmatmul.bf16.gmra.mxu0 %v7336_v33  ;;  %853 = vmatmul.bf16.gmra.mxu2 %v7347_v34  ;;  %v972_v61 = vmul.f32 0.1, %v930_v55  ;;  %v1601_v29 = vmul.f32 %v1559_v6, %v1517_v7  ;;  %v7375_v33 = vld [vmem:[%s8244_s24 + $0xd8] sm:$0xff] }
  0xe6   : > { %6321 = vperm.xlu1 %8073, %v6077_v40   ;;  %6312 = vperm.xlu0 %8072, %v6076_v45   ;;  %v1143_v34 = vperm.slane %v8540_v27, %v8519_v9  ;;  %v2680_v44 = vrot.slane %v2678_v23, 2  ;;  %v2683_v45 = vrot.slane %v2681_v24, 3  ;;  %v6083_v7 = vld [vmem:[%s11534_s1 + $0x7c] sm:$0xf] }
  0xe7   : > { %v1580_v63 = vmul.f32 %v1538_v36, %v1496_v56  ;;  %v951_v0 = vmul.f32 0.1, %v909_v57  ;;  %v1014_v8 = vmax.f32 %v930_v55, %v972_v61  ;;  %4946 = vmatpush.bf16.msrb.mxu0 %v7375_v33  ;;  %v1341_v61 = vperm.slane %v8581_v26, %v8519_v9 }
  0xe8   : > { %6330 = vperm.xlu2 %8074, %v6078_v58   ;;  %v814_v11 = vpop.f32.mrf.mxu2  ;;  %v1539_v55 = vunpack.c.l.bf16 %v1143_v34  ;;  %v7337_v58 = vld [vmem:[#allocation2 + $0x50] sm:$0xff]  ;;  %v7372_v34 = vld [vmem:[%s8244_s24 + $0xc0] sm:$0xff] }
  0xe9   : > { %v8566_v10 = vpack.c.bf16 %v1580_v63, %v1579_v62  ;;  %v1056_v13 = vpack.c.bf16 %v1014_v8, %v1014_v8  ;;  %v886_v14 = vmul.f32 %v8495_v52, %v814_v11  ;;  %v993_v20 = vmax.f32 %v909_v57, %v951_v0  ;;  %v6082_v8 = vld [vmem:[%s11534_s1 + $0x78] sm:$0xf]  ;;  %v1156_v24 = vpop.permute.xlu0 %1155 }
  0xea   : > { %v761_v15 = vpop.f32.mrf.mxu0  ;;  %v1540_v62 = vunpack.c.l.bf16 %v1152_v35  ;;  %v8615_v11 = vpack.c.b16 %v7528_v59, %v2014_v42  ;;  %v1350_v59 = vperm.slane %v8573_v19, %v8519_v9 }
  0xeb   : > { %7803 = vst [vmem:[#allocation3 + $0x10] sm:$0xff] %v8566_v10   ;;  %v865_v21 = vmul.f32 %v8495_v52, %v761_v15  ;;  %v1518_v30 = vunpack.c.l.bf16 %v1056_v13  ;;  %v931_v31 = vadd.f32 %v8499_v54, %v886_v14  ;;  %v7532_v32 = vunpack.c.l.b16 %v8566_v10  ;;  %4947 = vmatpush.bf16.msrb.mxu0 %v7374_v60 }
  0xec   : > { %v1035_v43 = vpack.c.bf16 %v993_v20, %v993_v20  ;;  %v2684_v14 = vor.u32 %v2683_v45, %v2680_v44  ;;  %v1354_v20 = vpop.permute.xlu2 %1353  ;;  %v6086_v45 = vld [vmem:[%s11534_s1 + $0x88] sm:$0xf] }
  0xed   : > { %v910_v36 = vadd.f32 %v8499_v54, %v865_v21  ;;  %v1602_v38 = vmul.f32 %v1560_v12, %v1518_v30  ;;  %v973_v39 = vmul.f32 0.1, %v931_v31  ;;  %v8595_v40 = vpack.c.b16 %v7532_v32, %v7529_v17  ;;  %v1165_v21 = vpop.permute.xlu1 %1164 }
  0xee   : > { %6348 = vperm.xlu1 %8073, %v6080_v16   ;;  %6339 = vperm.xlu0 %8072, %v6079_v22   ;;  %v1497_v2 = vunpack.c.l.bf16 %v1035_v43  ;;  %v7373_v16 = vld [vmem:[%s8244_s24 + $0xc8] sm:$0xff]  ;;  %v1561_v30 = vunpack.c.l.bf16 %v1341_v61  ;;  %v2018_v43 = vshrl.u32 %v8615_v11, 16 }
  0xef   : > { %v952_v27 = vmul.f32 0.1, %v910_v36  ;;  %v7479_v49 = vpack.c.bf16 %v1602_v38, %v1601_v29  ;;  %v1015_v50 = vmax.f32 %v931_v31, %v973_v39  ;;  %v2025_v51 = vshll.u32 %v8595_v40, 16  ;;  %4948 = vmatpush.bf16.msrb.mxu0 %v7373_v16  ;;  %v6087_v61 = vld [vmem:[%s11534_s1 + $0x8c] sm:$0xf] }
  0xf0   : > { %v2029_v53 = vshrl.u32 %v8595_v40, 16  ;;  %6357 = vperm.xlu2 %8074, %v6081_v37   ;;  %v816_v57 = vpop.f32.mrf.mxu2  ;;  %v1581_v25 = vmul.f32 %v1539_v55, %v1497_v2  ;;  %v2020_v29 = vshll.u32 %v8615_v11, 16  ;;  %v1562_v37 = vunpack.c.l.bf16 %v1350_v59 }
  0xf1   : > { %v994_v56 = vmax.f32 %v910_v36, %v952_v27  ;;  %7814 = vst [vmem:[#allocation3 + $0x68] sm:$0xff] %v7479_v49   ;;  %v887_v63 = vmul.f32 %v8495_v52, %v816_v57  ;;  %v1057_v12 = vpack.c.bf16 %v1015_v50, %v1015_v50  ;;  %v2686_v15 = vrot.slane %v2025_v51, 3 }
  0xf2   : > { %v764_v0 = vpop.f32.mrf.mxu0  ;;  %v2685_v1 = vrot.slane %v2029_v53, 2  ;;  %v2022_v49 = vrot.slane %v2020_v29, 1  ;;  %v1359_v57 = vperm.slane %v1354_v20, %v8519_v9 }
  0xf3   : > { %v1036_v5 = vpack.c.bf16 %v994_v56, %v994_v56  ;;  %v866_v6 = vmul.f32 %v8495_v52, %v764_v0  ;;  %v932_v13 = vadd.f32 %v8499_v54, %v887_v63  ;;  %v1519_v31 = vunpack.c.l.bf16 %v1057_v12  ;;  %4949 = vmatpush.bf16.msrb.mxu0 %v7372_v34 }
  0xf4   : > { %v8627_v23 = vor.u32 %v2686_v15, %v2685_v1 }
  0xf5   : > { %v1498_v17 = vunpack.c.l.bf16 %v1036_v5  ;;  %v911_v18 = vadd.f32 %v8499_v54, %v866_v6  ;;  %803 = vmatmul.bf16.gmra.mxu0 %v7337_v58  ;;  %v974_v22 = vmul.f32 0.1, %v932_v13  ;;  %v1603_v50 = vmul.f32 %v1561_v30, %v1519_v31  ;;  %v6089_v30 = vld [vmem:[%s11534_s1 + $0x94] sm:$0xf]  ;;  %v6088_v31 = vld [vmem:[%s11534_s1 + $0x90] sm:$0xf] }
  0xf6   : > { %6375 = vperm.xlu1 %8073, %v6083_v7   ;;  %6366 = vperm.xlu0 %8072, %v6082_v8   ;;  %v2688_v19 = vsel %vm2676_vm0, %v2684_v14, %v8627_v23  ;;  %v1170_v58 = vperm.slane %v1165_v21, %v8519_v9  ;;  %v2027_v5 = vrot.slane %v2025_v51, 1  ;;  %v2023_v6 = vor.u32 %v2022_v49, %v2018_v43  ;;  %v1183_v7 = vpop.permute.xlu2 %1182  ;;  %v1174_v8 = vpop.permute.xlu1 %1173  ;;  %v6090_v43 = vld [vmem:[%s11534_s1 + $0x98] sm:$0xf] }
  0xf7   : > { %v1582_v26 = vmul.f32 %v1540_v62, %v1498_v17  ;;  %v953_v28 = vmul.f32 0.1, %v911_v18  ;;  %v1016_v33 = vmax.f32 %v932_v13, %v974_v22  ;;  %4608 = vmatmul.bf16.vlgmr.msra.gmra.mxu1 %v2688_v19  ;;  %v1161_v62 = vperm.slane %v1156_v24, %v8519_v9  ;;  %v1363_v17 = vpop.permute.xlu0 %1362 }
  0xf8   : > { %6384 = vperm.xlu2 %8074, %v6084_v41   ;;  %v819_v36 = vpop.f32.mrf.mxu2  ;;  %v1563_v14 = vunpack.c.l.bf16 %v1359_v57  ;;  %v1542_v15 = vunpack.c.l.bf16 %v1170_v58  ;;  %v1188_v16 = vperm.slane %v1183_v7, %v8519_v9  ;;  %v1179_v20 = vperm.slane %v1174_v8, %v8519_v9 }
  0xf9   : > { %v8633_v35 = vpack.c.bf16 %v1582_v26, %v1581_v25  ;;  %v1058_v38 = vpack.c.bf16 %v1016_v33, %v1016_v33  ;;  %v888_v39 = vmul.f32 %v8495_v52, %v819_v36  ;;  %v995_v27 = vmax.f32 %v911_v18, %v953_v28  ;;  %v1896_v25 = vld [vmem:[#allocation3 + $0xc] sm:$0x8] }
  0xfa   : > { %v766_v42 = vpop.f32.mrf.mxu0  ;;  %v1541_v59 = vunpack.c.l.bf16 %v1161_v62  ;;  %v1368_v21 = vperm.slane %v1363_v17, %v8519_v9  ;;  %v2028_v33 = vsel %vm2016_vm1, %v2023_v6, %v2027_v5  ;;  %v8682_v57 = vunpack.c.l.bf16 %v1188_v16  ;;  %v6092_v16 = vld [vmem:[%s11534_s1 + $0xa0] sm:$0xf]  ;;  %v6091_v17 = vld [vmem:[%s11534_s1 + $0x9c] sm:$0xf] }
  0xfb   : > { %7804 = vst [vmem:[#allocation3 + $0x18] sm:$0xff] %v8633_v35   ;;  %v867_v44 = vmul.f32 %v8495_v52, %v766_v42  ;;  %v1520_v55 = vunpack.c.l.bf16 %v1058_v38  ;;  %v933_v56 = vadd.f32 %v8499_v54, %v888_v39  ;;  %v1037_v1 = vpack.c.bf16 %v995_v27, %v995_v27 }
  0xfc   : > { %v2031_v39 = vor.u32 %v2029_v53, %v2027_v5  ;;  %v2242_v27 = vunpack.c.l.b16 %v1896_v25  ;;  %v2690_v49 = vshrl.u32 %v2028_v33, 16  ;;  %v8686_v62 = vunpack.c.l.bf16 %v1179_v20 }
  0xfd   : > { %v912_v60 = vadd.f32 %v8499_v54, %v867_v44  ;;  %v1604_v63 = vmul.f32 %v1562_v37, %v1520_v55  ;;  %v975_v0 = vmul.f32 0.1, %v933_v56  ;;  %v1499_v26 = vunpack.c.l.bf16 %v1037_v1 }
  0xfe   : > { %6402 = vperm.xlu1 %8073, %v6086_v45   ;;  %6393 = vperm.xlu0 %8072, %v6085_v46  }
  0xff   : > { %v954_v2 = vmul.f32 0.1, %v912_v60  ;;  %v7484_v12 = vpack.c.bf16 %v1604_v63, %v1603_v50  ;;  %v1017_v13 = vmax.f32 %v933_v56, %v975_v0  ;;  %v1583_v50 = vmul.f32 %v1541_v59, %v1499_v26 }
 0x100   : > { %6411 = vperm.xlu2 %8074, %v6087_v61   ;;  %v821_v41 = vpop.f32.mrf.mxu2  ;;  %v1564_v63 = vunpack.c.l.bf16 %v1368_v21 }
 0x101   : > { %v996_v18 = vmax.f32 %v912_v60, %v954_v2  ;;  %7815 = vst [vmem:[#allocation3 + $0x70] sm:$0xff] %v7484_v12   ;;  %v889_v51 = vmul.f32 %v8495_v52, %v821_v41  ;;  %v1059_v19 = vpack.c.bf16 %v1017_v13, %v1017_v13  ;;  %v2693_v2 = vshll.u32 %v2028_v33, 16 }
 0x102   : > { %v769_v22 = vpop.f32.mrf.mxu0  ;;  %v8659_v24 = vld [vmem:[#allocation3 + $0x14] sm:$0xff]   ;;  %v2245_v41 = vpack.c.b16 %v7532_v32, %v2242_v27 }
 0x103   : > { %v1038_v28 = vpack.c.bf16 %v996_v18, %v996_v18  ;;  %v868_v29 = vmul.f32 %v8495_v52, %v769_v22  ;;  %v934_v34 = vadd.f32 %v8499_v54, %v889_v51  ;;  %v2033_v36 = vshll.u32 %v8659_v24, 16 }
 0x104   : > { %v2037_v37 = vshrl.u32 %v8659_v24, 16  ;;  %v1521_v58 = vunpack.c.l.bf16 %v1059_v19  ;;  %v2692_v18 = vrot.slane %v2690_v49, 2  ;;  %v2695_v25 = vrot.slane %v2693_v2, 3  ;;  %v1372_v19 = vpop.permute.xlu0 %1371 }
 0x105   : > { %v1500_v38 = vunpack.c.l.bf16 %v1038_v28  ;;  %v913_v42 = vadd.f32 %v8499_v54, %v868_v29  ;;  %v976_v44 = vmul.f32 0.1, %v934_v34  ;;  %v8678_v45 = vrot.slane %v2033_v36, 1  ;;  %v6093_v29 = vld [vmem:[%s11534_s1 + $0xa4] sm:$0xf] }
 0x106   : > { %6429 = vperm.xlu1 %8073, %v6089_v30   ;;  %6420 = vperm.xlu0 %8072, %v6088_v31   ;;  %v2825_v46 = vrot.slane %v2037_v37, 2  ;;  %v2826_v53 = vrot.slane %v2033_v36, 3  ;;  %v1605_v59 = vmul.f32 %v1563_v14, %v1521_v58  ;;  %v7537_v14 = vunpack.c.h.b16 %v8633_v35 }
 0x107   : > { %v1584_v55 = vmul.f32 %v1542_v15, %v1500_v38  ;;  %v955_v56 = vmul.f32 0.1, %v913_v42  ;;  %v1018_v60 = vmax.f32 %v934_v34, %v976_v44  ;;  %v2036_v61 = vsel %vm2016_vm1, %v2031_v39, %v8678_v45 }
 0x108   : > { %6438 = vperm.xlu2 %8074, %v6090_v43   ;;  %v824_v1 = vpop.f32.mrf.mxu2  ;;  %v8689_v8 = vor.u32 %v2826_v53, %v2825_v46  ;;  %v2698_v12 = vshrl.u32 %v2036_v61, 16  ;;  %v2701_v28 = vshll.u32 %v2036_v61, 16  ;;  %v8714_v39 = vrot.slane %v8659_v24, 1 }
 0x109   : > { %v7434_v0 = vpack.c.bf16 %v1584_v55, %v1583_v50  ;;  %v1060_v5 = vpack.c.bf16 %v1018_v60, %v1018_v60  ;;  %v890_v6 = vmul.f32 %v8495_v52, %v824_v1  ;;  %v997_v13 = vmax.f32 %v913_v42, %v955_v56 }
 0x10a   : > { %v771_v7 = vpop.f32.mrf.mxu0  ;;  %v2828_v51 = vsel %vm2676_vm0, %v8627_v23, %v8689_v8  ;;  %v2700_v26 = vrot.slane %v2698_v12, 2  ;;  %v2703_v23 = vrot.slane %v2701_v28, 3  ;;  %v1377_v42 = vperm.slane %v1372_v19, %v8519_v9 }
 0x10b   : > { %7805 = vst [vmem:[#allocation3 + $0x20] sm:$0xff] %v7434_v0   ;;  %v869_v15 = vmul.f32 %v8495_v52, %v771_v7  ;;  %v1522_v20 = vunpack.c.l.bf16 %v1060_v5  ;;  %v935_v21 = vadd.f32 %v8499_v54, %v890_v6  ;;  %4613 = vmatmul.bf16.gmra.mxu1 %v2828_v51  ;;  %v7540_v30 = vunpack.c.l.b16 %v7434_v0  ;;  %v1381_v5 = vpop.permute.xlu1 %1380  ;;  %v1192_v51 = vpop.permute.xlu2 %1191 }
 0x10c   : > { %v1039_v31 = vpack.c.bf16 %v997_v13, %v997_v13  ;;  %v2696_v44 = vor.u32 %v2695_v25, %v2692_v18  ;;  %v8717_v46 = vor.u32 %v2703_v23, %v2700_v26  ;;  %v2248_v53 = vrot.slane %v2245_v41, 1 }
 0x10d   : > { %v914_v22 = vadd.f32 %v8499_v54, %v869_v15  ;;  %v1606_v10 = vmul.f32 %v1564_v63, %v1522_v20  ;;  %v977_v32 = vmul.f32 0.1, %v935_v21  ;;  %v8711_v38 = vpack.c.b16 %v7540_v30, %v7537_v14 }
 0x10e   : > { %6456 = vperm.xlu1 %8073, %v6092_v16   ;;  %6447 = vperm.xlu0 %8072, %v6091_v17   ;;  %v1501_v58 = vunpack.c.l.bf16 %v1039_v31  ;;  %v2705_v63 = vsel %vm2676_vm0, %v2696_v44, %v8717_v46  ;;  %v2249_v2 = vsel %vm2195_vm2, %v2248_v53, %v8714_v39  ;;  %v1386_v15 = vperm.slane %v1381_v5, %v8519_v9  ;;  %v1201_v53 = vpop.permute.xlu0 %1200 }
 0x10f   : > { %v956_v33 = vmul.f32 0.1, %v914_v22  ;;  %v7489_v34 = vpack.c.bf16 %v1606_v10, %v1605_v59  ;;  %v1019_v36 = vmax.f32 %v935_v21, %v977_v32  ;;  %v2041_v55 = vshll.u32 %v8711_v38, 16  ;;  %4722 = vmatmul.bf16.vlgmr.msrb.gmra.mxu2 %v2705_v63 }
 0x110   : > { %6465 = vperm.xlu2 %8074, %v6093_v29   ;;  %v826_v27 = vpop.f32.mrf.mxu2  ;;  %v2045_v56 = vshrl.u32 %v8711_v38, 16  ;;  %v2201_v13 = vrot.slane %v8711_v38, 1  ;;  %v1565_v16 = vunpack.c.l.bf16 %v1377_v42  ;;  %v1585_v41 = vmul.f32 %v8686_v62, %v1501_v58 }
 0x111   : > { %v998_v43 = vmax.f32 %v914_v22, %v956_v33  ;;  %7816 = vst [vmem:[#allocation3 + $0x78] sm:$0xff] %v7489_v34   ;;  %v891_v49 = vmul.f32 %v8495_v52, %v826_v27  ;;  %v1061_v60 = vpack.c.bf16 %v1019_v36, %v1019_v36  ;;  %v2886_v12 = vrot.slane %v2041_v55, 3 }
 0x112   : > { %v774_v50 = vpop.f32.mrf.mxu0  ;;  %v2885_v7 = vrot.slane %v2045_v56, 2  ;;  %v2202_v21 = vsel %vm2195_vm2, %v8714_v39, %v2201_v13  ;;  %v2724_v28 = vshrl.u32 %v2249_v2, 16  ;;  %v1197_v29 = vperm.slane %v1192_v51, %v8519_v9 }
 0x113   : > { %v1040_v61 = vpack.c.bf16 %v998_v43, %v998_v43  ;;  %v936_v0 = vadd.f32 %v8499_v54, %v891_v49  ;;  %v870_v1 = vmul.f32 %v8495_v52, %v774_v50  ;;  %v1523_v59 = vunpack.c.l.bf16 %v1061_v60 }
 0x114   : > { %v8739_v26 = vor.u32 %v2886_v12, %v2885_v7  ;;  %v2727_v30 = vshll.u32 %v2249_v2, 16  ;;  %v2732_v62 = vshrl.u32 %v2202_v21, 16  ;;  %v1566_v31 = vunpack.c.l.bf16 %v1386_v15 }
 0x115   : > { %v1502_v6 = vunpack.c.l.bf16 %v1040_v61  ;;  %v978_v17 = vmul.f32 0.1, %v936_v0  ;;  %v915_v18 = vadd.f32 %v8499_v54, %v870_v1  ;;  %v8743_v19 = vrot.slane %v2041_v55, 1 }
 0x116   : > { %v1607_v34 = vmul.f32 %v1565_v16, %v1523_v59  ;;  %v2039_v36 = vor.u32 %v2037_v37, %v8678_v45  ;;  %v2888_v49 = vsel %vm2676_vm0, %v8689_v8, %v8739_v26  ;;  %v2726_v50 = vrot.slane %v2724_v28, 2 }
 0x117   : > { %v1586_v20 = vmul.f32 %v8682_v57, %v1502_v6  ;;  %v1020_v22 = vmax.f32 %v936_v0, %v978_v17  ;;  %v957_v25 = vmul.f32 0.1, %v915_v18  ;;  %v2729_v58 = vrot.slane %v2727_v30, 3  ;;  %v1390_v6 = vpop.permute.xlu1 %1389 }
 0x118   : > { %v829_v32 = vpop.f32.mrf.mxu2  ;;  %v2734_v60 = vrot.slane %v2732_v62, 2  ;;  %v2735_v61 = vshll.u32 %v2202_v21, 16  ;;  %v1206_v24 = vperm.slane %v1201_v53, %v8519_v9  ;;  %v2044_v63 = vsel %vm2016_vm1, %v2039_v36, %v8743_v19  ;;  %v1399_v62 = vpop.permute.xlu2 %1398 }
 0x119   : > { %v7439_v10 = vpack.c.bf16 %v1586_v20, %v1585_v41  ;;  %v1062_v33 = vpack.c.bf16 %v1020_v22, %v1020_v22  ;;  %v892_v57 = vmul.f32 %v8495_v52, %v829_v32  ;;  %v999_v42 = vmax.f32 %v915_v18, %v957_v25 }
 0x11a   : > { %v776_v23 = vpop.f32.mrf.mxu0  ;;  %v2737_v2 = vrot.slane %v2735_v61, 3  ;;  %v2830_v5 = vshrl.u32 %v2044_v63, 16  ;;  %v1545_v8 = vunpack.c.l.bf16 %v1197_v29  ;;  %v2833_v15 = vshll.u32 %v2044_v63, 16 }
 0x11b   : > { %7806 = vst [vmem:[#allocation3 + $0x28] sm:$0xff] %v7439_v10   ;;  %v871_v43 = vmul.f32 %v8495_v52, %v776_v23  ;;  %v1524_v27 = vunpack.c.l.bf16 %v1062_v33  ;;  %v937_v44 = vadd.f32 %v8499_v54, %v892_v57  ;;  %4618 = vmatmul.bf16.gmra.mxu1 %v2888_v49  ;;  %v1041_v0 = vpack.c.bf16 %v999_v42, %v999_v42 }
 0x11c   : > { %v1395_v16 = vperm.slane %v1390_v6, %v8519_v9  ;;  %v2730_v41 = vor.u32 %v2729_v58, %v2726_v50  ;;  %v8758_v59 = vor.u32 %v2737_v2, %v2734_v60  ;;  %v1546_v20 = vunpack.c.l.bf16 %v1206_v24  ;;  %v1210_v6 = vpop.permute.xlu0 %1209 }
 0x11d   : > { %v916_v55 = vadd.f32 %v8499_v54, %v871_v43  ;;  %v1608_v37 = vmul.f32 %v1566_v31, %v1524_v27  ;;  %v979_v45 = vmul.f32 0.1, %v937_v44  ;;  %v2832_v22 = vrot.slane %v2830_v5, 2 }
 0x11e   : > { %v2835_v25 = vrot.slane %v2833_v15, 3  ;;  %v1503_v29 = vunpack.c.l.bf16 %v1041_v0  ;;  %v2739_v30 = vsel %vm2676_vm0, %v2730_v41, %v8758_v59  ;;  %v1404_v23 = vperm.slane %v1399_v62, %v8519_v9 }
 0x11f   : > { %v958_v1 = vmul.f32 0.1, %v916_v55  ;;  %v7494_v7 = vpack.c.bf16 %v1608_v37, %v1607_v34  ;;  %v1021_v12 = vmax.f32 %v937_v44, %v979_v45  ;;  %4950 = vmatmul.bf16.vlgmr.msrb.gmra.mxu0 %v2739_v30  ;;  %v1567_v43 = vunpack.c.l.bf16 %v1395_v16 }
 0x120   : > { %v831_v18 = vpop.f32.mrf.mxu2  ;;  %v8767_v57 = vor.u32 %v2835_v25, %v2832_v22  ;;  %v1587_v50 = vmul.f32 %v1545_v8, %v1503_v29  ;;  %v1568_v45 = vunpack.c.l.bf16 %v1404_v23  ;;  %v1408_v25 = vpop.permute.xlu2 %1407  ;;  %v1215_v38 = vperm.slane %v1210_v6, %v8519_v9 }
 0x121   : > { %v1000_v17 = vmax.f32 %v916_v55, %v958_v1  ;;  %7817 = vst [vmem:[#allocation3 + $0x80] sm:$0xff] %v7494_v7   ;;  %v893_v21 = vmul.f32 %v8495_v52, %v831_v18  ;;  %v1063_v10 = vpack.c.bf16 %v1021_v12, %v1021_v12  ;;  %v2047_v7 = vor.u32 %v2045_v56, %v8743_v19 }
 0x122   : > { %v779_v51 = vpop.f32.mrf.mxu0  ;;  %v8761_v28 = vld [vmem:[#allocation3 + $0x24] sm:$0xff]   ;;  %v2837_v49 = vsel %vm2676_vm0, %v8717_v46, %v8767_v57 }
 0x123   : > { %v1042_v32 = vpack.c.bf16 %v1000_v17, %v1000_v17  ;;  %v938_v31 = vadd.f32 %v8499_v54, %v893_v21  ;;  %v872_v33 = vmul.f32 %v8495_v52, %v779_v51  ;;  %v2049_v36 = vshll.u32 %v8761_v28, 16  ;;  %4727 = vmatmul.bf16.gmra.mxu2 %v2837_v49  ;;  %v1219_v17 = vpop.permute.xlu1 %1218 }
 0x124   : > { %v2053_v42 = vshrl.u32 %v8761_v28, 16  ;;  %v1525_v53 = vunpack.c.l.bf16 %v1063_v10  ;;  %v2203_v37 = vrot.slane %v8761_v28, 1  ;;  %v1224_v56 = vperm.slane %v1219_v17, %v8519_v9  ;;  %v1417_v6 = vpop.permute.xlu0 %1416 }
 0x125   : > { %v1504_v34 = vunpack.c.l.bf16 %v1042_v32  ;;  %v980_v27 = vmul.f32 0.1, %v938_v31  ;;  %v917_v44 = vadd.f32 %v8499_v54, %v872_v33  ;;  %v2944_v24 = vrot.slane %v2049_v36, 3 }
 0x126   : > { %v2943_v58 = vrot.slane %v2053_v42, 2  ;;  %v8780_v46 = vrot.slane %v2049_v36, 1  ;;  %v2204_v16 = vsel %vm2195_vm2, %v2201_v13, %v2203_v37  ;;  %v1609_v18 = vmul.f32 %v1567_v43, %v1525_v53 }
 0x127   : > { %v1588_v55 = vmul.f32 %v1546_v20, %v1504_v34  ;;  %v1022_v60 = vmax.f32 %v938_v31, %v980_v27  ;;  %v959_v61 = vmul.f32 0.1, %v917_v44  ;;  %v2840_v51 = vshrl.u32 %v2204_v16, 16 }
 0x128   : > { %v834_v0 = vpop.f32.mrf.mxu2  ;;  %v8782_v8 = vor.u32 %v2944_v24, %v2943_v58  ;;  %v2843_v22 = vshll.u32 %v2204_v16, 16  ;;  %v2052_v10 = vsel %vm2016_vm1, %v2047_v7, %v8780_v46  ;;  %v1413_v34 = vperm.slane %v1408_v25, %v8519_v9 }
 0x129   : > { %v7444_v63 = vpack.c.bf16 %v1588_v55, %v1587_v50  ;;  %v1064_v1 = vpack.c.bf16 %v1022_v60, %v1022_v60  ;;  %v894_v2 = vmul.f32 %v8495_v52, %v834_v0  ;;  %v1001_v12 = vmax.f32 %v917_v44, %v959_v61 }
 0x12a   : > { %v781_v5 = vpop.f32.mrf.mxu0  ;;  %v2946_v21 = vsel %vm2676_vm0, %v8739_v26, %v8782_v8  ;;  %v2842_v62 = vrot.slane %v2840_v51, 2  ;;  %v2845_v31 = vrot.slane %v2843_v22, 3  ;;  %v2890_v23 = vshrl.u32 %v2052_v10, 16 }
 0x12b   : > { %7807 = vst [vmem:[#allocation3 + $0x30] sm:$0xff] %v7444_v63   ;;  %v873_v15 = vmul.f32 %v8495_v52, %v781_v5  ;;  %v1526_v41 = vunpack.c.l.bf16 %v1064_v1  ;;  %v939_v20 = vadd.f32 %v8499_v54, %v894_v2  ;;  %4623 = vmatmul.bf16.gmra.mxu1 %v2946_v21  ;;  %v1043_v32 = vpack.c.bf16 %v1001_v12, %v1001_v12 }
 0x12c   : > { %v1548_v36 = vunpack.c.l.bf16 %v1224_v56  ;;  %v8803_v44 = vor.u32 %v2845_v31, %v2842_v62  ;;  %v1547_v49 = vunpack.c.l.bf16 %v1215_v38  ;;  %v2892_v55 = vrot.slane %v2890_v23, 2  ;;  %v8831_v31 = vld [vmem:[%s8249_s28] ss:$0 sm:$0xff] }
 0x12d   : > { %v918_v19 = vadd.f32 %v8499_v54, %v873_v15  ;;  %v1610_v13 = vmul.f32 %v1568_v45, %v1526_v41  ;;  %v981_v29 = vmul.f32 0.1, %v939_v20  ;;  %v2893_v58 = vshll.u32 %v2052_v10, 16 }
 0x12e   : > { %v1505_v61 = vunpack.c.l.bf16 %v1043_v32  ;;  %v8811_v63 = vsel %vm2676_vm0, %v8758_v59, %v8803_v44  ;;  %v1569_v5 = vunpack.c.l.bf16 %v1413_v34  ;;  %v1422_v16 = vperm.slane %v1417_v6, %v8519_v9  ;;  %v1228_v32 = vpop.permute.xlu1 %1227 }
 0x12f   : > { %v960_v30 = vmul.f32 0.1, %v918_v19  ;;  %v7499_v26 = vpack.c.bf16 %v1610_v13, %v1609_v18  ;;  %v1023_v33 = vmax.f32 %v939_v20, %v981_v29  ;;  %4955 = vmatmul.bf16.gmra.mxu0 %v8811_v63  ;;  %v2895_v2 = vrot.slane %v2893_v58, 3 }
 0x130   : > { %v836_v27 = vpop.f32.mrf.mxu2  ;;  %v1589_v20 = vmul.f32 %v1547_v49, %v1505_v61  ;;  %v1233_v58 = vperm.slane %v1228_v32, %v8519_v9 }
 0x131   : > { %v1002_v43 = vmax.f32 %v918_v19, %v960_v30  ;;  %7818 = vst [vmem:[#allocation3 + $0x88] sm:$0xff] %v7499_v26   ;;  %v895_v50 = vmul.f32 %v8495_v52, %v836_v27  ;;  %v1065_v24 = vpack.c.bf16 %v1023_v33, %v1023_v33  ;;  %v8820_v41 = vor.u32 %v2895_v2, %v2892_v55  ;;  %v1237_v19 = vpop.permute.xlu2 %1236 }
 0x132   : > { %v784_v53 = vpop.f32.mrf.mxu0  ;;  %v8806_v60 = vld [vmem:[#allocation3 + $0x2c] sm:$0xff]   ;;  %v1242_v13 = vperm.slane %v1237_v19, %v8519_v9  ;;  %v1570_v30 = vunpack.c.l.bf16 %v1422_v16 }
 0x133   : > { %v1044_v45 = vpack.c.bf16 %v1002_v43, %v1002_v43  ;;  %v940_v0 = vadd.f32 %v8499_v54, %v895_v50  ;;  %v874_v1 = vmul.f32 %v8495_v52, %v784_v53  ;;  %v2057_v12 = vshll.u32 %v8806_v60, 16  ;;  %v8842_v50 = vld [vmem:[%s8254_s16] ss:$0 sm:$0xff] }
 0x134   : > { %v2061_v15 = vshrl.u32 %v8806_v60, 16  ;;  %v1527_v21 = vunpack.c.l.bf16 %v1065_v24  ;;  %v2897_v25 = vsel %vm2676_vm0, %v8767_v57, %v8820_v41  ;;  %v2055_v57 = vor.u32 %v2053_v42, %v8780_v46 }
 0x135   : > { %v1506_v7 = vunpack.c.l.bf16 %v1044_v45  ;;  %v982_v17 = vmul.f32 0.1, %v940_v0  ;;  %v919_v18 = vadd.f32 %v8499_v54, %v874_v1  ;;  %v3002_v38 = vrot.slane %v2057_v12, 3  ;;  %4732 = vmatmul.bf16.gmra.mxu2 %v2897_v25 }
 0x136   : > { %v3001_v52 = vrot.slane %v2061_v15, 2  ;;  %v8828_v10 = vrot.slane %v2057_v12, 1  ;;  %v2205_v43 = vrot.slane %v8806_v60, 1  ;;  %v1611_v27 = vmul.f32 %v1569_v5, %v1527_v21 }
 0x137   : > { %v1590_v56 = vmul.f32 %v1548_v36, %v1506_v7  ;;  %v1024_v51 = vmax.f32 %v940_v0, %v982_v17  ;;  %v961_v22 = vmul.f32 0.1, %v919_v18  ;;  %v1550_v16 = vunpack.c.l.bf16 %v1242_v13  ;;  %v1435_v13 = vpop.permute.xlu1 %1434 }
 0x138   : > { %v839_v29 = vpop.f32.mrf.mxu2  ;;  %v8834_v23 = vor.u32 %v3002_v38, %v3001_v52  ;;  %v2206_v42 = vsel %vm2195_vm2, %v2203_v37, %v2205_v43  ;;  %v2060_v46 = vsel %vm2016_vm1, %v2055_v57, %v8828_v10  ;;  %v1549_v17 = vunpack.c.l.bf16 %v1233_v58 }
 0x139   : > { %v7449_v54 = vpack.c.bf16 %v1590_v56, %v1589_v20  ;;  %v1066_v62 = vpack.c.bf16 %v1024_v51, %v1024_v51  ;;  %v896_v26 = vmul.f32 %v8831_v31, %v839_v29  ;;  %v1003_v34 = vmax.f32 %v919_v18, %v961_v22  ;;  %v1426_v18 = vpop.permute.xlu0 %1425 }
 0x13a   : > { %v786_v33 = vpop.f32.mrf.mxu0  ;;  %v3004_v55 = vsel %vm2676_vm0, %v8782_v8, %v8834_v23  ;;  %v2899_v0 = vshrl.u32 %v2206_v42, 16  ;;  %v2902_v8 = vshll.u32 %v2206_v42, 16  ;;  %v2948_v5 = vshrl.u32 %v2060_v46, 16 }
 0x13b   : > { %7808 = vst [vmem:[#allocation3 + $0x38] sm:$0xff] %v7449_v54   ;;  %v875_v36 = vmul.f32 %v8831_v31, %v786_v33  ;;  %v1528_v49 = vunpack.c.l.bf16 %v1066_v62  ;;  %v941_v53 = vadd.f32 %v8842_v50, %v896_v26  ;;  %4628 = vmatmul.bf16.gmra.mxu1 %v3004_v55  ;;  %v1045_v1 = vpack.c.bf16 %v1003_v34, %v1003_v34 }
 0x13c   : > { %v2901_v12 = vrot.slane %v2899_v0, 2  ;;  %v2904_v21 = vrot.slane %v2902_v8, 3  ;;  %v1431_v37 = vperm.slane %v1426_v18, %v8519_v9  ;;  %v2950_v19 = vrot.slane %v2948_v5, 2  ;;  %v1246_v8 = vpop.permute.xlu2 %1245 }
 0x13d   : > { %v920_v61 = vadd.f32 %v8842_v50, %v875_v36  ;;  %v1612_v24 = vmul.f32 %v1570_v30, %v1528_v49  ;;  %v983_v45 = vmul.f32 0.1, %v941_v53  ;;  %v2951_v51 = vshll.u32 %v2060_v46, 16 }
 0x13e   : > { %v1507_v25 = vunpack.c.l.bf16 %v1045_v1  ;;  %v8861_v29 = vor.u32 %v2904_v21, %v2901_v12  ;;  %v1440_v26 = vperm.slane %v1435_v13, %v8519_v9  ;;  %v1571_v36 = vunpack.c.l.bf16 %v1431_v37 }
 0x13f   : > { %v962_v2 = vmul.f32 0.1, %v920_v61  ;;  %v7504_v6 = vpack.c.bf16 %v1612_v24, %v1611_v27  ;;  %v1025_v7 = vmax.f32 %v941_v53, %v983_v45  ;;  %v2953_v62 = vrot.slane %v2951_v51, 3 }
 0x140   : > { %v841_v28 = vpop.f32.mrf.mxu2  ;;  %v8869_v57 = vsel %vm2676_vm0, %v8803_v44, %v8861_v29  ;;  %v1591_v55 = vmul.f32 %v1549_v17, %v1507_v25  ;;  %v1572_v5 = vunpack.c.l.bf16 %v1440_v26 }
 0x141   : > { %v1004_v20 = vmax.f32 %v920_v61, %v962_v2  ;;  %7819 = vst [vmem:[#allocation3 + $0x90] sm:$0xff] %v7504_v6   ;;  %v897_v56 = vmul.f32 %v8831_v31, %v841_v28  ;;  %v1067_v38 = vpack.c.bf16 %v1025_v7, %v1025_v7  ;;  %4960 = vmatmul.bf16.gmra.mxu0 %v8869_v57 }
 0x142   : > { %v789_v52 = vpop.f32.mrf.mxu0  ;;  %v8859_v22 = vld [vmem:[#allocation3 + $0x34] sm:$0xff]   ;;  %v8874_v53 = vor.u32 %v2953_v62, %v2950_v19  ;;  %v1255_v19 = vpop.permute.xlu0 %1254 }
 0x143   : > { %v1046_v54 = vpack.c.bf16 %v1004_v20, %v1004_v20  ;;  %v942_v32 = vadd.f32 %v8842_v50, %v897_v56  ;;  %v876_v30 = vmul.f32 %v8831_v31, %v789_v52  ;;  %v2065_v34 = vshll.u32 %v8859_v22, 16 }
 0x144   : > { %v1529_v58 = vunpack.c.l.bf16 %v1067_v38  ;;  %v2069_v42 = vshrl.u32 %v8859_v22, 16  ;;  %v2955_v44 = vsel %vm2676_vm0, %v8820_v41, %v8874_v53  ;;  %v2063_v41 = vor.u32 %v2061_v15, %v8828_v10 }
 0x145   : > { %v1508_v33 = vunpack.c.l.bf16 %v1046_v54  ;;  %v984_v27 = vmul.f32 0.1, %v942_v32  ;;  %v921_v49 = vadd.f32 %v8842_v50, %v876_v30  ;;  %v3060_v45 = vrot.slane %v2065_v34, 3  ;;  %4737 = vmatmul.bf16.gmra.mxu2 %v2955_v44 }
 0x146   : > { %v8880_v2 = vrot.slane %v2065_v34, 1  ;;  %v2207_v20 = vrot.slane %v8859_v22, 1  ;;  %v1613_v28 = vmul.f32 %v1571_v36, %v1529_v58  ;;  %v1251_v52 = vperm.slane %v1246_v8, %v8519_v9 }
 0x147   : > { %v1592_v61 = vmul.f32 %v1550_v16, %v1508_v33  ;;  %v1026_v46 = vmax.f32 %v942_v32, %v984_v27  ;;  %v963_v24 = vmul.f32 0.1, %v921_v49  ;;  %v3059_v16 = vrot.slane %v2069_v42, 2  ;;  %v1444_v33 = vpop.permute.xlu1 %1443 }
 0x148   : > { %v844_v1 = vpop.f32.mrf.mxu2  ;;  %v2208_v15 = vsel %vm2195_vm2, %v2205_v43, %v2207_v20  ;;  %v2068_v10 = vsel %vm2016_vm1, %v2063_v41, %v8880_v2  ;;  %v1260_v25 = vperm.slane %v1255_v19, %v8519_v9  ;;  %v1449_v36 = vperm.slane %v1444_v33, %v8519_v9 }
 0x149   : > { %v7454_v0 = vpack.c.bf16 %v1592_v61, %v1591_v55  ;;  %v1068_v6 = vpack.c.bf16 %v1026_v46, %v1026_v46  ;;  %v898_v7 = vmul.f32 %v8831_v31, %v844_v1  ;;  %v1005_v17 = vmax.f32 %v921_v49, %v963_v24 }
 0x14a   : > { %v791_v12 = vpop.f32.mrf.mxu0  ;;  %v8891_v56 = vor.u32 %v3060_v45, %v3059_v16  ;;  %v2957_v62 = vshrl.u32 %v2208_v15, 16  ;;  %v2960_v26 = vshll.u32 %v2208_v15, 16  ;;  %v3006_v43 = vshrl.u32 %v2068_v10, 16 }
 0x14b   : > { %7809 = vst [vmem:[#allocation3 + $0x40] sm:$0xff] %v7454_v0   ;;  %v877_v18 = vmul.f32 %v8831_v31, %v791_v12  ;;  %v1530_v21 = vunpack.c.l.bf16 %v1068_v6  ;;  %v943_v37 = vadd.f32 %v8842_v50, %v898_v7  ;;  %v1047_v32 = vpack.c.bf16 %v1005_v17, %v1005_v17 }
 0x14c   : > { %v3062_v13 = vsel %vm2676_vm0, %v8834_v23, %v8891_v56  ;;  %v2959_v55 = vrot.slane %v2957_v62, 2  ;;  %v1551_v58 = vunpack.c.l.bf16 %v1251_v52  ;;  %v1552_v61 = vunpack.c.l.bf16 %v1260_v25 }
 0x14d   : > { %v922_v51 = vadd.f32 %v8842_v50, %v877_v18  ;;  %v1614_v38 = vmul.f32 %v1572_v5, %v1530_v21  ;;  %v985_v54 = vmul.f32 0.1, %v943_v37  ;;  %4633 = vmatmul.bf16.gmra.mxu1 %v3062_v13  ;;  %v2962_v23 = vrot.slane %v2960_v26, 3  ;;  %v1453_v5 = vpop.permute.xlu2 %1452 }
 0x14e   : > { %v1509_v45 = vunpack.c.l.bf16 %v1047_v32  ;;  %v3008_v12 = vrot.slane %v3006_v43, 2  ;;  %v3009_v16 = vshll.u32 %v2068_v10, 16  ;;  %v1458_v41 = vperm.slane %v1453_v5, %v8519_v9 }
 0x14f   : > { %v964_v30 = vmul.f32 0.1, %v922_v51  ;;  %v7509_v60 = vpack.c.bf16 %v1614_v38, %v1613_v28  ;;  %v1027_v34 = vmax.f32 %v943_v37, %v985_v54  ;;  %v8912_v7 = vor.u32 %v2962_v23, %v2959_v55 }
 0x150   : > { %v846_v49 = vpop.f32.mrf.mxu2  ;;  %v1573_v17 = vunpack.c.l.bf16 %v1449_v36  ;;  %v3011_v52 = vrot.slane %v3009_v16, 3  ;;  %v1574_v32 = vunpack.c.l.bf16 %v1458_v41 }
 0x151   : > { %v1006_v27 = vmax.f32 %v922_v51, %v964_v30  ;;  %7820 = vst [vmem:[#allocation3 + $0x98] sm:$0xff] %v7509_v60   ;;  %v899_v46 = vmul.f32 %v8831_v31, %v846_v49  ;;  %v1069_v0 = vpack.c.bf16 %v1027_v34, %v1027_v34  ;;  %v8919_v37 = vsel %vm2676_vm0, %v8861_v29, %v8912_v7  ;;  %v1273_v29 = vpop.permute.xlu1 %1272  ;;  %v1264_v49 = vpop.permute.xlu0 %1263 }
 0x152   : > { %v794_v24 = vpop.f32.mrf.mxu0  ;;  %v8908_v44 = vld [vmem:[#allocation3 + $0x3c] sm:$0xff]   ;;  %v1593_v51 = vmul.f32 %v1551_v58, %v1509_v45  ;;  %4965 = vmatmul.bf16.gmra.mxu0 %v8919_v37  ;;  %v8923_v54 = vor.u32 %v3011_v52, %v3008_v12  ;;  %v1269_v45 = vperm.slane %v1264_v49, %v8519_v9 }
 0x153   : > { %v1048_v1 = vpack.c.bf16 %v1006_v27, %v1006_v27  ;;  %v878_v8 = vmul.f32 %v8831_v31, %v794_v24  ;;  %v944_v6 = vadd.f32 %v8842_v50, %v899_v46  ;;  %v2073_v19 = vshll.u32 %v8908_v44, 16 }
 0x154   : > { %v1531_v15 = vunpack.c.l.bf16 %v1069_v0  ;;  %v2077_v13 = vshrl.u32 %v8908_v44, 16  ;;  %v3013_v60 = vsel %vm2676_vm0, %v8874_v53, %v8923_v54  ;;  %v1278_v27 = vperm.slane %v1273_v29, %v8519_v9 }
 0x155   : > { %v1510_v18 = vunpack.c.l.bf16 %v1048_v1  ;;  %v923_v28 = vadd.f32 %v8842_v50, %v878_v8  ;;  %v986_v21 = vmul.f32 0.1, %v944_v6  ;;  %v3118_v36 = vrot.slane %v2073_v19, 3  ;;  %4742 = vmatmul.bf16.gmra.mxu2 %v3013_v60 }
 0x156   : > { %v1615_v55 = vmul.f32 %v1573_v17, %v1531_v15  ;;  %v3117_v53 = vrot.slane %v2077_v13, 2  ;;  %v2209_v24 = vrot.slane %v8908_v44, 1  ;;  %v2071_v0 = vor.u32 %v2069_v42, %v8880_v2 }
 0x157   : > { %v1594_v25 = vmul.f32 %v1552_v61, %v1510_v18  ;;  %v965_v10 = vmul.f32 0.1, %v923_v28  ;;  %v1028_v38 = vmax.f32 %v944_v6, %v986_v21  ;;  %v8932_v61 = vrot.slane %v2073_v19, 1 }
 0x158   : > { %v849_v26 = vpop.f32.mrf.mxu2  ;;  %v8943_v12 = vor.u32 %v3118_v36, %v3117_v53  ;;  %v2210_v16 = vsel %vm2195_vm2, %v2207_v20, %v2209_v24  ;;  %v1554_v15 = vunpack.c.l.bf16 %v1278_v27 }
 0x159   : > { %v7459_v30 = vpack.c.bf16 %v1594_v25, %v1593_v51  ;;  %v1007_v62 = vmax.f32 %v923_v28, %v965_v10  ;;  %v1070_v33 = vpack.c.bf16 %v1028_v38, %v1028_v38  ;;  %v900_v34 = vmul.f32 %v8831_v31, %v849_v26 }
 0x15a   : > { %v796_v43 = vpop.f32.mrf.mxu0  ;;  %v3015_v17 = vshrl.u32 %v2210_v16, 16  ;;  %v3018_v18 = vshll.u32 %v2210_v16, 16  ;;  %v2076_v28 = vsel %vm2016_vm1, %v2071_v0, %v8932_v61  ;;  %v3120_v21 = vsel %vm2676_vm0, %v8891_v56, %v8943_v12 }
 0x15b   : > { %7810 = vst [vmem:[#allocation3 + $0x48] sm:$0xff] %v7459_v30   ;;  %v879_v58 = vmul.f32 %v8831_v31, %v796_v43  ;;  %v1532_v46 = vunpack.c.l.bf16 %v1070_v33  ;;  %v945_v23 = vadd.f32 %v8842_v50, %v900_v34  ;;  %v1049_v1 = vpack.c.bf16 %v1007_v62, %v1007_v62  ;;  %v1471_v43 = vpop.permute.xlu0 %1470 }
 0x15c   : > { %v3017_v51 = vrot.slane %v3015_v17, 2  ;;  %v3020_v20 = vrot.slane %v3018_v18, 3  ;;  %v3064_v10 = vshrl.u32 %v2076_v28, 16  ;;  %v1553_v30 = vunpack.c.l.bf16 %v1269_v45 }
 0x15d   : > { %v924_v8 = vadd.f32 %v8842_v50, %v879_v58  ;;  %v1616_v5 = vmul.f32 %v1574_v32, %v1532_v46  ;;  %v987_v6 = vmul.f32 0.1, %v945_v23  ;;  %4638 = vmatmul.bf16.gmra.mxu1 %v3120_v21  ;;  %v1462_v32 = vpop.permute.xlu2 %1461  ;;  %v1511_v62 = vunpack.c.l.bf16 %v1049_v1 }
 0x15e   : > { %v1467_v56 = vperm.slane %v1462_v32, %v8519_v9  ;;  %v8961_v34 = vor.u32 %v3020_v20, %v3017_v51  ;;  %v3066_v49 = vrot.slane %v3064_v10, 2  ;;  %v1476_v58 = vperm.slane %v1471_v43, %v8519_v9 }
 0x15f   : > { %v966_v41 = vmul.f32 0.1, %v924_v8  ;;  %v7514_v42 = vpack.c.bf16 %v1616_v5, %v1615_v55  ;;  %v1029_v2 = vmax.f32 %v945_v23, %v987_v6  ;;  %v3067_v55 = vshll.u32 %v2076_v28, 16 }
 0x160   : > { %v851_v19 = vpop.f32.mrf.mxu2  ;;  %v8968_v23 = vsel %vm2676_vm0, %v8912_v7, %v8961_v34  ;;  %v1595_v45 = vmul.f32 %v1553_v30, %v1511_v62  ;;  %v1575_v5 = vunpack.c.l.bf16 %v1467_v56  ;;  %v1287_v30 = vperm.slane %v8486_v48, %v8519_v9 }
 0x161   : > { %v1008_v52 = vmax.f32 %v924_v8, %v966_v41  ;;  %7821 = vst [vmem:[#allocation3 + $0xa0] sm:$0xff] %v7514_v42   ;;  %v901_v22 = vmul.f32 %v8831_v31, %v851_v19  ;;  %v1071_v33 = vpack.c.bf16 %v1029_v2, %v1029_v2  ;;  %v3069_v8 = vrot.slane %v3067_v55, 3 }
 0x162   : > { %v799_v25 = vpop.f32.mrf.mxu0  ;;  %v8956_v38 = vld [vmem:[#allocation3 + $0x44] sm:$0xff]   ;;  %4970 = vmatmul.bf16.gmra.mxu0 %v8968_v23  ;;  %v1576_v42 = vunpack.c.l.bf16 %v1476_v58  ;;  %v2079_v62 = vor.u32 %v2077_v13, %v8932_v61 }
 0x163   : > { %v1050_v26 = vpack.c.bf16 %v1008_v52, %v1008_v52  ;;  %v880_v29 = vmul.f32 %v8831_v31, %v799_v25  ;;  %v946_v60 = vadd.f32 %v8842_v50, %v901_v22  ;;  %v2081_v53 = vshll.u32 %v8956_v38, 16 }
 0x164   : > { %v1533_v6 = vunpack.c.l.bf16 %v1071_v33  ;;  %v2085_v41 = vshrl.u32 %v8956_v38, 16  ;;  %v8973_v18 = vor.u32 %v3069_v8, %v3066_v49 }
 0x165   : > { %v1512_v36 = vunpack.c.l.bf16 %v1050_v26  ;;  %v925_v27 = vadd.f32 %v8842_v50, %v880_v29  ;;  %v988_v46 = vmul.f32 0.1, %v946_v60  ;;  %v3176_v52 = vrot.slane %v2081_v53, 3 }
 0x166   : > { %v3071_v51 = vsel %vm2676_vm0, %v8923_v54, %v8973_v18  ;;  %v8980_v22 = vrot.slane %v2081_v53, 1  ;;  %v1617_v20 = vmul.f32 %v1575_v5, %v1533_v6  ;;  %v3175_v32 = vrot.slane %v2085_v41, 2  ;;  %v7387_v53 = vld [vmem:[%s8244_s24 + $0x138] sm:$0xff]  ;;  %v1480_v6 = vpop.permute.xlu1 %1479 }
 0x167   : > { %v1596_v0 = vmul.f32 %v1554_v15, %v1512_v36  ;;  %v967_v1 = vmul.f32 0.1, %v925_v27  ;;  %v1030_v16 = vmax.f32 %v946_v60, %v988_v46  ;;  %4747 = vmatmul.bf16.gmra.mxu2 %v3071_v51  ;;  %v2211_v26 = vrot.slane %v8956_v38, 1  ;;  %5056 = vmatpush.bf16.msrb.mxu1 %v7387_v53 }
 0x168   : > { %v854_v28 = vpop.f32.mrf.mxu2  ;;  %v1296_v29 = vperm.slane %v8516_v4, %v8519_v9  ;;  %v8994_v60 = vor.u32 %v3176_v52, %v3175_v32  ;;  %v2084_v13 = vsel %vm2016_vm1, %v2079_v62, %v8980_v22  ;;  %v2087_v53 = vor.u32 %v2085_v41, %v8980_v22 }
 0x169   : > { %v7464_v17 = vpack.c.bf16 %v1596_v0, %v1595_v45  ;;  %v1072_v7 = vpack.c.bf16 %v1030_v16, %v1030_v16  ;;  %v902_v2 = vmul.f32 %v8831_v31, %v854_v28  ;;  %v1009_v19 = vmax.f32 %v925_v27, %v967_v1 }
 0x16a   : > { %v801_v21 = vpop.f32.mrf.mxu0  ;;  %v2212_v48 = vsel %vm2195_vm2, %v2209_v24, %v2211_v26  ;;  %v3178_v4 = vsel %vm2676_vm0, %v8943_v12, %v8994_v60  ;;  %v1555_v45 = vunpack.c.l.bf16 %v1287_v30  ;;  %v3122_v1 = vshrl.u32 %v2084_v13, 16 }
 0x16b   : > { %7811 = vst [vmem:[#allocation3 + $0x50] sm:$0xff] %v7464_v17   ;;  %v881_v15 = vmul.f32 %v8831_v31, %v801_v21  ;;  %v1534_v25 = vunpack.c.l.bf16 %v1072_v7  ;;  %v947_v10 = vadd.f32 %v8842_v50, %v902_v2  ;;  %v1051_v43 = vpack.c.bf16 %v1009_v19, %v1009_v19  ;;  %v1489_v21 = vpop.permute.xlu2 %1488 }
 0x16c   : > { %v3073_v49 = vshrl.u32 %v2212_v48, 16  ;;  %v3076_v46 = vshll.u32 %v2212_v48, 16  ;;  %v1556_v5 = vunpack.c.l.bf16 %v1296_v29  ;;  %v1485_v28 = vperm.slane %v1480_v6, %v8519_v9 }
 0x16d   : > { %v926_v54 = vadd.f32 %v8842_v50, %v881_v15  ;;  %v1618_v56 = vmul.f32 %v1576_v42, %v1534_v25  ;;  %v989_v33 = vmul.f32 0.1, %v947_v10  ;;  %4643 = vmatmul.bf16.gmra.mxu1 %v3178_v4  ;;  %v1513_v16 = vunpack.c.l.bf16 %v1051_v43 }
 0x16e   : > { %v3075_v24 = vrot.slane %v3073_v49, 2  ;;  %v3078_v12 = vrot.slane %v3076_v46, 3  ;;  %v3124_v51 = vrot.slane %v3122_v1, 2  ;;  %v3125_v15 = vshll.u32 %v2084_v13, 16 }
 0x16f   : > { %v968_v36 = vmul.f32 0.1, %v926_v54  ;;  %v7519_v61 = vpack.c.bf16 %v1618_v56, %v1617_v20  ;;  %v1031_v27 = vmax.f32 %v947_v10, %v989_v33  ;;  %v1494_v20 = vperm.slane %v1489_v21, %v8519_v9 }
 0x170   : > { %v856_v58 = vpop.f32.mrf.mxu2  ;;  %v9013_v19 = vor.u32 %v3078_v12, %v3075_v24  ;;  %v1597_v30 = vmul.f32 %v1555_v45, %v1513_v16  ;;  %v3127_v29 = vrot.slane %v3125_v15, 3  ;;  %v1577_v56 = vunpack.c.l.bf16 %v1485_v28  ;;  %v7385_v28 = vld [vmem:[%s8244_s24 + $0x128] sm:$0xff] }
 0x171   : > { %v1010_v55 = vmax.f32 %v926_v54, %v968_v36  ;;  %7822 = vst [vmem:[#allocation3 + $0xa8] sm:$0xff] %v7519_v61   ;;  %v903_v44 = vmul.f32 %v8831_v31, %v856_v58  ;;  %v1073_v42 = vpack.c.bf16 %v1031_v27, %v1031_v27  ;;  %v1578_v49 = vunpack.c.l.bf16 %v1494_v20 }
 0x172   : > { %v804_v0 = vpop.f32.mrf.mxu0  ;;  %v9008_v8 = vld [vmem:[#allocation3 + $0x4c] sm:$0xff]   ;;  %v9021_v54 = vsel %vm2676_vm0, %v8961_v34, %v9013_v19  ;;  %v9027_v27 = vor.u32 %v3127_v29, %v3124_v51  ;;  %v1305_v6 = vperm.slane %v8484_v47, %v8519_v9  ;;  %v1314_v15 = vperm.slane %v8514_v3, %v8519_v9 }
 0x173   : > { %v1052_v17 = vpack.c.bf16 %v1010_v55, %v1010_v55  ;;  %v948_v7 = vadd.f32 %v8842_v50, %v903_v44  ;;  %v882_v2 = vmul.f32 %v8831_v31, %v804_v0  ;;  %v2089_v32 = vshll.u32 %v9008_v8, 16  ;;  %4975 = vmatmul.bf16.gmra.mxu0 %v9021_v54  ;;  %v7371_v51 = vld [vmem:[%s8244_s24 + $0xb8] sm:$0xff] }
 0x174   : > { %v9024_v36 = vpop.f32.mrf.mxu1  ;;  %v2093_v48 = vshrl.u32 %v9008_v8, 16  ;;  %v1535_v13 = vunpack.c.l.bf16 %v1073_v42  ;;  %v3129_v45 = vsel %vm2676_vm0, %v8973_v18, %v9027_v27  ;;  %v2213_v1 = vrot.slane %v9008_v8, 1  ;;  %4828 = vmatpush.bf16.msrb.mxu3 %v7371_v51  ;;  %v7382_v8 = vld [vmem:[%s8244_s24 + $0x110] sm:$0xff]  ;;  %v8081_v51 = vld [vmem:[#allocation3 + $0x18] sm:$0xff] }
 0x175   : > { %v1514_v52 = vunpack.c.l.bf16 %v1052_v17  ;;  %v990_v25 = vmul.f32 0.1, %v948_v7  ;;  %v927_v10 = vadd.f32 %v8842_v50, %v882_v2  ;;  %v9029_v4 = vrot.slane %v2089_v32, 1 }
 0x176   : > { %v3233_v46 = vrot.slane %v2093_v48, 2  ;;  %v3234_v0 = vrot.slane %v2089_v32, 3  ;;  %v1619_v16 = vmul.f32 %v1577_v56, %v1535_v13  ;;  %v1558_v13 = vunpack.c.l.bf16 %v1314_v15 }
 0x177   : > { %v1598_v62 = vmul.f32 %v1556_v5, %v1514_v52  ;;  %v1032_v33 = vmax.f32 %v948_v7, %v990_v25  ;;  %v969_v43 = vmul.f32 0.1, %v927_v10  ;;  %4752 = vmatmul.bf16.gmra.mxu2 %v3129_v45  ;;  %v7386_v5 = vld [vmem:[%s8244_s24 + $0x130] sm:$0xff]  ;;  %v2092_v22 = vsel %vm2016_vm1, %v2087_v53, %v9029_v4  ;;  %v7383_v53 = vld [vmem:[%s8244_s24 + $0x118] sm:$0xff] }
 0x178   : > { %v3235_v12 = vor.u32 %v3234_v0, %v3233_v46  ;;  %5057 = vmatpush.bf16.msrb.mxu1 %v7386_v5  ;;  %v3180_v47 = vshrl.u32 %v2092_v22, 16  ;;  %v3183_v52 = vshll.u32 %v2092_v22, 16  ;;  %v2095_v5 = vor.u32 %v2093_v48, %v9029_v4 }
 0x179   : > { %v7469_v61 = vpack.c.bf16 %v1598_v62, %v1597_v30  ;;  %v1074_v34 = vpack.c.bf16 %v1032_v33, %v1032_v33  ;;  %v1011_v55 = vmax.f32 %v927_v10, %v969_v43  ;;  %v7384_v62 = vld [vmem:[%s8244_s24 + $0x120] sm:$0xff]  ;;  %v2285_v15 = vshrl.u32 %v8081_v51, 16 }
 0x17a   : > { %v806_v58 = vpop.f32.mrf.mxu0  ;;  %v3182_v10 = vrot.slane %v3180_v47, 2  ;;  %v3185_v32 = vrot.slane %v3183_v52, 3  ;;  %v7380_v52 = vld [vmem:[%s8244_s24 + $0x100] sm:$0xff] }
 0x17b   : > { %7812 = vst [vmem:[#allocation3 + $0x58] sm:$0xff] %v7469_v61   ;;  %v883_v44 = vmul.f32 %v8831_v31, %v806_v58  ;;  %v1536_v24 = vunpack.c.l.bf16 %v1074_v34  ;;  %v1053_v17 = vpack.c.bf16 %v1011_v55, %v1011_v55  ;;  %v2214_v31 = vsel %vm2195_vm2, %v2211_v26, %v2213_v1 }
 0x17c   : > { %v3131_v7 = vshrl.u32 %v2214_v31, 16  ;;  %v3134_v2 = vshll.u32 %v2214_v31, 16  ;;  %v9056_v25 = vpop.f32.mrf.mxu1  ;;  %5058 = vmatpush.bf16.msrb.mxu1 %v7385_v28  ;;  %v7381_v28 = vld [vmem:[%s8244_s24 + $0x108] sm:$0xff] }
 0x17d   : > { %v928_v41 = vadd.f32 %v8842_v50, %v883_v44  ;;  %v1620_v18 = vmul.f32 %v1578_v49, %v1536_v24  ;;  %v3236_v50 = vsel %vm2676_vm0, %v8994_v60, %v3235_v12  ;;  %v1557_v60 = vunpack.c.l.bf16 %v1305_v6 }
 0x17e   : > { %4648 = vmatmul.bf16.gmra.mxu1 %v3236_v50  ;;  %v3133_v38 = vrot.slane %v3131_v7, 2  ;;  %v3136_v26 = vrot.slane %v3134_v2, 3  ;;  %v1515_v29 = vunpack.c.l.bf16 %v1053_v17  ;;  %v9063_v49 = vor.u32 %v3185_v32, %v3182_v10 }
 0x17f   : > { %v970_v42 = vmul.f32 0.1, %v928_v41  ;;  %v7524_v21 = vpack.c.bf16 %v1620_v18, %v1619_v16 }
 0x180   : > { %v3137_v33 = vor.u32 %v3136_v26, %v3133_v38  ;;  %5059 = vmatpush.bf16.msrb.mxu1 %v7384_v62  ;;  %v1599_v45 = vmul.f32 %v1557_v60, %v1515_v29  ;;  %v3187_v6 = vsel %vm2676_vm0, %v9027_v27, %v9063_v49  ;;  %v7370_v38 = vld [vmem:[%s8244_s24 + $0xb0] sm:$0xff] }
 0x181   : > { %v1012_v20 = vmax.f32 %v928_v41, %v970_v42  ;;  %7823 = vst [vmem:[#allocation3 + $0xb0] sm:$0xff] %v7524_v21   ;;  %4829 = vmatpush.bf16.msrb.mxu3 %v7370_v38  ;;  %v9150_v38 = vld [vmem:[#allocation3 + $0x20] sm:$0xff] }
 0x182   : > { %v9058_v30 = vld [vmem:[#allocation3 + $0x54] sm:$0xff]   ;;  %v9068_v55 = vsel %vm2676_vm0, %v9013_v19, %v3137_v33 }
 0x183   : > { %v1054_v56 = vpack.c.bf16 %v1012_v20, %v1012_v20  ;;  %v2097_v3 = vshll.u32 %v9058_v30, 16  ;;  %v2101_v43 = vshrl.u32 %v9058_v30, 16  ;;  %v2215_v34 = vrot.slane %v9058_v30, 1  ;;  %4980 = vmatmul.bf16.gmra.mxu0 %v9068_v55 }
 0x184   : > { %5060 = vmatpush.bf16.msrb.mxu1 %v7383_v53  ;;  %v2288_v20 = vshll.u32 %v8081_v51, 16 }
 0x185   : > { %v1516_v61 = vunpack.c.l.bf16 %v1054_v56  ;;  %v2099_v58 = vrot.slane %v2097_v3, 1  ;;  %v3291_v46 = vrot.slane %v2101_v43, 2  ;;  %v3292_v24 = vrot.slane %v2097_v3, 3  ;;  %v8082_v56 = vld [vmem:[#allocation3 + $0x10] sm:$0xff] }
 0x186   : > { %v2216_v0 = vsel %vm2195_vm2, %v2213_v1, %v2215_v34  ;;  %v2277_v3 = vshrl.u32 %v8082_v56, 16  ;;  %v2280_v53 = vshll.u32 %v8082_v56, 16  ;;  %v2297_v56 = vshll.u32 %v9150_v38, 16 }
 0x187   : > { %v1600_v44 = vmul.f32 %v1558_v13, %v1516_v61  ;;  %v3189_v16 = vshrl.u32 %v2216_v0, 16  ;;  %v3192_v41 = vshll.u32 %v2216_v0, 16  ;;  %v9083_v18 = vor.u32 %v3292_v24, %v3291_v46  ;;  %4757 = vmatmul.bf16.gmra.mxu2 %v3187_v6 }
 0x188   : > { %v9081_v22 = vpop.f32.mrf.mxu1  ;;  %v2100_v1 = vsel %vm2016_vm1, %v2095_v5, %v2099_v58  ;;  %5061 = vmatpush.bf16.msrb.mxu1 %v7382_v8  ;;  %v2287_v0 = vrot.slane %v2285_v15, 5  ;;  %v2103_v5 = vor.u32 %v2101_v43, %v2099_v58  ;;  %v2282_v58 = vrot.slane %v2280_v53, 6 }
 0x189   : > { %v7474_v19 = vpack.c.bf16 %v1600_v44, %v1599_v45  ;;  %v3191_v48 = vrot.slane %v3189_v16, 2  ;;  %v3194_v4 = vrot.slane %v3192_v41, 3  ;;  %v3238_v17 = vshrl.u32 %v2100_v1, 16 }
 0x18a   : > { %v3241_v31 = vshll.u32 %v2100_v1, 16  ;;  %v3294_v27 = vsel %vm2676_vm0, %v3235_v12, %v9083_v18  ;;  %v2290_v16 = vrot.slane %v2288_v20, 6 }
 0x18b   : > { %7813 = vst [vmem:[#allocation3 + $0x60] sm:$0xff] %v7474_v19   ;;  %v9090_v42 = vor.u32 %v3194_v4, %v3191_v48  ;;  %v3240_v7 = vrot.slane %v3238_v17, 2  ;;  %v9139_v4 = vld [vmem:[#allocation3 + $0x6c] sm:$0xff]  }
 0x18c   : > { %v3243_v2 = vrot.slane %v3241_v31, 3  ;;  %5062 = vmatpush.bf16.msrb.mxu1 %v7381_v28  ;;  %v9141_v17 = vor.u32 %v2290_v16, %v2287_v0  ;;  %v2121_v20 = vshll.u32 %v9139_v4, 16  ;;  %v2299_v16 = vrot.slane %v2297_v56, 6 }
 0x18d   : > { %v9106_v62 = vsel %vm2676_vm0, %v3137_v33, %v9090_v42 }
 0x18e   : > { %4653 = vmatmul.bf16.gmra.mxu1 %v3294_v27  ;;  %v9108_v60 = vor.u32 %v3243_v2, %v3240_v7 }
 0x190   : > { %v9092_v47 = vpop.f32.mrf.mxu1  ;;  %5063 = vmatpush.bf16.msrb.mxu1 %v7380_v52  ;;  %v3245_v41 = vsel %vm2676_vm0, %v9063_v49, %v9108_v60  ;;  %v11545_v52 = vshrl.u32 %v9139_v4, 16 }
 0x192   : > { %v9094_v21 = vld [vmem:[#allocation3 + $0x5c] sm:$0xff]   ;;  %v9096_v50 = vld [vmem:[#allocation3 + $0x64] sm:$0xff]   ;;  %v4723_v45 = vpop.f32.mrf.mxu2 }
 0x193   : > { %v2105_v12 = vshll.u32 %v9094_v21, 16  ;;  %v2109_v26 = vshrl.u32 %v9094_v21, 16  ;;  %v2113_v10 = vshll.u32 %v9096_v50, 16  ;;  %v2117_v32 = vshrl.u32 %v9096_v50, 16  ;;  %4985 = vmatmul.bf16.gmra.mxu0 %v9106_v62 }
 0x194   : > { %v2217_v29 = vrot.slane %v9094_v21, 1  ;;  %v9126_v19 = vadd.f32 %v4723_v45, %v9024_v36  ;;  %v2279_v36 = vrot.slane %v2277_v3, 5  ;;  %v2219_v45 = vrot.slane %v9096_v50, 1 }
 0x195   : > { %v9111_v13 = vrot.slane %v2105_v12, 1  ;;  %v3349_v61 = vrot.slane %v2109_v26, 2  ;;  %v3350_v46 = vrot.slane %v2105_v12, 3  ;;  %v3407_v33 = vrot.slane %v2117_v32, 2 }
 0x196   : > { %v3408_v44 = vrot.slane %v2113_v10, 3  ;;  %v2218_v24 = vsel %vm2195_vm2, %v2215_v34, %v2217_v29  ;;  %v2283_v51 = vor.u32 %v2282_v58, %v2279_v36  ;;  %v2294_v12 = vshrl.u32 %v9150_v38, 16 }
 0x197   : > { %v3351_v6 = vor.u32 %v3350_v46, %v3349_v61  ;;  %v3247_v8 = vshrl.u32 %v2218_v24, 16  ;;  %v3250_v48 = vshll.u32 %v2218_v24, 16  ;;  %v2108_v30 = vsel %vm2016_vm1, %v2103_v5, %v9111_v13  ;;  %4762 = vmatmul.bf16.gmra.mxu2 %v3245_v41  ;;  %v1903_v24 = vld [vmem:[#allocation3 + $0x18] sm:$0xe] }
 0x198   : > { %v9131_v1 = vor.u32 %v3408_v44, %v3407_v33  ;;  %v9133_v34 = vpop.f32.mrf.mxu1  ;;  %v3296_v27 = vshrl.u32 %v2108_v30, 16  ;;  %v3299_v28 = vshll.u32 %v2108_v30, 16  ;;  %v2292_v53 = vsel %vm2275_vm3, %v2283_v51, %v9141_v17 }
 0x199   : > { %v3249_v49 = vrot.slane %v3247_v8, 2  ;;  %v3252_v31 = vrot.slane %v3250_v48, 3  ;;  %v3352_v7 = vsel %vm2676_vm0, %v9083_v18, %v3351_v6  ;;  %v3465_v33 = vrot.slane %v11545_v52, 2 }
 0x19a   : > { %v3410_v43 = vsel %vm2676_vm0, %v3351_v6, %v9131_v1  ;;  %v4725_v2 = vpop.f32.mrf.mxu2  ;;  %v3298_v61 = vrot.slane %v3296_v27, 2  ;;  %v3301_v46 = vrot.slane %v3299_v28, 3  ;;  %v3466_v44 = vrot.slane %v2121_v20, 3 }
 0x19b   : > { %4663 = vmatmul.bf16.vlgmr.msra.gmra.mxu3 %v3410_v43  ;;  %v9147_v15 = vadd.f32 %v4725_v2, %v9056_v25  ;;  %v9156_v18 = vor.u32 %v3252_v31, %v3249_v49  ;;  %v2749_v0 = vshrl.u32 %v2292_v53, 16  ;;  %v2752_v5 = vshll.u32 %v2292_v53, 16 }
 0x19c   : > { %v9154_v3 = vpop.f32.mrf.mxu0  ;;  %v2296_v6 = vrot.slane %v2294_v12, 5  ;;  %v9176_v8 = vor.u32 %v3301_v46, %v3298_v61  ;;  %v2741_v48 = vshrl.u32 %v2283_v51, 16  ;;  %v2744_v30 = vshll.u32 %v2283_v51, 16 }
 0x19d   : > { %11632 = vst [vmem:[#allocation7_spill] sm:$0xff] %v9154_v3  ;;  %v9174_v41 = vsel %vm2676_vm0, %v9090_v42, %v9156_v18  ;;  %v2220_v43 = vsel %vm2195_vm2, %v2217_v29, %v2219_v45  ;;  %v2524_v36 = vunpack.c.l.b16 %v1903_v24  ;;  %v2111_v58 = vor.u32 %v2109_v26, %v9111_v13 }
 0x19e   : > { %4658 = vmatmul.bf16.gmra.mxu1 %v3352_v7  ;;  %11633 = vst [vmem:[#allocation8_spill] sm:$0xff] %v9174_v41  ;;  %v9187_v49 = vor.u32 %v3466_v44, %v3465_v33  ;;  %v2751_v42 = vrot.slane %v2749_v0, 2  ;;  %v2754_v31 = vrot.slane %v2752_v5, 3  ;;  %v9189_v27 = vor.u32 %v2299_v16, %v2296_v6  ;;  %v9209_v33 = vld [vmem:[#allocation3 + $0x74] sm:$0xff]   ;;  %v7369_v44 = vld [vmem:[%s8244_s24 + $0xa8] sm:$0xff] }
 0x19f   : > { %v2115_v28 = vrot.slane %v2113_v10, 1  ;;  %v3303_v29 = vsel %vm2676_vm0, %v9108_v60, %v9176_v8  ;;  %v3305_v21 = vshrl.u32 %v2220_v43, 16  ;;  %v3308_v26 = vshll.u32 %v2220_v43, 16  ;;  %4830 = vmatpush.bf16.msrb.mxu3 %v7369_v44 }
 0x1a0   : > { %v9160_v25 = vpop.f32.mrf.mxu1  ;;  %v2743_v51 = vrot.slane %v2741_v48, 2  ;;  %v2746_v61 = vrot.slane %v2744_v30, 3  ;;  %v3468_v10 = vsel %vm2676_vm0, %v9131_v1, %v9187_v49  ;;  %v9207_v60 = vor.u32 %v2754_v31, %v2751_v42  ;;  %v9219_v48 = vld [vmem:[#allocation3 + $0x28] sm:$0xff]  }
 0x1a1   : > { %v2116_v53 = vsel %vm2016_vm1, %v2111_v58, %v2115_v28  ;;  %v9214_v24 = vpack.c.b16 %v7537_v14, %v2524_v36  ;;  %v3307_v0 = vrot.slane %v3305_v21, 2  ;;  %v2301_v5 = vsel %vm2275_vm3, %v9141_v17, %v9189_v27 }
 0x1a2   : > { %v2747_v1 = vor.u32 %v2746_v61, %v2743_v51  ;;  %v3354_v6 = vshrl.u32 %v2116_v53, 16  ;;  %v3357_v16 = vshll.u32 %v2116_v53, 16  ;;  %v11542_v30 = vshrl.u32 %v9209_v33, 16 }
 0x1a3   : > { %4990 = vmatmul.bf16.gmra.mxu0 %v9174_v41  ;;  %11636 = vst [vmem:[#allocation11_spill] sm:$0xff] %v9214_v24  ;;  %v11543_v35 = vshll.u32 %v9209_v33, 16  ;;  %v2849_v14 = vshrl.u32 %v2301_v5, 16  ;;  %v2852_v36 = vshll.u32 %v2301_v5, 16  ;;  %v2303_v17 = vshrl.u32 %v9219_v48, 16 }
 0x1a4   : > { %v9196_v7 = vpop.f32.mrf.mxu0  ;;  %v2756_v43 = vsel %vm2676_vm0, %v2747_v1, %v9207_v60  ;;  %v2306_v31 = vshll.u32 %v9219_v48, 16  ;;  %v3359_v51 = vrot.slane %v3357_v16, 3  ;;  %v2531_v61 = vshll.u32 %v9214_v24, 16 }
 0x1a5   : > { %11634 = vst [vmem:[#allocation9_spill] sm:$0xff] %v9196_v7  ;;  %v3523_v44 = vrot.slane %v11542_v30, 2  ;;  %v11544_v5 = vrot.slane %v9139_v4, 1  ;;  %v2119_v16 = vor.u32 %v2117_v32, %v2115_v28 }
 0x1a6   : > { %v4728_v13 = vpop.f32.mrf.mxu2  ;;  %v2533_v1 = vrot.slane %v2531_v61, 7  ;;  %v2854_v61 = vrot.slane %v2852_v36, 3 }
 0x1a7   : > { %v9201_v46 = vadd.f32 %v4728_v13, %v9081_v22  ;;  %4767 = vmatmul.bf16.gmra.mxu2 %v3303_v29  ;;  %v3310_v22 = vrot.slane %v3308_v26, 3  ;;  %v2528_v29 = vshrl.u32 %v9214_v24, 16  ;;  %v3356_v13 = vrot.slane %v3354_v6, 2 }
 0x1a8   : > { %v9198_v2 = vpop.f32.mrf.mxu1  ;;  %v2536_v6 = vrot.slane %v2297_v56, 7 }
 0x1a9   : > { %11635 = vst [vmem:[#allocation10_spill] sm:$0xff] %v9201_v46  ;;  %v9227_v42 = vor.u32 %v3310_v22, %v3307_v0  ;;  %v3524_v0 = vrot.slane %v11543_v35, 3  ;;  %v2530_v22 = vrot.slane %v2528_v29, 6  ;;  %v2222_v29 = vsel %vm2195_vm2, %v2219_v45, %v11544_v5  ;;  %v9292_v5 = vld [vmem:[#allocation3 + $0x7c] sm:$0xff]  }
 0x1aa   : > { %v9263_v56 = vor.u32 %v3359_v51, %v3356_v13  ;;  %v3366_v13 = vshll.u32 %v2222_v29, 16  ;;  %v11643_v48 = vshrl.u32 %v9292_v5, 16 }
 0x1ab   : > { %4668 = vmatmul.bf16.gmra.mxu3 %v3468_v10  ;;  %v2535_v10 = vrot.slane %v2294_v12, 6  ;;  %v2308_v12 = vrot.slane %v2306_v31, 6  ;;  %v9261_v32 = vsel %vm2676_vm0, %v9156_v18, %v9227_v42  ;;  %v9265_v28 = vor.u32 %v3524_v0, %v3523_v44 }
 0x1ac   : > { %v9225_v58 = vpop.f32.mrf.mxu0  ;;  %11639 = vst [vmem:[#allocation14_spill] sm:$0xff] %v9261_v32 }
 0x1ad   : > { %11637 = vst [vmem:[#allocation12_spill] sm:$0xff] %v9225_v58  ;;  %v2537_v38 = vor.u32 %v2536_v6, %v2535_v10  ;;  %v3363_v10 = vshrl.u32 %v2222_v29, 16  ;;  %v3526_v0 = vsel %vm2676_vm0, %v9187_v49, %v9265_v28  ;;  %v11656_v58 = vshll.u32 %v9292_v5, 16 }
 0x1ae   : > { %5064 = vmatmul.bf16.vlgmr.msrb.gmra.mxu1 %v2756_v43  ;;  %v4730_v21 = vpop.f32.mrf.mxu2  ;;  %v2851_v43 = vrot.slane %v2849_v14, 2  ;;  %v9269_v14 = vrot.slane %v2121_v20, 1  ;;  %v3361_v20 = vsel %vm2676_vm0, %v9176_v8, %v9263_v56 }
 0x1af   : > { %v9238_v53 = vadd.f32 %v4730_v21, %v9092_v47  ;;  %v2305_v47 = vrot.slane %v2303_v17, 5  ;;  %v2534_v21 = vor.u32 %v2533_v1, %v2530_v22  ;;  %v3365_v49 = vrot.slane %v3363_v10, 2 }
 0x1b0   : > { %v9232_v26 = vpop.f32.mrf.mxu1  ;;  %v2124_v36 = vsel %vm2016_vm1, %v2119_v16, %v9269_v14  ;;  %v9287_v6 = vor.u32 %v2854_v61, %v2851_v43  ;;  %v3368_v43 = vrot.slane %v3366_v13, 3  ;;  %v11546_v13 = vshll.u32 %v9292_v5, 16 }
 0x1b1   : > { %11638 = vst [vmem:[#allocation13_spill] sm:$0xff] %v9238_v53  ;;  %v2538_v50 = vsel %vm2526_vm4, %v2534_v21, %v2537_v38  ;;  %v9275_v22 = vor.u32 %v2308_v12, %v2305_v47  ;;  %v2792_v18 = vshrl.u32 %v2534_v21, 16  ;;  %v2795_v51 = vshll.u32 %v2534_v21, 16 }
 0x1b2   : > { %v2800_v44 = vshrl.u32 %v2538_v50, 16  ;;  %v2803_v16 = vshll.u32 %v2538_v50, 16  ;;  %v3412_v35 = vshrl.u32 %v2124_v36, 16  ;;  %v3415_v61 = vshll.u32 %v2124_v36, 16 }
 0x1b3   : > { %4995 = vmatmul.bf16.gmra.mxu0 %v9261_v32  ;;  %v2794_v12 = vrot.slane %v2792_v18, 2  ;;  %v2797_v29 = vrot.slane %v2795_v51, 3  ;;  %v2310_v8 = vsel %vm2275_vm3, %v9189_v27, %v9275_v22  ;;  %v2856_v18 = vsel %vm2676_vm0, %v9207_v60, %v9287_v6  ;;  %v7368_v51 = vld [vmem:[%s8244_s24 + $0xa0] sm:$0xff] }
 0x1b4   : > { %v9273_v45 = vpop.f32.mrf.mxu0  ;;  %v2802_v30 = vrot.slane %v2800_v44, 2  ;;  %v2540_v27 = vrot.slane %v2306_v31, 7  ;;  %v3414_v10 = vrot.slane %v3412_v35, 2  ;;  %v2908_v36 = vshrl.u32 %v2310_v8, 16  ;;  %4831 = vmatpush.bf16.msrb.mxu3 %v7368_v51 }
 0x1b5   : > { %11640 = vst [vmem:[#allocation15_spill] sm:$0xff] %v9273_v45  ;;  %v2798_v44 = vor.u32 %v2797_v29, %v2794_v12  ;;  %v9309_v60 = vor.u32 %v3368_v43, %v3365_v49  ;;  %v3417_v50 = vrot.slane %v3415_v61, 3  ;;  %v3581_v35 = vrot.slane %v11643_v48, 2 }
 0x1b6   : > { %v3582_v31 = vrot.slane %v11546_v13, 3 }
 0x1b7   : > { %4772 = vmatmul.bf16.gmra.mxu2 %v3361_v20  ;;  %v2805_v20 = vrot.slane %v2803_v16, 3  ;;  %v2911_v16 = vshll.u32 %v2310_v8, 16 }
 0x1b8   : > { %v9277_v1 = vpop.f32.mrf.mxu1  ;;  %v4733_v47 = vpop.f32.mrf.mxu2  ;;  %v9339_v48 = vor.u32 %v3582_v31, %v3581_v35 }
 0x1b9   : > { %v9290_v21 = vadd.f32 %v4733_v47, %v9133_v34  ;;  %v9302_v34 = vld [vmem:[#allocation3 + $0x30] sm:$0xff]   ;;  %v2539_v47 = vrot.slane %v2303_v17, 6 }
 0x1ba   : > { %v2312_v29 = vshrl.u32 %v9302_v34, 16  ;;  %v2315_v8 = vshll.u32 %v9302_v34, 16 }
 0x1bb   : > { %4673 = vmatmul.bf16.gmra.mxu3 %v3526_v0  ;;  %11641 = vst [vmem:[#allocation16_spill] sm:$0xff] %v9290_v21  ;;  %v2806_v0 = vor.u32 %v2805_v20, %v2802_v30  ;;  %v9316_v12 = vor.u32 %v2540_v27, %v2539_v47  ;;  %v2910_v20 = vrot.slane %v2908_v36, 2  ;;  %v9337_v47 = vor.u32 %v3417_v50, %v3414_v10 }
 0x1bc   : > { %v2913_v27 = vrot.slane %v2911_v16, 3  ;;  %v2314_v13 = vrot.slane %v2312_v29, 5  ;;  %v11648_v10 = vshll.u32 %v9209_v33, 16 }
 0x1bd   : > { %v9314_v30 = vsel %vm2676_vm0, %v2798_v44, %v2806_v0  ;;  %v2542_v43 = vsel %vm2526_vm4, %v2537_v38, %v9316_v12  ;;  %v9335_v44 = vsel %vm2676_vm0, %v9227_v42, %v9309_v60  ;;  %v2317_v38 = vrot.slane %v2315_v8, 6 }
 0x1be   : > { %5069 = vmatmul.bf16.gmra.mxu1 %v2856_v18  ;;  %v9318_v17 = vpop.f32.mrf.mxu0  ;;  %v11549_v18 = vrot.slane %v9209_v33, 1  ;;  %v2868_v51 = vshrl.u32 %v2542_v43, 16  ;;  %11645 = vst [vmem:[#allocation19_spill] sm:$0xff] %v9335_v44  ;;  %v2871_v34 = vshll.u32 %v2542_v43, 16  ;;  %v11647_v42 = vrot.slane %v9139_v4, 1 }
 0x1bf   : > { %11642 = vst [vmem:[#allocation17_spill] sm:$0xff] %v9318_v17  ;;  %v2131_v16 = vrot.slane %v11648_v10, 1  ;;  %v9352_v35 = vor.u32 %v2913_v27, %v2910_v20 }
 0x1c0   : > { %v9311_v52 = vpop.f32.mrf.mxu1  ;;  %v4735_v49 = vpop.f32.mrf.mxu2  ;;  %v2870_v9 = vrot.slane %v2868_v51, 2  ;;  %v2224_v50 = vsel %vm2195_vm2, %v11647_v42, %v11549_v18  ;;  %v3584_v51 = vsel %vm2676_vm0, %v9265_v28, %v9339_v48  ;;  %v9376_v28 = vld [vmem:[#allocation3 + $0x84] sm:$0xff]   ;;  %v7830_v18 = vld [vmem:[#allocation3 + $0x38] sm:$0xff]  }
 0x1c1   : > { %v9329_v61 = vadd.f32 %v4735_v49, %v9160_v25  ;;  %v11646_v25 = vshrl.u32 %v9139_v4, 16  ;;  %v2873_v49 = vrot.slane %v2871_v34, 3  ;;  %v9364_v4 = vor.u32 %v2317_v38, %v2314_v13 }
 0x1c2   : > { %v3424_v20 = vshll.u32 %v2224_v50, 16  ;;  %v2915_v13 = vsel %vm2676_vm0, %v9287_v6, %v9352_v35  ;;  %v11550_v10 = vshrl.u32 %v9376_v28, 16  ;;  %v2324_v45 = vshll.u32 %v7830_v18, 16 }
 0x1c3   : > { %11644 = vst [vmem:[#allocation18_spill] sm:$0xff] %v9329_v61  ;;  %v2127_v36 = vor.u32 %v11646_v25, %v9269_v14  ;;  %5000 = vmatmul.bf16.gmra.mxu0 %v9335_v44  ;;  %v9354_v31 = vor.u32 %v2873_v49, %v2870_v9  ;;  %v3419_v14 = vsel %vm2676_vm0, %v9263_v56, %v9337_v47  ;;  %v3421_v9 = vshrl.u32 %v2224_v50, 16 }
 0x1c4   : > { %v3639_v6 = vrot.slane %v11550_v10, 2  ;;  %v2321_v10 = vshrl.u32 %v7830_v18, 16 }
 0x1c5   : > { %v2132_v27 = vsel %vm2016_vm1, %v2127_v36, %v2131_v16  ;;  %v9371_v56 = vsel %vm2676_vm0, %v2806_v0, %v9354_v31  ;;  %v2319_v36 = vsel %vm2275_vm3, %v9275_v22, %v9364_v4  ;;  %v3423_v50 = vrot.slane %v3421_v9, 2 }
 0x1c6   : > { %v9359_v43 = vpop.f32.mrf.mxu0  ;;  %v3470_v38 = vshrl.u32 %v2132_v27, 16  ;;  %v3473_v42 = vshll.u32 %v2132_v27, 16  ;;  %v3426_v0 = vrot.slane %v3424_v20, 3  ;;  %v2966_v17 = vshrl.u32 %v2319_v36, 16 }
 0x1c7   : > { %11649 = vst [vmem:[#allocation20_spill] sm:$0xff] %v9359_v43  ;;  %4777 = vmatmul.bf16.gmra.mxu2 %v3419_v14  ;;  %v7367_v14 = vld [vmem:[%s8244_s24 + $0x98] sm:$0xff]  ;;  %v2969_v22 = vshll.u32 %v2319_v36, 16 }
 0x1c8   : > { %v4738_v34 = vpop.f32.mrf.mxu2  ;;  %4832 = vmatpush.bf16.msrb.mxu3 %v7367_v14  ;;  %v11552_v14 = vrot.slane %v9292_v5, 1 }
 0x1c9   : > { %v9374_v49 = vadd.f32 %v4738_v34, %v9198_v2  ;;  %v2544_v2 = vrot.slane %v2315_v8, 7  ;;  %v11551_v34 = vshll.u32 %v9376_v28, 16  ;;  %v3472_v8 = vrot.slane %v3470_v38, 2 }
 0x1ca   : > { %v9366_v25 = vpop.f32.mrf.mxu1 }
 0x1cb   : > { %4678 = vmatmul.bf16.gmra.mxu3 %v3584_v51  ;;  %11650 = vst [vmem:[#allocation21_spill] sm:$0xff] %v9374_v49  ;;  %v2543_v51 = vrot.slane %v2312_v29, 6  ;;  %v3640_v27 = vrot.slane %v11551_v34, 3  ;;  %v9395_v29 = vor.u32 %v3426_v0, %v3423_v50  ;;  %v11653_v34 = vshrl.u32 %v9209_v33, 16 }
 0x1cd   : > { %v9387_v43 = vor.u32 %v2544_v2, %v2543_v51  ;;  %v9411_v38 = vsel %vm2676_vm0, %v9309_v60, %v9395_v29  ;;  %v2139_v60 = vrot.slane %v11656_v58, 1 }
 0x1ce   : > { %5074 = vmatmul.bf16.gmra.mxu1 %v2915_v13  ;;  %v3475_v13 = vrot.slane %v3473_v42, 3  ;;  %11654 = vst [vmem:[#allocation24_spill] sm:$0xff] %v9411_v38  ;;  %v9413_v42 = vor.u32 %v3640_v27, %v3639_v6  ;;  %v2326_v6 = vrot.slane %v2324_v45, 6 }
 0x1cf   : > { %v9393_v20 = vpop.f32.mrf.mxu0  ;;  %v2546_v36 = vsel %vm2526_vm4, %v9316_v12, %v9387_v43  ;;  %v11655_v12 = vrot.slane %v9209_v33, 1 }
 0x1d0   : > { %v4740_v9 = vpop.f32.mrf.mxu2  ;;  %11651 = vst [vmem:[#allocation22_spill] sm:$0xff] %v9393_v20  ;;  %v2135_v20 = vor.u32 %v11653_v34, %v2131_v16  ;;  %v2926_v50 = vshrl.u32 %v2546_v36, 16  ;;  %v2929_v0 = vshll.u32 %v2546_v36, 16  ;;  %v9416_v18 = vor.u32 %v3475_v13, %v3472_v8 }
 0x1d1   : > { %v9399_v51 = vadd.f32 %v4740_v9, %v9232_v26  ;;  %v2968_v26 = vrot.slane %v2966_v17, 2  ;;  %v2971_v9 = vrot.slane %v2969_v22, 3  ;;  %v2226_v16 = vsel %vm2195_vm2, %v11655_v12, %v11552_v14 }
 0x1d2   : > { %v9401_v2 = vpop.f32.mrf.mxu1  ;;  %v2928_v34 = vrot.slane %v2926_v50, 2  ;;  %v2931_v27 = vrot.slane %v2929_v0, 3  ;;  %v3477_v17 = vsel %vm2676_vm0, %v9337_v47, %v9416_v18  ;;  %v3642_v22 = vsel %vm2676_vm0, %v9339_v48, %v9413_v42  ;;  %v9438_v0 = vld [vmem:[#allocation3 + $0x8c] sm:$0xff]  }
 0x1d3   : > { %11652 = vst [vmem:[#allocation23_spill] sm:$0xff] %v9399_v51  ;;  %5005 = vmatmul.bf16.gmra.mxu0 %v9411_v38  ;;  %v2323_v51 = vrot.slane %v2321_v10, 5  ;;  %v3479_v8 = vshrl.u32 %v2226_v16, 16  ;;  %v3482_v13 = vshll.u32 %v2226_v16, 16  ;;  %v2140_v33 = vsel %vm2016_vm1, %v2135_v20, %v2139_v60 }
 0x1d4   : > { %v9434_v58 = vor.u32 %v2971_v9, %v2968_v26  ;;  %v9436_v50 = vor.u32 %v2931_v27, %v2928_v34  ;;  %v3528_v48 = vshrl.u32 %v2140_v33, 16  ;;  %v3531_v38 = vshll.u32 %v2140_v33, 16  ;;  %v7831_v33 = vld [vmem:[#allocation3 + $0x40] sm:$0xff]  }
 0x1d5   : > { %v9440_v12 = vor.u32 %v2326_v6, %v2323_v51  ;;  %v3481_v26 = vrot.slane %v3479_v8, 2  ;;  %v3484_v9 = vrot.slane %v3482_v13, 3  ;;  %v11554_v34 = vshrl.u32 %v9438_v0, 16 }
 0x1d6   : > { %v9447_v20 = vsel %vm2676_vm0, %v9354_v31, %v9436_v50  ;;  %v2973_v51 = vsel %vm2676_vm0, %v9352_v35, %v9434_v58  ;;  %v2547_v6 = vrot.slane %v2321_v10, 6  ;;  %v2548_v27 = vrot.slane %v2324_v45, 7 }
 0x1d7   : > { %4782 = vmatmul.bf16.gmra.mxu2 %v3477_v17  ;;  %v9432_v36 = vpop.f32.mrf.mxu0  ;;  %v11555_v17 = vshll.u32 %v9438_v0, 16  ;;  %v2328_v31 = vsel %vm2275_vm3, %v9364_v4, %v9440_v12  ;;  %v9462_v13 = vor.u32 %v3484_v9, %v3481_v26  ;;  %v2330_v4 = vshrl.u32 %v7831_v33, 16 }
 0x1d8   : > { %11657 = vst [vmem:[#allocation25_spill] sm:$0xff] %v9432_v36  ;;  %v4743_v47 = vpop.f32.mrf.mxu2  ;;  %v9460_v8 = vor.u32 %v2548_v27, %v2547_v6  ;;  %v3024_v10 = vshrl.u32 %v2328_v31, 16 }
 0x1d9   : > { %v9450_v16 = vadd.f32 %v4743_v47, %v9277_v1  ;;  %v3533_v1 = vrot.slane %v3531_v38, 3  ;;  %v3697_v47 = vrot.slane %v11554_v34, 2  ;;  %v3698_v45 = vrot.slane %v11555_v17, 3 }
 0x1da   : > { %v9442_v14 = vpop.f32.mrf.mxu1  ;;  %v2333_v38 = vshll.u32 %v7831_v33, 16  ;;  %v11660_v17 = vshrl.u32 %v9292_v5, 16  ;;  %v9486_v33 = vsel %vm2676_vm0, %v9395_v29, %v9462_v13 }
 0x1db   : > { %4683 = vmatmul.bf16.gmra.mxu3 %v3642_v22  ;;  %11658 = vst [vmem:[#allocation26_spill] sm:$0xff] %v9450_v16  ;;  %v3530_v22 = vrot.slane %v3528_v48, 2  ;;  %v2550_v48 = vsel %vm2526_vm4, %v9387_v43, %v9460_v8  ;;  %v9488_v36 = vor.u32 %v3698_v45, %v3697_v47  ;;  %v3026_v43 = vrot.slane %v3024_v10, 2 }
 0x1dc   : > { %v2984_v27 = vshrl.u32 %v2550_v48, 16  ;;  %v2987_v34 = vshll.u32 %v2550_v48, 16  ;;  %11662 = vst [vmem:[#allocation29_spill] sm:$0xff] %v9486_v33  ;;  %v11664_v48 = vrot.slane %v9292_v5, 1  ;;  %v2332_v16 = vrot.slane %v2330_v4, 5 }
 0x1dd   : > { %v9476_v6 = vor.u32 %v3533_v1, %v3530_v22  ;;  %v11663_v1 = vrot.slane %v9376_v28, 1  ;;  %v2335_v29 = vrot.slane %v2333_v38, 6  ;;  %v3700_v45 = vsel %vm2676_vm0, %v9413_v42, %v9488_v36 }
 0x1de   : > { %5079 = vmatmul.bf16.gmra.mxu1 %v2973_v51  ;;  %v3027_v51 = vshll.u32 %v2328_v31, 16  ;;  %v2989_v7 = vrot.slane %v2987_v34, 3 }
 0x1df   : > { %v9468_v35 = vpop.f32.mrf.mxu0  ;;  %v3535_v47 = vsel %vm2676_vm0, %v9416_v18, %v9476_v6  ;;  %v9514_v18 = vor.u32 %v2335_v29, %v2332_v16 }
 0x1e0   : > { %11659 = vst [vmem:[#allocation27_spill] sm:$0xff] %v9468_v35  ;;  %v4745_v26 = vpop.f32.mrf.mxu2  ;;  %v2143_v35 = vor.u32 %v11660_v17, %v2139_v60  ;;  %v3029_v22 = vrot.slane %v3027_v51, 3  ;;  %v2228_v60 = vsel %vm2195_vm2, %v11664_v48, %v11663_v1  ;;  %v7366_v17 = vld [vmem:[%s8244_s24 + $0x90] sm:$0xff]  ;;  %v9512_v48 = vld [vmem:[#allocation3 + $0x94] sm:$0xff]  }
 0x1e1   : > { %v9481_v31 = vadd.f32 %v4745_v26, %v9311_v52  ;;  %v2986_v52 = vrot.slane %v2984_v27, 2  ;;  %v11665_v26 = vshll.u32 %v9376_v28, 16  ;;  %4833 = vmatpush.bf16.msrb.mxu3 %v7366_v17  ;;  %v3537_v5 = vshrl.u32 %v2228_v60, 16 }
 0x1e2   : > { %v9474_v9 = vpop.f32.mrf.mxu1  ;;  %v3540_v10 = vshll.u32 %v2228_v60, 16  ;;  %v9508_v1 = vor.u32 %v3029_v22, %v3026_v43  ;;  %v2551_v22 = vrot.slane %v2330_v4, 6  ;;  %v11556_v29 = vshll.u32 %v9512_v48, 16 }
 0x1e3   : > { %11661 = vst [vmem:[#allocation28_spill] sm:$0xff] %v9481_v31  ;;  %5010 = vmatmul.bf16.gmra.mxu0 %v9486_v33  ;;  %v2147_v31 = vrot.slane %v11665_v26, 1  ;;  %v9510_v34 = vor.u32 %v2989_v7, %v2986_v52  ;;  %v2552_v52 = vrot.slane %v2333_v38, 7 }
 0x1e4   : > { %v3031_v16 = vsel %vm2676_vm0, %v9434_v58, %v9508_v1  ;;  %v3756_v4 = vrot.slane %v11556_v29, 3 }
 0x1e5   : > { %v2148_v51 = vsel %vm2016_vm1, %v2143_v35, %v2147_v31  ;;  %v9521_v35 = vsel %vm2676_vm0, %v9436_v50, %v9510_v34  ;;  %v2337_v50 = vsel %vm2275_vm3, %v9440_v12, %v9514_v18  ;;  %v9536_v43 = vor.u32 %v2552_v52, %v2551_v22 }
 0x1e6   : > { %v3586_v26 = vshrl.u32 %v2148_v51, 16  ;;  %v3589_v42 = vshll.u32 %v2148_v51, 16  ;;  %v9534_v51 = vld [vmem:[#allocation3 + $0x48] sm:$0xff]   ;;  %v3082_v38 = vshrl.u32 %v2337_v50, 16  ;;  %v11670_v22 = vshrl.u32 %v9376_v28, 16 }
 0x1e7   : > { %4787 = vmatmul.bf16.gmra.mxu2 %v3535_v47  ;;  %v9506_v27 = vpop.f32.mrf.mxu0  ;;  %v3539_v47 = vrot.slane %v3537_v5, 2  ;;  %v11558_v12 = vshrl.u32 %v9534_v51, 16 }
 0x1e8   : > { %11666 = vst [vmem:[#allocation30_spill] sm:$0xff] %v9506_v27  ;;  %v3588_v5 = vrot.slane %v3586_v26, 2  ;;  %v11557_v27 = vrot.slane %v9438_v0, 1  ;;  %v2151_v52 = vor.u32 %v11670_v22, %v2147_v31  ;;  %v11673_v31 = vrot.slane %v9376_v28, 1 }
 0x1e9   : > { %v11674_v22 = vshll.u32 %v9438_v0, 16 }
 0x1ea   : > { %v9516_v17 = vpop.f32.mrf.mxu1  ;;  %v4748_v60 = vpop.f32.mrf.mxu2 }
 0x1eb   : > { %4688 = vmatmul.bf16.gmra.mxu3 %v3700_v45  ;;  %v3542_v45 = vrot.slane %v3540_v10, 3  ;;  %v9525_v7 = vadd.f32 %v4748_v60, %v9366_v25  ;;  %v3591_v10 = vrot.slane %v3589_v42, 3  ;;  %v11668_v60 = vshrl.u32 %v9512_v48, 16 }
 0x1ec   : > { %v2554_v42 = vsel %vm2526_vm4, %v9460_v8, %v9536_v43  ;;  %v3084_v8 = vrot.slane %v3082_v38, 2 }
 0x1ed   : > { %11667 = vst [vmem:[#allocation31_spill] sm:$0xff] %v9525_v7  ;;  %v9538_v25 = vor.u32 %v3542_v45, %v3539_v47  ;;  %v3755_v58 = vrot.slane %v11668_v60, 2  ;;  %v9554_v45 = vor.u32 %v3591_v10, %v3588_v5  ;;  %v2230_v10 = vsel %vm2195_vm2, %v11673_v31, %v11557_v27 }
 0x1ee   : > { %5084 = vmatmul.bf16.gmra.mxu1 %v3031_v16  ;;  %v3085_v16 = vshll.u32 %v2337_v50, 16  ;;  %v3595_v31 = vshrl.u32 %v2230_v10, 16  ;;  %v3598_v27 = vshll.u32 %v2230_v10, 16 }
 0x1ef   : > { %v9561_v60 = vsel %vm2676_vm0, %v9462_v13, %v9538_v25  ;;  %v9563_v29 = vor.u32 %v3756_v4, %v3755_v58  ;;  %v2155_v13 = vrot.slane %v11674_v22, 1  ;;  %v2341_v58 = vrot.slane %v11558_v12, 5 }
 0x1f0   : > { %v9545_v7 = vpop.f32.mrf.mxu0  ;;  %11671 = vst [vmem:[#allocation33_spill] sm:$0xff] %v9561_v60  ;;  %v3087_v5 = vrot.slane %v3085_v16, 3  ;;  %v3593_v38 = vsel %vm2676_vm0, %v9476_v6, %v9554_v45  ;;  %v3042_v16 = vshrl.u32 %v2554_v42, 16 }
 0x1f1   : > { %11669 = vst [vmem:[#allocation32_spill] sm:$0xff] %v9545_v7  ;;  %v3758_v28 = vsel %vm2676_vm0, %v9488_v36, %v9563_v29  ;;  %v2156_v22 = vsel %vm2016_vm1, %v2151_v52, %v2155_v13  ;;  %v7365_v7 = vld [vmem:[%s8244_s24 + $0x88] sm:$0xff]  ;;  %v3597_v52 = vrot.slane %v3595_v31, 2 }
 0x1f2   : > { %v9552_v47 = vpop.f32.mrf.mxu1  ;;  %v4750_v50 = vpop.f32.mrf.mxu2  ;;  %v9587_v12 = vor.u32 %v3087_v5, %v3084_v8  ;;  %v3647_v33 = vshll.u32 %v2156_v22, 16  ;;  %4834 = vmatpush.bf16.msrb.mxu3 %v7365_v7  ;;  %v3044_v36 = vrot.slane %v3042_v16, 2 }
 0x1f3   : > { %v9566_v26 = vadd.f32 %v4750_v50, %v9401_v2  ;;  %5015 = vmatmul.bf16.gmra.mxu0 %v9561_v60  ;;  %v11675_v2 = vshll.u32 %v9534_v51, 16  ;;  %v3045_v50 = vshll.u32 %v2554_v42, 16  ;;  %v9592_v60 = vld [vmem:[#allocation3 + $0x9c] sm:$0xff]  }
 0x1f4   : > { %v11561_v8 = vshrl.u32 %v9592_v60, 16 }
 0x1f5   : > { %11672 = vst [vmem:[#allocation34_spill] sm:$0xff] %v9566_v26  ;;  %v2344_v4 = vrot.slane %v11675_v2, 6  ;;  %v3644_v26 = vshrl.u32 %v2156_v22, 16  ;;  %v3047_v10 = vrot.slane %v3045_v50, 3  ;;  %v3649_v50 = vrot.slane %v3647_v33, 3 }
 0x1f6   : > { %v11679_v33 = vshrl.u32 %v9438_v0, 16 }
 0x1f7   : > { %4792 = vmatmul.bf16.gmra.mxu2 %v3593_v38  ;;  %v9594_v6 = vor.u32 %v2344_v4, %v2341_v58  ;;  %v3600_v38 = vrot.slane %v3598_v27, 3  ;;  %v3089_v58 = vsel %vm2676_vm0, %v9508_v1, %v9587_v12  ;;  %v11562_v4 = vshll.u32 %v9592_v60, 16 }
 0x1f8   : > { %v9590_v2 = vpop.f32.mrf.mxu0  ;;  %v3646_v16 = vrot.slane %v3644_v26, 2  ;;  %v9609_v27 = vor.u32 %v3047_v10, %v3044_v36  ;;  %v11564_v1 = vrot.slane %v9512_v48, 1  ;;  %v2159_v36 = vor.u32 %v11679_v33, %v2155_v13 }
 0x1f9   : > { %11676 = vst [vmem:[#allocation35_spill] sm:$0xff] %v9590_v2  ;;  %v2346_v7 = vsel %vm2275_vm3, %v9514_v18, %v9594_v6  ;;  %v9611_v31 = vor.u32 %v3600_v38, %v3597_v52  ;;  %v11681_v13 = vrot.slane %v9438_v0, 1  ;;  %v11682_v33 = vshll.u32 %v9512_v48, 16 }
 0x1fa   : > { %v4753_v49 = vpop.f32.mrf.mxu2  ;;  %v3140_v22 = vshrl.u32 %v2346_v7, 16  ;;  %v9627_v52 = vsel %vm2676_vm0, %v9510_v34, %v9609_v27 }
 0x1fb   : > { %4693 = vmatmul.bf16.gmra.mxu3 %v3758_v28  ;;  %v9596_v42 = vpop.f32.mrf.mxu1  ;;  %v9600_v5 = vadd.f32 %v4753_v49, %v9442_v14  ;;  %v7833_v28 = vld [vmem:[#allocation3 + $0x50] sm:$0xff]   ;;  %v3813_v49 = vrot.slane %v11561_v8, 2  ;;  %v3814_v14 = vrot.slane %v11562_v4, 3  ;;  %v9632_v8 = vsel %vm2676_vm0, %v9538_v25, %v9611_v31 }
 0x1fc   : > { %v2348_v18 = vshrl.u32 %v7833_v28, 16  ;;  %v2351_v26 = vshll.u32 %v7833_v28, 16  ;;  %11680 = vst [vmem:[#allocation38_spill] sm:$0xff] %v9632_v8  ;;  %v2232_v28 = vsel %vm2195_vm2, %v11681_v13, %v11564_v1  ;;  %v2163_v34 = vrot.slane %v11682_v33, 1 }
 0x1fd   : > { %11677 = vst [vmem:[#allocation36_spill] sm:$0xff] %v9600_v5  ;;  %v9636_v4 = vor.u32 %v3814_v14, %v3813_v49  ;;  %v3142_v25 = vrot.slane %v3140_v22, 2  ;;  %v3653_v49 = vshrl.u32 %v2232_v28, 16  ;;  %v3656_v14 = vshll.u32 %v2232_v28, 16 }
 0x1fe   : > { %5089 = vmatmul.bf16.gmra.mxu1 %v3089_v58  ;;  %v3143_v58 = vshll.u32 %v2346_v7, 16  ;;  %v9634_v7 = vor.u32 %v3649_v50, %v3646_v16  ;;  %v2350_v16 = vrot.slane %v2348_v18, 5  ;;  %v2353_v50 = vrot.slane %v2351_v26, 6 }
 0x1ff   : > { %v2164_v24 = vsel %vm2016_vm1, %v2159_v36, %v2163_v34  ;;  %v3816_v13 = vsel %vm2676_vm0, %v9563_v29, %v9636_v4  ;;  %v11685_v22 = vshll.u32 %v9534_v51, 16  ;;  %v9662_v36 = vld [vmem:[#allocation3 + $0xa4] sm:$0xff]  }
 0x200   : > { %v9618_v2 = vpop.f32.mrf.mxu0  ;;  %v3145_v5 = vrot.slane %v3143_v58, 3  ;;  %v3651_v0 = vsel %vm2676_vm0, %v9554_v45, %v9634_v7  ;;  %v3702_v45 = vshrl.u32 %v2164_v24, 16  ;;  %v9666_v1 = vor.u32 %v2353_v50, %v2350_v16  ;;  %v7364_v50 = vld [vmem:[%s8244_s24 + $0x80] sm:$0xff] }
 0x201   : > { %11678 = vst [vmem:[#allocation37_spill] sm:$0xff] %v9618_v2  ;;  %v2556_v58 = vrot.slane %v11685_v22, 7  ;;  %v3705_v44 = vshll.u32 %v2164_v24, 16  ;;  %v2560_v22 = vrot.slane %v2351_v26, 7  ;;  %4835 = vmatpush.bf16.msrb.mxu3 %v7364_v50 }
 0x202   : > { %v4755_v38 = vpop.f32.mrf.mxu2  ;;  %v9660_v28 = vor.u32 %v3145_v5, %v3142_v25  ;;  %v2355_v24 = vsel %vm2275_vm3, %v9594_v6, %v9666_v1 }
 0x203   : > { %v9622_v10 = vpop.f32.mrf.mxu1  ;;  %v9646_v2 = vadd.f32 %v4755_v38, %v9474_v9  ;;  %5020 = vmatmul.bf16.gmra.mxu0 %v9632_v8  ;;  %v11684_v9 = vshrl.u32 %v9534_v51, 16  ;;  %v11567_v51 = vshrl.u32 %v9662_v36, 16  ;;  %v3198_v6 = vshrl.u32 %v2355_v24, 16 }
 0x204   : > { %v3147_v16 = vsel %vm2676_vm0, %v9587_v12, %v9660_v28  ;;  %v9688_v12 = vld [vmem:[#allocation3 + $0x58] sm:$0xff]  }
 0x205   : > { %11683 = vst [vmem:[#allocation39_spill] sm:$0xff] %v9646_v2  ;;  %v2555_v38 = vrot.slane %v11684_v9, 6  ;;  %v3655_v2 = vrot.slane %v3653_v49, 2  ;;  %v3658_v9 = vrot.slane %v3656_v14, 3  ;;  %v11568_v49 = vshll.u32 %v9662_v36, 16 }
 0x206   : > { %v2559_v14 = vrot.slane %v2348_v18, 6  ;;  %v3201_v18 = vshll.u32 %v2355_v24, 16 }
 0x207   : > { %4797 = vmatmul.bf16.gmra.mxu2 %v3651_v0  ;;  %v2557_v8 = vor.u32 %v2556_v58, %v2555_v38  ;;  %v3707_v58 = vrot.slane %v3705_v44, 3  ;;  %v11570_v44 = vshrl.u32 %v9688_v12, 16 }
 0x208   : > { %v9664_v33 = vpop.f32.mrf.mxu0  ;;  %v9692_v3 = vor.u32 %v2560_v22, %v2559_v14 }
 0x209   : > { %11686 = vst [vmem:[#allocation40_spill] sm:$0xff] %v9664_v33  ;;  %v2558_v5 = vsel %vm2526_vm4, %v9536_v43, %v2557_v8  ;;  %v9684_v43 = vor.u32 %v3658_v9, %v3655_v2  ;;  %v11571_v2 = vrot.slane %v9592_v60, 1 }
 0x20a   : > { %v4758_v0 = vpop.f32.mrf.mxu2  ;;  %v3103_v38 = vshll.u32 %v2558_v5, 16  ;;  %v9703_v50 = vsel %vm2526_vm4, %v2557_v8, %v9692_v3 }
 0x20b   : > { %4698 = vmatmul.bf16.gmra.mxu3 %v3816_v13  ;;  %v9668_v29 = vpop.f32.mrf.mxu1  ;;  %v9674_v25 = vadd.f32 %v4758_v0, %v9516_v17  ;;  %v3100_v13 = vshrl.u32 %v2558_v5, 16  ;;  %v3704_v17 = vrot.slane %v3702_v45, 2  ;;  %v3871_v0 = vrot.slane %v11567_v51, 2 }
 0x20c   : > { %v3872_v5 = vrot.slane %v11568_v49, 3  ;;  %v11569_v45 = vshll.u32 %v9688_v12, 16  ;;  %v9712_v51 = vsel %vm2676_vm0, %v9611_v31, %v9684_v43  ;;  %v11692_v31 = vrot.slane %v9512_v48, 1 }
 0x20d   : > { %11687 = vst [vmem:[#allocation41_spill] sm:$0xff] %v9674_v25  ;;  %v3102_v33 = vrot.slane %v3100_v13, 2  ;;  %v3105_v25 = vrot.slane %v3103_v38, 3  ;;  %v11689_v13 = vshrl.u32 %v9512_v48, 16  ;;  %v9714_v49 = vor.u32 %v3707_v58, %v3704_v17 }
 0x20e   : > { %5094 = vmatmul.bf16.gmra.mxu1 %v3147_v16  ;;  %v1893_v16 = vld [vmem:[#allocation3 + $0xac] sm:$0x7]  ;;  %11690 = vst [vmem:[#allocation43_spill] sm:$0xff] %v9712_v51  ;;  %v2234_v17 = vsel %vm2195_vm2, %v11692_v31, %v11571_v2  ;;  %v2359_v58 = vrot.slane %v11570_v44, 5 }
 0x20f   : > { %v9699_v9 = vor.u32 %v3105_v25, %v3102_v33  ;;  %v2167_v38 = vor.u32 %v11689_v13, %v2163_v34  ;;  %v1990_v24 = vunpack.c.l.b16 %v1893_v16  ;;  %v9716_v33 = vor.u32 %v3872_v5, %v3871_v0 }
 0x210   : > { %v9695_v26 = vpop.f32.mrf.mxu0  ;;  %v3200_v25 = vrot.slane %v3198_v6, 2  ;;  %v3203_v16 = vrot.slane %v3201_v18, 3  ;;  %v11693_v0 = vshll.u32 %v9592_v60, 16  ;;  %v3709_v6 = vsel %vm2676_vm0, %v9634_v7, %v9714_v49 }
 0x211   : > { %11688 = vst [vmem:[#allocation42_spill] sm:$0xff] %v9695_v26  ;;  %v9721_v8 = vsel %vm2676_vm0, %v9609_v27, %v9699_v9  ;;  %v2362_v27 = vrot.slane %v11569_v45, 6  ;;  %v9738_v5 = vpack.c.b16 %v1990_v24, %v1990_v24  ;;  %v3874_v48 = vsel %vm2676_vm0, %v9636_v4, %v9716_v33 }
 0x212   : > { %v4760_v22 = vpop.f32.mrf.mxu2  ;;  %v3711_v18 = vshrl.u32 %v2234_v17, 16  ;;  %v3714_v13 = vshll.u32 %v2234_v17, 16 }
 0x213   : > { %v9707_v14 = vpop.f32.mrf.mxu1  ;;  %v9724_v34 = vadd.f32 %v4760_v22, %v9552_v47  ;;  %5025 = vmatmul.bf16.gmra.mxu0 %v9712_v51  ;;  %v2171_v47 = vrot.slane %v11693_v0, 1  ;;  %v9746_v22 = vor.u32 %v3203_v16, %v3200_v25  ;;  %v9751_v0 = vor.u32 %v2362_v27, %v2359_v58  ;;  %v7395_v58 = vld [vmem:[%s8244_s24 + $0x178] sm:$0xff] }
 0x214   : > { %v11572_v4 = vshrl.u32 %v9738_v5, 16  ;;  %v7403_v27 = vld [vmem:[%s8244_s24 + $0x1b8] sm:$0xff]  ;;  %5170 = vmatpush.bf16.msra.mxu2 %v7395_v58 }
 0x215   : > { %11691 = vst [vmem:[#allocation44_spill] sm:$0xff] %v9724_v34  ;;  %v2172_v31 = vsel %vm2016_vm1, %v2167_v38, %v2171_v47  ;;  %v3205_v38 = vsel %vm2676_vm0, %v9660_v28, %v9746_v22  ;;  %v2364_v7 = vsel %vm2275_vm3, %v9666_v1, %v9751_v0  ;;  %5284 = vmatpush.bf16.msra.mxu3 %v7403_v27  ;;  %v11696_v28 = vshll.u32 %v9738_v5, 16 }
 0x216   : > { %v3760_v25 = vshrl.u32 %v2172_v31, 16  ;;  %v3763_v16 = vshll.u32 %v2172_v31, 16  ;;  %v3256_v26 = vshrl.u32 %v2364_v7, 16  ;;  %v11699_v27 = vshrl.u32 %v9592_v60, 16 }
 0x217   : > { %4802 = vmatmul.bf16.gmra.mxu2 %v3709_v6  ;;  %v3713_v6 = vrot.slane %v3711_v18, 2  ;;  %v3938_v18 = vrot.slane %v11572_v4, 2 }
 0x218   : > { %v9749_v24 = vpop.f32.mrf.mxu0  ;;  %v3765_v31 = vrot.slane %v3763_v16, 3  ;;  %v2197_v16 = vrot.slane %v8595_v40, 1  ;;  %v3258_v40 = vrot.slane %v3256_v26, 2 }
 0x219   : > { %11694 = vst [vmem:[#allocation45_spill] sm:$0xff] %v9749_v24  ;;  %v3939_v24 = vrot.slane %v11696_v28, 3 }
 0x21a   : > { %v4763_v44 = vpop.f32.mrf.mxu2  ;;  %v2200_v26 = vsel %vm2195_vm2, %v2197_v16, %v8714_v39 }
 0x21b   : > { %4703 = vmatmul.bf16.gmra.mxu3 %v3874_v48  ;;  %v9753_v45 = vpop.f32.mrf.mxu1  ;;  %v3716_v48 = vrot.slane %v3714_v13, 3  ;;  %v9760_v2 = vadd.f32 %v4763_v44, %v9596_v42  ;;  %v9772_v13 = vld [vmem:[#allocation3 + $0x60] sm:$0xff]   ;;  %v3762_v44 = vrot.slane %v3760_v25, 2  ;;  %v2196_v25 = vrot.slane %v8615_v11, 1 }
 0x21d   : > { %11695 = vst [vmem:[#allocation46_spill] sm:$0xff] %v9760_v2  ;;  %v9774_v42 = vor.u32 %v3716_v48, %v3713_v6  ;;  %v9779_v2 = vrot.slane %v9662_v36, 1  ;;  %v2175_v6 = vor.u32 %v11699_v27, %v2171_v47  ;;  %v9800_v58 = vor.u32 %v3765_v31, %v3762_v44 }
 0x21e   : > { %v9757_v17 = vpop.f32.mrf.mxu3  ;;  %5099 = vmatmul.bf16.gmra.mxu1 %v3205_v38  ;;  %v3259_v38 = vshll.u32 %v2364_v7, 16  ;;  %v11700_v7 = vshll.u32 %v9662_v36, 16  ;;  %v3940_v47 = vor.u32 %v3939_v24, %v3938_v18  ;;  %v11705_v31 = vshll.u32 %v9772_v13, 16  ;;  %v9816_v24 = vld [vmem:[#allocation3 + $0xb0] sm:$0xff]  }
 0x21f   : > { %11697 = vst [vmem:[#allocation47_spill] sm:$0xff] %v9779_v2  ;;  %v9798_v4 = vsel %vm2676_vm0, %v9684_v43, %v9774_v42  ;;  %v11704_v43 = vshrl.u32 %v9772_v13, 16 }
 0x220   : > { %v9781_v1 = vpop.f32.mrf.mxu0  ;;  %v9793_v28 = vrot.slane %v11700_v7, 1  ;;  %11701 = vst [vmem:[#allocation49_spill] sm:$0xff] %v9798_v4  ;;  %v3261_v11 = vrot.slane %v3259_v38, 3  ;;  %v11703_v7 = vrot.slane %v9592_v60, 1  ;;  %v2371_v61 = vrot.slane %v11705_v31, 6 }
 0x221   : > { %11698 = vst [vmem:[#allocation48_spill] sm:$0xff] %v9781_v1  ;;  %v2368_v44 = vrot.slane %v11704_v43, 5  ;;  %v3767_v60 = vsel %vm2676_vm0, %v9714_v49, %v9800_v58  ;;  %v3941_v18 = vsel %vm2676_vm0, %v9716_v33, %v3940_v47  ;;  %v9828_v43 = vld [vmem:[#allocation3 + $0xa8] sm:$0xff]  }
 0x222   : > { %v4765_v51 = vpop.f32.mrf.mxu2  ;;  %v2236_v34 = vsel %vm2195_vm2, %v11703_v7, %v9779_v2  ;;  %11706 = vst [vmem:[#allocation51_spill] sm:$0xff] %v9816_v24  ;;  %v9830_v31 = vor.u32 %v3261_v11, %v3258_v40  ;;  %v9841_v40 = vunpack.c.h.b16 %v9828_v43 }
 0x223   : > { %v9787_v48 = vpop.f32.mrf.mxu1  ;;  %v9805_v27 = vadd.f32 %v4765_v51, %v9622_v10  ;;  %5030 = vmatmul.bf16.gmra.mxu0 %v9798_v4  ;;  %v2180_v10 = vsel %vm2016_vm1, %v2175_v6, %v9793_v28  ;;  %v2198_v51 = vsel %vm2195_vm2, %v2196_v25, %v2197_v16  ;;  %v3769_v38 = vshrl.u32 %v2236_v34, 16  ;;  %11707 = vst [vmem:[#allocation52_spill] sm:$0xff] %v9828_v43  ;;  %v7411_v25 = vld [vmem:[%s8244_s24 + $0x1f8] sm:$0xff] }
 0x224   : > { %v3772_v7 = vshll.u32 %v2236_v34, 16  ;;  %v7612_v6 = vunpack.c.l.b16 %v9816_v24  ;;  %v2707_v39 = vshrl.u32 %v2198_v51, 16  ;;  %v2715_v16 = vshrl.u32 %v2200_v26, 16  ;;  %11710 = vst [vmem:[#allocation55_spill] sm:$0xff] %v9841_v40  ;;  %5398 = vmatpush.bf16.msra.mxu0 %v7411_v25  ;;  %v7419_v25 = vld [vmem:[%s8244_s24 + $0x238] sm:$0xff] }
 0x225   : > { %11702 = vst [vmem:[#allocation50_spill] sm:$0xff] %v9805_v27  ;;  %v2718_v27 = vshll.u32 %v2200_v26, 16  ;;  %v9836_v49 = vor.u32 %v2371_v61, %v2368_v44  ;;  %v3818_v34 = vshrl.u32 %v2180_v10, 16  ;;  %v3821_v47 = vshll.u32 %v2180_v10, 16  ;;  %5512 = vmatpush.bf16.msra.mxu1 %v7419_v25 }
 0x226   : > { %v9802_v1 = vpop.f32.mrf.mxu3  ;;  %v3774_v21 = vrot.slane %v3772_v7, 3  ;;  %v3158_v26 = vshrl.u32 %v9703_v50, 16  ;;  %v3161_v61 = vshll.u32 %v9703_v50, 16  ;;  %v3263_v10 = vsel %vm2676_vm0, %v9746_v22, %v9830_v31 }
 0x227   : > { %4807 = vmatmul.bf16.gmra.mxu2 %v3767_v60  ;;  %v2710_v60 = vshll.u32 %v2198_v51, 16  ;;  %v9854_v51 = vpack.c.b16 %v7612_v6, %v9841_v40  ;;  %v2720_v7 = vrot.slane %v2718_v27, 3  ;;  %v2373_v50 = vsel %vm2275_vm3, %v9751_v0, %v9836_v49  ;;  %v9864_v6 = vld [vmem:[#allocation3 + $0x68] sm:$0xff]  }
 0x228   : > { %v9834_v4 = vpop.f32.mrf.mxu0  ;;  %v3820_v32 = vrot.slane %v3818_v34, 2  ;;  %v3823_v53 = vrot.slane %v3821_v47, 3  ;;  %v3160_v40 = vrot.slane %v3158_v26, 2  ;;  %v3163_v46 = vrot.slane %v3161_v61, 3 }
 0x229   : > { %11708 = vst [vmem:[#allocation53_spill] sm:$0xff] %v9834_v4  ;;  %v3771_v4 = vrot.slane %v3769_v38, 2  ;;  %v2717_v38 = vrot.slane %v2715_v16, 2  ;;  %v3317_v16 = vshll.u32 %v2373_v50, 16  ;;  %v11580_v27 = vrot.slane %v9854_v51, 1 }
 0x22a   : > { %v4768_v11 = vpop.f32.mrf.mxu2  ;;  %v9871_v34 = vor.u32 %v3823_v53, %v3820_v32  ;;  %v11714_v47 = vshrl.u32 %v9662_v36, 16  ;;  %v11715_v26 = vshll.u32 %v9738_v5, 16 }
 0x22b   : > { %4708 = vmatmul.bf16.gmra.mxu3 %v3941_v18  ;;  %v9838_v33 = vpop.f32.mrf.mxu1  ;;  %v9848_v44 = vadd.f32 %v4768_v11, %v9668_v29  ;;  %v2709_v29 = vrot.slane %v2707_v39, 2  ;;  %v2712_v11 = vrot.slane %v2710_v60, 3  ;;  %v9862_v22 = vor.u32 %v3774_v21, %v3771_v4 }
 0x22c   : > { %11709 = vst [vmem:[#allocation54_spill] sm:$0xff] %v9838_v33  ;;  %v7394_v33 = vld [vmem:[%s8244_s24 + $0x170] sm:$0xff]  ;;  %v9869_v0 = vor.u32 %v2720_v7, %v2717_v38  ;;  %v11579_v21 = vshrl.u32 %v9864_v6, 16  ;;  %v11578_v4 = vshll.u32 %v9864_v6, 16  ;;  %v2183_v60 = vor.u32 %v11714_v47, %v9793_v28  ;;  %v7391_v47 = vld [vmem:[%s8244_s24 + $0x158] sm:$0xff] }
 0x22d   : > { %11711 = vst [vmem:[#allocation56_spill] sm:$0xff] %v9848_v44  ;;  %5171 = vmatpush.bf16.msra.mxu2 %v7394_v33  ;;  %v7393_v44 = vld [vmem:[%s8244_s24 + $0x168] sm:$0xff]  ;;  %v2713_v33 = vor.u32 %v2712_v11, %v2709_v29  ;;  %v9882_v61 = vrot.slane %v11715_v26, 1  ;;  %v9887_v53 = vsel %vm2676_vm0, %v9774_v42, %v9862_v22  ;;  %v3319_v28 = vrot.slane %v3317_v16, 3 }
 0x22e   : > { %v9843_v18 = vpop.f32.mrf.mxu3  ;;  %5104 = vmatmul.bf16.gmra.mxu1 %v3263_v10  ;;  %11712 = vst [vmem:[#allocation57_spill] sm:$0xff] %v9862_v22  ;;  %v3314_v10 = vshrl.u32 %v2373_v50, 16  ;;  %v2251_v7 = vsel %vm2195_vm2, %v9779_v2, %v11580_v27  ;;  %v7392_v50 = vld [vmem:[%s8244_s24 + $0x160] sm:$0xff] }
 0x22f   : > { %11716 = vst [vmem:[#allocation59_spill] sm:$0xff] %v9887_v53  ;;  %v2722_v42 = vsel %vm2676_vm0, %v2713_v33, %v9869_v0  ;;  %v3827_v11 = vshrl.u32 %v2251_v7, 16  ;;  %v2188_v16 = vsel %vm2016_vm1, %v2183_v60, %v9882_v61  ;;  %v7613_v33 = vunpack.c.h.b16 %v9816_v24 }
 0x230   : > { %v9867_v41 = vpop.f32.mrf.mxu0  ;;  %v3316_v36 = vrot.slane %v3314_v10, 2  ;;  %v3830_v10 = vshll.u32 %v2251_v7, 16 }
 0x231   : > { %11713 = vst [vmem:[#allocation58_spill] sm:$0xff] %v9867_v41  ;;  %5172 = vmatpush.bf16.msra.mxu2 %v7393_v44  ;;  %v9891_v44 = vor.u32 %v3163_v46, %v3160_v40  ;;  %v3825_v46 = vsel %vm2676_vm0, %v9800_v58, %v9871_v34  ;;  %v2380_v40 = vrot.slane %v11578_v4, 6  ;;  %v11723_v41 = vshll.u32 %v9772_v13, 16 }
 0x232   : > { %v4770_v25 = vpop.f32.mrf.mxu2  ;;  %v9919_v58 = vor.u32 %v3319_v28, %v3316_v36  ;;  %v3832_v36 = vrot.slane %v3830_v10, 3  ;;  %v2247_v28 = vpack.c.b16 %v7613_v33, %v7613_v33 }
 0x233   : > { %v9873_v39 = vpop.f32.mrf.mxu1  ;;  %v9894_v38 = vadd.f32 %v4770_v25, %v9707_v14  ;;  %5035 = vmatmul.bf16.gmra.mxu0 %v9887_v53  ;;  %v2377_v14 = vrot.slane %v11579_v21, 5  ;;  %v9914_v29 = vsel %vm2676_vm0, %v9699_v9, %v9891_v44  ;;  %v3876_v9 = vshrl.u32 %v2188_v16, 16 }
 0x235   : > { %11717 = vst [vmem:[#allocation60_spill] sm:$0xff] %v9894_v38  ;;  %5173 = vmatpush.bf16.msra.mxu2 %v7392_v50  ;;  %v3879_v50 = vshll.u32 %v2188_v16, 16  ;;  %v9926_v4 = vor.u32 %v2380_v40, %v2377_v14  ;;  %v3321_v14 = vsel %vm2676_vm0, %v9830_v31, %v9919_v58  ;;  %v7410_v40 = vld [vmem:[%s8244_s24 + $0x1f0] sm:$0xff]  ;;  %v3878_v33 = vrot.slane %v3876_v9, 2 }
 0x236   : > { %v9889_v32 = vpop.f32.mrf.mxu3  ;;  %v7390_v16 = vld [vmem:[%s8244_s24 + $0x150] sm:$0xff]  ;;  %5399 = vmatpush.bf16.msra.mxu0 %v7410_v40 }
 0x237   : > { %4812 = vmatmul.bf16.gmra.mxu2 %v3825_v46  ;;  %v11719_v46 = vshrl.u32 %v9688_v12, 16  ;;  %v3881_v2 = vrot.slane %v3879_v50, 3 }
 0x238   : > { %v9922_v26 = vpop.f32.mrf.mxu0 }
 0x239   : > { %11718 = vst [vmem:[#allocation61_spill] sm:$0xff] %v9922_v26  ;;  %5174 = vmatpush.bf16.msra.mxu2 %v7391_v47  ;;  %v2563_v21 = vrot.slane %v11719_v46, 6  ;;  %v2382_v47 = vsel %vm2275_vm3, %v9836_v49, %v9926_v4  ;;  %v7409_v46 = vld [vmem:[%s8244_s24 + $0x1e8] sm:$0xff]  ;;  %v11722_v26 = vshrl.u32 %v9772_v13, 16  ;;  %v9955_v49 = vrot.slane %v2247_v28, 1 }
 0x23a   : > { %v4773_v7 = vpop.f32.mrf.mxu2  ;;  %v3375_v9 = vshll.u32 %v2382_v47, 16  ;;  %5400 = vmatpush.bf16.msra.mxu0 %v7409_v46 }
 0x23b   : > { %4836 = vmatmul.bf16.vlgmr.msrb.gmra.mxu3 %v2722_v42  ;;  %v9924_v25 = vpop.f32.mrf.mxu1  ;;  %v3829_v42 = vrot.slane %v3827_v11, 2  ;;  %v9933_v27 = vadd.f32 %v4773_v7, %v9753_v45  ;;  %v11721_v11 = vshll.u32 %v9688_v12, 16  ;;  %v7389_v45 = vld [vmem:[%s8244_s24 + $0x148] sm:$0xff]  ;;  %v9947_v7 = vld [vmem:[#allocation3 + $0x70] sm:$0xff]   ;;  %v2567_v31 = vrot.slane %v11722_v26, 6 }
 0x23c   : > { %v2384_v53 = vshrl.u32 %v9947_v7, 16  ;;  %v2387_v38 = vshll.u32 %v9947_v7, 16  ;;  %v7408_v7 = vld [vmem:[%s8244_s24 + $0x1e0] sm:$0xff] }
 0x23d   : > { %11720 = vst [vmem:[#allocation62_spill] sm:$0xff] %v9933_v27  ;;  %v2564_v10 = vrot.slane %v11721_v11, 7  ;;  %5175 = vmatpush.bf16.msra.mxu2 %v7390_v16  ;;  %v9953_v27 = vor.u32 %v3832_v36, %v3829_v42  ;;  %v3372_v11 = vshrl.u32 %v2382_v47, 16  ;;  %v9970_v36 = vor.u32 %v3881_v2, %v3878_v33 }
 0x23e   : > { %v9928_v60 = vpop.f32.mrf.mxu3  ;;  %5109 = vmatmul.bf16.gmra.mxu1 %v3321_v14  ;;  %v2568_v14 = vrot.slane %v11723_v41, 7  ;;  %v11725_v47 = vrot.slane %v9854_v51, 1  ;;  %v2389_v2 = vrot.slane %v2387_v38, 6  ;;  %v2838_v51 = vsel %vm2676_vm0, %v9869_v0, %v8758_v59  ;;  %5401 = vmatpush.bf16.msra.mxu0 %v7408_v7 }
 0x23f   : > { %v2565_v12 = vor.u32 %v2564_v10, %v2563_v21  ;;  %v3834_v42 = vsel %vm2676_vm0, %v9862_v22, %v9953_v27  ;;  %v3374_v46 = vrot.slane %v3372_v11, 2  ;;  %v7407_v11 = vld [vmem:[%s8244_s24 + $0x1d8] sm:$0xff]  ;;  %v11729_v7 = vshrl.u32 %v9864_v6, 16 }
 0x240   : > { %v9957_v40 = vor.u32 %v2568_v14, %v2567_v31  ;;  %v9959_v16 = vpop.f32.mrf.mxu0  ;;  %v7388_v31 = vld [vmem:[%s8244_s24 + $0x140] sm:$0xff] }
 0x241   : > { %11724 = vst [vmem:[#allocation63_spill] sm:$0xff] %v9959_v16  ;;  %v2566_v41 = vsel %vm2526_vm4, %v9692_v3, %v2565_v12  ;;  %5176 = vmatpush.bf16.msra.mxu2 %v7389_v45  ;;  %v2253_v3 = vsel %vm2195_vm2, %v11725_v47, %v9955_v49  ;;  %v3377_v45 = vrot.slane %v3375_v9, 3 }
 0x242   : > { %v3216_v21 = vshrl.u32 %v2566_v41, 16  ;;  %v3219_v26 = vshll.u32 %v2566_v41, 16  ;;  %v4775_v50 = vpop.f32.mrf.mxu2  ;;  %v2386_v41 = vrot.slane %v2384_v53, 5  ;;  %v2570_v16 = vsel %vm2526_vm4, %v2565_v12, %v9957_v40  ;;  %5402 = vmatpush.bf16.msra.mxu0 %v7407_v11 }
 0x243   : > { %v9965_v13 = vpop.f32.mrf.mxu1  ;;  %v9979_v10 = vadd.f32 %v4775_v50, %v9787_v48  ;;  %5040 = vmatmul.bf16.gmra.mxu0 %v3834_v42  ;;  %v11727_v48 = vshrl.u32 %v9738_v5, 16  ;;  %v3274_v9 = vshrl.u32 %v2570_v16, 16  ;;  %v3277_v42 = vshll.u32 %v2570_v16, 16 }
 0x244   : > { %v3218_v14 = vrot.slane %v3216_v21, 2  ;;  %v3221_v33 = vrot.slane %v3219_v26, 3  ;;  %v3883_v21 = vsel %vm2676_vm0, %v9871_v34, %v9970_v36  ;;  %v3894_v26 = vshrl.u32 %v2253_v3, 16 }
 0x245   : > { %11726 = vst [vmem:[#allocation64_spill] sm:$0xff] %v9979_v10  ;;  %v2191_v50 = vor.u32 %v11727_v48, %v9882_v61  ;;  %5177 = vmatpush.bf16.msra.mxu2 %v7388_v31  ;;  %v3897_v47 = vshll.u32 %v2253_v3, 16  ;;  %v9995_v22 = vor.u32 %v3377_v45, %v3374_v46  ;;  %v3276_v59 = vrot.slane %v3274_v9, 2 }
 0x246   : > { %v9972_v28 = vpop.f32.mrf.mxu3  ;;  %v3222_v12 = vor.u32 %v3221_v33, %v3218_v14  ;;  %v3279_v0 = vrot.slane %v3277_v42, 3  ;;  %v9999_v61 = vor.u32 %v2389_v2, %v2386_v41  ;;  %v2571_v34 = vrot.slane %v11729_v7, 6 }
 0x247   : > { %4817 = vmatmul.bf16.gmra.mxu2 %v3883_v21  ;;  %v3943_v31 = vshrl.u32 %v2191_v50, 16  ;;  %v11730_v45 = vshll.u32 %v9864_v6, 16  ;;  %v2575_v33 = vrot.slane %v2384_v53, 6  ;;  %v3946_v48 = vshll.u32 %v2191_v50, 16  ;;  %v7402_v21 = vld [vmem:[%s8244_s24 + $0x1b0] sm:$0xff] }
 0x248   : > { %v9997_v5 = vpop.f32.mrf.mxu0  ;;  %v10003_v16 = vsel %vm2676_vm0, %v9891_v44, %v3222_v12  ;;  %v3280_v46 = vor.u32 %v3279_v0, %v3276_v59  ;;  %v3899_v44 = vrot.slane %v3897_v47, 3  ;;  %v2576_v9 = vrot.slane %v2387_v38, 7  ;;  %v7406_v59 = vld [vmem:[%s8244_s24 + $0x1d0] sm:$0xff]  ;;  %v10024_v0 = vld [vmem:[#allocation3 + $0x78] sm:$0xff]   ;;  %5285 = vmatpush.bf16.msra.mxu3 %v7402_v21  ;;  %v7405_v38 = vld [vmem:[%s8244_s24 + $0x1c8] sm:$0xff] }
 0x249   : > { %11728 = vst [vmem:[#allocation65_spill] sm:$0xff] %v9997_v5  ;;  %v2572_v14 = vrot.slane %v11730_v45, 7  ;;  %v3379_v11 = vsel %vm2676_vm0, %v9919_v58, %v9995_v22  ;;  %v3945_v50 = vrot.slane %v3943_v31, 2  ;;  %5403 = vmatpush.bf16.msra.mxu0 %v7406_v59 }
 0x24a   : > { %v4778_v41 = vpop.f32.mrf.mxu2  ;;  %v10022_v6 = vsel %vm2676_vm0, %v3222_v12, %v3280_v46  ;;  %v3948_v12 = vrot.slane %v3946_v48, 3 }
 0x24b   : > { %4841 = vmatmul.bf16.gmra.mxu3 %v2838_v51  ;;  %v10007_v3 = vpop.f32.mrf.mxu1  ;;  %v3896_v51 = vrot.slane %v3894_v26, 2  ;;  %v10014_v42 = vadd.f32 %v4778_v41, %v9757_v17  ;;  %v2573_v53 = vor.u32 %v2572_v14, %v2571_v34  ;;  %v10026_v26 = vor.u32 %v2576_v9, %v2575_v33 }
 0x24c   : > { %v2391_v17 = vsel %vm2275_vm3, %v9926_v4, %v9999_v61  ;;  %v3949_v59 = vor.u32 %v3948_v12, %v3945_v50  ;;  %v8084_v4 = vld [vmem:[#allocation3 + $0x18] sm:$0xff] }
 0x24d   : > { %11731 = vst [vmem:[#allocation66_spill] sm:$0xff] %v10014_v42  ;;  %v2574_v58 = vsel %vm2526_vm4, %v9957_v40, %v2573_v53  ;;  %v10034_v47 = vor.u32 %v3899_v44, %v3896_v51  ;;  %v2578_v31 = vsel %vm2526_vm4, %v2573_v53, %v10026_v26  ;;  %v3430_v40 = vshrl.u32 %v2391_v17, 16  ;;  %5404 = vmatpush.bf16.msra.mxu0 %v7405_v38  ;;  %v7418_v38 = vld [vmem:[%s8244_s24 + $0x230] sm:$0xff] }
 0x24e   : > { %v10011_v2 = vpop.f32.mrf.mxu3  ;;  %5114 = vmatmul.bf16.gmra.mxu1 %v3379_v11  ;;  %v3332_v7 = vshrl.u32 %v2574_v58, 16  ;;  %v3335_v34 = vshll.u32 %v2574_v58, 16  ;;  %v3390_v9 = vshrl.u32 %v2578_v31, 16  ;;  %v3433_v51 = vshll.u32 %v2391_v17, 16  ;;  %v7404_v17 = vld [vmem:[%s8244_s24 + $0x1c0] sm:$0xff] }
 0x24f   : > { %v3393_v44 = vshll.u32 %v2578_v31, 16  ;;  %v3901_v21 = vsel %vm2676_vm0, %v9953_v27, %v10034_v47  ;;  %v10052_v45 = vrot.slane %v8084_v4, 6  ;;  %v11736_v27 = vshll.u32 %v10024_v0, 16  ;;  %5513 = vmatpush.bf16.msra.mxu1 %v7418_v38 }
 0x250   : > { %v10039_v14 = vpop.f32.mrf.mxu0  ;;  %v3334_v33 = vrot.slane %v3332_v7, 2  ;;  %v3337_v41 = vrot.slane %v3335_v34, 3  ;;  %v3392_v7 = vrot.slane %v3390_v9, 2 }
 0x251   : > { %11732 = vst [vmem:[#allocation67_spill] sm:$0xff] %v10039_v14  ;;  %v3395_v31 = vrot.slane %v3393_v44, 3  ;;  %v11735_v14 = vshrl.u32 %v10024_v0, 16  ;;  %v2398_v50 = vrot.slane %v11736_v27, 6  ;;  %5405 = vmatpush.bf16.msra.mxu0 %v7404_v17  ;;  %v3950_v44 = vsel %vm2676_vm0, %v9970_v36, %v3949_v59 }
 0x252   : > { %v4780_v48 = vpop.f32.mrf.mxu2  ;;  %v3338_v58 = vor.u32 %v3337_v41, %v3334_v33  ;;  %11734 = vst [vmem:[#allocation69_spill] sm:$0xff] %v10052_v45  ;;  %v3432_v33 = vrot.slane %v3430_v40, 2  ;;  %v8085_v41 = vld [vmem:[#allocation3 + $0x10] sm:$0xff] }
 0x253   : > { %v10042_v11 = vpop.f32.mrf.mxu1  ;;  %v10050_v34 = vadd.f32 %v4780_v48, %v9802_v1  ;;  %5045 = vmatmul.bf16.gmra.mxu0 %v3901_v21  ;;  %v2395_v5 = vrot.slane %v11735_v14, 5  ;;  %v3435_v1 = vrot.slane %v3433_v51, 3  ;;  %v2468_v9 = vrot.slane %v8085_v41, 6 }
 0x254   : > { %v10061_v12 = vsel %vm2676_vm0, %v3280_v46, %v3338_v58  ;;  %v10063_v4 = vor.u32 %v3395_v31, %v3392_v7  ;;  %v3961_v48 = vshrl.u32 %v9955_v49, 16  ;;  %v3964_v14 = vshll.u32 %v9955_v49, 16 }
 0x255   : > { %11733 = vst [vmem:[#allocation68_spill] sm:$0xff] %v10050_v34  ;;  %v2470_v46 = vsel %vm2467_vm5, %v2468_v9, %v10052_v45  ;;  %v2399_v21 = vor.u32 %v2398_v50, %v2395_v5  ;;  %v3436_v36 = vor.u32 %v3435_v1, %v3432_v33  ;;  %v2758_v41 = vshrl.u32 %v2468_v9, 16  ;;  %v10089_v50 = vld [vmem:[#allocation3 + $0x80] sm:$0xff]  }
 0x256   : > { %v10047_v53 = vpop.f32.mrf.mxu3  ;;  %v10074_v40 = vsel %vm2676_vm0, %v3338_v58, %v10063_v4  ;;  %v3963_v49 = vrot.slane %v3961_v48, 2  ;;  %v3966_v38 = vrot.slane %v3964_v14, 3  ;;  %v2766_v31 = vshrl.u32 %v2470_v46, 16 }
 0x257   : > { %4822 = vmatmul.bf16.gmra.mxu2 %v3950_v44  ;;  %v3437_v58 = vsel %vm2676_vm0, %v9995_v22, %v3436_v36  ;;  %v2761_v44 = vshll.u32 %v2468_v9, 16  ;;  %v2400_v5 = vsel %vm2275_vm3, %v9999_v61, %v2399_v21 }
 0x258   : > { %v10076_v51 = vpop.f32.mrf.mxu0  ;;  %v3967_v33 = vor.u32 %v3966_v38, %v3963_v49  ;;  %v2768_v1 = vrot.slane %v2766_v31, 2  ;;  %v3488_v14 = vshrl.u32 %v2400_v5, 16 }
 0x259   : > { %11737 = vst [vmem:[#allocation70_spill] sm:$0xff] %v10076_v51  ;;  %v3491_v51 = vshll.u32 %v2400_v5, 16 }
 0x25a   : > { %v4783_v59 = vpop.f32.mrf.mxu2  ;;  %v3968_v61 = vsel %vm2676_vm0, %v10034_v47, %v3967_v33  ;;  %v3490_v31 = vrot.slane %v3488_v14, 2 }
 0x25b   : > { %4846 = vmatmul.bf16.gmra.mxu3 %v8811_v63  ;;  %v10078_v7 = vpop.f32.mrf.mxu1  ;;  %v2769_v63 = vshll.u32 %v2470_v46, 16  ;;  %v10083_v27 = vadd.f32 %v4783_v59, %v9843_v18  ;;  %v2760_v18 = vrot.slane %v2758_v41, 2  ;;  %v2763_v59 = vrot.slane %v2761_v44, 3  ;;  %v10104_v41 = vld [vmem:[#allocation3 + $0x20] sm:$0xff] }
 0x25c   : > { %v2471_v44 = vrot.slane %v10104_v41, 6 }
 0x25d   : > { %11738 = vst [vmem:[#allocation71_spill] sm:$0xff] %v10083_v27  ;;  %v2771_v48 = vrot.slane %v2769_v63, 3  ;;  %v11584_v27 = vshrl.u32 %v10089_v50, 16  ;;  %v3493_v63 = vrot.slane %v3491_v51, 3  ;;  %v2764_v5 = vor.u32 %v2763_v59, %v2760_v18 }
 0x25e   : > { %v10080_v17 = vpop.f32.mrf.mxu3  ;;  %5119 = vmatmul.bf16.gmra.mxu1 %v3437_v58  ;;  %v2472_v51 = vsel %vm2467_vm5, %v10052_v45, %v2471_v44 }
 0x25f   : > { %v2772_v34 = vor.u32 %v2771_v48, %v2768_v1  ;;  %v2404_v22 = vrot.slane %v11584_v27, 5 }
 0x260   : > { %v10091_v46 = vpop.f32.mrf.mxu0 }
 0x261   : > { %11739 = vst [vmem:[#allocation72_spill] sm:$0xff] %v10091_v46  ;;  %v11741_v46 = vshll.u32 %v10089_v50, 16  ;;  %v2773_v33 = vsel %vm2676_vm0, %v2764_v5, %v2772_v34 }
 0x262   : > { %v4785_v9 = vpop.f32.mrf.mxu2 }
 0x263   : > { %v10095_v58 = vpop.f32.mrf.mxu1  ;;  %v10102_v38 = vadd.f32 %v4785_v9, %v9889_v32  ;;  %5050 = vmatmul.bf16.gmra.mxu0 %v3968_v61  ;;  %v2407_v47 = vrot.slane %v11741_v46, 6  ;;  %v3494_v32 = vor.u32 %v3493_v63, %v3490_v31  ;;  %v2783_v9 = vshrl.u32 %v2472_v51, 16  ;;  %v10126_v31 = vld [vmem:[#allocation3 + $0x88] sm:$0xff]  }
 0x264   : > { %v2786_v61 = vshll.u32 %v2472_v51, 16  ;;  %v11747_v51 = vshrl.u32 %v10126_v31, 16 }
 0x265   : > { %11740 = vst [vmem:[#allocation73_spill] sm:$0xff] %v10102_v38  ;;  %v2408_v48 = vor.u32 %v2407_v47, %v2404_v22  ;;  %v3495_v5 = vsel %vm2676_vm0, %v3436_v36, %v3494_v32  ;;  %v2785_v63 = vrot.slane %v2783_v9, 2  ;;  %v11751_v38 = vshll.u32 %v10024_v0, 16 }
 0x266   : > { %v10099_v49 = vpop.f32.mrf.mxu3 }
 0x267   : > { %5178 = vmatmul.bf16.vlgmr.msra.gmra.mxu2 %v2773_v33  ;;  %v2788_v33 = vrot.slane %v2786_v61, 3 }
 0x268   : > { %v10115_v1 = vpop.f32.mrf.mxu0 }
 0x269   : > { %11742 = vst [vmem:[#allocation74_spill] sm:$0xff] %v10115_v1  ;;  %v10134_v36 = vor.u32 %v2788_v33, %v2785_v63  ;;  %v11748_v63 = vshll.u32 %v10126_v31, 16 }
 0x26a   : > { %v4788_v18 = vpop.f32.mrf.mxu2 }
 0x26b   : > { %4851 = vmatmul.bf16.gmra.mxu3 %v8869_v57  ;;  %v10117_v14 = vpop.f32.mrf.mxu1  ;;  %v10122_v46 = vadd.f32 %v4788_v18, %v9928_v60  ;;  %v2409_v57 = vsel %vm2275_vm3, %v2399_v21, %v2408_v48  ;;  %11745 = vst [vmem:[#allocation77_spill] sm:$0xff] %v10134_v36  ;;  %v2416_v33 = vrot.slane %v11748_v63, 6  ;;  %v2580_v63 = vrot.slane %v11751_v38, 7  ;;  %v10175_v38 = vld [vmem:[#allocation3 + $0x90] sm:$0xff]  }
 0x26c   : > { %v3546_v22 = vshrl.u32 %v2409_v57, 16  ;;  %v3549_v47 = vshll.u32 %v2409_v57, 16  ;;  %v10142_v57 = vld [vmem:[#allocation3 + $0x28] sm:$0xff]  }
 0x26d   : > { %11743 = vst [vmem:[#allocation75_spill] sm:$0xff] %v10122_v46  ;;  %v2473_v1 = vrot.slane %v10142_v57, 6  ;;  %v2413_v46 = vrot.slane %v11747_v51, 5 }
 0x26e   : > { %v10119_v59 = vpop.f32.mrf.mxu3  ;;  %5124 = vmatmul.bf16.gmra.mxu1 %v3495_v5  ;;  %v3548_v9 = vrot.slane %v3546_v22, 2  ;;  %v3551_v61 = vrot.slane %v3549_v47, 3 }
 0x26f   : > { %v2474_v22 = vsel %vm2467_vm5, %v2471_v44, %v2473_v1 }
 0x270   : > { %v10128_v27 = vpop.f32.mrf.mxu0  ;;  %v2862_v42 = vshll.u32 %v2474_v22, 16 }
 0x271   : > { %11744 = vst [vmem:[#allocation76_spill] sm:$0xff] %v10128_v27  ;;  %v7401_v27 = vld [vmem:[%s8244_s24 + $0x1a8] sm:$0xff] }
 0x272   : > { %v4790_v18 = vpop.f32.mrf.mxu2  ;;  %5286 = vmatpush.bf16.msra.mxu3 %v7401_v27 }
 0x273   : > { %v10132_v60 = vpop.f32.mrf.mxu1  ;;  %v10139_v21 = vadd.f32 %v4790_v18, %v9972_v28  ;;  %5406 = vmatmul.bf16.vlgmr.msra.gmra.mxu0 %v9314_v30  ;;  %v2857_v28 = vsel %vm2676_vm0, %v2772_v34, %v10134_v36  ;;  %v3552_v30 = vor.u32 %v3551_v61, %v3548_v9  ;;  %v2417_v18 = vor.u32 %v2416_v33, %v2413_v46  ;;  %v7417_v9 = vld [vmem:[%s8244_s24 + $0x228] sm:$0xff] }
 0x274   : > { %5514 = vmatpush.bf16.msra.mxu1 %v7417_v9 }
 0x275   : > { %11746 = vst [vmem:[#allocation78_spill] sm:$0xff] %v10139_v21  ;;  %v11750_v21 = vshrl.u32 %v10024_v0, 16  ;;  %v3553_v46 = vsel %vm2676_vm0, %v3494_v32, %v3552_v30 }
 0x276   : > { %v10136_v5 = vpop.f32.mrf.mxu3 }
 0x277   : > { %5183 = vmatmul.bf16.gmra.mxu2 %v2857_v28  ;;  %v2579_v51 = vrot.slane %v11750_v21, 6  ;;  %v2859_v28 = vshrl.u32 %v2474_v22, 16  ;;  %v2418_v21 = vsel %vm2275_vm3, %v2408_v48, %v2417_v18  ;;  %v11587_v48 = vshll.u32 %v10175_v38, 16 }
 0x278   : > { %v10154_v47 = vpop.f32.mrf.mxu0 }
 0x279   : > { %11749 = vst [vmem:[#allocation79_spill] sm:$0xff] %v10154_v47  ;;  %v2861_v22 = vrot.slane %v2859_v28, 2  ;;  %v10187_v28 = vld [vmem:[#allocation3 + $0x30] sm:$0xff]  }
 0x27a   : > { %v4793_v45 = vpop.f32.mrf.mxu2 }
 0x27b   : > { %4856 = vmatmul.bf16.gmra.mxu3 %v8919_v37  ;;  %v10160_v27 = vpop.f32.mrf.mxu1  ;;  %v10164_v37 = vor.u32 %v2580_v63, %v2579_v51  ;;  %v10167_v44 = vadd.f32 %v4793_v45, %v10011_v2  ;;  %v2864_v51 = vrot.slane %v2862_v42, 3  ;;  %v3604_v63 = vshrl.u32 %v2418_v21, 16 }
 0x27c   : > { %11752 = vst [vmem:[#allocation80_spill] sm:$0xff] %v10160_v27  ;;  %v3607_v2 = vshll.u32 %v2418_v21, 16  ;;  %v2475_v42 = vrot.slane %v10187_v28, 6 }
 0x27d   : > { %11753 = vst [vmem:[#allocation81_spill] sm:$0xff] %v10167_v44  ;;  %v2582_v0 = vsel %vm2526_vm4, %v10026_v26, %v10164_v37  ;;  %v2865_v10 = vor.u32 %v2864_v51, %v2861_v22  ;;  %v2425_v22 = vrot.slane %v11587_v48, 6 }
 0x27e   : > { %v10162_v34 = vpop.f32.mrf.mxu3  ;;  %5129 = vmatmul.bf16.gmra.mxu1 %v3553_v46  ;;  %v3448_v61 = vshrl.u32 %v2582_v0, 16  ;;  %v3451_v33 = vshll.u32 %v2582_v0, 16  ;;  %v11588_v46 = vshrl.u32 %v10175_v38, 16  ;;  %v3606_v0 = vrot.slane %v3604_v63, 2 }
 0x27f   : > { %v10205_v51 = vsel %vm2676_vm0, %v10134_v36, %v2865_v10 }
 0x280   : > { %v3450_v45 = vrot.slane %v3448_v61, 2  ;;  %v3453_v47 = vrot.slane %v3451_v33, 3  ;;  %v10177_v32 = vpop.f32.mrf.mxu0  ;;  %v3609_v61 = vrot.slane %v3607_v2, 3  ;;  %v2422_v33 = vrot.slane %v11588_v46, 5  ;;  %11756 = vst [vmem:[#allocation84_spill] sm:$0xff] %v10205_v51 }
 0x281   : > { %11754 = vst [vmem:[#allocation82_spill] sm:$0xff] %v10177_v32 }
 0x282   : > { %v10183_v26 = vor.u32 %v3453_v47, %v3450_v45  ;;  %v4795_v9 = vpop.f32.mrf.mxu2 }
 0x283   : > { %v10181_v44 = vpop.f32.mrf.mxu1  ;;  %v10191_v21 = vadd.f32 %v4795_v9, %v10047_v53  ;;  %5411 = vmatmul.bf16.gmra.mxu0 %v9371_v56  ;;  %v3610_v56 = vor.u32 %v3609_v61, %v3606_v0  ;;  %v2476_v53 = vsel %vm2467_vm5, %v2473_v1, %v2475_v42  ;;  %v10221_v0 = vld [vmem:[#allocation3 + $0x98] sm:$0xff]  }
 0x284   : > { %v10197_v47 = vsel %vm2676_vm0, %v10063_v4, %v10183_v26  ;;  %v2426_v4 = vor.u32 %v2425_v22, %v2422_v33  ;;  %v2917_v48 = vshrl.u32 %v2476_v53, 16  ;;  %v2920_v46 = vshll.u32 %v2476_v53, 16 }
 0x285   : > { %11755 = vst [vmem:[#allocation83_spill] sm:$0xff] %v10191_v21  ;;  %v3611_v21 = vsel %vm2676_vm0, %v3552_v30, %v3610_v56 }
 0x286   : > { %v10185_v27 = vpop.f32.mrf.mxu3  ;;  %v2919_v1 = vrot.slane %v2917_v48, 2  ;;  %v2922_v61 = vrot.slane %v2920_v46, 3 }
 0x287   : > { %5188 = vmatmul.bf16.gmra.mxu2 %v10205_v51 }
 0x288   : > { %v10210_v63 = vpop.f32.mrf.mxu0 }
 0x289   : > { %11757 = vst [vmem:[#allocation85_spill] sm:$0xff] %v10210_v63  ;;  %v11591_v63 = vshrl.u32 %v10221_v0, 16 }
 0x28a   : > { %v4798_v45 = vpop.f32.mrf.mxu2 }
 0x28b   : > { %4861 = vmatmul.bf16.gmra.mxu3 %v8968_v23  ;;  %v10212_v2 = vpop.f32.mrf.mxu1  ;;  %v10217_v32 = vadd.f32 %v4798_v45, %v10080_v17  ;;  %v2427_v23 = vsel %vm2275_vm3, %v2417_v18, %v2426_v4  ;;  %v2923_v45 = vor.u32 %v2922_v61, %v2919_v1  ;;  %v2431_v51 = vrot.slane %v11591_v63, 5 }
 0x28c   : > { %v3662_v33 = vshrl.u32 %v2427_v23, 16  ;;  %v3665_v22 = vshll.u32 %v2427_v23, 16 }
 0x28d   : > { %11758 = vst [vmem:[#allocation86_spill] sm:$0xff] %v10217_v32  ;;  %v10243_v61 = vsel %vm2676_vm0, %v2865_v10, %v2923_v45 }
 0x28e   : > { %v10214_v9 = vpop.f32.mrf.mxu3  ;;  %5134 = vmatmul.bf16.gmra.mxu1 %v3611_v21  ;;  %v3664_v46 = vrot.slane %v3662_v33, 2  ;;  %v3667_v48 = vrot.slane %v3665_v22, 3  ;;  %v10235_v21 = vld [vmem:[#allocation3 + $0x38] sm:$0xff]   ;;  %11763 = vst [vmem:[#allocation90_spill] sm:$0xff] %v10243_v61 }
 0x28f   : > { %v2477_v23 = vrot.slane %v10235_v21, 6 }
 0x290   : > { %v10225_v36 = vpop.f32.mrf.mxu0 }
 0x291   : > { %11759 = vst [vmem:[#allocation87_spill] sm:$0xff] %v10225_v36  ;;  %v11762_v36 = vshll.u32 %v10221_v0, 16 }
 0x292   : > { %v4800_v17 = vpop.f32.mrf.mxu2 }
 0x293   : > { %v10227_v53 = vpop.f32.mrf.mxu1  ;;  %v10232_v18 = vadd.f32 %v4800_v17, %v10099_v49  ;;  %5416 = vmatmul.bf16.gmra.mxu0 %v9447_v20  ;;  %v2434_v1 = vrot.slane %v11762_v36, 6  ;;  %v3668_v20 = vor.u32 %v3667_v48, %v3664_v46  ;;  %v2478_v49 = vsel %vm2467_vm5, %v2475_v42, %v2477_v23  ;;  %v10260_v42 = vld [vmem:[#allocation3 + $0xa0] sm:$0xff]  }
 0x294   : > { %11760 = vst [vmem:[#allocation88_spill] sm:$0xff] %v10227_v53  ;;  %v2975_v63 = vshrl.u32 %v2478_v49, 16  ;;  %v2978_v32 = vshll.u32 %v2478_v49, 16  ;;  %v7400_v53 = vld [vmem:[%s8244_s24 + $0x1a0] sm:$0xff]  ;;  %v11593_v49 = vshrl.u32 %v10260_v42, 16 }
 0x295   : > { %11761 = vst [vmem:[#allocation89_spill] sm:$0xff] %v10232_v18  ;;  %v2435_v33 = vor.u32 %v2434_v1, %v2431_v51  ;;  %5287 = vmatpush.bf16.msra.mxu3 %v7400_v53  ;;  %v10272_v53 = vld [vmem:[#allocation3 + $0x40] sm:$0xff]  }
 0x296   : > { %v10229_v30 = vpop.f32.mrf.mxu3  ;;  %11766 = vst [vmem:[#allocation93_spill] sm:$0xff] %v10260_v42  ;;  %v2977_v51 = vrot.slane %v2975_v63, 2  ;;  %v2980_v46 = vrot.slane %v2978_v32, 3 }
 0x297   : > { %5193 = vmatmul.bf16.gmra.mxu2 %v10243_v61  ;;  %v3669_v61 = vsel %vm2676_vm0, %v3610_v56, %v3668_v20 }
 0x298   : > { %v10255_v10 = vpop.f32.mrf.mxu0 }
 0x299   : > { %11765 = vst [vmem:[#allocation92_spill] sm:$0xff] %v10255_v10 }
 0x29a   : > { %v4803_v17 = vpop.f32.mrf.mxu2 }
 0x29b   : > { %4866 = vmatmul.bf16.gmra.mxu3 %v9021_v54  ;;  %v10248_v22 = vpop.f32.mrf.mxu1  ;;  %v10253_v36 = vadd.f32 %v4803_v17, %v10119_v59  ;;  %v2436_v54 = vsel %vm2275_vm3, %v2426_v4, %v2435_v33  ;;  %v11594_v59 = vshll.u32 %v10260_v42, 16 }
 0x29c   : > { %v3720_v48 = vshrl.u32 %v2436_v54, 16  ;;  %v3723_v1 = vshll.u32 %v2436_v54, 16  ;;  %v2440_v54 = vrot.slane %v11593_v49, 5 }
 0x29d   : > { %11764 = vst [vmem:[#allocation91_spill] sm:$0xff] %v10253_v36  ;;  %v2981_v36 = vor.u32 %v2980_v46, %v2977_v51  ;;  %v2443_v51 = vrot.slane %v11594_v59, 6 }
 0x29e   : > { %v10250_v18 = vpop.f32.mrf.mxu3  ;;  %5139 = vmatmul.bf16.gmra.mxu1 %v3669_v61  ;;  %v3722_v63 = vrot.slane %v3720_v48, 2  ;;  %v3725_v32 = vrot.slane %v3723_v1, 3  ;;  %v2479_v61 = vrot.slane %v10272_v53, 6 }
 0x29f   : > { %v2444_v48 = vor.u32 %v2443_v51, %v2440_v54 }
 0x2a0   : > { %v10279_v46 = vpop.f32.mrf.mxu0 }
 0x2a1   : > { %11769 = vst [vmem:[#allocation96_spill] sm:$0xff] %v10279_v46 }
 0x2a2   : > { %v4805_v10 = vpop.f32.mrf.mxu2 }
 0x2a3   : > { %v10264_v17 = vpop.f32.mrf.mxu1  ;;  %v10269_v4 = vadd.f32 %v4805_v10, %v10136_v5  ;;  %5421 = vmatmul.bf16.gmra.mxu0 %v9521_v35  ;;  %v3726_v35 = vor.u32 %v3725_v32, %v3722_v63  ;;  %v2480_v5 = vsel %vm2467_vm5, %v2477_v23, %v2479_v61  ;;  %v7416_v10 = vld [vmem:[%s8244_s24 + $0x220] sm:$0xff] }
 0x2a4   : > { %11767 = vst [vmem:[#allocation94_spill] sm:$0xff] %v10264_v17  ;;  %v10282_v17 = vsel %vm2676_vm0, %v2923_v45, %v2981_v36  ;;  %5515 = vmatpush.bf16.msra.mxu1 %v7416_v10  ;;  %v3033_v59 = vshrl.u32 %v2480_v5, 16  ;;  %v3036_v46 = vshll.u32 %v2480_v5, 16  ;;  %v11598_v10 = vshrl.u32 %v9828_v43, 16 }
 0x2a5   : > { %11768 = vst [vmem:[#allocation95_spill] sm:$0xff] %v10269_v4 }
 0x2a6   : > { %v10266_v56 = vpop.f32.mrf.mxu3  ;;  %11770 = vst [vmem:[#allocation97_spill] sm:$0xff] %v10282_v17  ;;  %v3035_v63 = vrot.slane %v3033_v59, 2  ;;  %v3038_v23 = vrot.slane %v3036_v46, 3 }
 0x2a7   : > { %5198 = vmatmul.bf16.gmra.mxu2 %v10282_v17  ;;  %v3727_v17 = vsel %vm2676_vm0, %v3668_v20, %v3726_v35 }
 0x2a8   : > { %v10297_v32 = vpop.f32.mrf.mxu0 }
 0x2a9   : > { %11773 = vst [vmem:[#allocation100_spill] sm:$0xff] %v10297_v32 }
 0x2aa   : > { %v4808_v49 = vpop.f32.mrf.mxu2 }
 0x2ab   : > { %4871 = vmatmul.bf16.gmra.mxu3 %v9068_v55  ;;  %v10288_v1 = vpop.f32.mrf.mxu1  ;;  %v10293_v45 = vadd.f32 %v4808_v49, %v10162_v34  ;;  %v2445_v55 = vsel %vm2275_vm3, %v2435_v33, %v2444_v48  ;;  %v3039_v34 = vor.u32 %v3038_v23, %v3035_v63 }
 0x2ac   : > { %11771 = vst [vmem:[#allocation98_spill] sm:$0xff] %v10288_v1  ;;  %v3778_v54 = vshrl.u32 %v2445_v55, 16  ;;  %v3781_v51 = vshll.u32 %v2445_v55, 16  ;;  %v11599_v1 = vshll.u32 %v9828_v43, 16  ;;  %v2449_v55 = vrot.slane %v11598_v10, 5 }
 0x2ad   : > { %11772 = vst [vmem:[#allocation99_spill] sm:$0xff] %v10293_v45  ;;  %v10317_v63 = vsel %vm2676_vm0, %v2981_v36, %v3039_v34 }
 0x2ae   : > { %v10290_v4 = vpop.f32.mrf.mxu3  ;;  %5144 = vmatmul.bf16.gmra.mxu1 %v3727_v17  ;;  %v3780_v33 = vrot.slane %v3778_v54, 2  ;;  %v3783_v59 = vrot.slane %v3781_v51, 3  ;;  %v10309_v17 = vld [vmem:[#allocation3 + $0x48] sm:$0xff]   ;;  %v2452_v32 = vrot.slane %v11599_v1, 6  ;;  %11776 = vst [vmem:[#allocation103_spill] sm:$0xff] %v10317_v63 }
 0x2af   : > { %v2481_v46 = vrot.slane %v10309_v17, 6 }
 0x2b0   : > { %v2453_v23 = vor.u32 %v2452_v32, %v2449_v55  ;;  %v10322_v54 = vpop.f32.mrf.mxu0  ;;  %v11601_v55 = vshrl.u32 %v9816_v24, 16 }
 0x2b1   : > { %11777 = vst [vmem:[#allocation104_spill] sm:$0xff] %v10322_v54  ;;  %v11602_v54 = vshll.u32 %v9816_v24, 16 }
 0x2b2   : > { %v4810_v5 = vpop.f32.mrf.mxu2 }
 0x2b3   : > { %v10301_v42 = vpop.f32.mrf.mxu1  ;;  %v10306_v20 = vadd.f32 %v4810_v5, %v10185_v27  ;;  %5426 = vmatmul.bf16.gmra.mxu0 %v9627_v52  ;;  %v3784_v52 = vor.u32 %v3783_v59, %v3780_v33  ;;  %v2482_v27 = vsel %vm2467_vm5, %v2479_v61, %v2481_v46 }
 0x2b4   : > { %11774 = vst [vmem:[#allocation101_spill] sm:$0xff] %v10301_v42  ;;  %v3094_v45 = vshll.u32 %v2482_v27, 16 }
 0x2b5   : > { %11775 = vst [vmem:[#allocation102_spill] sm:$0xff] %v10306_v20  ;;  %v3091_v20 = vshrl.u32 %v2482_v27, 16  ;;  %v3785_v36 = vsel %vm2676_vm0, %v3726_v35, %v3784_v52  ;;  %v10338_v35 = vld [vmem:[#allocation3 + $0x50] sm:$0xff]  }
 0x2b6   : > { %v10303_v49 = vpop.f32.mrf.mxu3  ;;  %v3096_v32 = vrot.slane %v3094_v45, 3 }
 0x2b7   : > { %5203 = vmatmul.bf16.gmra.mxu2 %v10317_v63  ;;  %v3093_v61 = vrot.slane %v3091_v20, 2 }
 0x2ba   : > { %v4813_v5 = vpop.f32.mrf.mxu2 }
 0x2bb   : > { %4876 = vmatmul.bf16.gmra.mxu3 %v9106_v62  ;;  %v10324_v51 = vpop.f32.mrf.mxu1  ;;  %v10327_v1 = vadd.f32 %v4813_v5, %v10214_v9  ;;  %v2454_v62 = vsel %vm2275_vm3, %v2444_v48, %v2453_v23  ;;  %v3097_v5 = vor.u32 %v3096_v32, %v3093_v61  ;;  %v2461_v61 = vrot.slane %v11602_v54, 6 }
 0x2bc   : > { %11778 = vst [vmem:[#allocation105_spill] sm:$0xff] %v10324_v51  ;;  %v3836_v33 = vshrl.u32 %v2454_v62, 16  ;;  %v3839_v59 = vshll.u32 %v2454_v62, 16  ;;  %v2458_v62 = vrot.slane %v11601_v55, 5 }
 0x2bd   : > { %11779 = vst [vmem:[#allocation106_spill] sm:$0xff] %v10327_v1  ;;  %v10355_v32 = vsel %vm2676_vm0, %v3039_v34, %v3097_v5 }
 0x2be   : > { %v4837_v10 = vpop.f32.mrf.mxu3  ;;  %5149 = vmatmul.bf16.gmra.mxu1 %v3785_v36  ;;  %v3838_v20 = vrot.slane %v3836_v33, 2  ;;  %v3841_v36 = vrot.slane %v3839_v59, 3  ;;  %11783 = vst [vmem:[#allocation110_spill] sm:$0xff] %v10355_v32 }
 0x2bf   : > { %v10331_v63 = vadd.f32 %v4837_v10, %v9126_v19  ;;  %v2483_v19 = vrot.slane %v10338_v35, 6  ;;  %v10341_v10 = vpop.f32.mrf.mxu0 }
 0x2c0   : > { %11781 = vst [vmem:[#allocation108_spill] sm:$0xff] %v10341_v10 }
 0x2c2   : > { %v4815_v9 = vpop.f32.mrf.mxu2 }
 0x2c3   : > { %v10336_v27 = vpop.f32.mrf.mxu1  ;;  %v10344_v48 = vadd.f32 %v4815_v9, %v10229_v30  ;;  %5431 = vmatmul.bf16.gmra.mxu0 %v9721_v8  ;;  %v11784_v30 = vld [vmem:[#allocation8_spill] sm:$0xff]  ;;  %v3842_v9 = vor.u32 %v3841_v36, %v3838_v20  ;;  %v2484_v8 = vsel %vm2467_vm5, %v2481_v46, %v2483_v19 }
 0x2c4   : > { %11780 = vst [vmem:[#allocation107_spill] sm:$0xff] %v10336_v27  ;;  %v3149_v10 = vshrl.u32 %v2484_v8, 16  ;;  %v3152_v54 = vshll.u32 %v2484_v8, 16 }
 0x2c5   : > { %11782 = vst [vmem:[#allocation109_spill] sm:$0xff] %v10344_v48  ;;  %v3843_v27 = vsel %vm2676_vm0, %v3784_v52, %v3842_v9  ;;  %v11787_v48 = vld [vmem:[#allocation10_spill] sm:$0xff] }
 0x2c6   : > { %v4839_v51 = vpop.f32.mrf.mxu3  ;;  %v3151_v36 = vrot.slane %v3149_v10, 2  ;;  %v11791_v10 = vld [vmem:[#allocation13_spill] sm:$0xff] }
 0x2c7   : > { %v10348_v45 = vadd.f32 %v4839_v51, %v9147_v15  ;;  %5208 = vmatmul.bf16.gmra.mxu2 %v10355_v32  ;;  %v7399_v15 = vld [vmem:[%s8244_s24 + $0x198] sm:$0xff]  ;;  %v10361_v51 = vor.u32 %v2461_v61, %v2458_v62  ;;  %v10374_v20 = vpop.f32.mrf.mxu0  ;;  %v3154_v62 = vrot.slane %v3152_v54, 3 }
 0x2c8   : > { %5288 = vmatpush.bf16.msra.mxu3 %v7399_v15  ;;  %11788 = vst [vmem:[#allocation10_spill] sm:$0xff] %v10374_v20  ;;  %v7415_v20 = vld [vmem:[%s8244_s24 + $0x218] sm:$0xff] }
 0x2c9   : > { %v2463_v46 = vsel %vm2275_vm3, %v2453_v23, %v10361_v51  ;;  %5516 = vmatpush.bf16.msra.mxu1 %v7415_v20 }
 0x2ca   : > { %v4818_v59 = vpop.f32.mrf.mxu2  ;;  %v3903_v61 = vshrl.u32 %v2463_v46, 16  ;;  %v3906_v15 = vshll.u32 %v2463_v46, 16 }
 0x2cb   : > { %4881 = vmatmul.bf16.gmra.mxu3 %v11784_v30  ;;  %v10363_v33 = vpop.f32.mrf.mxu1  ;;  %v10366_v34 = vadd.f32 %v4818_v59, %v10250_v18  ;;  %v10378_v59 = vor.u32 %v3154_v62, %v3151_v36 }
 0x2cc   : > { %11785 = vst [vmem:[#allocation8_spill] sm:$0xff] %v10363_v33  ;;  %v3908_v46 = vrot.slane %v3906_v15, 3  ;;  %v7414_v15 = vld [vmem:[%s8244_s24 + $0x210] sm:$0xff]  ;;  %v7412_v33 = vld [vmem:[%s8244_s24 + $0x200] sm:$0xff] }
 0x2cd   : > { %11786 = vst [vmem:[#allocation111_spill] sm:$0xff] %v10366_v34  ;;  %v10393_v36 = vsel %vm2676_vm0, %v3097_v5, %v10378_v59  ;;  %5517 = vmatpush.bf16.msra.mxu1 %v7414_v15  ;;  %v8094_v5 = vld [vmem:[#allocation3 + $0xb0] sm:$0xff]  }
 0x2ce   : > { %v4842_v55 = vpop.f32.mrf.mxu3  ;;  %5154 = vmatmul.bf16.gmra.mxu1 %v3843_v27  ;;  %11792 = vst [vmem:[#allocation13_spill] sm:$0xff] %v10393_v36  ;;  %v11794_v27 = vld [vmem:[#allocation14_spill] sm:$0xff]  ;;  %v10407_v20 = vrot.slane %v8094_v5, 6  ;;  %v1902_v5 = vld [vmem:[#allocation3 + $0xc0] sm:$0x1] }
 0x2cf   : > { %v10370_v30 = vadd.f32 %v4842_v55, %v11787_v48  ;;  %v10380_v55 = vld [vmem:[#allocation3 + $0x58] sm:$0xff]   ;;  %v3905_v48 = vrot.slane %v3903_v61, 2  ;;  %v10395_v62 = vpop.f32.mrf.mxu0 }
 0x2d0   : > { %11793 = vst [vmem:[#allocation114_spill] sm:$0xff] %v10395_v62 }
 0x2d1   : > { %11797 = vst [vmem:[#allocation115_spill] sm:$0xff] %v10407_v20 }
 0x2d2   : > { %v4820_v18 = vpop.f32.mrf.mxu2 }
 0x2d3   : > { %v10376_v8 = vpop.f32.mrf.mxu1  ;;  %v10384_v23 = vadd.f32 %v4820_v18, %v10266_v56  ;;  %5436 = vmatmul.bf16.gmra.mxu0 %v9914_v29  ;;  %v10399_v56 = vor.u32 %v3908_v46, %v3905_v48  ;;  %v11795_v29 = vrot.slane %v10380_v55, 6  ;;  %v11799_v46 = vld [vmem:[#allocation16_spill] sm:$0xff] }
 0x2d4   : > { %11789 = vst [vmem:[#allocation112_spill] sm:$0xff] %v10376_v8 }
 0x2d5   : > { %11790 = vst [vmem:[#allocation113_spill] sm:$0xff] %v10384_v23  ;;  %v2486_v61 = vsel %vm2467_vm5, %v2483_v19, %v11795_v29  ;;  %v3910_v48 = vsel %vm2676_vm0, %v3842_v9, %v10399_v56  ;;  %v7413_v29 = vld [vmem:[%s8244_s24 + $0x208] sm:$0xff] }
 0x2d6   : > { %v4844_v52 = vpop.f32.mrf.mxu3  ;;  %v3207_v62 = vshrl.u32 %v2486_v61, 16  ;;  %v3210_v8 = vshll.u32 %v2486_v61, 16  ;;  %5518 = vmatpush.bf16.msra.mxu1 %v7413_v29  ;;  %v10426_v61 = vld [vmem:[#allocation3 + $0xb8] sm:$0xff] }
 0x2d7   : > { %v10388_v54 = vadd.f32 %v4844_v52, %v11791_v10  ;;  %5213 = vmatmul.bf16.gmra.mxu2 %v10393_v36  ;;  %11801 = vst [vmem:[#allocation117_spill] sm:$0xff] %v10426_v61  ;;  %v2519_v36 = vrot.slane %v10426_v61, 6 }
 0x2d8   : > { %v3209_v9 = vrot.slane %v3207_v62, 2 }
 0x2da   : > { %v4823_v52 = vpop.f32.mrf.mxu2  ;;  %5519 = vmatpush.bf16.msra.mxu1 %v7412_v33 }
 0x2db   : > { %4886 = vmatmul.bf16.gmra.mxu3 %v11794_v27  ;;  %v10405_v18 = vpop.f32.mrf.mxu1  ;;  %v10410_v27 = vadd.f32 %v4823_v52, %v10290_v4  ;;  %v3212_v52 = vrot.slane %v3210_v8, 3  ;;  %v10437_v8 = vld [vmem:[#allocation3 + $0x60] sm:$0xff]  }
 0x2dc   : > { %11796 = vst [vmem:[#allocation14_spill] sm:$0xff] %v10405_v18  ;;  %v10418_v18 = vld [vmem:[#allocation3 + $0xa8] sm:$0xff]  }
 0x2dd   : > { %11798 = vst [vmem:[#allocation116_spill] sm:$0xff] %v10410_v27  ;;  %v11604_v15 = vrot.slane %v10418_v18, 6  ;;  %v2516_v27 = vunpack.c.l.b16 %v1902_v5  ;;  %v11805_v5 = vld [vmem:[#allocation18_spill] sm:$0xff] }
 0x2de   : > { %v4847_v10 = vpop.f32.mrf.mxu3  ;;  %11800 = vst [vmem:[#allocation16_spill] sm:$0xff] %v10418_v18  ;;  %5159 = vmatmul.bf16.gmra.mxu1 %v3910_v48  ;;  %v10430_v48 = vpop.f32.mrf.mxu0 }
 0x2df   : > { %v10415_v19 = vadd.f32 %v4847_v10, %v11799_v46  ;;  %v2508_v4 = vsel %vm2467_vm5, %v11604_v15, %v10407_v20  ;;  %v3970_v10 = vshrl.u32 %v10361_v51, 16  ;;  %v3973_v46 = vshll.u32 %v10361_v51, 16  ;;  %11802 = vst [vmem:[#allocation118_spill] sm:$0xff] %v10430_v48 }
 0x2e0   : > { %v3845_v23 = vshrl.u32 %v2508_v4, 16  ;;  %v3848_v34 = vshll.u32 %v2508_v4, 16  ;;  %v10435_v15 = vor.u32 %v3212_v52, %v3209_v9  ;;  %v10447_v48 = vpack.c.b16 %v2516_v27, %v2516_v27 }
 0x2e1   : > { %v3972_v62 = vrot.slane %v3970_v10, 2  ;;  %v3975_v33 = vrot.slane %v3973_v46, 3  ;;  %v2520_v52 = vsel %vm2467_vm5, %v10407_v20, %v2519_v36  ;;  %v11807_v10 = vld [vmem:[#allocation7_spill] sm:$0xff] }
 0x2e2   : > { %v4825_v1 = vpop.f32.mrf.mxu2  ;;  %11806 = vst [vmem:[#allocation18_spill] sm:$0xff] %v10447_v48  ;;  %v3850_v9 = vrot.slane %v3848_v34, 3  ;;  %v4952_v61 = vadd.f32 %v11807_v10, %v10331_v63  ;;  %v3912_v24 = vshrl.u32 %v2520_v52, 16  ;;  %v11811_v34 = vld [vmem:[#allocation19_spill] sm:$0xff]  ;;  %v2521_v63 = vrot.slane %v10447_v48, 6 }
 0x2e3   : > { %v10432_v29 = vpop.f32.mrf.mxu1  ;;  %v10441_v51 = vadd.f32 %v4825_v1, %v10303_v49  ;;  %5441 = vmatmul.bf16.gmra.mxu0 %v10003_v16  ;;  %v10456_v1 = vsel %vm2676_vm0, %v10378_v59, %v10435_v15  ;;  %v11809_v16 = vrot.slane %v10437_v8, 6  ;;  %v11810_v49 = vrot.slane %v10380_v55, 6 }
 0x2e4   : > { %11803 = vst [vmem:[#allocation119_spill] sm:$0xff] %v10432_v29  ;;  %v3847_v29 = vrot.slane %v3845_v23, 2  ;;  %v3915_v23 = vshll.u32 %v2520_v52, 16  ;;  %v3976_v27 = vor.u32 %v3975_v33, %v3972_v62  ;;  %v3914_v46 = vrot.slane %v3912_v24, 2  ;;  %v11814_v52 = vld [vmem:[#allocation11_spill] sm:$0xff] }
 0x2e5   : > { %11804 = vst [vmem:[#allocation120_spill] sm:$0xff] %v10441_v51  ;;  %v11812_v51 = vld [vmem:[#allocation54_spill] sm:$0xff] }
 0x2e6   : > { %v4849_v32 = vpop.f32.mrf.mxu3  ;;  %11808 = vst [vmem:[#allocation7_spill] sm:$0xff] %v10456_v1  ;;  %v10467_v59 = vor.u32 %v3850_v9, %v3847_v29  ;;  %v3917_v10 = vrot.slane %v3915_v23, 3  ;;  %v5066_v20 = vadd.f32 %v11812_v51, %v4952_v61  ;;  %v10474_v43 = vpop.f32.mrf.mxu0  ;;  %v3977_v61 = vsel %vm2676_vm0, %v10399_v56, %v3976_v27  ;;  %v11816_v51 = vld [vmem:[#allocation21_spill] sm:$0xff] }
 0x2e7   : > { %v10445_v4 = vadd.f32 %v4849_v32, %v11805_v5  ;;  %v2488_v32 = vsel %vm2467_vm5, %v11810_v49, %v11809_v16  ;;  %5218 = vmatmul.bf16.gmra.mxu2 %v10456_v1  ;;  %v11617_v5 = vrot.slane %v10104_v41, 7  ;;  %v2633_v49 = vrot.slane %v11814_v52, 7  ;;  %11815 = vst [vmem:[#allocation54_spill] sm:$0xff] %v10474_v43 }
 0x2e8   : > { %v3265_v16 = vshrl.u32 %v2488_v32, 16  ;;  %v2522_v1 = vsel %vm2467_vm5, %v2519_v36, %v2521_v63  ;;  %v3268_v24 = vshll.u32 %v2488_v32, 16  ;;  %v3918_v33 = vor.u32 %v3917_v10, %v3914_v46 }
 0x2e9   : > { %v3988_v48 = vshrl.u32 %v2522_v1, 16  ;;  %v3991_v42 = vshll.u32 %v2522_v1, 16  ;;  %v2635_v36 = vsel %vm2632_vm6, %v2633_v49, %v11617_v5  ;;  %v2812_v5 = vshll.u32 %v2633_v49, 16 }
 0x2ea   : > { %v10488_v32 = vsel %vm2676_vm0, %v10467_v59, %v3918_v33  ;;  %v3267_v63 = vrot.slane %v3265_v16, 2  ;;  %v3270_v10 = vrot.slane %v3268_v24, 3  ;;  %v2817_v27 = vshrl.u32 %v2635_v36, 16 }
 0x2eb   : > { %4891 = vmatmul.bf16.gmra.mxu3 %v11811_v34  ;;  %v10470_v18 = vpop.f32.mrf.mxu1  ;;  %v5179_v34 = vpop.f32.mrf.mxu2  ;;  %11817 = vst [vmem:[#allocation11_spill] sm:$0xff] %v10488_v32  ;;  %v3990_v1 = vrot.slane %v3988_v48, 2  ;;  %v3993_v23 = vrot.slane %v3991_v42, 3  ;;  %v2820_v52 = vshll.u32 %v2635_v36, 16 }
 0x2ec   : > { %11813 = vst [vmem:[#allocation19_spill] sm:$0xff] %v10470_v18  ;;  %v10476_v29 = vadd.f32 %v5179_v34, %v5066_v20  ;;  %v11818_v20 = vld [vmem:[#allocation9_spill] sm:$0xff]  ;;  %v3271_v42 = vor.u32 %v3270_v10, %v3267_v63  ;;  %v2819_v24 = vrot.slane %v2817_v27, 2 }
 0x2ed   : > { %v4954_v46 = vadd.f32 %v11818_v20, %v10348_v45  ;;  %v3994_v56 = vor.u32 %v3993_v23, %v3990_v1  ;;  %v11821_v45 = vld [vmem:[#allocation23_spill] sm:$0xff]  ;;  %v2822_v36 = vrot.slane %v2820_v52, 3  ;;  %v11822_v1 = vld [vmem:[#allocation12_spill] sm:$0xff] }
 0x2ee   : > { %v4852_v62 = vpop.f32.mrf.mxu3  ;;  %5164 = vmatmul.bf16.gmra.mxu1 %v3977_v61  ;;  %v10507_v23 = vpop.f32.mrf.mxu0 }
 0x2ef   : > { %v10481_v9 = vadd.f32 %v4852_v62, %v11816_v51  ;;  %v10493_v34 = vsel %vm2676_vm0, %v3918_v33, %v3994_v56  ;;  %v5068_v62 = vadd.f32 %v9873_v39, %v4954_v46  ;;  %v2809_v51 = vshrl.u32 %v2633_v49, 16  ;;  %v7398_v33 = vld [vmem:[%s8244_s24 + $0x190] sm:$0xff]  ;;  %11823 = vst [vmem:[#allocation23_spill] sm:$0xff] %v10507_v23 }
 0x2f0   : > { %11819 = vst [vmem:[#allocation21_spill] sm:$0xff] %v10493_v34  ;;  %v4957_v39 = vadd.f32 %v11822_v1, %v10370_v30  ;;  %v2814_v49 = vrot.slane %v2812_v5, 3  ;;  %v10509_v46 = vld [vmem:[#allocation3 + $0x68] sm:$0xff]   ;;  %5289 = vmatpush.bf16.msra.mxu3 %v7398_v33  ;;  %v2823_v10 = vor.u32 %v2822_v36, %v2819_v24  ;;  %v11825_v30 = vrot.slane %v10437_v8, 6 }
 0x2f1   : > { %v2811_v20 = vrot.slane %v2809_v51, 2  ;;  %v2489_v63 = vrot.slane %v10509_v46, 6  ;;  %v2636_v5 = vrot.slane %v10142_v57, 7  ;;  %v11827_v24 = vld [vmem:[#allocation26_spill] sm:$0xff] }
 0x2f2   : > { %v5071_v27 = vadd.f32 %v9924_v25, %v4957_v39  ;;  %v11829_v25 = vld [vmem:[#allocation15_spill] sm:$0xff] }
 0x2f3   : > { %v10496_v61 = vpop.f32.mrf.mxu1  ;;  %v5181_v48 = vpop.f32.mrf.mxu2  ;;  %5446 = vmatmul.bf16.gmra.mxu0 %v10022_v6  ;;  %v10514_v6 = vsel %vm2676_vm0, %v10435_v15, %v3271_v42  ;;  %v2490_v56 = vsel %vm2467_vm5, %v11825_v30, %v2489_v63  ;;  %v4959_v39 = vadd.f32 %v11829_v25, %v10388_v54 }
 0x2f4   : > { %11820 = vst [vmem:[#allocation9_spill] sm:$0xff] %v10496_v61  ;;  %v10498_v18 = vadd.f32 %v5181_v48, %v5068_v62  ;;  %v2815_v62 = vor.u32 %v2814_v49, %v2811_v20  ;;  %v3323_v15 = vshrl.u32 %v2490_v56, 16 }
 0x2f6   : > { %v4854_v43 = vpop.f32.mrf.mxu3  ;;  %v2824_v1 = vsel %vm2676_vm0, %v2815_v62, %v2823_v10  ;;  %v3325_v20 = vrot.slane %v3323_v15, 2  ;;  %v10536_v30 = vpop.f32.mrf.mxu0 }
 0x2f7   : > { %v10502_v16 = vadd.f32 %v4854_v43, %v11821_v45  ;;  %5223 = vmatmul.bf16.gmra.mxu2 %v10514_v6  ;;  %v11824_v43 = vld [vmem:[#allocation24_spill] sm:$0xff]  ;;  %v3326_v45 = vshll.u32 %v2490_v56, 16 }
 0x2f8   : > { %11830 = vst [vmem:[#allocation24_spill] sm:$0xff] %v10536_v30 }
 0x2f9   : > { %v3328_v49 = vrot.slane %v3326_v45, 3  ;;  %v11833_v45 = vld [vmem:[#allocation17_spill] sm:$0xff] }
 0x2fa   : > { %v4962_v25 = vadd.f32 %v11833_v45, %v10415_v19  ;;  %v11836_v45 = vld [vmem:[#allocation31_spill] sm:$0xff] }
 0x2fb   : > { %4896 = vmatmul.bf16.gmra.mxu3 %v11824_v43  ;;  %v10523_v52 = vpop.f32.mrf.mxu1  ;;  %v5184_v51 = vpop.f32.mrf.mxu2  ;;  %v11828_v43 = vrot.slane %v10104_v41, 7  ;;  %v11832_v41 = vld [vmem:[#allocation28_spill] sm:$0xff] }
 0x2fc   : > { %11826 = vst [vmem:[#allocation12_spill] sm:$0xff] %v10523_v52  ;;  %v10525_v33 = vadd.f32 %v5184_v51, %v5071_v27  ;;  %v5073_v51 = vadd.f32 %v9965_v13, %v4959_v39 }
 0x2fd   : > { %v2637_v57 = vsel %vm2632_vm6, %v11828_v43, %v2636_v5 }
 0x2fe   : > { %v4857_v48 = vpop.f32.mrf.mxu3  ;;  %5520 = vmatmul.bf16.vlgmr.msra.gmra.mxu1 %v2824_v1  ;;  %v2877_v56 = vshrl.u32 %v2637_v57, 16  ;;  %v2880_v27 = vshll.u32 %v2637_v57, 16  ;;  %v10549_v57 = vld [vmem:[#allocation3 + $0x70] sm:$0xff]  }
 0x2ff   : > { %v10529_v36 = vadd.f32 %v4857_v48, %v11827_v24  ;;  %v3329_v24 = vor.u32 %v3328_v49, %v3325_v20  ;;  %v2491_v13 = vrot.slane %v10549_v57, 6  ;;  %v11834_v20 = vld [vmem:[#allocation29_spill] sm:$0xff]  ;;  %v2638_v49 = vrot.slane %v10187_v28, 7 }
 0x300   : > { %v2879_v54 = vrot.slane %v2877_v56, 2  ;;  %v2882_v15 = vrot.slane %v2880_v27, 3  ;;  %v5076_v56 = vadd.f32 %v10007_v3, %v4962_v25  ;;  %v11837_v3 = vld [vmem:[#allocation20_spill] sm:$0xff] }
 0x301   : > { %v10553_v39 = vsel %vm2676_vm0, %v3271_v42, %v3329_v24  ;;  %v2492_v19 = vsel %vm2467_vm5, %v2489_v63, %v2491_v13  ;;  %v4964_v25 = vadd.f32 %v11837_v3, %v10445_v4 }
 0x302   : > { %v3381_v28 = vshrl.u32 %v2492_v19, 16 }
 0x303   : > { %v10539_v62 = vpop.f32.mrf.mxu1  ;;  %v5186_v48 = vpop.f32.mrf.mxu2  ;;  %5451 = vmatmul.bf16.gmra.mxu0 %v10061_v12  ;;  %v2883_v12 = vor.u32 %v2882_v15, %v2879_v54  ;;  %v2639_v54 = vsel %vm2632_vm6, %v2636_v5, %v2638_v49  ;;  %v3384_v15 = vshll.u32 %v2492_v19, 16  ;;  %v11840_v19 = vld [vmem:[#allocation34_spill] sm:$0xff] }
 0x304   : > { %11831 = vst [vmem:[#allocation26_spill] sm:$0xff] %v10539_v62  ;;  %v10541_v23 = vadd.f32 %v5186_v48, %v5073_v51  ;;  %v10558_v51 = vpop.f32.mrf.mxu0  ;;  %v3383_v63 = vrot.slane %v3381_v28, 2  ;;  %v11841_v28 = vld [vmem:[#allocation22_spill] sm:$0xff] }
 0x305   : > { %v2884_v42 = vsel %vm2676_vm0, %v2823_v10, %v2883_v12  ;;  %v3386_v62 = vrot.slane %v3384_v15, 3  ;;  %v4967_v15 = vadd.f32 %v11841_v28, %v10481_v9  ;;  %v11846_v28 = vshrl.u32 %v10089_v50, 16 }
 0x306   : > { %v4859_v1 = vpop.f32.mrf.mxu3 }
 0x307   : > { %v10545_v43 = vadd.f32 %v4859_v1, %v11832_v41  ;;  %5228 = vmatmul.bf16.gmra.mxu2 %v10553_v39 }
 0x30b   : > { %4901 = vmatmul.bf16.gmra.mxu3 %v11834_v20  ;;  %v10561_v27 = vpop.f32.mrf.mxu1  ;;  %v5189_v48 = vpop.f32.mrf.mxu2  ;;  %v2935_v20 = vshrl.u32 %v2639_v54, 16 }
 0x30c   : > { %11835 = vst [vmem:[#allocation15_spill] sm:$0xff] %v10561_v27  ;;  %v10564_v41 = vadd.f32 %v5189_v48, %v5076_v56  ;;  %v2938_v27 = vshll.u32 %v2639_v54, 16  ;;  %v5078_v56 = vadd.f32 %v10042_v11, %v4964_v25  ;;  %v10576_v61 = vpop.f32.mrf.mxu0  ;;  %v3387_v11 = vor.u32 %v3386_v62, %v3383_v63 }
 0x30d   : > { %v2640_v25 = vrot.slane %v10235_v21, 7 }
 0x30e   : > { %v4862_v1 = vpop.f32.mrf.mxu3  ;;  %5525 = vmatmul.bf16.gmra.mxu1 %v2884_v42  ;;  %v10584_v42 = vld [vmem:[#allocation3 + $0x78] sm:$0xff]   ;;  %v10590_v3 = vsel %vm2676_vm0, %v3329_v24, %v3387_v11 }
 0x30f   : > { %v10568_v30 = vadd.f32 %v4862_v1, %v11836_v45  ;;  %v2937_v1 = vrot.slane %v2935_v20, 2  ;;  %v2940_v45 = vrot.slane %v2938_v27, 3  ;;  %v2493_v54 = vrot.slane %v10584_v42, 6 }
 0x310   : > { %v5081_v20 = vadd.f32 %v10078_v7, %v4967_v15  ;;  %v11847_v7 = vshll.u32 %v10089_v50, 16 }
 0x311   : > { %v2941_v27 = vor.u32 %v2940_v45, %v2937_v1  ;;  %v2641_v1 = vsel %vm2632_vm6, %v2638_v49, %v2640_v25  ;;  %v11845_v45 = vld [vmem:[#allocation36_spill] sm:$0xff] }
 0x312   : > { %v2584_v15 = vrot.slane %v11847_v7, 7  ;;  %v2996_v49 = vshll.u32 %v2641_v1, 16 }
 0x313   : > { %v10574_v48 = vpop.f32.mrf.mxu1  ;;  %v5191_v10 = vpop.f32.mrf.mxu2  ;;  %5456 = vmatmul.bf16.gmra.mxu0 %v10074_v40  ;;  %v11842_v40 = vld [vmem:[#allocation33_spill] sm:$0xff]  ;;  %v2942_v9 = vsel %vm2676_vm0, %v2883_v12, %v2941_v27 }
 0x314   : > { %11838 = vst [vmem:[#allocation28_spill] sm:$0xff] %v10574_v48  ;;  %v10578_v5 = vadd.f32 %v5191_v10, %v5078_v56  ;;  %v11848_v12 = vld [vmem:[#allocation25_spill] sm:$0xff]  ;;  %v10613_v48 = vpop.f32.mrf.mxu0 }
 0x316   : > { %v4864_v52 = vpop.f32.mrf.mxu3  ;;  %11839 = vst [vmem:[#allocation17_spill] sm:$0xff] %v10578_v5 }
 0x317   : > { %v10582_v4 = vadd.f32 %v4864_v52, %v11840_v19  ;;  %5233 = vmatmul.bf16.gmra.mxu2 %v10590_v3  ;;  %v2494_v52 = vsel %vm2467_vm5, %v2491_v13, %v2493_v54  ;;  %v2583_v13 = vrot.slane %v11846_v28, 6  ;;  %v2998_v28 = vrot.slane %v2996_v49, 3 }
 0x318   : > { %v3439_v24 = vshrl.u32 %v2494_v52, 16  ;;  %v3442_v10 = vshll.u32 %v2494_v52, 16  ;;  %v2993_v52 = vshrl.u32 %v2641_v1, 16 }
 0x31a   : > { %v2995_v34 = vrot.slane %v2993_v52, 2  ;;  %v11852_v52 = vld [vmem:[#allocation38_spill] sm:$0xff] }
 0x31b   : > { %4906 = vmatmul.bf16.gmra.mxu3 %v11842_v40  ;;  %v10597_v56 = vpop.f32.mrf.mxu1  ;;  %v5194_v62 = vpop.f32.mrf.mxu2  ;;  %v7397_v40 = vld [vmem:[%s8244_s24 + $0x188] sm:$0xff] }
 0x31c   : > { %11843 = vst [vmem:[#allocation29_spill] sm:$0xff] %v10597_v56  ;;  %v10601_v21 = vadd.f32 %v5194_v62, %v5081_v20  ;;  %v4969_v56 = vadd.f32 %v11848_v12, %v10502_v16  ;;  %5290 = vmatpush.bf16.msra.mxu3 %v7397_v40  ;;  %v3441_v20 = vrot.slane %v3439_v24, 2  ;;  %v3444_v62 = vrot.slane %v3442_v10, 3  ;;  %v10633_v40 = vpop.f32.mrf.mxu0 }
 0x31d   : > { %v2495_v10 = vrot.slane %v10089_v50, 6  ;;  %v2999_v1 = vor.u32 %v2998_v28, %v2995_v34 }
 0x31e   : > { %v4867_v63 = vpop.f32.mrf.mxu3  ;;  %11844 = vst [vmem:[#allocation31_spill] sm:$0xff] %v10601_v21  ;;  %5530 = vmatmul.bf16.gmra.mxu1 %v2942_v9  ;;  %v3445_v21 = vor.u32 %v3444_v62, %v3441_v20  ;;  %v11850_v9 = vld [vmem:[#allocation39_spill] sm:$0xff] }
 0x31f   : > { %v10604_v19 = vadd.f32 %v4867_v63, %v11845_v45  ;;  %v2585_v63 = vor.u32 %v2584_v15, %v2583_v13  ;;  %v5083_v45 = vadd.f32 %v10095_v58, %v4969_v56  ;;  %v11851_v58 = vld [vmem:[#allocation27_spill] sm:$0xff]  ;;  %v2642_v13 = vrot.slane %v10272_v53, 7 }
 0x320   : > { %v4972_v56 = vadd.f32 %v11851_v58, %v10529_v36  ;;  %v3000_v36 = vsel %vm2676_vm0, %v2941_v27, %v2999_v1  ;;  %v11857_v27 = vld [vmem:[#allocation30_spill] sm:$0xff] }
 0x321   : > { %v2586_v24 = vsel %vm2526_vm4, %v10164_v37, %v2585_v63  ;;  %v2496_v37 = vsel %vm2467_vm5, %v2493_v54, %v2495_v10  ;;  %v2643_v34 = vsel %vm2632_vm6, %v2640_v25, %v2642_v13  ;;  %v4974_v25 = vadd.f32 %v11857_v27, %v10545_v43 }
 0x322   : > { %v3509_v15 = vshll.u32 %v2586_v24, 16  ;;  %v5086_v50 = vadd.f32 %v10117_v14, %v4972_v56  ;;  %v3497_v62 = vshrl.u32 %v2496_v37, 16  ;;  %v11856_v14 = vshll.u32 %v10126_v31, 16 }
 0x323   : > { %v5196_v32 = vpop.f32.mrf.mxu2  ;;  %5461 = vmatmul.bf16.gmra.mxu0 %v10197_v47  ;;  %v10619_v16 = vpop.f32.mrf.mxu1  ;;  %v3506_v47 = vshrl.u32 %v2586_v24, 16  ;;  %v11855_v24 = vshrl.u32 %v10126_v31, 16 }
 0x324   : > { %v10616_v5 = vadd.f32 %v5196_v32, %v5083_v45  ;;  %11849 = vst [vmem:[#allocation20_spill] sm:$0xff] %v10619_v16  ;;  %v10631_v32 = vsel %vm2676_vm0, %v3387_v11, %v3445_v21  ;;  %v3511_v20 = vrot.slane %v3509_v15, 3  ;;  %v3500_v45 = vshll.u32 %v2496_v37, 16 }
 0x325   : > { %v3508_v11 = vrot.slane %v3506_v47, 2  ;;  %v2587_v54 = vrot.slane %v11855_v24, 6  ;;  %v2588_v58 = vrot.slane %v11856_v14, 7  ;;  %v3051_v47 = vshrl.u32 %v2643_v34, 16 }
 0x326   : > { %v4869_v7 = vpop.f32.mrf.mxu3  ;;  %v3054_v15 = vshll.u32 %v2643_v34, 16  ;;  %v3499_v37 = vrot.slane %v3497_v62, 2  ;;  %v11859_v34 = vld [vmem:[#allocation44_spill] sm:$0xff]  ;;  %v2497_v62 = vrot.slane %v10126_v31, 6 }
 0x327   : > { %v10622_v12 = vadd.f32 %v4869_v7, %v11850_v9  ;;  %5238 = vmatmul.bf16.gmra.mxu2 %v10631_v32  ;;  %v11854_v7 = vld [vmem:[#allocation41_spill] sm:$0xff]  ;;  %v3053_v24 = vrot.slane %v3051_v47, 2 }
 0x328   : > { %v3056_v16 = vrot.slane %v3054_v15, 3  ;;  %v11862_v15 = vld [vmem:[#allocation43_spill] sm:$0xff]  ;;  %v2498_v31 = vsel %vm2467_vm5, %v2495_v10, %v2497_v62  ;;  %v11866_v10 = vshrl.u32 %v10175_v38, 16 }
 0x32b   : > { %4911 = vmatmul.bf16.gmra.mxu3 %v11852_v52  ;;  %v5199_v53 = vpop.f32.mrf.mxu2  ;;  %v10652_v56 = vpop.f32.mrf.mxu1  ;;  %v3512_v52 = vor.u32 %v3511_v20, %v3508_v11 }
 0x32c   : > { %v10641_v28 = vadd.f32 %v5199_v53, %v5086_v50  ;;  %11858 = vst [vmem:[#allocation22_spill] sm:$0xff] %v10652_v56  ;;  %v3502_v50 = vrot.slane %v3500_v45, 3  ;;  %v2589_v53 = vor.u32 %v2588_v58, %v2587_v54  ;;  %v10668_v54 = vor.u32 %v3056_v16, %v3053_v24 }
 0x32d   : > { %v2644_v58 = vrot.slane %v10309_v17, 7  ;;  %v3555_v24 = vshrl.u32 %v2498_v31, 16 }
 0x32e   : > { %v4872_v49 = vpop.f32.mrf.mxu3  ;;  %11853 = vst [vmem:[#allocation34_spill] sm:$0xff] %v10641_v28  ;;  %5535 = vmatmul.bf16.gmra.mxu1 %v3000_v36  ;;  %v3513_v36 = vsel %vm2676_vm0, %v10183_v26, %v3512_v52  ;;  %v3503_v14 = vor.u32 %v3502_v50, %v3499_v37  ;;  %v2590_v20 = vsel %vm2526_vm4, %v2585_v63, %v2589_v53  ;;  %v11863_v63 = vld [vmem:[#allocation80_spill] sm:$0xff] }
 0x32f   : > { %v10644_v9 = vadd.f32 %v4872_v49, %v11854_v7  ;;  %v10654_v49 = vpop.f32.mrf.mxu0  ;;  %v5088_v7 = vadd.f32 %v10132_v60, %v4974_v25  ;;  %v11860_v60 = vld [vmem:[#allocation32_spill] sm:$0xff]  ;;  %v3567_v25 = vshll.u32 %v2590_v20, 16  ;;  %v2645_v17 = vsel %vm2632_vm6, %v2642_v13, %v2644_v58  ;;  %v11868_v13 = vld [vmem:[#allocation35_spill] sm:$0xff] }
 0x330   : > { %v4977_v45 = vadd.f32 %v11860_v60, %v10568_v30  ;;  %v10672_v26 = vsel %vm2676_vm0, %v3445_v21, %v3503_v14  ;;  %v3058_v30 = vsel %vm2676_vm0, %v2999_v1, %v10668_v54  ;;  %v11867_v1 = vshll.u32 %v10175_v38, 16 }
 0x331   : > { %v3112_v56 = vshll.u32 %v2645_v17, 16 }
 0x332   : > { %v5091_v37 = vadd.f32 %v11863_v63, %v4977_v45  ;;  %v2591_v45 = vrot.slane %v11866_v10, 6 }
 0x333   : > { %v5201_v28 = vpop.f32.mrf.mxu2  ;;  %5466 = vmatmul.bf16.gmra.mxu0 %v3513_v36  ;;  %v10674_v47 = vpop.f32.mrf.mxu1  ;;  %v3558_v36 = vshll.u32 %v2498_v31, 16  ;;  %v3557_v31 = vrot.slane %v3555_v24, 2  ;;  %v10708_v24 = vld [vmem:[#allocation3 + $0x90] sm:$0xff]  }
 0x334   : > { %v10659_v27 = vadd.f32 %v5201_v28, %v5088_v7  ;;  %v3564_v28 = vshrl.u32 %v2590_v20, 16  ;;  %11861 = vst [vmem:[#allocation33_spill] sm:$0xff] %v10674_v47  ;;  %v3569_v7 = vrot.slane %v3567_v25, 3  ;;  %v11865_v20 = vld [vmem:[#allocation46_spill] sm:$0xff]  ;;  %v3109_v25 = vshrl.u32 %v2645_v17, 16 }
 0x335   : > { %v3560_v47 = vrot.slane %v3558_v36, 3  ;;  %v7396_v36 = vld [vmem:[%s8244_s24 + $0x180] sm:$0xff] }
 0x336   : > { %v4874_v43 = vpop.f32.mrf.mxu3  ;;  %v3566_v50 = vrot.slane %v3564_v28, 2  ;;  %v4979_v28 = vadd.f32 %v11868_v13, %v10582_v4  ;;  %5291 = vmatpush.bf16.msra.mxu3 %v7396_v36 }
 0x337   : > { %v10662_v11 = vadd.f32 %v4874_v43, %v11859_v34  ;;  %5243 = vmatmul.bf16.gmra.mxu2 %v10672_v26  ;;  %v10683_v43 = vpop.f32.mrf.mxu0  ;;  %v10700_v38 = vor.u32 %v3560_v47, %v3557_v31 }
 0x338   : > { %v3570_v63 = vor.u32 %v3569_v7, %v3566_v50  ;;  %v11871_v50 = vld [vmem:[#allocation50_spill] sm:$0xff] }
 0x33a   : > { %v3571_v10 = vsel %vm2676_vm0, %v3512_v52, %v3570_v63  ;;  %v11872_v52 = vld [vmem:[#allocation37_spill] sm:$0xff] }
 0x33b   : > { %4916 = vmatmul.bf16.gmra.mxu3 %v11862_v15  ;;  %v5204_v16 = vpop.f32.mrf.mxu2  ;;  %v2592_v15 = vrot.slane %v11867_v1, 7  ;;  %v3111_v1 = vrot.slane %v3109_v25, 2  ;;  %v4982_v47 = vadd.f32 %v11872_v52, %v10604_v19 }
 0x33c   : > { %v10685_v34 = vadd.f32 %v5204_v16, %v5091_v37  ;;  %v10696_v16 = vpop.f32.mrf.mxu1 }
 0x33d   : > { %v2593_v37 = vor.u32 %v2592_v15, %v2591_v45  ;;  %11869 = vst [vmem:[#allocation25_spill] sm:$0xff] %v10696_v16  ;;  %v10719_v15 = vsel %vm2676_vm0, %v3503_v14, %v10700_v38  ;;  %v11875_v14 = vshll.u32 %v10221_v0, 16 }
 0x33e   : > { %v4877_v21 = vpop.f32.mrf.mxu3  ;;  %11864 = vst [vmem:[#allocation36_spill] sm:$0xff] %v10685_v34  ;;  %5540 = vmatmul.bf16.gmra.mxu1 %v3058_v30  ;;  %v3114_v34 = vrot.slane %v3112_v56, 3  ;;  %v11618_v56 = vrot.slane %v10338_v35, 7 }
 0x33f   : > { %v10688_v60 = vadd.f32 %v4877_v21, %v11865_v20  ;;  %v5093_v21 = vadd.f32 %v10181_v44, %v4979_v28  ;;  %v2594_v17 = vsel %vm2526_vm4, %v2589_v53, %v2593_v37  ;;  %v2499_v44 = vrot.slane %v10708_v24, 6  ;;  %v10712_v45 = vpop.f32.mrf.mxu0  ;;  %v11873_v53 = vld [vmem:[#allocation49_spill] sm:$0xff] }
 0x340   : > { %v3622_v13 = vshrl.u32 %v2594_v17, 16  ;;  %v3625_v28 = vshll.u32 %v2594_v17, 16  ;;  %v3115_v25 = vor.u32 %v3114_v34, %v3111_v1  ;;  %v2647_v19 = vsel %vm2632_vm6, %v2644_v58, %v11618_v56  ;;  %v11878_v58 = vld [vmem:[#allocation56_spill] sm:$0xff] }
 0x341   : > { %v2500_v31 = vsel %vm2467_vm5, %v2497_v62, %v2499_v44  ;;  %v3167_v56 = vshrl.u32 %v2647_v19, 16  ;;  %v3170_v16 = vshll.u32 %v2647_v19, 16 }
 0x342   : > { %v3624_v36 = vrot.slane %v3622_v13, 2  ;;  %v3627_v52 = vrot.slane %v3625_v28, 3  ;;  %v3616_v34 = vshll.u32 %v2500_v31, 16 }
 0x343   : > { %v5206_v20 = vpop.f32.mrf.mxu2  ;;  %5471 = vmatmul.bf16.gmra.mxu0 %v3571_v10 }
 0x344   : > { %v10702_v4 = vadd.f32 %v5206_v20, %v5093_v21  ;;  %v5096_v21 = vadd.f32 %v10212_v2, %v4982_v47  ;;  %v11874_v20 = vshrl.u32 %v10221_v0, 16  ;;  %v10732_v1 = vpop.f32.mrf.mxu1  ;;  %v3116_v2 = vsel %vm2676_vm0, %v10668_v54, %v3115_v25 }
 0x345   : > { %11876 = vst [vmem:[#allocation27_spill] sm:$0xff] %v10732_v1  ;;  %v10743_v13 = vor.u32 %v3627_v52, %v3624_v36  ;;  %v11882_v1 = vld [vmem:[#allocation88_spill] sm:$0xff]  ;;  %v3172_v52 = vrot.slane %v3170_v16, 3 }
 0x346   : > { %v4879_v30 = vpop.f32.mrf.mxu3  ;;  %11870 = vst [vmem:[#allocation39_spill] sm:$0xff] %v10702_v4  ;;  %v2595_v10 = vrot.slane %v11874_v20, 6  ;;  %v11880_v20 = vld [vmem:[#allocation40_spill] sm:$0xff] }
 0x347   : > { %v10705_v7 = vadd.f32 %v4879_v30, %v11871_v50  ;;  %5248 = vmatmul.bf16.gmra.mxu2 %v10719_v15  ;;  %v2596_v30 = vrot.slane %v11875_v14, 7  ;;  %v4984_v14 = vadd.f32 %v11880_v20, %v10622_v12  ;;  %v3629_v12 = vsel %vm2676_vm0, %v3570_v63, %v10743_v13 }
 0x349   : > { %v10745_v4 = vor.u32 %v2596_v30, %v2595_v10 }
 0x34b   : > { %4921 = vmatmul.bf16.gmra.mxu3 %v11873_v53  ;;  %v5209_v50 = vpop.f32.mrf.mxu2  ;;  %v3613_v53 = vshrl.u32 %v2500_v31, 16  ;;  %v3618_v31 = vrot.slane %v3616_v34, 3  ;;  %v2598_v10 = vsel %vm2526_vm4, %v2593_v37, %v10745_v4 }
 0x34c   : > { %v10734_v62 = vadd.f32 %v5209_v50, %v5096_v21  ;;  %v10747_v21 = vpop.f32.mrf.mxu0  ;;  %v11881_v50 = vld [vmem:[#allocation55_spill] sm:$0xff]  ;;  %v3680_v63 = vshrl.u32 %v2598_v10, 16 }
 0x34d   : > { %v3615_v28 = vrot.slane %v3613_v53, 2  ;;  %v2194_v54 = vpack.c.b16 %v11881_v50, %v11881_v50  ;;  %v11884_v53 = vld [vmem:[#allocation60_spill] sm:$0xff]  ;;  %v11890_v50 = vld [vmem:[#allocation47_spill] sm:$0xff] }
 0x34e   : > { %v4882_v17 = vpop.f32.mrf.mxu3  ;;  %11877 = vst [vmem:[#allocation38_spill] sm:$0xff] %v10734_v62  ;;  %5545 = vmatmul.bf16.gmra.mxu1 %v3116_v2  ;;  %v11619_v2 = vrot.slane %v10221_v0, 6 }
 0x34f   : > { %v10739_v47 = vadd.f32 %v4882_v17, %v11878_v58  ;;  %v5098_v17 = vadd.f32 %v11882_v1, %v4984_v14  ;;  %v3169_v58 = vrot.slane %v3167_v56, 2  ;;  %v10755_v19 = vor.u32 %v3618_v31, %v3615_v28  ;;  %v11886_v1 = vld [vmem:[#allocation42_spill] sm:$0xff]  ;;  %v10768_v14 = vpop.f32.mrf.mxu1 }
 0x350   : > { %v10764_v56 = vrot.slane %v2194_v54, 1  ;;  %v4987_v20 = vadd.f32 %v11886_v1, %v10644_v9  ;;  %11887 = vst [vmem:[#allocation32_spill] sm:$0xff] %v10768_v14  ;;  %v3683_v28 = vshll.u32 %v2598_v10, 16  ;;  %v2502_v16 = vsel %vm2467_vm5, %v2499_v44, %v11619_v2  ;;  %v11889_v9 = vld [vmem:[#allocation59_spill] sm:$0xff] }
 0x351   : > { %11879 = vst [vmem:[#allocation41_spill] sm:$0xff] %v10739_v47  ;;  %v10776_v37 = vsel %vm2676_vm0, %v10700_v38, %v10755_v19  ;;  %v11621_v31 = vrot.slane %v10380_v55, 7  ;;  %v3674_v10 = vshll.u32 %v2502_v16, 16 }
 0x352   : > { %11888 = vst [vmem:[#allocation43_spill] sm:$0xff] %v10776_v37  ;;  %v2238_v54 = vsel %vm2195_vm2, %v11890_v50, %v10764_v56  ;;  %v5101_v44 = vadd.f32 %v10248_v22, %v4987_v20  ;;  %v3685_v38 = vrot.slane %v3683_v28, 3  ;;  %v11895_v20 = vld [vmem:[#allocation93_spill] sm:$0xff] }
 0x353   : > { %v5211_v47 = vpop.f32.mrf.mxu2  ;;  %5476 = vmatmul.bf16.gmra.mxu0 %v3629_v12  ;;  %v3885_v1 = vshrl.u32 %v2238_v54, 16  ;;  %v3888_v2 = vshll.u32 %v2238_v54, 16  ;;  %v11898_v54 = vld [vmem:[#allocation45_spill] sm:$0xff] }
 0x354   : > { %v10759_v30 = vadd.f32 %v5211_v47, %v5098_v17  ;;  %v10778_v47 = vor.u32 %v3172_v52, %v3169_v58  ;;  %v3671_v17 = vshrl.u32 %v2502_v16, 16  ;;  %v10786_v12 = vpop.f32.mrf.mxu0  ;;  %v11897_v16 = vshll.u32 %v11895_v20, 16 }
 0x356   : > { %v4884_v36 = vpop.f32.mrf.mxu3  ;;  %11883 = vst [vmem:[#allocation30_spill] sm:$0xff] %v10759_v30  ;;  %v3174_v52 = vsel %vm2676_vm0, %v3115_v25, %v10778_v47  ;;  %v2600_v25 = vrot.slane %v11897_v16, 7  ;;  %v4989_v30 = vadd.f32 %v11898_v54, %v10662_v11 }
 0x357   : > { %v10762_v34 = vadd.f32 %v4884_v36, %v11884_v53  ;;  %5253 = vmatmul.bf16.gmra.mxu2 %v10776_v37  ;;  %v3682_v36 = vrot.slane %v3680_v63, 2  ;;  %v11896_v63 = vshrl.u32 %v11895_v20, 16  ;;  %v3676_v37 = vrot.slane %v3674_v10, 3 }
 0x359   : > { %11885 = vst [vmem:[#allocation44_spill] sm:$0xff] %v10762_v34  ;;  %v11893_v34 = vld [vmem:[#allocation62_spill] sm:$0xff]  ;;  %v2599_v28 = vrot.slane %v11896_v63, 6  ;;  %v10807_v62 = vor.u32 %v3685_v38, %v3682_v36 }
 0x35a   : > { %v11900_v63 = vld [vmem:[#allocation94_spill] sm:$0xff] }
 0x35b   : > { %4926 = vmatmul.bf16.gmra.mxu3 %v11889_v9  ;;  %v5214_v58 = vpop.f32.mrf.mxu2  ;;  %v11891_v9 = vrot.slane %v10338_v35, 7  ;;  %v3673_v35 = vrot.slane %v3671_v17, 2  ;;  %v3687_v17 = vsel %vm2676_vm0, %v10743_v13, %v10807_v62 }
 0x35c   : > { %v10796_v14 = vadd.f32 %v5214_v58, %v5101_v44  ;;  %v3890_v44 = vrot.slane %v3888_v2, 3 }
 0x35d   : > { %v2649_v50 = vsel %vm2632_vm6, %v11891_v9, %v11621_v31  ;;  %v3887_v9 = vrot.slane %v3885_v1, 2  ;;  %v10814_v20 = vor.u32 %v3676_v37, %v3673_v35  ;;  %v11907_v35 = vld [vmem:[#allocation57_spill] sm:$0xff] }
 0x35e   : > { %v4887_v53 = vpop.f32.mrf.mxu3  ;;  %11892 = vst [vmem:[#allocation80_spill] sm:$0xff] %v10796_v14  ;;  %5550 = vmatmul.bf16.gmra.mxu1 %v3174_v52  ;;  %v3225_v58 = vshrl.u32 %v2649_v50, 16  ;;  %v3228_v31 = vshll.u32 %v2649_v50, 16  ;;  %v10816_v52 = vld [vmem:[#allocation3 + $0xa0] sm:$0xff]   ;;  %v10822_v50 = vpop.f32.mrf.mxu0 }
 0x35f   : > { %v10799_v22 = vadd.f32 %v4887_v53, %v11893_v34  ;;  %v10809_v34 = vpop.f32.mrf.mxu1  ;;  %v10811_v53 = vor.u32 %v2600_v25, %v2599_v28  ;;  %v11622_v11 = vrot.slane %v10816_v52, 6  ;;  %v3891_v38 = vor.u32 %v3890_v44, %v3887_v9  ;;  %v11904_v25 = vld [vmem:[#allocation48_spill] sm:$0xff] }
 0x360   : > { %11899 = vst [vmem:[#allocation35_spill] sm:$0xff] %v10809_v34  ;;  %v3227_v10 = vrot.slane %v3225_v58, 2  ;;  %v3230_v1 = vrot.slane %v3228_v31, 3  ;;  %v4992_v54 = vadd.f32 %v11904_v25, %v10688_v60  ;;  %v10837_v13 = vsel %vm2676_vm0, %v10755_v19, %v10814_v20  ;;  %v11913_v34 = vld [vmem:[#allocation66_spill] sm:$0xff] }
 0x361   : > { %11894 = vst [vmem:[#allocation46_spill] sm:$0xff] %v10799_v22  ;;  %v5103_v22 = vadd.f32 %v11900_v63, %v4989_v30  ;;  %v11902_v30 = vld [vmem:[#allocation64_spill] sm:$0xff]  ;;  %v2602_v16 = vsel %vm2526_vm4, %v10745_v4, %v10811_v53  ;;  %v11906_v31 = vrot.slane %v10221_v0, 6  ;;  %v3892_v9 = vsel %vm2676_vm0, %v11907_v35, %v3891_v38 }
 0x362   : > { %11905 = vst [vmem:[#allocation49_spill] sm:$0xff] %v10837_v13  ;;  %v3231_v44 = vor.u32 %v3230_v1, %v3227_v10  ;;  %v3738_v58 = vshrl.u32 %v2602_v16, 16  ;;  %v3741_v4 = vshll.u32 %v2602_v16, 16  ;;  %v3952_v19 = vshrl.u32 %v10764_v56, 16  ;;  %v11910_v35 = vld [vmem:[#allocation52_spill] sm:$0xff] }
 0x363   : > { %v5216_v36 = vpop.f32.mrf.mxu2  ;;  %5481 = vmatmul.bf16.gmra.mxu0 %v3687_v17 }
 0x364   : > { %v10824_v28 = vadd.f32 %v5216_v36, %v5103_v22  ;;  %v2504_v22 = vsel %vm2467_vm5, %v11906_v31, %v11622_v11  ;;  %v11909_v36 = vld [vmem:[#allocation98_spill] sm:$0xff]  ;;  %v3232_v10 = vsel %vm2676_vm0, %v10778_v47, %v3231_v44  ;;  %v3740_v16 = vrot.slane %v3738_v58, 2 }
 0x365   : > { %v5106_v17 = vadd.f32 %v11909_v36, %v4992_v54  ;;  %v3729_v0 = vshrl.u32 %v2504_v22, 16  ;;  %v3743_v31 = vrot.slane %v3741_v4, 3  ;;  %v11915_v54 = vrot.slane %v10437_v8, 7  ;;  %v11919_v4 = vld [vmem:[#allocation53_spill] sm:$0xff] }
 0x366   : > { %v4889_v2 = vpop.f32.mrf.mxu3  ;;  %11901 = vst [vmem:[#allocation50_spill] sm:$0xff] %v10824_v28  ;;  %v11917_v36 = vshll.u32 %v11910_v35, 16  ;;  %v10869_v58 = vpop.f32.mrf.mxu0 }
 0x367   : > { %v10827_v37 = vadd.f32 %v4889_v2, %v11902_v30  ;;  %5258 = vmatmul.bf16.gmra.mxu2 %v10837_v13  ;;  %v10849_v63 = vpop.f32.mrf.mxu1  ;;  %v3732_v2 = vshll.u32 %v2504_v22, 16  ;;  %v3955_v30 = vshll.u32 %v10764_v56, 16  ;;  %v11916_v22 = vrot.slane %v10380_v55, 7  ;;  %11918 = vst [vmem:[#allocation88_spill] sm:$0xff] %v10869_v58  ;;  %v11920_v55 = vld [vmem:[#allocation101_spill] sm:$0xff] }
 0x368   : > { %11908 = vst [vmem:[#allocation56_spill] sm:$0xff] %v10849_v63  ;;  %v2604_v47 = vrot.slane %v11917_v36, 7 }
 0x369   : > { %11903 = vst [vmem:[#allocation37_spill] sm:$0xff] %v10827_v37  ;;  %v2651_v56 = vsel %vm2632_vm6, %v11916_v22, %v11915_v54  ;;  %v3744_v37 = vor.u32 %v3743_v31, %v3740_v16 }
 0x36b   : > { %4931 = vmatmul.bf16.gmra.mxu3 %v3892_v9  ;;  %v5219_v25 = vpop.f32.mrf.mxu2  ;;  %v11911_v9 = vshrl.u32 %v11910_v35, 16 }
 0x36c   : > { %v10857_v60 = vadd.f32 %v5219_v25, %v5106_v17  ;;  %v3731_v17 = vrot.slane %v3729_v0, 2  ;;  %v3734_v25 = vrot.slane %v3732_v2, 3 }
 0x36d   : > { %v2603_v11 = vrot.slane %v11911_v9, 6  ;;  %v4994_v9 = vadd.f32 %v11919_v4, %v10705_v7  ;;  %v11922_v7 = vld [vmem:[#allocation68_spill] sm:$0xff] }
 0x36e   : > { %v4892_v1 = vpop.f32.mrf.mxu3  ;;  %11912 = vst [vmem:[#allocation40_spill] sm:$0xff] %v10857_v60  ;;  %5555 = vmatmul.bf16.gmra.mxu1 %v3232_v10  ;;  %v3286_v60 = vshll.u32 %v2651_v56, 16  ;;  %v3735_v54 = vor.u32 %v3734_v25, %v3731_v17  ;;  %v3745_v10 = vsel %vm2676_vm0, %v10807_v62, %v3744_v37 }
 0x36f   : > { %v10860_v63 = vadd.f32 %v4892_v1, %v11913_v34  ;;  %v3954_v34 = vrot.slane %v3952_v19, 2  ;;  %v3957_v1 = vrot.slane %v3955_v30, 3  ;;  %v2605_v28 = vor.u32 %v2604_v47, %v2603_v11  ;;  %v10883_v2 = vpop.f32.mrf.mxu1 }
 0x370   : > { %v5108_v14 = vadd.f32 %v11920_v55, %v4994_v9  ;;  %v3288_v19 = vrot.slane %v3286_v60, 3  ;;  %11924 = vst [vmem:[#allocation59_spill] sm:$0xff] %v10883_v2  ;;  %v10887_v30 = vsel %vm2676_vm0, %v10814_v20, %v3735_v54  ;;  %v10895_v60 = vpop.f32.mrf.mxu0 }
 0x371   : > { %11914 = vst [vmem:[#allocation55_spill] sm:$0xff] %v10860_v63  ;;  %v3283_v63 = vshrl.u32 %v2651_v56, 16  ;;  %v3958_v36 = vor.u32 %v3957_v1, %v3954_v34  ;;  %v2606_v11 = vsel %vm2526_vm4, %v10811_v53, %v2605_v28  ;;  %v11927_v56 = vrot.slane %v10816_v52, 6  ;;  %v11928_v1 = vld [vmem:[#allocation71_spill] sm:$0xff] }
 0x372   : > { %v3796_v16 = vshrl.u32 %v2606_v11, 16 }
 0x373   : > { %v5221_v22 = vpop.f32.mrf.mxu2  ;;  %v3285_v13 = vrot.slane %v3283_v63, 2  ;;  %5486 = vmatmul.bf16.gmra.mxu0 %v3745_v10  ;;  %v3959_v62 = vsel %vm2676_vm0, %v3891_v38, %v3958_v36  ;;  %v3799_v63 = vshll.u32 %v2606_v11, 16  ;;  %v2652_v38 = vrot.slane %v10509_v46, 7 }
 0x374   : > { %v10876_v58 = vadd.f32 %v5221_v22, %v5108_v14  ;;  %v11925_v14 = vld [vmem:[#allocation16_spill] sm:$0xff]  ;;  %v3798_v20 = vrot.slane %v3796_v16, 2  ;;  %v11930_v22 = vld [vmem:[#allocation51_spill] sm:$0xff] }
 0x375   : > { %v11926_v31 = vrot.slane %v11925_v14, 6  ;;  %v3289_v53 = vor.u32 %v3288_v19, %v3285_v13  ;;  %v3801_v17 = vrot.slane %v3799_v63, 3  ;;  %v11931_v10 = vshrl.u32 %v11930_v22, 16  ;;  %v11933_v13 = vld [vmem:[#allocation69_spill] sm:$0xff] }
 0x376   : > { %v4894_v35 = vpop.f32.mrf.mxu3  ;;  %11921 = vst [vmem:[#allocation60_spill] sm:$0xff] %v10876_v58  ;;  %v11932_v36 = vshll.u32 %v11930_v22, 16  ;;  %v2775_v19 = vshrl.u32 %v11933_v13, 16  ;;  %v2778_v11 = vshll.u32 %v11933_v13, 16  ;;  %v6097_v58 = vpop.permute.xlu0 %6096 }
 0x377   : > { %v10879_v0 = vadd.f32 %v4894_v35, %v11922_v7  ;;  %v2506_v47 = vsel %vm2467_vm5, %v11927_v56, %v11926_v31  ;;  %5263 = vmatmul.bf16.gmra.mxu2 %v10887_v30  ;;  %v3290_v34 = vsel %vm2676_vm0, %v3231_v44, %v3289_v53  ;;  %v2607_v35 = vrot.slane %v11931_v10, 6  ;;  %v10912_v16 = vpop.f32.mrf.mxu1 }
 0x378   : > { %v3787_v4 = vshrl.u32 %v2506_v47, 16  ;;  %v3790_v25 = vshll.u32 %v2506_v47, 16  ;;  %v2608_v7 = vrot.slane %v11932_v36, 7  ;;  %11935 = vst [vmem:[#allocation62_spill] sm:$0xff] %v10912_v16  ;;  %v3802_v44 = vor.u32 %v3801_v17, %v3798_v20  ;;  %v10914_v22 = vpop.f32.mrf.mxu0 }
 0x379   : > { %11923 = vst [vmem:[#allocation42_spill] sm:$0xff] %v10879_v0 }
 0x37a   : > { %v3789_v63 = vrot.slane %v3787_v4, 2  ;;  %v3792_v14 = vrot.slane %v3790_v25, 3  ;;  %v2609_v47 = vor.u32 %v2608_v7, %v2607_v35  ;;  %v11939_v25 = vld [vmem:[#allocation77_spill] sm:$0xff] }
 0x37b   : > { %4936 = vmatmul.bf16.gmra.mxu3 %v3959_v62  ;;  %v11934_v62 = vrot.slane %v10437_v8, 7  ;;  %v11936_v8 = vld [vmem:[#allocation73_spill] sm:$0xff] }
 0x37c   : > { %v3793_v10 = vor.u32 %v3792_v14, %v3789_v63  ;;  %v2610_v4 = vsel %vm2526_vm4, %v2605_v28, %v2609_v47  ;;  %v1899_v14 = vld [vmem:[#allocation3 + $0xb8] sm:$0x1] }
 0x37d   : > { %v2653_v46 = vsel %vm2632_vm6, %v11934_v62, %v2652_v38  ;;  %v3854_v7 = vshrl.u32 %v2610_v4, 16 }
 0x37e   : > { %v4897_v9 = vpop.f32.mrf.mxu3  ;;  %5560 = vmatmul.bf16.gmra.mxu1 %v3290_v34  ;;  %v3341_v31 = vshrl.u32 %v2653_v46, 16  ;;  %v3344_v56 = vshll.u32 %v2653_v46, 16  ;;  %v3803_v34 = vsel %vm2676_vm0, %v3744_v37, %v3802_v44  ;;  %v10922_v17 = vsel %vm2676_vm0, %v3735_v54, %v3793_v10 }
 0x37f   : > { %v10901_v55 = vadd.f32 %v4897_v9, %v11928_v1  ;;  %v2777_v9 = vrot.slane %v2775_v19, 2  ;;  %v2780_v1 = vrot.slane %v2778_v11, 3  ;;  %11938 = vst [vmem:[#allocation45_spill] sm:$0xff] %v10922_v17  ;;  %v3857_v19 = vshll.u32 %v2610_v4, 16  ;;  %v11940_v11 = vld [vmem:[#allocation117_spill] sm:$0xff] }
 0x380   : > { %v3343_v62 = vrot.slane %v3341_v31, 2  ;;  %v3346_v16 = vrot.slane %v3344_v56, 3  ;;  %v2612_v46 = vshrl.u32 %v11940_v11, 16  ;;  %v2615_v63 = vshll.u32 %v11940_v11, 16  ;;  %v10929_v31 = vpop.f32.mrf.mxu1 }
 0x381   : > { %11929 = vst [vmem:[#allocation47_spill] sm:$0xff] %v10901_v55  ;;  %v2781_v20 = vor.u32 %v2780_v1, %v2777_v9  ;;  %v3856_v56 = vrot.slane %v3854_v7, 2  ;;  %v3859_v54 = vrot.slane %v3857_v19, 3  ;;  %v2654_v9 = vrot.slane %v10549_v57, 7 }
 0x382   : > { %v3347_v37 = vor.u32 %v3346_v16, %v3343_v62  ;;  %11941 = vst [vmem:[#allocation94_spill] sm:$0xff] %v10929_v31  ;;  %v2465_v1 = vunpack.c.l.b16 %v1899_v14  ;;  %v2614_v16 = vrot.slane %v2612_v46, 6  ;;  %v2617_v62 = vrot.slane %v2615_v63, 7 }
 0x383   : > { %5491 = vmatmul.bf16.gmra.mxu0 %v3803_v34  ;;  %v2790_v35 = vsel %vm2676_vm0, %v2781_v20, %v11939_v25  ;;  %v10932_v34 = vpop.f32.mrf.mxu0  ;;  %v3860_v20 = vor.u32 %v3859_v54, %v3856_v56  ;;  %v2655_v25 = vsel %vm2632_vm6, %v2652_v38, %v2654_v9  ;;  %v10950_v54 = vsel %vm2676_vm0, %v3793_v10, %v10467_v59 }
 0x384   : > { %v2466_v11 = vpack.c.b16 %v2465_v1, %v2465_v1  ;;  %v3399_v7 = vshrl.u32 %v2655_v25, 16  ;;  %v3402_v19 = vshll.u32 %v2655_v25, 16  ;;  %11946 = vst [vmem:[#allocation57_spill] sm:$0xff] %v10950_v54 }
 0x385   : > { %v3861_v57 = vsel %vm2676_vm0, %v3802_v44, %v3860_v20  ;;  %v11947_v44 = vld [vmem:[#allocation84_spill] sm:$0xff] }
 0x386   : > { %v4899_v36 = vpop.f32.mrf.mxu3  ;;  %v2509_v63 = vrot.slane %v2466_v11, 6  ;;  %v3401_v56 = vrot.slane %v3399_v7, 2  ;;  %v3404_v38 = vrot.slane %v3402_v19, 3  ;;  %v2656_v11 = vrot.slane %v10584_v42, 7 }
 0x387   : > { %v10918_v13 = vadd.f32 %v4899_v36, %v11936_v8  ;;  %5268 = vmatmul.bf16.gmra.mxu2 %v10922_v17  ;;  %v3348_v36 = vsel %vm2676_vm0, %v3289_v53, %v3347_v37  ;;  %v11942_v8 = vld [vmem:[#allocation75_spill] sm:$0xff]  ;;  %v11944_v53 = vld [vmem:[#allocation78_spill] sm:$0xff] }
 0x388   : > { %v10939_v31 = vpop.f32.mrf.mxu1  ;;  %v3405_v7 = vor.u32 %v3404_v38, %v3401_v56 }
 0x389   : > { %11937 = vst [vmem:[#allocation93_spill] sm:$0xff] %v10918_v13 }
 0x38b   : > { %5292 = vmatmul.bf16.vlgmr.msra.gmra.mxu3 %v2790_v35  ;;  %v2618_v35 = vor.u32 %v2617_v62, %v2614_v16  ;;  %v11949_v62 = vld [vmem:[#allocation18_spill] sm:$0xff] }
 0x38c   : > { %v2624_v25 = vshll.u32 %v11949_v62, 16 }
 0x38d   : > { %v2619_v46 = vsel %vm2526_vm4, %v2609_v47, %v2618_v35  ;;  %v2621_v47 = vshrl.u32 %v11949_v62, 16 }
 0x38e   : > { %v4902_v28 = vpop.f32.mrf.mxu3  ;;  %5565 = vmatmul.bf16.gmra.mxu1 %v3348_v36  ;;  %v3921_v1 = vshrl.u32 %v2619_v46, 16  ;;  %v3924_v36 = vshll.u32 %v2619_v46, 16  ;;  %v3406_v46 = vsel %vm2676_vm0, %v3347_v37, %v3405_v7  ;;  %v2626_v13 = vrot.slane %v2624_v25, 7 }
 0x38f   : > { %v10936_v4 = vadd.f32 %v4902_v28, %v11942_v8  ;;  %v10946_v28 = vpop.f32.mrf.mxu0  ;;  %v11948_v8 = vld [vmem:[#allocation115_spill] sm:$0xff] }
 0x390   : > { %v2510_v16 = vsel %vm2467_vm5, %v11948_v8, %v2509_v63  ;;  %v3926_v10 = vrot.slane %v3924_v36, 3  ;;  %v10963_v63 = vpop.f32.mrf.mxu1  ;;  %v2657_v8 = vsel %vm2632_vm6, %v2654_v9, %v2656_v11 }
 0x391   : > { %11943 = vst [vmem:[#allocation64_spill] sm:$0xff] %v10936_v4  ;;  %v3460_v36 = vshll.u32 %v2657_v8, 16 }
 0x393   : > { %5496 = vmatmul.bf16.gmra.mxu0 %v3861_v57  ;;  %v3923_v57 = vrot.slane %v3921_v1, 2  ;;  %v3457_v1 = vshrl.u32 %v2657_v8, 16 }
 0x395   : > { %v3927_v62 = vor.u32 %v3926_v10, %v3923_v57 }
 0x396   : > { %v4904_v14 = vpop.f32.mrf.mxu3 }
 0x397   : > { %v10943_v2 = vadd.f32 %v4904_v14, %v11944_v53  ;;  %5273 = vmatmul.bf16.gmra.mxu2 %v10950_v54  ;;  %v3979_v14 = vshrl.u32 %v2510_v16, 16  ;;  %v3982_v53 = vshll.u32 %v2510_v16, 16  ;;  %v10966_v38 = vpop.f32.mrf.mxu0  ;;  %v3928_v37 = vsel %vm2676_vm0, %v3860_v20, %v3927_v62 }
 0x398   : > { %v10973_v57 = vpop.f32.mrf.mxu1 }
 0x399   : > { %11945 = vst [vmem:[#allocation48_spill] sm:$0xff] %v10943_v2  ;;  %v11950_v2 = vld [vmem:[#allocation81_spill] sm:$0xff]  ;;  %v3981_v42 = vrot.slane %v3979_v14, 2  ;;  %v3984_v56 = vrot.slane %v3982_v53, 3 }
 0x39b   : > { %5297 = vmatmul.bf16.gmra.mxu3 %v11947_v44  ;;  %v2623_v44 = vrot.slane %v2621_v47, 6  ;;  %v3985_v55 = vor.u32 %v3984_v56, %v3981_v42  ;;  %v11952_v47 = vld [vmem:[#allocation83_spill] sm:$0xff] }
 0x39d   : > { %v2627_v16 = vor.u32 %v2626_v13, %v2623_v44  ;;  %v3986_v10 = vsel %vm2676_vm0, %v10467_v59, %v3985_v55  ;;  %v11954_v13 = vld [vmem:[#allocation90_spill] sm:$0xff]  ;;  %v8102_v44 = vld [vmem:[#allocation3 + $0x80] sm:$0xff]  }
 0x39e   : > { %v4907_v19 = vpop.f32.mrf.mxu3  ;;  %5570 = vmatmul.bf16.gmra.mxu1 %v3406_v46  ;;  %v3462_v46 = vrot.slane %v3460_v36, 3  ;;  %v2658_v8 = vrot.slane %v8102_v44, 7  ;;  %v11960_v44 = vld [vmem:[#allocation97_spill] sm:$0xff] }
 0x39f   : > { %v10961_v4 = vadd.f32 %v4907_v19, %v11950_v2  ;;  %v3459_v19 = vrot.slane %v3457_v1, 2  ;;  %v2628_v9 = vsel %vm2526_vm4, %v2618_v35, %v2627_v16  ;;  %v10978_v42 = vpop.f32.mrf.mxu0  ;;  %v11955_v16 = vld [vmem:[#allocation86_spill] sm:$0xff] }
 0x3a0   : > { %v3997_v14 = vshrl.u32 %v2628_v9, 16  ;;  %v4000_v53 = vshll.u32 %v2628_v9, 16  ;;  %v2659_v59 = vsel %vm2632_vm6, %v2656_v11, %v2658_v8  ;;  %v10985_v9 = vpop.f32.mrf.mxu1  ;;  %v8103_v11 = vld [vmem:[#allocation3 + $0x88] sm:$0xff]  }
 0x3a1   : > { %11951 = vst [vmem:[#allocation98_spill] sm:$0xff] %v10961_v4  ;;  %v3463_v20 = vor.u32 %v3462_v46, %v3459_v19  ;;  %v11981_v4 = vld [vmem:[#allocation116_spill] sm:$0xff] }
 0x3a2   : > { %v3999_v1 = vrot.slane %v3997_v14, 2  ;;  %v4002_v36 = vrot.slane %v4000_v53, 3  ;;  %v11958_v14 = vld [vmem:[#allocation89_spill] sm:$0xff] }
 0x3a3   : > { %5501 = vmatmul.bf16.gmra.mxu0 %v3928_v37  ;;  %v3464_v35 = vsel %vm2676_vm0, %v3405_v7, %v3463_v20 }
 0x3a4   : > { %v4003_v55 = vor.u32 %v4002_v36, %v3999_v1  ;;  %v2660_v1 = vrot.slane %v8103_v11, 7  ;;  %v11965_v11 = vld [vmem:[#allocation103_spill] sm:$0xff] }
 0x3a6   : > { %v4909_v2 = vpop.f32.mrf.mxu3  ;;  %v4004_v19 = vsel %vm2676_vm0, %v3927_v62, %v4003_v55  ;;  %v11961_v62 = vld [vmem:[#allocation91_spill] sm:$0xff]  ;;  %v2661_v55 = vsel %vm2632_vm6, %v2658_v8, %v2660_v1 }
 0x3a7   : > { %v10970_v25 = vadd.f32 %v4909_v2, %v11952_v47  ;;  %5278 = vmatmul.bf16.gmra.mxu2 %v3986_v10  ;;  %v3515_v2 = vshrl.u32 %v2659_v59, 16  ;;  %v3518_v47 = vshll.u32 %v2659_v59, 16  ;;  %v10988_v10 = vpop.f32.mrf.mxu0 }
 0x3a8   : > { %11957 = vst [vmem:[#allocation53_spill] sm:$0xff] %v10988_v10  ;;  %v10994_v36 = vpop.f32.mrf.mxu1  ;;  %v6106_v10 = vpop.permute.xlu1 %6105 }
 0x3a9   : > { %11953 = vst [vmem:[#allocation52_spill] sm:$0xff] %v10970_v25  ;;  %v3517_v7 = vrot.slane %v3515_v2, 2 }
 0x3ab   : > { %5302 = vmatmul.bf16.gmra.mxu3 %v11954_v13  ;;  %v3520_v13 = vrot.slane %v3518_v47, 3  ;;  %v11963_v47 = vld [vmem:[#allocation95_spill] sm:$0xff] }
 0x3ae   : > { %v4912_v56 = vpop.f32.mrf.mxu3  ;;  %5575 = vmatmul.bf16.gmra.mxu1 %v3464_v35 }
 0x3af   : > { %v10982_v37 = vadd.f32 %v4912_v56, %v11955_v16  ;;  %v3521_v56 = vor.u32 %v3520_v13, %v3517_v7 }
 0x3b1   : > { %11956 = vst [vmem:[#allocation66_spill] sm:$0xff] %v10982_v37  ;;  %v3522_v16 = vsel %vm2676_vm0, %v3463_v20, %v3521_v56  ;;  %v2662_v20 = vrot.slane %v10708_v24, 7  ;;  %v11970_v24 = vld [vmem:[#allocation110_spill] sm:$0xff] }
 0x3b3   : > { %5506 = vmatmul.bf16.gmra.mxu0 %v4004_v19  ;;  %v3573_v19 = vshrl.u32 %v2661_v55, 16 }
 0x3b5   : > { %v3575_v7 = vrot.slane %v3573_v19, 2 }
 0x3b6   : > { %v4914_v46 = vpop.f32.mrf.mxu3 }
 0x3b7   : > { %v10991_v53 = vadd.f32 %v4914_v46, %v11958_v14  ;;  %v3576_v46 = vshll.u32 %v2661_v55, 16  ;;  %v2663_v55 = vsel %vm2632_vm6, %v2660_v1, %v2662_v20 }
 0x3b8   : > { %v3631_v19 = vshrl.u32 %v2663_v55, 16 }
 0x3b9   : > { %11959 = vst [vmem:[#allocation101_spill] sm:$0xff] %v10991_v53  ;;  %v3578_v13 = vrot.slane %v3576_v46, 3  ;;  %v3634_v46 = vshll.u32 %v2663_v55, 16 }
 0x3bb   : > { %5307 = vmatmul.bf16.gmra.mxu3 %v11960_v44  ;;  %v11004_v44 = vpop.f32.mrf.mxu1  ;;  %v3579_v53 = vor.u32 %v3578_v13, %v3575_v7  ;;  %v3633_v7 = vrot.slane %v3631_v19, 2  ;;  %v3636_v13 = vrot.slane %v3634_v46, 3 }
 0x3be   : > { %v4917_v35 = vpop.f32.mrf.mxu3  ;;  %5580 = vmatmul.bf16.gmra.mxu1 %v3522_v16  ;;  %v3580_v16 = vsel %vm2676_vm0, %v3521_v56, %v3579_v53 }
 0x3bf   : > { %v10998_v59 = vadd.f32 %v4917_v35, %v11961_v62  ;;  %v11966_v62 = vld [vmem:[#allocation99_spill] sm:$0xff] }
 0x3c1   : > { %11962 = vst [vmem:[#allocation68_spill] sm:$0xff] %v10998_v59 }
 0x3c6   : > { %v4919_v2 = vpop.f32.mrf.mxu3 }
 0x3c7   : > { %v11002_v14 = vadd.f32 %v4919_v2, %v11963_v47  ;;  %v11013_v2 = vpop.f32.mrf.mxu1 }
 0x3c9   : > { %11964 = vst [vmem:[#allocation16_spill] sm:$0xff] %v11002_v14  ;;  %v11968_v14 = vld [vmem:[#allocation102_spill] sm:$0xff] }
 0x3cb   : > { %5312 = vmatmul.bf16.gmra.mxu3 %v11965_v11  ;;  %v3637_v11 = vor.u32 %v3636_v13, %v3633_v7 }
 0x3cd   : > { %v3638_v1 = vsel %vm2676_vm0, %v3579_v53, %v3637_v11  ;;  %v2666_v53 = vrot.slane %v10816_v52, 7 }
 0x3ce   : > { %v4922_v35 = vpop.f32.mrf.mxu3  ;;  %5585 = vmatmul.bf16.gmra.mxu1 %v3580_v16 }
 0x3cf   : > { %v11010_v8 = vadd.f32 %v4922_v35, %v11966_v62  ;;  %v11019_v56 = vpop.f32.mrf.mxu1  ;;  %v8104_v35 = vld [vmem:[#allocation3 + $0x98] sm:$0xff]  }
 0x3d0   : > { %v2664_v62 = vrot.slane %v8104_v35, 7  ;;  %v11975_v35 = vld [vmem:[#allocation13_spill] sm:$0xff] }
 0x3d1   : > { %11967 = vst [vmem:[#allocation71_spill] sm:$0xff] %v11010_v8  ;;  %v11971_v8 = vld [vmem:[#allocation106_spill] sm:$0xff] }
 0x3d2   : > { %v2665_v55 = vsel %vm2632_vm6, %v2662_v20, %v2664_v62 }
 0x3d6   : > { %v4924_v47 = vpop.f32.mrf.mxu3 }
 0x3d7   : > { %v11016_v59 = vadd.f32 %v4924_v47, %v11968_v14  ;;  %v3689_v14 = vshrl.u32 %v2665_v55, 16  ;;  %v3692_v47 = vshll.u32 %v2665_v55, 16  ;;  %v11026_v19 = vpop.f32.mrf.mxu1 }
 0x3d9   : > { %11969 = vst [vmem:[#allocation51_spill] sm:$0xff] %v11016_v59  ;;  %v3691_v13 = vrot.slane %v3689_v14, 2  ;;  %v3694_v59 = vrot.slane %v3692_v47, 3  ;;  %v11978_v47 = vld [vmem:[#allocation113_spill] sm:$0xff] }
 0x3db   : > { %5317 = vmatmul.bf16.gmra.mxu3 %v11970_v24  ;;  %v11973_v24 = vld [vmem:[#allocation109_spill] sm:$0xff]  ;;  %v3695_v25 = vor.u32 %v3694_v59, %v3691_v13 }
 0x3de   : > { %v4927_v16 = vpop.f32.mrf.mxu3  ;;  %5590 = vmatmul.bf16.gmra.mxu1 %v3638_v1  ;;  %v11976_v1 = vld [vmem:[#allocation111_spill] sm:$0xff] }
 0x3df   : > { %v11023_v37 = vadd.f32 %v4927_v16, %v11971_v8  ;;  %v3696_v16 = vsel %vm2676_vm0, %v3637_v11, %v3695_v25  ;;  %v11037_v55 = vpop.f32.mrf.mxu1 }
 0x3e1   : > { %11972 = vst [vmem:[#allocation69_spill] sm:$0xff] %v11023_v37  ;;  %v2667_v37 = vsel %vm2632_vm6, %v2664_v62, %v2666_v53 }
 0x3e6   : > { %v4929_v46 = vpop.f32.mrf.mxu3 }
 0x3e7   : > { %v11029_v7 = vadd.f32 %v4929_v46, %v11973_v24  ;;  %v3747_v46 = vshrl.u32 %v2667_v37, 16  ;;  %v3750_v24 = vshll.u32 %v2667_v37, 16  ;;  %v11043_v52 = vpop.f32.mrf.mxu1 }
 0x3e9   : > { %11974 = vst [vmem:[#allocation73_spill] sm:$0xff] %v11029_v7  ;;  %v3749_v59 = vrot.slane %v3747_v46, 2  ;;  %v3752_v13 = vrot.slane %v3750_v24, 3 }
 0x3eb   : > { %5322 = vmatmul.bf16.gmra.mxu3 %v11975_v35  ;;  %v11980_v35 = vld [vmem:[#allocation7_spill] sm:$0xff]  ;;  %v3753_v11 = vor.u32 %v3752_v13, %v3749_v59 }
 0x3ee   : > { %v4932_v8 = vpop.f32.mrf.mxu3  ;;  %5595 = vmatmul.bf16.gmra.mxu1 %v3696_v16  ;;  %v3754_v16 = vsel %vm2676_vm0, %v3695_v25, %v3753_v11 }
 0x3ef   : > { %v11035_v20 = vadd.f32 %v4932_v8, %v11976_v1  ;;  %v8105_v8 = vld [vmem:[#allocation3 + $0xa8] sm:$0xff]   ;;  %v11051_v46 = vpop.f32.mrf.mxu1 }
 0x3f0   : > { %v2668_v1 = vrot.slane %v8105_v8, 7 }
 0x3f1   : > { %11977 = vst [vmem:[#allocation77_spill] sm:$0xff] %v11035_v20 }
 0x3f2   : > { %v2669_v37 = vsel %vm2632_vm6, %v2666_v53, %v2668_v1 }
 0x3f6   : > { %v4934_v14 = vpop.f32.mrf.mxu3 }
 0x3f7   : > { %v11041_v7 = vadd.f32 %v4934_v14, %v11978_v47  ;;  %v3805_v14 = vshrl.u32 %v2669_v37, 16  ;;  %v3808_v47 = vshll.u32 %v2669_v37, 16  ;;  %v11057_v8 = vpop.f32.mrf.mxu1 }
 0x3f9   : > { %11979 = vst [vmem:[#allocation117_spill] sm:$0xff] %v11041_v7  ;;  %v11983_v7 = vld [vmem:[#allocation120_spill] sm:$0xff]  ;;  %v3807_v59 = vrot.slane %v3805_v14, 2  ;;  %v3810_v13 = vrot.slane %v3808_v47, 3 }
 0x3fa   : > { %v11064_v14 = vld [vmem:[%s8259_s14] ss:$0 sm:$0xff] }
 0x3fb   : > { %5327 = vmatmul.bf16.gmra.mxu3 %v11980_v35  ;;  %v3811_v25 = vor.u32 %v3810_v13, %v3807_v59  ;;  %v11068_v59 = vld [vmem:[%s8264_s15] ss:$0 sm:$0xff] }
 0x3fe   : > { %v4937_v20 = vpop.f32.mrf.mxu3  ;;  %5600 = vmatmul.bf16.gmra.mxu1 %v3754_v16  ;;  %v3812_v16 = vsel %vm2676_vm0, %v3753_v11, %v3811_v25 }
 0x3ff   : > { %v11048_v62 = vadd.f32 %v4937_v20, %v11981_v4  ;;  %v8106_v4 = vld [vmem:[#allocation3 + $0xb0] sm:$0xff]  }
 0x400   : > { %v2670_v20 = vrot.slane %v8106_v4, 7 }
 0x401   : > { %11982 = vst [vmem:[#allocation75_spill] sm:$0xff] %v11048_v62 }
 0x402   : > { %v2671_v62 = vsel %vm2632_vm6, %v2668_v1, %v2670_v20 }
 0x403   : > { %v3863_v47 = vshrl.u32 %v2671_v62, 16 }
 0x406   : > { %v4939_v24 = vpop.f32.mrf.mxu3 }
 0x407   : > { %v11054_v35 = vadd.f32 %v4939_v24, %v11983_v7  ;;  %v3866_v24 = vshll.u32 %v2671_v62, 16  ;;  %v11078_v62 = vld [vmem:[#allocation3 + $0xb8] sm:$0xff] }
 0x409   : > { %11984 = vst [vmem:[#allocation78_spill] sm:$0xff] %v11054_v35  ;;  %v3865_v35 = vrot.slane %v3863_v47, 2  ;;  %v3868_v11 = vrot.slane %v3866_v24, 3  ;;  %v7615_v47 = vld [vmem:[#allocation2] sm:$0xff]  }
 0x40b   : > { %5332 = vmatmul.bf16.gmra.mxu3 %v10514_v6 }
 0x40e   : > { %v5293_v53 = vpop.f32.mrf.mxu3  ;;  %5605 = vmatmul.bf16.gmra.mxu1 %v3812_v16 }
 0x40f   : > { %v5294_v37 = vadd.f32 %v5293_v53, %v10476_v29  ;;  %v11073_v53 = vpop.f32.mrf.mxu1 }
 0x411   : > { %v5408_v7 = vadd.f32 %v10558_v51, %v5294_v37  ;;  %v11076_v37 = vor.u32 %v3868_v11, %v3865_v35  ;;  %v7616_v35 = vunpack.c.l.bf16 %v7615_v47 }
 0x413   : > { %v5522_v6 = vadd.f32 %v10939_v31, %v5408_v7  ;;  %v11625_v31 = vrot.slane %v11078_v62, 7 }
 0x415   : > { %v5629_v13 = vmul.f32 %v11064_v14, %v5522_v6 }
 0x416   : > { %v5295_v4 = vpop.f32.mrf.mxu3 }
 0x417   : > { %v5674_v29 = vadd.f32 %v11068_v59, %v5629_v13  ;;  %v5296_v1 = vadd.f32 %v5295_v4, %v10498_v18  ;;  %v3870_v13 = vsel %vm2676_vm0, %v3811_v25, %v11076_v37 }
 0x419   : > { %v5716_v51 = vmul.f32 0.1, %v5674_v29  ;;  %v5410_v16 = vadd.f32 %v10576_v61, %v5296_v1  ;;  %v2673_v61 = vsel %vm2632_vm6, %v2670_v20, %v11625_v31 }
 0x41a   : > { %v3933_v54 = vshll.u32 %v2673_v61, 16 }
 0x41b   : > { %v5758_v7 = vmax.f32 %v5674_v29, %v5716_v51  ;;  %v5524_v6 = vadd.f32 %v10963_v63, %v5410_v16  ;;  %5337 = vmatmul.bf16.gmra.mxu3 %v10553_v39  ;;  %v1904_v51 = vld [vmem:[#allocation3 + $0xc0] sm:$0x3]  ;;  %v11092_v16 = vpop.f32.mrf.mxu1 }
 0x41c   : > { %v2630_v20 = vunpack.c.l.b16 %v1904_v51 }
 0x41d   : > { %v5800_v24 = vpack.c.bf16 %v5758_v7, %v5758_v7  ;;  %v5630_v18 = vmul.f32 %v11064_v14, %v5524_v6  ;;  %v3930_v7 = vshrl.u32 %v2673_v61, 16 }
 0x41e   : > { %v5298_v4 = vpop.f32.mrf.mxu3  ;;  %5610 = vmatmul.bf16.gmra.mxu1 %v3870_v13 }
 0x41f   : > { %v5884_v11 = vunpack.c.l.bf16 %v5800_v24  ;;  %v5675_v29 = vadd.f32 %v11068_v59, %v5630_v18  ;;  %v5299_v63 = vadd.f32 %v5298_v4, %v10525_v33  ;;  %v7617_v24 = vunpack.c.h.bf16 %v7615_v47 }
 0x420   : > { %v3932_v33 = vrot.slane %v3930_v7, 2 }
 0x421   : > { %v5717_v39 = vmul.f32 0.1, %v5675_v29  ;;  %v5413_v1 = vadd.f32 %v10613_v48, %v5299_v63  ;;  %v5968_v25 = vadd.f32 %v7616_v35, %v5884_v11  ;;  %v3935_v63 = vrot.slane %v3933_v54, 3 }
 0x422   : > { %v2631_v11 = vpack.c.b16 %v2630_v20, %v2630_v20  ;;  %v7846_v20 = vld [vmem:[#allocation2 + $0x8] sm:$0xff]  }
 0x423   : > { %v5759_v6 = vmax.f32 %v5675_v29, %v5717_v39  ;;  %v5527_v0 = vadd.f32 %v10973_v57, %v5413_v1  ;;  %v6010_v13 = vpack.c.bf16 %v5968_v25, %v5968_v25  ;;  %v11985_v29 = vld [vmem:[#allocation6_spill] sm:$0xff]  ;;  %v11104_v54 = vpop.f32.mrf.mxu1 }
 0x424   : > { %v6111_v57 = vperm.slane %v6106_v10, %v11985_v29  ;;  %v6102_v61 = vperm.slane %v6097_v58, %v11985_v29 }
 0x425   : > { %v5801_v31 = vpack.c.bf16 %v5759_v6, %v5759_v6  ;;  %v5631_v18 = vmul.f32 %v11064_v14, %v5527_v0  ;;  %v6472_v1 = vunpack.c.l.bf16 %v6010_v13 }
 0x426   : > { %v5300_v17 = vpop.f32.mrf.mxu3  ;;  %v6515_v25 = vunpack.c.l.bf16 %v6111_v57  ;;  %v6514_v10 = vunpack.c.l.bf16 %v6102_v61 }
 0x427   : > { %v5885_v4 = vunpack.c.l.bf16 %v5801_v31  ;;  %v5676_v48 = vadd.f32 %v11068_v59, %v5631_v18  ;;  %v5301_v35 = vadd.f32 %v5300_v17, %v10541_v23  ;;  %v11102_v31 = vor.u32 %v3935_v63, %v3932_v33 }
 0x428   : > { %v2674_v17 = vrot.slane %v2631_v11, 7  ;;  %v6556_v18 = vmul.f32 %v6514_v10, %v6472_v1  ;;  %v11986_v63 = vrot.slane %v11078_v62, 7 }
 0x429   : > { %v5969_v39 = vadd.f32 %v7617_v24, %v5885_v4  ;;  %v5718_v47 = vmul.f32 0.1, %v5676_v48  ;;  %v5415_v0 = vadd.f32 %v10633_v40, %v5301_v35  ;;  %v7620_v4 = vunpack.c.l.bf16 %v7846_v20 }
 0x42a   : > { %v2675_v35 = vsel %vm2632_vm6, %v11986_v63, %v2674_v17 }
 0x42b   : > { %v6011_v51 = vpack.c.bf16 %v5969_v39, %v5969_v39  ;;  %v5760_v7 = vmax.f32 %v5676_v48, %v5718_v47  ;;  %5342 = vmatmul.bf16.gmra.mxu3 %v10590_v3  ;;  %v5529_v23 = vadd.f32 %v10985_v9, %v5415_v0  ;;  %v3937_v3 = vsel %vm2676_vm0, %v11076_v37, %v11102_v31 }
 0x42c   : > { %v4006_v47 = vshrl.u32 %v2675_v35, 16  ;;  %v4009_v37 = vshll.u32 %v2675_v35, 16 }
 0x42d   : > { %v6473_v6 = vunpack.c.l.bf16 %v6011_v51  ;;  %v5802_v58 = vpack.c.bf16 %v5760_v7, %v5760_v7  ;;  %v5632_v24 = vmul.f32 %v11064_v14, %v5529_v23  ;;  %v11119_v51 = vpop.f32.mrf.mxu1  ;;  %v7621_v23 = vunpack.c.h.bf16 %v7846_v20 }
 0x42e   : > { %v5303_v40 = vpop.f32.mrf.mxu3  ;;  %5615 = vmatmul.bf16.gmra.mxu1 %v3937_v3 }
 0x42f   : > { %v6557_v13 = vmul.f32 %v6515_v25, %v6473_v6  ;;  %v5304_v33 = vadd.f32 %v5303_v40, %v10564_v41  ;;  %v5886_v48 = vunpack.c.l.bf16 %v5802_v58  ;;  %v5677_v9 = vadd.f32 %v11068_v59, %v5632_v24  ;;  %v11987_v25 = vld [vmem:[#allocation17_spill] sm:$0xff]  ;;  %v6124_v40 = vpop.permute.xlu0 %6123 }
 0x430   : > { %v4011_v6 = vrot.slane %v4009_v37, 3 }
 0x431   : > { %v7701_v11 = vpack.c.bf16 %v6557_v13, %v6556_v18  ;;  %v5418_v57 = vadd.f32 %v10654_v49, %v5304_v33  ;;  %v5719_v61 = vmul.f32 0.1, %v5677_v9  ;;  %v5970_v0 = vadd.f32 %v7620_v4, %v5886_v48  ;;  %v7847_v48 = vld [vmem:[#allocation2 + $0x10] sm:$0xff]  }
 0x432   : > { %v4008_v49 = vrot.slane %v4006_v47, 2  ;;  %v6129_v33 = vperm.slane %v6124_v40, %v11985_v29  ;;  %v7624_v37 = vunpack.c.l.bf16 %v7847_v48  ;;  %v7625_v40 = vunpack.c.h.bf16 %v7847_v48 }
 0x433   : > { %7702 = vst [vmem:[#allocation2] sm:$0xff] %v7701_v11   ;;  %v5532_v39 = vadd.f32 %v10994_v36, %v5418_v57  ;;  %v5761_v41 = vmax.f32 %v5677_v9, %v5719_v61  ;;  %v6012_v58 = vpack.c.bf16 %v5970_v0, %v5970_v0  ;;  %v6115_v36 = vpop.permute.xlu2 %6114 }
 0x434   : > { %v6120_v3 = vperm.slane %v6115_v36, %v11985_v29  ;;  %v4012_v63 = vor.u32 %v4011_v6, %v4008_v49  ;;  %v6517_v47 = vunpack.c.l.bf16 %v6129_v33 }
 0x435   : > { %v5633_v1 = vmul.f32 %v11064_v14, %v5532_v39  ;;  %v5803_v7 = vpack.c.bf16 %v5761_v41, %v5761_v41  ;;  %v6474_v35 = vunpack.c.l.bf16 %v6012_v58 }
 0x436   : > { %v5305_v62 = vpop.f32.mrf.mxu3  ;;  %v6516_v39 = vunpack.c.l.bf16 %v6120_v3  ;;  %v6133_v3 = vpop.permute.xlu1 %6132 }
 0x437   : > { %v5678_v17 = vadd.f32 %v11068_v59, %v5633_v1  ;;  %v5306_v10 = vadd.f32 %v5305_v62, %v11987_v25  ;;  %v5887_v24 = vunpack.c.l.bf16 %v5803_v7  ;;  %v4013_v7 = vsel %vm2676_vm0, %v11102_v31, %v4012_v63 }
 0x438   : > { %v6558_v62 = vmul.f32 %v6516_v39, %v6474_v35  ;;  %v7848_v39 = vld [vmem:[#allocation2 + $0x18] sm:$0xff]  }
 0x439   : > { %v5720_v18 = vmul.f32 0.1, %v5678_v17  ;;  %v5420_v13 = vadd.f32 %v10683_v43, %v5306_v10  ;;  %v5971_v4 = vadd.f32 %v7621_v23, %v5887_v24 }
 0x43b   : > { %v5762_v20 = vmax.f32 %v5678_v17, %v5720_v18  ;;  %v5534_v9 = vadd.f32 %v11004_v44, %v5420_v13  ;;  %5347 = vmatmul.bf16.gmra.mxu3 %v10631_v32  ;;  %v6013_v11 = vpack.c.bf16 %v5971_v4, %v5971_v4  ;;  %v11988_v44 = vld [vmem:[#allocation31_spill] sm:$0xff]  ;;  %v11133_v32 = vpop.f32.mrf.mxu1 }
 0x43d   : > { %v5804_v57 = vpack.c.bf16 %v5762_v20, %v5762_v20  ;;  %v5634_v61 = vmul.f32 %v11064_v14, %v5534_v9  ;;  %v6475_v43 = vunpack.c.l.bf16 %v6013_v11  ;;  %v6142_v9 = vpop.permute.xlu2 %6141 }
 0x43e   : > { %v5308_v0 = vpop.f32.mrf.mxu3  ;;  %5620 = vmatmul.bf16.gmra.mxu1 %v4013_v7  ;;  %v6147_v63 = vperm.slane %v6142_v9, %v11985_v29  ;;  %v7628_v7 = vunpack.c.l.bf16 %v7848_v39 }
 0x43f   : > { %v5888_v41 = vunpack.c.l.bf16 %v5804_v57  ;;  %v5679_v1 = vadd.f32 %v11068_v59, %v5634_v61  ;;  %v5309_v23 = vadd.f32 %v5308_v0, %v11988_v44  ;;  %v6559_v17 = vmul.f32 %v6517_v47, %v6475_v43 }
 0x441   : > { %v5721_v25 = vmul.f32 0.1, %v5679_v1  ;;  %v5423_v10 = vadd.f32 %v10712_v45, %v5309_v23  ;;  %v7706_v49 = vpack.c.bf16 %v6559_v17, %v6558_v62  ;;  %v5972_v6 = vadd.f32 %v7624_v37, %v5888_v41  ;;  %v11989_v17 = vld [vmem:[#allocation34_spill] sm:$0xff] }
 0x442   : > { %v6138_v45 = vperm.slane %v6133_v3, %v11985_v29  ;;  %v6519_v37 = vunpack.c.l.bf16 %v6147_v63 }
 0x443   : > { %v5763_v58 = vmax.f32 %v5679_v1, %v5721_v25  ;;  %v5537_v24 = vadd.f32 %v11013_v2, %v5423_v10  ;;  %7866 = vst [vmem:[#allocation2 + $0x8] sm:$0xff] %v7706_v49   ;;  %v6014_v18 = vpack.c.bf16 %v5972_v6, %v5972_v6 }
 0x444   : > { %v6518_v43 = vunpack.c.l.bf16 %v6138_v45 }
 0x445   : > { %v5805_v36 = vpack.c.bf16 %v5763_v58, %v5763_v58  ;;  %v5635_v31 = vmul.f32 %v11064_v14, %v5537_v24  ;;  %v6476_v48 = vunpack.c.l.bf16 %v6014_v18 }
 0x446   : > { %v5310_v13 = vpop.f32.mrf.mxu3 }
 0x447   : > { %v5889_v33 = vunpack.c.l.bf16 %v5805_v36  ;;  %v5680_v4 = vadd.f32 %v11068_v59, %v5635_v31  ;;  %v5311_v20 = vadd.f32 %v5310_v13, %v10616_v5  ;;  %v6560_v1 = vmul.f32 %v6518_v43, %v6476_v48  ;;  %v6151_v13 = vpop.permute.xlu0 %6150  ;;  %v7849_v48 = vld [vmem:[#allocation2 + $0x20] sm:$0xff]  }
 0x448   : > { %v7629_v36 = vunpack.c.h.bf16 %v7848_v39 }
 0x449   : > { %v5973_v35 = vadd.f32 %v7625_v40, %v5889_v33  ;;  %v5722_v2 = vmul.f32 0.1, %v5680_v4  ;;  %v5425_v11 = vadd.f32 %v10747_v21, %v5311_v20  ;;  %v6160_v20 = vpop.permute.xlu1 %6159 }
 0x44a   : > { %v6165_v9 = vperm.slane %v6160_v20, %v11985_v29 }
 0x44b   : > { %v6015_v57 = vpack.c.bf16 %v5973_v35, %v5973_v35  ;;  %v5764_v61 = vmax.f32 %v5680_v4, %v5722_v2  ;;  %v5539_v47 = vadd.f32 %v11019_v56, %v5425_v11  ;;  %5352 = vmatmul.bf16.gmra.mxu3 %v10672_v26 }
 0x44c   : > { %v6521_v39 = vunpack.c.l.bf16 %v6165_v9 }
 0x44d   : > { %v6477_v5 = vunpack.c.l.bf16 %v6015_v57  ;;  %v5806_v0 = vpack.c.bf16 %v5764_v61, %v5764_v61  ;;  %v5636_v41 = vmul.f32 %v11064_v14, %v5539_v47 }
 0x44e   : > { %v5313_v44 = vpop.f32.mrf.mxu3 }
 0x44f   : > { %v6561_v23 = vmul.f32 %v6519_v37, %v6477_v5  ;;  %v5890_v62 = vunpack.c.l.bf16 %v5806_v0  ;;  %v5681_v21 = vadd.f32 %v11068_v59, %v5636_v41  ;;  %v5314_v25 = vadd.f32 %v5313_v44, %v11989_v17 }
 0x450   : > { %v7632_v5 = vunpack.c.l.bf16 %v7849_v48 }
 0x451   : > { %v7711_v10 = vpack.c.bf16 %v6561_v23, %v6560_v1  ;;  %v5723_v49 = vmul.f32 0.1, %v5681_v21  ;;  %v5428_v56 = vadd.f32 %v10786_v12, %v5314_v25  ;;  %v5974_v26 = vadd.f32 %v7628_v7, %v5890_v62  ;;  %v11990_v7 = vld [vmem:[#allocation36_spill] sm:$0xff] }
 0x452   : > { %v6156_v12 = vperm.slane %v6151_v13, %v11985_v29  ;;  %v6178_v13 = vpop.permute.xlu0 %6177 }
 0x453   : > { %7867 = vst [vmem:[#allocation2 + $0x10] sm:$0xff] %v7711_v10   ;;  %v5765_v6 = vmax.f32 %v5681_v21, %v5723_v49  ;;  %v5542_v58 = vadd.f32 %v11026_v19, %v5428_v56  ;;  %v6016_v31 = vpack.c.bf16 %v5974_v26, %v5974_v26  ;;  %v7633_v49 = vunpack.c.h.bf16 %v7849_v48 }
 0x454   : > { %v6520_v61 = vunpack.c.l.bf16 %v6156_v12 }
 0x455   : > { %v5807_v24 = vpack.c.bf16 %v5765_v6, %v5765_v6  ;;  %v5637_v40 = vmul.f32 %v11064_v14, %v5542_v58  ;;  %v6478_v35 = vunpack.c.l.bf16 %v6016_v31  ;;  %v6169_v58 = vpop.permute.xlu2 %6168 }
 0x456   : > { %v5315_v18 = vpop.f32.mrf.mxu3 }
 0x457   : > { %v5891_v3 = vunpack.c.l.bf16 %v5807_v24  ;;  %v5682_v33 = vadd.f32 %v11068_v59, %v5637_v40  ;;  %v5316_v4 = vadd.f32 %v5315_v18, %v10659_v27  ;;  %v6562_v37 = vmul.f32 %v6520_v61, %v6478_v35  ;;  %v11992_v40 = vld [vmem:[#allocation39_spill] sm:$0xff] }
 0x458   : > { %v6174_v18 = vperm.slane %v6169_v58, %v11985_v29 }
 0x459   : > { %v5975_v45 = vadd.f32 %v7629_v36, %v5891_v3  ;;  %v5724_v63 = vmul.f32 0.1, %v5682_v33  ;;  %v5430_v19 = vadd.f32 %v10822_v50, %v5316_v4  ;;  %v6183_v3 = vperm.slane %v6178_v13, %v11985_v29 }
 0x45a   : > { %v6522_v35 = vunpack.c.l.bf16 %v6174_v18 }
 0x45b   : > { %v6017_v2 = vpack.c.bf16 %v5975_v45, %v5975_v45  ;;  %v5766_v11 = vmax.f32 %v5682_v33, %v5724_v63  ;;  %v5544_v57 = vadd.f32 %v11037_v55, %v5430_v19  ;;  %5357 = vmatmul.bf16.gmra.mxu3 %v10719_v15  ;;  %v11991_v55 = vld [vmem:[#allocation88_spill] sm:$0xff]  ;;  %v7850_v45 = vld [vmem:[#allocation2 + $0x28] sm:$0xff]   ;;  %v11993_v19 = vld [vmem:[#allocation43_spill] sm:$0xff] }
 0x45d   : > { %v6479_v27 = vunpack.c.l.bf16 %v6017_v2  ;;  %v5808_v47 = vpack.c.bf16 %v5766_v11, %v5766_v11  ;;  %v5638_v43 = vmul.f32 %v11064_v14, %v5544_v57  ;;  %v11171_v2 = vpop.f32.mrf.mxu2  ;;  %v6523_v11 = vunpack.c.l.bf16 %v6183_v3  ;;  %v6196_v58 = vpop.permute.xlu2 %6195 }
 0x45e   : > { %v5318_v0 = vpop.f32.mrf.mxu3 }
 0x45f   : > { %v6563_v41 = vmul.f32 %v6521_v39, %v6479_v27  ;;  %v5892_v1 = vunpack.c.l.bf16 %v5808_v47  ;;  %v5683_v50 = vadd.f32 %v11068_v59, %v5638_v43  ;;  %v5319_v44 = vadd.f32 %v5318_v0, %v11990_v7 }
 0x460   : > { %v7636_v27 = vunpack.c.l.bf16 %v7850_v45 }
 0x461   : > { %v7716_v23 = vpack.c.bf16 %v6563_v41, %v6562_v37  ;;  %v5725_v62 = vmul.f32 0.1, %v5683_v50  ;;  %v5433_v21 = vadd.f32 %v11991_v55, %v5319_v44  ;;  %v5976_v15 = vadd.f32 %v7632_v5, %v5892_v1  ;;  %v11994_v5 = vld [vmem:[#allocation38_spill] sm:$0xff] }
 0x463   : > { %7868 = vst [vmem:[#allocation2 + $0x18] sm:$0xff] %v7716_v23   ;;  %v5767_v17 = vmax.f32 %v5683_v50, %v5725_v62  ;;  %v5547_v25 = vadd.f32 %v11043_v52, %v5433_v21  ;;  %v6018_v26 = vpack.c.bf16 %v5976_v15, %v5976_v15  ;;  %v11177_v50 = vpop.f32.mrf.mxu0  ;;  %v11180_v62 = vpop.f32.mrf.mxu1  ;;  %v7637_v21 = vunpack.c.h.bf16 %v7850_v45 }
 0x465   : > { %v5809_v10 = vpack.c.bf16 %v5767_v17, %v5767_v17  ;;  %v5639_v56 = vmul.f32 %v11064_v14, %v5547_v25  ;;  %v6480_v20 = vunpack.c.l.bf16 %v6018_v26  ;;  %v11183_v17 = vpop.f32.mrf.mxu2  ;;  %v11995_v26 = vld [vmem:[#allocation30_spill] sm:$0xff] }
 0x466   : > { %v5320_v6 = vpop.f32.mrf.mxu3 }
 0x467   : > { %v5893_v24 = vunpack.c.l.bf16 %v5809_v10  ;;  %v5684_v36 = vadd.f32 %v11068_v59, %v5639_v56  ;;  %v5321_v31 = vadd.f32 %v5320_v6, %v11992_v40  ;;  %v6564_v39 = vmul.f32 %v6522_v35, %v6480_v20 }
 0x469   : > { %v5977_v33 = vadd.f32 %v7633_v49, %v5893_v24  ;;  %v5726_v4 = vmul.f32 0.1, %v5684_v36  ;;  %v5435_v52 = vadd.f32 %v10895_v60, %v5321_v31  ;;  %v6187_v49 = vpop.permute.xlu1 %6186 }
 0x46a   : > { %v6192_v24 = vperm.slane %v6187_v49, %v11985_v29 }
 0x46b   : > { %v6019_v12 = vpack.c.bf16 %v5977_v33, %v5977_v33  ;;  %v5768_v9 = vmax.f32 %v5684_v36, %v5726_v4  ;;  %v5549_v63 = vadd.f32 %v11051_v46, %v5435_v52  ;;  %5362 = vmatmul.bf16.gmra.mxu3 %v11993_v19  ;;  %v7851_v33 = vld [vmem:[#allocation2 + $0x30] sm:$0xff]   ;;  %v11996_v52 = vld [vmem:[#allocation49_spill] sm:$0xff]  ;;  %v11195_v35 = vpop.f32.mrf.mxu1 }
 0x46c   : > { %v6524_v20 = vunpack.c.l.bf16 %v6192_v24 }
 0x46d   : > { %v6481_v48 = vunpack.c.l.bf16 %v6019_v12  ;;  %v5810_v57 = vpack.c.bf16 %v5768_v9, %v5768_v9  ;;  %v5640_v61 = vmul.f32 %v11064_v14, %v5549_v63  ;;  %v11192_v12 = vpop.f32.mrf.mxu0 }
 0x46e   : > { %v5323_v47 = vpop.f32.mrf.mxu3 }
 0x46f   : > { %v6565_v60 = vmul.f32 %v6523_v11, %v6481_v48  ;;  %v5894_v43 = vunpack.c.l.bf16 %v5810_v57  ;;  %v5685_v37 = vadd.f32 %v11068_v59, %v5640_v61  ;;  %v5324_v0 = vadd.f32 %v5323_v47, %v11994_v5  ;;  %v11199_v47 = vpop.f32.mrf.mxu2 }
 0x471   : > { %v7721_v46 = vpack.c.bf16 %v6565_v60, %v6564_v39  ;;  %v5727_v41 = vmul.f32 0.1, %v5685_v37  ;;  %v5438_v1 = vadd.f32 %v10914_v22, %v5324_v0  ;;  %v5978_v7 = vadd.f32 %v7636_v27, %v5894_v43 }
 0x473   : > { %7869 = vst [vmem:[#allocation2 + $0x20] sm:$0xff] %v7721_v46   ;;  %v5769_v44 = vmax.f32 %v5685_v37, %v5727_v41  ;;  %v5552_v23 = vadd.f32 %v11057_v8, %v5438_v1  ;;  %v6020_v25 = vpack.c.bf16 %v5978_v7, %v5978_v7  ;;  %v6201_v8 = vperm.slane %v6196_v58, %v11985_v29 }
 0x474   : > { %v7641_v1 = vunpack.c.h.bf16 %v7851_v33 }
 0x475   : > { %v5811_v55 = vpack.c.bf16 %v5769_v44, %v5769_v44  ;;  %v5641_v15 = vmul.f32 %v11064_v14, %v5552_v23  ;;  %v6482_v18 = vunpack.c.l.bf16 %v6020_v25  ;;  %v6525_v9 = vunpack.c.l.bf16 %v6201_v8  ;;  %v11204_v44 = vpop.f32.mrf.mxu0 }
 0x476   : > { %v5325_v10 = vpop.f32.mrf.mxu3 }
 0x477   : > { %v5895_v56 = vunpack.c.l.bf16 %v5811_v55  ;;  %v5686_v22 = vadd.f32 %v11068_v59, %v5641_v15  ;;  %v5326_v6 = vadd.f32 %v5325_v10, %v11995_v26  ;;  %v6566_v11 = vmul.f32 %v6524_v20, %v6482_v18  ;;  %v11998_v10 = vld [vmem:[#allocation50_spill] sm:$0xff]  ;;  %v11213_v24 = vpop.f32.mrf.mxu2 }
 0x479   : > { %v5979_v36 = vadd.f32 %v7637_v21, %v5895_v56  ;;  %v5728_v40 = vmul.f32 0.1, %v5686_v22  ;;  %v5440_v31 = vadd.f32 %v10932_v34, %v5326_v6  ;;  %v7640_v34 = vunpack.c.l.bf16 %v7851_v33  ;;  %v6205_v21 = vpop.permute.xlu0 %6204 }
 0x47a   : > { %v6210_v56 = vperm.slane %v6205_v21, %v11985_v29 }
 0x47b   : > { %v6021_v13 = vpack.c.bf16 %v5979_v36, %v5979_v36  ;;  %v5770_v3 = vmax.f32 %v5686_v22, %v5728_v40  ;;  %v5554_v4 = vadd.f32 %v11073_v53, %v5440_v31  ;;  %5367 = vmatmul.bf16.gmra.mxu3 %v11996_v52  ;;  %v11997_v53 = vld [vmem:[#allocation80_spill] sm:$0xff]  ;;  %v11209_v22 = vpop.f32.mrf.mxu1  ;;  %v7852_v31 = vld [vmem:[#allocation2 + $0x38] sm:$0xff]  }
 0x47d   : > { %v6483_v45 = vunpack.c.l.bf16 %v6021_v13  ;;  %v5812_v63 = vpack.c.bf16 %v5770_v3, %v5770_v3  ;;  %v5642_v19 = vmul.f32 %v11064_v14, %v5554_v4  ;;  %v6526_v13 = vunpack.c.l.bf16 %v6210_v56  ;;  %v12003_v56 = vld [vmem:[#allocation53_spill] sm:$0xff] }
 0x47e   : > { %v5328_v48 = vpop.f32.mrf.mxu3 }
 0x47f   : > { %v6567_v57 = vmul.f32 %v6525_v9, %v6483_v45  ;;  %v5896_v61 = vunpack.c.l.bf16 %v5812_v63  ;;  %v5687_v39 = vadd.f32 %v11068_v59, %v5642_v19  ;;  %v5329_v27 = vadd.f32 %v5328_v48, %v11997_v53  ;;  %v11220_v48 = vpop.f32.mrf.mxu0 }
 0x480   : > { %v7644_v9 = vunpack.c.l.bf16 %v7852_v31 }
 0x481   : > { %v7726_v60 = vpack.c.bf16 %v6567_v57, %v6566_v11  ;;  %v5729_v43 = vmul.f32 0.1, %v5687_v39  ;;  %v5443_v37 = vadd.f32 %v10946_v28, %v5329_v27  ;;  %v5980_v5 = vadd.f32 %v7640_v34, %v5896_v61  ;;  %v6214_v28 = vpop.permute.xlu1 %6213  ;;  %v11999_v11 = vld [vmem:[#allocation40_spill] sm:$0xff] }
 0x483   : > { %7870 = vst [vmem:[#allocation2 + $0x28] sm:$0xff] %v7726_v60   ;;  %v5771_v0 = vmax.f32 %v5687_v39, %v5729_v43  ;;  %v5557_v46 = vadd.f32 %v11092_v16, %v5443_v37  ;;  %v6022_v23 = vpack.c.bf16 %v5980_v5, %v5980_v5  ;;  %v6219_v16 = vperm.slane %v6214_v28, %v11985_v29  ;;  %v11223_v61 = vpop.f32.mrf.mxu1  ;;  %v11226_v60 = vpop.f32.mrf.mxu2 }
 0x484   : > { %v7645_v37 = vunpack.c.h.bf16 %v7852_v31  ;;  %v7853_v31 = vld [vmem:[#allocation2 + $0x40] sm:$0xff]  }
 0x485   : > { %v5813_v41 = vpack.c.bf16 %v5771_v0, %v5771_v0  ;;  %v5643_v7 = vmul.f32 %v11064_v14, %v5557_v46  ;;  %v6484_v8 = vunpack.c.l.bf16 %v6022_v23  ;;  %v6527_v3 = vunpack.c.l.bf16 %v6219_v16  ;;  %v12001_v23 = vld [vmem:[#allocation58_spill] sm:$0xff] }
 0x486   : > { %v5330_v55 = vpop.f32.mrf.mxu3 }
 0x487   : > { %v5897_v15 = vunpack.c.l.bf16 %v5813_v41  ;;  %v5688_v25 = vadd.f32 %v11068_v59, %v5643_v7  ;;  %v5331_v49 = vadd.f32 %v5330_v55, %v11998_v10  ;;  %v6568_v20 = vmul.f32 %v6526_v13, %v6484_v8  ;;  %v6223_v41 = vpop.permute.xlu2 %6222  ;;  %v12000_v7 = vld [vmem:[#allocation41_spill] sm:$0xff] }
 0x488   : > { %v12005_v13 = vld [vmem:[#allocation45_spill] sm:$0xff] }
 0x489   : > { %v5981_v26 = vadd.f32 %v7641_v1, %v5897_v15  ;;  %v5730_v6 = vmul.f32 0.1, %v5688_v25  ;;  %v5445_v58 = vadd.f32 %v10966_v38, %v5331_v49  ;;  %v6232_v1 = vpop.permute.xlu0 %6231  ;;  %v12002_v15 = vld [vmem:[#allocation60_spill] sm:$0xff] }
 0x48a   : > { %v6237_v10 = vperm.slane %v6232_v1, %v11985_v29 }
 0x48b   : > { %v6023_v36 = vpack.c.bf16 %v5981_v26, %v5981_v26  ;;  %v5772_v40 = vmax.f32 %v5688_v25, %v5730_v6  ;;  %v5559_v18 = vadd.f32 %v11104_v54, %v5445_v58  ;;  %5372 = vmatmul.bf16.gmra.mxu3 %v10887_v30  ;;  %v11236_v26 = vpop.f32.mrf.mxu0  ;;  %v12004_v58 = vld [vmem:[#allocation105_spill] sm:$0xff] }
 0x48d   : > { %v6485_v33 = vunpack.c.l.bf16 %v6023_v36  ;;  %v5814_v4 = vpack.c.bf16 %v5772_v40, %v5772_v40  ;;  %v5644_v52 = vmul.f32 %v11064_v14, %v5559_v18 }
 0x48e   : > { %v5333_v45 = vpop.f32.mrf.mxu3 }
 0x48f   : > { %v6569_v38 = vmul.f32 %v6527_v3, %v6485_v33  ;;  %v5898_v63 = vunpack.c.l.bf16 %v5814_v4  ;;  %v5689_v19 = vadd.f32 %v11068_v59, %v5644_v52  ;;  %v5334_v34 = vadd.f32 %v5333_v45, %v11999_v11  ;;  %v11241_v4 = vpop.f32.mrf.mxu1  ;;  %v11247_v11 = vpop.f32.mrf.mxu2 }
 0x490   : > { %v6529_v33 = vunpack.c.l.bf16 %v6237_v10  ;;  %v12009_v10 = vld [vmem:[#allocation46_spill] sm:$0xff] }
 0x491   : > { %v7731_v54 = vpack.c.bf16 %v6569_v38, %v6568_v20  ;;  %v5731_v57 = vmul.f32 0.1, %v5689_v19  ;;  %v5448_v30 = vadd.f32 %v10978_v42, %v5334_v34  ;;  %v5982_v39 = vadd.f32 %v7644_v9, %v5898_v63  ;;  %v12006_v38 = vld [vmem:[#allocation44_spill] sm:$0xff]  ;;  %v12007_v63 = vld [vmem:[#allocation61_spill] sm:$0xff] }
 0x492   : > { %v4997_v42 = vadd.f32 %v12001_v23, %v12000_v7 }
 0x493   : > { %7871 = vst [vmem:[#allocation2 + $0x30] sm:$0xff] %v7731_v54   ;;  %v5773_v53 = vmax.f32 %v5689_v19, %v5731_v57  ;;  %v5562_v27 = vadd.f32 %v11119_v51, %v5448_v30  ;;  %v6024_v0 = vpack.c.bf16 %v5982_v39, %v5982_v39  ;;  %v6228_v51 = vperm.slane %v6223_v41, %v11985_v29  ;;  %v11253_v1 = vpop.f32.mrf.mxu0 }
 0x494   : > { %v5111_v8 = vadd.f32 %v12004_v58, %v4997_v42  ;;  %v4999_v19 = vadd.f32 %v12007_v63, %v12006_v38  ;;  %v7648_v54 = vunpack.c.l.bf16 %v7853_v31  ;;  %v7649_v42 = vunpack.c.h.bf16 %v7853_v31 }
 0x495   : > { %v5815_v43 = vpack.c.bf16 %v5773_v53, %v5773_v53  ;;  %v5645_v5 = vmul.f32 %v11064_v14, %v5562_v27  ;;  %v6486_v6 = vunpack.c.l.bf16 %v6024_v0  ;;  %v6528_v3 = vunpack.c.l.bf16 %v6228_v51  ;;  %v6241_v51 = vpop.permute.xlu1 %6240 }
 0x496   : > { %v5335_v46 = vpop.f32.mrf.mxu3  ;;  %v5225_v52 = vadd.f32 %v11171_v2, %v5111_v8 }
 0x497   : > { %v5899_v55 = vunpack.c.l.bf16 %v5815_v43  ;;  %v5690_v21 = vadd.f32 %v11068_v59, %v5645_v5  ;;  %v5336_v25 = vadd.f32 %v5335_v46, %v12002_v15  ;;  %v6570_v34 = vmul.f32 %v6528_v3, %v6486_v6  ;;  %v12008_v5 = vld [vmem:[#allocation107_spill] sm:$0xff]  ;;  %v11264_v58 = vpop.f32.mrf.mxu2 }
 0x498   : > { %v5113_v0 = vadd.f32 %v12008_v5, %v4999_v19 }
 0x499   : > { %v5983_v49 = vadd.f32 %v7645_v37, %v5899_v55  ;;  %v5732_v28 = vmul.f32 0.1, %v5690_v21  ;;  %v5450_v16 = vadd.f32 %v12003_v56, %v5336_v25 }
 0x49a   : > { %v5227_v7 = vadd.f32 %v11183_v17, %v5113_v0  ;;  %v6246_v17 = vperm.slane %v6241_v51, %v11985_v29 }
 0x49b   : > { %v6025_v36 = vpack.c.bf16 %v5983_v49, %v5983_v49  ;;  %v5774_v40 = vmax.f32 %v5690_v21, %v5732_v28  ;;  %v5564_v18 = vadd.f32 %v11133_v32, %v5450_v16  ;;  %5377 = vmatmul.bf16.gmra.mxu3 %v12005_v13  ;;  %v11257_v21 = vpop.f32.mrf.mxu1  ;;  %v12010_v49 = vld [vmem:[#allocation63_spill] sm:$0xff] }
 0x49c   : > { %v5002_v28 = vadd.f32 %v12010_v49, %v12009_v10  ;;  %v6530_v38 = vunpack.c.l.bf16 %v6246_v17 }
 0x49d   : > { %v6487_v20 = vunpack.c.l.bf16 %v6025_v36  ;;  %v5816_v9 = vpack.c.bf16 %v5774_v40, %v5774_v40  ;;  %v5646_v45 = vmul.f32 %v11064_v14, %v5564_v18  ;;  %v12011_v18 = vld [vmem:[#allocation8_spill] sm:$0xff] }
 0x49e   : > { %v5338_v32 = vpop.f32.mrf.mxu3  ;;  %v5116_v13 = vadd.f32 %v12011_v18, %v5002_v28 }
 0x49f   : > { %v6571_v57 = vmul.f32 %v6529_v33, %v6487_v20  ;;  %v5900_v30 = vunpack.c.l.bf16 %v5816_v9  ;;  %v5691_v39 = vadd.f32 %v11068_v59, %v5646_v45  ;;  %v5339_v53 = vadd.f32 %v5338_v32, %v5225_v52  ;;  %v7854_v52 = vld [vmem:[#allocation2 + $0x48] sm:$0xff]  }
 0x4a0   : > { %v12012_v9 = vld [vmem:[#allocation57_spill] sm:$0xff]  ;;  %v5230_v63 = vadd.f32 %v11199_v47, %v5116_v13  ;;  %v7653_v51 = vunpack.c.h.bf16 %v7854_v52 }
 0x4a1   : > { %v7736_v27 = vpack.c.bf16 %v6571_v57, %v6570_v34  ;;  %v5733_v43 = vmul.f32 0.1, %v5691_v39  ;;  %v5453_v2 = vadd.f32 %v11177_v50, %v5339_v53  ;;  %v5984_v37 = vadd.f32 %v7648_v54, %v5900_v30  ;;  %v6250_v50 = vpop.permute.xlu2 %6249  ;;  %v12013_v32 = vld [vmem:[#allocation37_spill] sm:$0xff]  ;;  %v11274_v30 = vpop.f32.mrf.mxu0 }
 0x4a2   : > { %v6255_v6 = vperm.slane %v6250_v50, %v11985_v29  ;;  %v7652_v53 = vunpack.c.l.bf16 %v7854_v52  ;;  %v12018_v52 = vld [vmem:[#allocation14_spill] sm:$0xff] }
 0x4a3   : > { %7872 = vst [vmem:[#allocation2 + $0x38] sm:$0xff] %v7736_v27   ;;  %v5775_v46 = vmax.f32 %v5691_v39, %v5733_v43  ;;  %v5567_v41 = vadd.f32 %v11180_v62, %v5453_v2  ;;  %v6026_v15 = vpack.c.bf16 %v5984_v37, %v5984_v37  ;;  %v11277_v5 = vpop.f32.mrf.mxu1 }
 0x4a4   : > { %v6531_v45 = vunpack.c.l.bf16 %v6255_v6 }
 0x4a5   : > { %v5817_v23 = vpack.c.bf16 %v5775_v46, %v5775_v46  ;;  %v5647_v55 = vmul.f32 %v11064_v14, %v5567_v41  ;;  %v6488_v31 = vunpack.c.l.bf16 %v6026_v15  ;;  %v11280_v41 = vpop.f32.mrf.mxu2 }
 0x4a6   : > { %v5340_v25 = vpop.f32.mrf.mxu3 }
 0x4a7   : > { %v5901_v56 = vunpack.c.l.bf16 %v5817_v23  ;;  %v5692_v62 = vadd.f32 %v11068_v59, %v5647_v55  ;;  %v5341_v16 = vadd.f32 %v5340_v25, %v5227_v7  ;;  %v6572_v39 = vmul.f32 %v6530_v38, %v6488_v31  ;;  %v12015_v23 = vld [vmem:[#allocation112_spill] sm:$0xff]  ;;  %v7855_v38 = vld [vmem:[#allocation2 + $0x50] sm:$0xff]  }
 0x4a9   : > { %v5985_v8 = vadd.f32 %v7649_v42, %v5901_v56  ;;  %v5734_v36 = vmul.f32 0.1, %v5692_v62  ;;  %v5455_v40 = vadd.f32 %v11192_v12, %v5341_v16  ;;  %v12014_v12 = vld [vmem:[#allocation65_spill] sm:$0xff]  ;;  %v6268_v56 = vpop.permute.xlu1 %6267  ;;  %v12017_v16 = vld [vmem:[#allocation67_spill] sm:$0xff] }
 0x4aa   : > { %v5004_v57 = vadd.f32 %v12014_v12, %v12013_v32 }
 0x4ab   : > { %v6027_v3 = vpack.c.bf16 %v5985_v8, %v5985_v8  ;;  %v5776_v33 = vmax.f32 %v5692_v62, %v5734_v36  ;;  %v5569_v20 = vadd.f32 %v11195_v35, %v5455_v40  ;;  %5382 = vmatmul.bf16.gmra.mxu3 %v12012_v9  ;;  %v6259_v62 = vpop.permute.xlu0 %6258  ;;  %v6273_v40 = vperm.slane %v6268_v56, %v11985_v29 }
 0x4ac   : > { %v5118_v42 = vadd.f32 %v12015_v23, %v5004_v57  ;;  %v7657_v56 = vunpack.c.h.bf16 %v7855_v38 }
 0x4ad   : > { %v6489_v19 = vunpack.c.l.bf16 %v6027_v3  ;;  %v5818_v34 = vpack.c.bf16 %v5776_v33, %v5776_v33  ;;  %v5648_v54 = vmul.f32 %v11064_v14, %v5569_v20  ;;  %v11294_v3 = vpop.f32.mrf.mxu1  ;;  %v11299_v32 = vpop.f32.mrf.mxu2 }
 0x4ae   : > { %v5343_v27 = vpop.f32.mrf.mxu3  ;;  %v5232_v25 = vadd.f32 %v11213_v24, %v5118_v42  ;;  %v11291_v24 = vpop.f32.mrf.mxu0 }
 0x4af   : > { %v6573_v43 = vmul.f32 %v6531_v45, %v6489_v19  ;;  %v5902_v35 = vunpack.c.l.bf16 %v5818_v34  ;;  %v5693_v2 = vadd.f32 %v11068_v59, %v5648_v54  ;;  %v5344_v37 = vadd.f32 %v5343_v27, %v5230_v63  ;;  %v12019_v19 = vld [vmem:[#allocation11_spill] sm:$0xff]  ;;  %v12021_v27 = vld [vmem:[#allocation70_spill] sm:$0xff] }
 0x4b0   : > { %v6533_v34 = vunpack.c.l.bf16 %v6273_v40 }
 0x4b1   : > { %v7741_v47 = vpack.c.bf16 %v6573_v43, %v6572_v39  ;;  %v5735_v0 = vmul.f32 0.1, %v5693_v2  ;;  %v5458_v46 = vadd.f32 %v11204_v44, %v5344_v37  ;;  %v5986_v7 = vadd.f32 %v7652_v53, %v5902_v35  ;;  %v12016_v44 = vld [vmem:[#allocation55_spill] sm:$0xff]  ;;  %v12020_v53 = vld [vmem:[#allocation42_spill] sm:$0xff] }
 0x4b2   : > { %v5007_v6 = vadd.f32 %v12017_v16, %v12016_v44  ;;  %v5009_v43 = vadd.f32 %v12021_v27, %v12020_v53  ;;  %v12027_v27 = vld [vmem:[#allocation93_spill] sm:$0xff] }
 0x4b3   : > { %7873 = vst [vmem:[#allocation2 + $0x40] sm:$0xff] %v7741_v47   ;;  %v5777_v55 = vmax.f32 %v5693_v2, %v5735_v0  ;;  %v5572_v15 = vadd.f32 %v11209_v22, %v5458_v46  ;;  %v6028_v49 = vpack.c.bf16 %v5986_v7, %v5986_v7  ;;  %v6264_v22 = vperm.slane %v6259_v62, %v11985_v29 }
 0x4b4   : > { %v5121_v20 = vadd.f32 %v12018_v52, %v5007_v6  ;;  %v7656_v2 = vunpack.c.l.bf16 %v7855_v38  ;;  %v6277_v6 = vpop.permute.xlu2 %6276 }
 0x4b5   : > { %v5819_v50 = vpack.c.bf16 %v5777_v55, %v5777_v55  ;;  %v5649_v10 = vmul.f32 %v11064_v14, %v5572_v15  ;;  %v6490_v33 = vunpack.c.l.bf16 %v6028_v49  ;;  %v6532_v54 = vunpack.c.l.bf16 %v6264_v22  ;;  %v12022_v15 = vld [vmem:[#allocation119_spill] sm:$0xff]  ;;  %v11315_v44 = vpop.f32.mrf.mxu2 }
 0x4b6   : > { %v5345_v28 = vpop.f32.mrf.mxu3  ;;  %v5235_v12 = vadd.f32 %v11226_v60, %v5121_v20  ;;  %v11307_v60 = vpop.f32.mrf.mxu0  ;;  %v12025_v20 = vld [vmem:[#allocation19_spill] sm:$0xff] }
 0x4b7   : > { %v5903_v17 = vunpack.c.l.bf16 %v5819_v50  ;;  %v5694_v8 = vadd.f32 %v11068_v59, %v5649_v10  ;;  %v5346_v36 = vadd.f32 %v5345_v28, %v5232_v25  ;;  %v6574_v35 = vmul.f32 %v6532_v54, %v6490_v33  ;;  %v11311_v10 = vpop.f32.mrf.mxu1 }
 0x4b8   : > { %v5123_v25 = vadd.f32 %v12022_v15, %v5009_v43  ;;  %v12028_v43 = vld [vmem:[#allocation74_spill] sm:$0xff] }
 0x4b9   : > { %v5987_v31 = vadd.f32 %v7653_v51, %v5903_v17  ;;  %v5736_v18 = vmul.f32 0.1, %v5694_v8  ;;  %v5460_v13 = vadd.f32 %v11220_v48, %v5346_v36  ;;  %v6286_v17 = vpop.permute.xlu0 %6285  ;;  %v12024_v36 = vld [vmem:[#allocation72_spill] sm:$0xff] }
 0x4ba   : > { %v5237_v49 = vadd.f32 %v11247_v11, %v5123_v25  ;;  %v6291_v11 = vperm.slane %v6286_v17, %v11985_v29 }
 0x4bb   : > { %v6029_v9 = vpack.c.bf16 %v5987_v31, %v5987_v31  ;;  %v5778_v45 = vmax.f32 %v5694_v8, %v5736_v18  ;;  %v5574_v63 = vadd.f32 %v11223_v61, %v5460_v13  ;;  %5387 = vmatmul.bf16.gmra.mxu3 %v12019_v19  ;;  %v12023_v8 = vld [vmem:[#allocation47_spill] sm:$0xff]  ;;  %v6282_v18 = vperm.slane %v6277_v6, %v11985_v29 }
 0x4bc   : > { %v5012_v40 = vadd.f32 %v12024_v36, %v12023_v8  ;;  %v6535_v54 = vunpack.c.l.bf16 %v6291_v11  ;;  %v6304_v36 = vpop.permute.xlu2 %6303 }
 0x4bd   : > { %v6491_v57 = vunpack.c.l.bf16 %v6029_v9  ;;  %v5820_v48 = vpack.c.bf16 %v5778_v45, %v5778_v45  ;;  %v5650_v39 = vmul.f32 %v11064_v14, %v5574_v63  ;;  %v7856_v63 = vld [vmem:[#allocation2 + $0x58] sm:$0xff]  }
 0x4be   : > { %v5348_v37 = vpop.f32.mrf.mxu3  ;;  %v5126_v9 = vadd.f32 %v12025_v20, %v5012_v40  ;;  %v6295_v40 = vpop.permute.xlu1 %6294 }
 0x4bf   : > { %v6575_v47 = vmul.f32 %v6533_v34, %v6491_v57  ;;  %v5904_v61 = vunpack.c.l.bf16 %v5820_v48  ;;  %v5695_v0 = vadd.f32 %v11068_v59, %v5650_v39  ;;  %v5349_v46 = vadd.f32 %v5348_v37, %v5235_v12  ;;  %v12026_v34 = vld [vmem:[#allocation21_spill] sm:$0xff]  ;;  %v11326_v12 = vpop.f32.mrf.mxu0 }
 0x4c0   : > { %v5240_v57 = vadd.f32 %v11264_v58, %v5126_v9  ;;  %v7660_v37 = vunpack.c.l.bf16 %v7856_v63 }
 0x4c1   : > { %v7746_v7 = vpack.c.bf16 %v6575_v47, %v6574_v35  ;;  %v5737_v23 = vmul.f32 0.1, %v5695_v0  ;;  %v5463_v42 = vadd.f32 %v11236_v26, %v5349_v46  ;;  %v5988_v55 = vadd.f32 %v7656_v2, %v5904_v61  ;;  %v11335_v2 = vpop.f32.mrf.mxu1  ;;  %v11338_v46 = vld [vmem:[%s8264_s15] ss:$0 sm:$0xff] }
 0x4c2   : > { %v5014_v35 = vadd.f32 %v12028_v43, %v12027_v27  ;;  %v12033_v43 = vld [vmem:[#allocation48_spill] sm:$0xff] }
 0x4c3   : > { %7874 = vst [vmem:[#allocation2 + $0x48] sm:$0xff] %v7746_v7   ;;  %v5779_v50 = vmax.f32 %v5695_v0, %v5737_v23  ;;  %v5577_v51 = vadd.f32 %v11241_v4, %v5463_v42  ;;  %v6030_v26 = vpack.c.bf16 %v5988_v55, %v5988_v55  ;;  %v11341_v23 = vpop.f32.mrf.mxu2 }
 0x4c5   : > { %v5821_v28 = vpack.c.bf16 %v5779_v50, %v5779_v50  ;;  %v5651_v62 = vmul.f32 %v11064_v14, %v5577_v51  ;;  %v6492_v52 = vunpack.c.l.bf16 %v6030_v26  ;;  %v12029_v50 = vld [vmem:[#allocation9_spill] sm:$0xff]  ;;  %v7661_v26 = vunpack.c.h.bf16 %v7856_v63 }
 0x4c6   : > { %v5350_v16 = vpop.f32.mrf.mxu3  ;;  %v5128_v51 = vadd.f32 %v12029_v50, %v5014_v35  ;;  %v12035_v50 = vld [vmem:[#allocation26_spill] sm:$0xff] }
 0x4c7   : > { %v5905_v22 = vunpack.c.l.bf16 %v5821_v28  ;;  %v5696_v4 = vadd.f32 %v11068_v59, %v5651_v62  ;;  %v5351_v31 = vadd.f32 %v5350_v16, %v5237_v49  ;;  %v6534_v59 = vunpack.c.l.bf16 %v6282_v18  ;;  %v11348_v6 = vpop.f32.mrf.mxu0 }
 0x4c9   : > { %v5989_v13 = vadd.f32 %v7657_v56, %v5905_v22  ;;  %v5738_v14 = vmul.f32 0.1, %v5696_v4  ;;  %v5465_v33 = vadd.f32 %v11253_v1, %v5351_v31  ;;  %v11330_v1 = vld [vmem:[%s8259_s14] ss:$0 sm:$0xff]  ;;  %v5242_v56 = vadd.f32 %v11280_v41, %v5128_v51 }
 0x4ca   : > { %v12031_v22 = vld [vmem:[#allocation76_spill] sm:$0xff]  ;;  %v6300_v41 = vperm.slane %v6295_v40, %v11985_v29  ;;  %v6313_v40 = vpop.permute.xlu0 %6312 }
 0x4cb   : > { %v6031_v45 = vpack.c.bf16 %v5989_v13, %v5989_v13  ;;  %v5780_v38 = vmax.f32 %v5696_v4, %v5738_v14  ;;  %v5579_v19 = vadd.f32 %v11257_v21, %v5465_v33  ;;  %5392 = vmatmul.bf16.gmra.mxu3 %v12026_v34  ;;  %v6576_v21 = vmul.f32 %v6534_v59, %v6492_v52  ;;  %v11355_v13 = vpop.f32.mrf.mxu1  ;;  %v11358_v20 = vpop.f32.mrf.mxu2  ;;  %v7857_v34 = vld [vmem:[#allocation2 + $0x60] sm:$0xff]  }
 0x4cd   : > { %v6493_v48 = vunpack.c.l.bf16 %v6031_v45  ;;  %v5822_v39 = vpack.c.bf16 %v5780_v38, %v5780_v38  ;;  %v5652_v53 = vmul.f32 %v11330_v1, %v5579_v19  ;;  %v12032_v45 = vld [vmem:[#allocation12_spill] sm:$0xff] }
 0x4ce   : > { %v5353_v47 = vpop.f32.mrf.mxu3 }
 0x4cf   : > { %v6577_v61 = vmul.f32 %v6535_v54, %v6493_v48  ;;  %v5906_v0 = vunpack.c.l.bf16 %v5822_v39  ;;  %v5697_v58 = vadd.f32 %v11338_v46, %v5652_v53  ;;  %v5354_v7 = vadd.f32 %v5353_v47, %v5240_v57 }
 0x4d0   : > { %v6536_v57 = vunpack.c.l.bf16 %v6300_v41 }
 0x4d1   : > { %v7751_v42 = vpack.c.bf16 %v6577_v61, %v6576_v21  ;;  %v5739_v55 = vmul.f32 0.1, %v5697_v58  ;;  %v5468_v15 = vadd.f32 %v11274_v30, %v5354_v7  ;;  %v5990_v25 = vadd.f32 %v7660_v37, %v5906_v0  ;;  %v12030_v30 = vld [vmem:[#allocation64_spill] sm:$0xff] }
 0x4d2   : > { %v5017_v4 = vadd.f32 %v12031_v22, %v12030_v30  ;;  %v7664_v37 = vunpack.c.l.bf16 %v7857_v34  ;;  %v12036_v30 = vld [vmem:[#allocation98_spill] sm:$0xff] }
 0x4d3   : > { %7875 = vst [vmem:[#allocation2 + $0x50] sm:$0xff] %v7751_v42   ;;  %v5781_v49 = vmax.f32 %v5697_v58, %v5739_v55  ;;  %v5582_v28 = vadd.f32 %v11277_v5, %v5468_v15  ;;  %v6032_v17 = vpack.c.bf16 %v5990_v25, %v5990_v25  ;;  %v6309_v5 = vperm.slane %v6304_v36, %v11985_v29  ;;  %v11370_v15 = vpop.f32.mrf.mxu1  ;;  %v12037_v22 = vld [vmem:[#allocation82_spill] sm:$0xff] }
 0x4d4   : > { %v5131_v38 = vadd.f32 %v12032_v45, %v5017_v4  ;;  %v5022_v4 = vadd.f32 %v12037_v22, %v12036_v30  ;;  %v12043_v30 = vld [vmem:[#allocation87_spill] sm:$0xff] }
 0x4d5   : > { %v5823_v62 = vpack.c.bf16 %v5781_v49, %v5781_v49  ;;  %v5653_v16 = vmul.f32 %v11330_v1, %v5582_v28  ;;  %v6494_v9 = vunpack.c.l.bf16 %v6032_v17  ;;  %v6537_v54 = vunpack.c.l.bf16 %v6309_v5 }
 0x4d6   : > { %v5355_v8 = vpop.f32.mrf.mxu3  ;;  %v5245_v48 = vadd.f32 %v11299_v32, %v5131_v38  ;;  %v6318_v5 = vperm.slane %v6313_v40, %v11985_v29  ;;  %v12042_v40 = vld [vmem:[#allocation66_spill] sm:$0xff] }
 0x4d7   : > { %v5907_v31 = vunpack.c.l.bf16 %v5823_v62  ;;  %v5698_v18 = vadd.f32 %v11338_v46, %v5653_v16  ;;  %v5356_v11 = vadd.f32 %v5355_v8, %v5242_v56  ;;  %v6578_v21 = vmul.f32 %v6536_v57, %v6494_v9  ;;  %v11374_v56 = vpop.f32.mrf.mxu2  ;;  %v12038_v9 = vld [vmem:[#allocation15_spill] sm:$0xff] }
 0x4d8   : > { %v7665_v16 = vunpack.c.h.bf16 %v7857_v34  ;;  %v5136_v45 = vadd.f32 %v12038_v9, %v5022_v4  ;;  %v5027_v22 = vadd.f32 %v12043_v30, %v12042_v40 }
 0x4d9   : > { %v5991_v14 = vadd.f32 %v7661_v26, %v5907_v31  ;;  %v5740_v33 = vmul.f32 0.1, %v5698_v18  ;;  %v5470_v52 = vadd.f32 %v11291_v24, %v5356_v11  ;;  %v12034_v24 = vld [vmem:[#allocation79_spill] sm:$0xff] }
 0x4da   : > { %v5019_v35 = vadd.f32 %v12034_v24, %v12033_v43  ;;  %v12040_v43 = vld [vmem:[#allocation85_spill] sm:$0xff] }
 0x4db   : > { %v6033_v63 = vpack.c.bf16 %v5991_v14, %v5991_v14  ;;  %v5782_v19 = vmax.f32 %v5698_v18, %v5740_v33  ;;  %v5584_v59 = vadd.f32 %v11294_v3, %v5470_v52  ;;  %v11367_v3 = vpop.f32.mrf.mxu0  ;;  %v11388_v57 = vpop.f32.mrf.mxu1 }
 0x4dc   : > { %v5133_v51 = vadd.f32 %v12035_v50, %v5019_v35 }
 0x4dd   : > { %v6495_v39 = vunpack.c.l.bf16 %v6033_v63  ;;  %v5824_v53 = vpack.c.bf16 %v5782_v19, %v5782_v19  ;;  %v5654_v27 = vmul.f32 %v11330_v1, %v5584_v59  ;;  %v7858_v19 = vld [vmem:[#allocation2 + $0x68] sm:$0xff]  }
 0x4de   : > { %v5358_v47 = vpop.f32.mrf.mxu3  ;;  %v5247_v62 = vadd.f32 %v11315_v44, %v5133_v51 }
 0x4df   : > { %v6579_v61 = vmul.f32 %v6537_v54, %v6495_v39  ;;  %v5908_v0 = vunpack.c.l.bf16 %v5824_v53  ;;  %v5699_v58 = vadd.f32 %v11338_v46, %v5654_v27  ;;  %v5359_v7 = vadd.f32 %v5358_v47, %v5245_v48  ;;  %v12039_v27 = vld [vmem:[#allocation52_spill] sm:$0xff]  ;;  %v11394_v35 = vpop.f32.mrf.mxu2 }
 0x4e0   : > { %v6538_v54 = vunpack.c.l.bf16 %v6318_v5  ;;  %v5250_v48 = vadd.f32 %v11341_v23, %v5136_v45  ;;  %v5024_v24 = vadd.f32 %v12040_v43, %v12039_v27 }
 0x4e1   : > { %v7756_v42 = vpack.c.bf16 %v6579_v61, %v6578_v21  ;;  %v5741_v55 = vmul.f32 0.1, %v5699_v58  ;;  %v5473_v32 = vadd.f32 %v11307_v60, %v5359_v7  ;;  %v5992_v25 = vadd.f32 %v7664_v37, %v5908_v0  ;;  %v6322_v60 = vpop.permute.xlu1 %6321 }
 0x4e2   : > { %v7668_v37 = vunpack.c.l.bf16 %v7858_v19 }
 0x4e3   : > { %7876 = vst [vmem:[#allocation2 + $0x58] sm:$0xff] %v7756_v42   ;;  %v5783_v49 = vmax.f32 %v5699_v58, %v5741_v55  ;;  %v5587_v28 = vadd.f32 %v11311_v10, %v5473_v32  ;;  %v6034_v8 = vpack.c.bf16 %v5992_v25, %v5992_v25  ;;  %v6327_v10 = vperm.slane %v6322_v60, %v11985_v29  ;;  %v11384_v33 = vpop.f32.mrf.mxu0  ;;  %v12041_v32 = vld [vmem:[#allocation28_spill] sm:$0xff]  ;;  %v6340_v60 = vpop.permute.xlu0 %6339 }
 0x4e4   : > { %v5138_v25 = vadd.f32 %v12041_v32, %v5024_v24 }
 0x4e5   : > { %v5825_v26 = vpack.c.bf16 %v5783_v49, %v5783_v49  ;;  %v5655_v17 = vmul.f32 %v11330_v1, %v5587_v28  ;;  %v6496_v52 = vunpack.c.l.bf16 %v6034_v8  ;;  %v6539_v59 = vunpack.c.l.bf16 %v6327_v10 }
 0x4e6   : > { %v5360_v36 = vpop.f32.mrf.mxu3  ;;  %v5252_v28 = vadd.f32 %v11358_v20, %v5138_v25  ;;  %v6345_v20 = vperm.slane %v6340_v60, %v11985_v29 }
 0x4e7   : > { %v5909_v31 = vunpack.c.l.bf16 %v5825_v26  ;;  %v5700_v18 = vadd.f32 %v11338_v46, %v5655_v17  ;;  %v5361_v11 = vadd.f32 %v5360_v36, %v5247_v62  ;;  %v6580_v21 = vmul.f32 %v6538_v54, %v6496_v52  ;;  %v11404_v17 = vpop.f32.mrf.mxu1 }
 0x4e8   : > { %v7669_v26 = vunpack.c.h.bf16 %v7858_v19 }
 0x4e9   : > { %v5993_v44 = vadd.f32 %v7665_v16, %v5909_v31  ;;  %v5742_v41 = vmul.f32 0.1, %v5700_v18  ;;  %v5475_v14 = vadd.f32 %v11326_v12, %v5361_v11  ;;  %v11411_v11 = vpop.f32.mrf.mxu2 }
 0x4eb   : > { %v6035_v38 = vpack.c.bf16 %v5993_v44, %v5993_v44  ;;  %v5784_v63 = vmax.f32 %v5700_v18, %v5742_v41  ;;  %v5589_v34 = vadd.f32 %v11335_v2, %v5475_v14  ;;  %v11400_v49 = vpop.f32.mrf.mxu0  ;;  %v12044_v14 = vld [vmem:[#allocation29_spill] sm:$0xff] }
 0x4ec   : > { %v5141_v52 = vadd.f32 %v12044_v14, %v5027_v22 }
 0x4ed   : > { %v6497_v39 = vunpack.c.l.bf16 %v6035_v38  ;;  %v5826_v53 = vpack.c.bf16 %v5784_v63, %v5784_v63  ;;  %v5656_v12 = vmul.f32 %v11330_v1, %v5589_v34  ;;  %v7859_v38 = vld [vmem:[#allocation2 + $0x70] sm:$0xff]   ;;  %v6541_v34 = vunpack.c.l.bf16 %v6345_v20 }
 0x4ee   : > { %v5363_v47 = vpop.f32.mrf.mxu3  ;;  %v7672_v24 = vunpack.c.l.bf16 %v7859_v38 }
 0x4ef   : > { %v6581_v61 = vmul.f32 %v6539_v59, %v6497_v39  ;;  %v5910_v2 = vunpack.c.l.bf16 %v5826_v53  ;;  %v5701_v0 = vadd.f32 %v11338_v46, %v5656_v12  ;;  %v5364_v58 = vadd.f32 %v5363_v47, %v5250_v48  ;;  %v12045_v53 = vld [vmem:[#allocation101_spill] sm:$0xff]  ;;  %v12046_v12 = vld [vmem:[#allocation92_spill] sm:$0xff] }
 0x4f0   : > { %v5255_v59 = vadd.f32 %v11374_v56, %v5141_v52  ;;  %v5029_v27 = vadd.f32 %v12046_v12, %v12045_v53  ;;  %v7860_v52 = vld [vmem:[#allocation2 + $0x78] sm:$0xff]  }
 0x4f1   : > { %v7761_v7 = vpack.c.bf16 %v6581_v61, %v6580_v21  ;;  %v5743_v42 = vmul.f32 0.1, %v5701_v0  ;;  %v5478_v23 = vadd.f32 %v11348_v6, %v5364_v58  ;;  %v5994_v55 = vadd.f32 %v7668_v37, %v5910_v2  ;;  %v6331_v6 = vpop.permute.xlu2 %6330  ;;  %v5601_v2 = vpop.f32.mrf.mxu1 }
 0x4f2   : > { %v6336_v18 = vperm.slane %v6331_v6, %v11985_v29  ;;  %v12048_v6 = vld [vmem:[#allocation68_spill] sm:$0xff]  ;;  %v7676_v12 = vunpack.c.l.bf16 %v7860_v52 }
 0x4f3   : > { %7877 = vst [vmem:[#allocation2 + $0x60] sm:$0xff] %v7761_v7   ;;  %v5785_v50 = vmax.f32 %v5701_v0, %v5743_v42  ;;  %v5592_v51 = vadd.f32 %v11355_v13, %v5478_v23  ;;  %v6036_v8 = vpack.c.bf16 %v5994_v55, %v5994_v55  ;;  %v5261_v7 = vpop.f32.mrf.mxu2  ;;  %v12047_v23 = vld [vmem:[#allocation20_spill] sm:$0xff] }
 0x4f4   : > { %v6540_v19 = vunpack.c.l.bf16 %v6336_v18  ;;  %v5143_v55 = vadd.f32 %v12047_v23, %v5029_v27 }
 0x4f5   : > { %v5827_v62 = vpack.c.bf16 %v5785_v50, %v5785_v50  ;;  %v5657_v16 = vmul.f32 %v11330_v1, %v5592_v51  ;;  %v6498_v41 = vunpack.c.l.bf16 %v6036_v8 }
 0x4f6   : > { %v5365_v36 = vpop.f32.mrf.mxu3  ;;  %v5257_v50 = vadd.f32 %v11394_v35, %v5143_v55 }
 0x4f7   : > { %v5911_v4 = vunpack.c.l.bf16 %v5827_v62  ;;  %v5702_v13 = vadd.f32 %v11338_v46, %v5657_v16  ;;  %v5366_v31 = vadd.f32 %v5365_v36, %v5252_v28  ;;  %v6582_v43 = vmul.f32 %v6540_v19, %v6498_v41  ;;  %v6349_v36 = vpop.permute.xlu1 %6348 }
 0x4f8   : > { %v7673_v28 = vunpack.c.h.bf16 %v7859_v38 }
 0x4f9   : > { %v5995_v10 = vadd.f32 %v7669_v26, %v5911_v4  ;;  %v5744_v5 = vmul.f32 0.1, %v5702_v13  ;;  %v5480_v44 = vadd.f32 %v11367_v3, %v5366_v31  ;;  %v5487_v3 = vpop.f32.mrf.mxu0  ;;  %v6358_v8 = vpop.permute.xlu2 %6357 }
 0x4fa   : > { %v6363_v4 = vperm.slane %v6358_v8, %v11985_v29  ;;  %v5603_v20 = vpop.f32.mrf.mxu1  ;;  %v12054_v8 = vld [vmem:[#allocation71_spill] sm:$0xff] }
 0x4fb   : > { %v6037_v9 = vpack.c.bf16 %v5995_v10, %v5995_v10  ;;  %v5786_v45 = vmax.f32 %v5702_v13, %v5744_v5  ;;  %v5594_v63 = vadd.f32 %v11370_v15, %v5480_v44  ;;  %v12050_v5 = vld [vmem:[#allocation22_spill] sm:$0xff] }
 0x4fd   : > { %v6499_v54 = vunpack.c.l.bf16 %v6037_v9  ;;  %v5828_v48 = vpack.c.bf16 %v5786_v45, %v5786_v45  ;;  %v5658_v39 = vmul.f32 %v11330_v1, %v5594_v63  ;;  %v6543_v45 = vunpack.c.l.bf16 %v6363_v4  ;;  %v5264_v63 = vpop.f32.mrf.mxu2 }
 0x4fe   : > { %v5368_v21 = vpop.f32.mrf.mxu3 }
 0x4ff   : > { %v6583_v37 = vmul.f32 %v6541_v34, %v6499_v54  ;;  %v5912_v47 = vunpack.c.l.bf16 %v5828_v48  ;;  %v5703_v61 = vadd.f32 %v11338_v46, %v5658_v39  ;;  %v5369_v15 = vadd.f32 %v5368_v21, %v5255_v59  ;;  %v12051_v48 = vld [vmem:[#allocation16_spill] sm:$0xff] }
 0x501   : > { %v7766_v0 = vpack.c.bf16 %v6583_v37, %v6582_v43  ;;  %v5745_v58 = vmul.f32 0.1, %v5703_v61  ;;  %v5483_v56 = vadd.f32 %v11384_v33, %v5369_v15  ;;  %v5996_v42 = vadd.f32 %v7672_v24, %v5912_v47  ;;  %v12049_v33 = vld [vmem:[#allocation96_spill] sm:$0xff]  ;;  %v5489_v35 = vpop.f32.mrf.mxu0 }
 0x502   : > { %v5032_v60 = vadd.f32 %v12049_v33, %v12048_v6  ;;  %v5606_v23 = vpop.f32.mrf.mxu1 }
 0x503   : > { %7878 = vst [vmem:[#allocation2 + $0x68] sm:$0xff] %v7766_v0   ;;  %v5787_v32 = vmax.f32 %v5703_v61, %v5745_v58  ;;  %v5597_v25 = vadd.f32 %v11388_v57, %v5483_v56  ;;  %v6038_v26 = vpack.c.bf16 %v5996_v42, %v5996_v42  ;;  %v6354_v57 = vperm.slane %v6349_v36, %v11985_v29  ;;  %v12053_v0 = vld [vmem:[#allocation33_spill] sm:$0xff] }
 0x504   : > { %v5146_v44 = vadd.f32 %v12050_v5, %v5032_v60 }
 0x505   : > { %v5829_v51 = vpack.c.bf16 %v5787_v32, %v5787_v32  ;;  %v5659_v62 = vmul.f32 %v11330_v1, %v5597_v25  ;;  %v6500_v10 = vunpack.c.l.bf16 %v6038_v26  ;;  %v6542_v38 = vunpack.c.l.bf16 %v6354_v57  ;;  %v6376_v26 = vpop.permute.xlu1 %6375  ;;  %v12056_v57 = vld [vmem:[#allocation25_spill] sm:$0xff] }
 0x506   : > { %v5370_v16 = vpop.f32.mrf.mxu3  ;;  %v5260_v19 = vadd.f32 %v11411_v11, %v5146_v44  ;;  %v7677_v25 = vunpack.c.h.bf16 %v7860_v52 }
 0x507   : > { %v5913_v40 = vunpack.c.l.bf16 %v5829_v51  ;;  %v5704_v30 = vadd.f32 %v11338_v46, %v5659_v62  ;;  %v5371_v22 = vadd.f32 %v5370_v16, %v5257_v50  ;;  %v6584_v53 = vmul.f32 %v6542_v38, %v6500_v10  ;;  %v5266_v51 = vpop.f32.mrf.mxu2  ;;  %v6367_v16 = vpop.permute.xlu0 %6366  ;;  %v7861_v10 = vld [vmem:[#allocation2 + $0x80] sm:$0xff]  }
 0x509   : > { %v5997_v13 = vadd.f32 %v7673_v28, %v5913_v40  ;;  %v5746_v31 = vmul.f32 0.1, %v5704_v30  ;;  %v5485_v18 = vadd.f32 %v11400_v49, %v5371_v22  ;;  %v12052_v49 = vld [vmem:[#allocation100_spill] sm:$0xff]  ;;  %v5492_v15 = vpop.f32.mrf.mxu0 }
 0x50a   : > { %v5034_v39 = vadd.f32 %v12052_v49, %v12051_v48  ;;  %v7680_v48 = vunpack.c.l.bf16 %v7861_v10 }
 0x50b   : > { %v6039_v41 = vpack.c.bf16 %v5997_v13, %v5997_v13  ;;  %v5788_v14 = vmax.f32 %v5704_v30, %v5746_v31  ;;  %v5599_v9 = vadd.f32 %v11404_v17, %v5485_v18 }
 0x50c   : > { %v5148_v58 = vadd.f32 %v12053_v0, %v5034_v39 }
 0x50d   : > { %v6501_v34 = vunpack.c.l.bf16 %v6039_v41  ;;  %v5830_v59 = vpack.c.bf16 %v5788_v14, %v5788_v14  ;;  %v5660_v54 = vmul.f32 %v11330_v1, %v5599_v9 }
 0x50e   : > { %v5373_v27 = vpop.f32.mrf.mxu3  ;;  %v5262_v55 = vadd.f32 %v5261_v7, %v5148_v58  ;;  %v6372_v7 = vperm.slane %v6367_v16, %v11985_v29  ;;  %v7681_v58 = vunpack.c.h.bf16 %v7861_v10 }
 0x50f   : > { %v6585_v43 = vmul.f32 %v6543_v45, %v6501_v34  ;;  %v5914_v24 = vunpack.c.l.bf16 %v5830_v59  ;;  %v5705_v21 = vadd.f32 %v11338_v46, %v5660_v54  ;;  %v5374_v17 = vadd.f32 %v5373_v27, %v5260_v19  ;;  %v12057_v19 = vld [vmem:[#allocation51_spill] sm:$0xff]  ;;  %v12058_v34 = vld [vmem:[#allocation108_spill] sm:$0xff]  ;;  %v5608_v54 = vpop.f32.mrf.mxu1  ;;  %v5269_v27 = vpop.f32.mrf.mxu2 }
 0x510   : > { %v6544_v41 = vunpack.c.l.bf16 %v6372_v7  ;;  %v5039_v59 = vadd.f32 %v12058_v34, %v12057_v19  ;;  %v12062_v7 = vld [vmem:[#allocation32_spill] sm:$0xff] }
 0x511   : > { %v7771_v37 = vpack.c.bf16 %v6585_v43, %v6584_v53  ;;  %v5747_v47 = vmul.f32 0.1, %v5705_v21  ;;  %v5488_v61 = vadd.f32 %v5487_v3, %v5374_v17  ;;  %v5998_v11 = vadd.f32 %v7676_v12, %v5914_v24  ;;  %v12055_v3 = vld [vmem:[#allocation104_spill] sm:$0xff]  ;;  %v5494_v14 = vpop.f32.mrf.mxu0  ;;  %v12059_v17 = vld [vmem:[#allocation27_spill] sm:$0xff] }
 0x512   : > { %v5037_v36 = vadd.f32 %v12055_v3, %v12054_v8 }
 0x513   : > { %7879 = vst [vmem:[#allocation2 + $0x70] sm:$0xff] %v7771_v37   ;;  %v5789_v56 = vmax.f32 %v5705_v21, %v5747_v47  ;;  %v5602_v42 = vadd.f32 %v5601_v2, %v5488_v61  ;;  %v6040_v28 = vpack.c.bf16 %v5998_v11, %v5998_v11  ;;  %v6381_v2 = vperm.slane %v6376_v26, %v11985_v29 }
 0x514   : > { %v5151_v13 = vadd.f32 %v12056_v57, %v5037_v36  ;;  %v5153_v37 = vadd.f32 %v12059_v17, %v5039_v59 }
 0x515   : > { %v5831_v32 = vpack.c.bf16 %v5789_v56, %v5789_v56  ;;  %v5661_v50 = vmul.f32 %v11330_v1, %v5602_v42  ;;  %v6502_v4 = vunpack.c.l.bf16 %v6040_v28  ;;  %v6545_v44 = vunpack.c.l.bf16 %v6381_v2  ;;  %v12060_v28 = vld [vmem:[#allocation69_spill] sm:$0xff] }
 0x516   : > { %v5375_v62 = vpop.f32.mrf.mxu3  ;;  %v5265_v52 = vadd.f32 %v5264_v63, %v5151_v13  ;;  %v5267_v11 = vadd.f32 %v5266_v51, %v5153_v37 }
 0x517   : > { %v5915_v6 = vunpack.c.l.bf16 %v5831_v32  ;;  %v5706_v33 = vadd.f32 %v11338_v46, %v5661_v50  ;;  %v5376_v60 = vadd.f32 %v5375_v62, %v5262_v55  ;;  %v6394_v50 = vpop.permute.xlu0 %6393  ;;  %v12061_v62 = vld [vmem:[#allocation10_spill] sm:$0xff]  ;;  %v5611_v51 = vpop.f32.mrf.mxu1 }
 0x518   : > { %v5042_v26 = vadd.f32 %v12061_v62, %v12060_v28 }
 0x519   : > { %v5999_v40 = vadd.f32 %v7677_v25, %v5915_v6  ;;  %v5748_v30 = vmul.f32 0.1, %v5706_v33  ;;  %v5490_v22 = vadd.f32 %v5489_v35, %v5376_v60  ;;  %v6586_v35 = vmul.f32 %v6544_v41, %v6502_v4  ;;  %v5497_v42 = vpop.f32.mrf.mxu0  ;;  %v6385_v25 = vpop.permute.xlu2 %6384  ;;  %v7862_v4 = vld [vmem:[#allocation2 + $0x88] sm:$0xff]  }
 0x51a   : > { %v6390_v3 = vperm.slane %v6385_v25, %v11985_v29  ;;  %v5271_v60 = vpop.f32.mrf.mxu2  ;;  %v12063_v41 = vld [vmem:[#allocation73_spill] sm:$0xff]  ;;  %v7685_v37 = vunpack.c.h.bf16 %v7862_v4 }
 0x51b   : > { %v6041_v31 = vpack.c.bf16 %v5999_v40, %v5999_v40  ;;  %v5790_v18 = vmax.f32 %v5706_v33, %v5748_v30  ;;  %v5604_v5 = vadd.f32 %v5603_v20, %v5490_v22  ;;  %v5156_v40 = vadd.f32 %v12062_v7, %v5042_v26 }
 0x51c   : > { %v6546_v13 = vunpack.c.l.bf16 %v6390_v3 }
 0x51d   : > { %v6503_v9 = vunpack.c.l.bf16 %v6041_v31  ;;  %v5832_v45 = vpack.c.bf16 %v5790_v18, %v5790_v18  ;;  %v5662_v38 = vmul.f32 %v11330_v1, %v5604_v5  ;;  %v5270_v18 = vadd.f32 %v5269_v27, %v5156_v40 }
 0x51e   : > { %v5378_v49 = vpop.f32.mrf.mxu3 }
 0x51f   : > { %v6587_v39 = vmul.f32 %v6545_v44, %v6503_v9  ;;  %v5916_v53 = vunpack.c.l.bf16 %v5832_v45  ;;  %v5707_v12 = vadd.f32 %v11338_v46, %v5662_v38  ;;  %v5379_v20 = vadd.f32 %v5378_v49, %v5265_v52  ;;  %v12064_v52 = vld [vmem:[#allocation114_spill] sm:$0xff] }
 0x520   : > { %v5044_v9 = vadd.f32 %v12064_v52, %v12063_v41 }
 0x521   : > { %v7776_v43 = vpack.c.bf16 %v6587_v39, %v6586_v35  ;;  %v5749_v24 = vmul.f32 0.1, %v5707_v12  ;;  %v5493_v63 = vadd.f32 %v5492_v15, %v5379_v20  ;;  %v6000_v21 = vadd.f32 %v7680_v48, %v5916_v53  ;;  %v5499_v48 = vpop.f32.mrf.mxu0  ;;  %v5613_v53 = vpop.f32.mrf.mxu1  ;;  %v12065_v20 = vld [vmem:[#allocation35_spill] sm:$0xff] }
 0x522   : > { %v5158_v27 = vadd.f32 %v12065_v20, %v5044_v9 }
 0x523   : > { %7880 = vst [vmem:[#allocation2 + $0x78] sm:$0xff] %v7776_v43   ;;  %v5791_v47 = vmax.f32 %v5707_v12, %v5749_v24  ;;  %v5607_v61 = vadd.f32 %v5606_v23, %v5493_v63  ;;  %v6042_v55 = vpack.c.bf16 %v6000_v21, %v6000_v21  ;;  %v6399_v23 = vperm.slane %v6394_v50, %v11985_v29  ;;  %v5274_v63 = vpop.f32.mrf.mxu2 }
 0x524   : > { %v5272_v21 = vadd.f32 %v5271_v60, %v5158_v27 }
 0x525   : > { %v5833_v0 = vpack.c.bf16 %v5791_v47, %v5791_v47  ;;  %v5663_v56 = vmul.f32 %v11330_v1, %v5607_v61  ;;  %v6504_v2 = vunpack.c.l.bf16 %v6042_v55  ;;  %v6547_v31 = vunpack.c.l.bf16 %v6399_v23  ;;  %v12067_v55 = vld [vmem:[#allocation118_spill] sm:$0xff]  ;;  %v12068_v23 = vld [vmem:[#allocation56_spill] sm:$0xff] }
 0x526   : > { %v5380_v32 = vpop.f32.mrf.mxu3 }
 0x527   : > { %v5917_v15 = vunpack.c.l.bf16 %v5833_v0  ;;  %v5708_v16 = vadd.f32 %v11338_v46, %v5663_v56  ;;  %v5381_v8 = vadd.f32 %v5380_v32, %v5267_v11  ;;  %v6588_v45 = vmul.f32 %v6546_v13, %v6504_v2  ;;  %v6412_v0 = vpop.permute.xlu2 %6411  ;;  %v12066_v56 = vld [vmem:[#allocation77_spill] sm:$0xff] }
 0x528   : > { %v6417_v28 = vperm.slane %v6412_v0, %v11985_v29  ;;  %v12069_v13 = vld [vmem:[#allocation117_spill] sm:$0xff] }
 0x529   : > { %v6001_v36 = vadd.f32 %v7681_v58, %v5917_v15  ;;  %v5750_v6 = vmul.f32 0.1, %v5708_v16  ;;  %v5495_v33 = vadd.f32 %v5494_v14, %v5381_v8  ;;  %v7684_v14 = vunpack.c.l.bf16 %v7862_v4  ;;  %v6403_v58 = vpop.permute.xlu1 %6402  ;;  %v5502_v8 = vpop.f32.mrf.mxu0 }
 0x52a   : > { %v6408_v62 = vperm.slane %v6403_v58, %v11985_v29  ;;  %v6549_v2 = vunpack.c.l.bf16 %v6417_v28  ;;  %v5616_v40 = vpop.f32.mrf.mxu1 }
 0x52b   : > { %v6043_v30 = vpack.c.bf16 %v6001_v36, %v6001_v36  ;;  %v5792_v22 = vmax.f32 %v5708_v16, %v5750_v6  ;;  %v5609_v57 = vadd.f32 %v5608_v54, %v5495_v33  ;;  %v7863_v33 = vld [vmem:[#allocation2 + $0x90] sm:$0xff]  }
 0x52c   : > { %v6548_v7 = vunpack.c.l.bf16 %v6408_v62  ;;  %v12074_v62 = vld [vmem:[#allocation62_spill] sm:$0xff] }
 0x52d   : > { %v6505_v10 = vunpack.c.l.bf16 %v6043_v30  ;;  %v5834_v5 = vpack.c.bf16 %v5792_v22, %v5792_v22  ;;  %v5664_v44 = vmul.f32 %v11330_v1, %v5609_v57 }
 0x52e   : > { %v5383_v38 = vpop.f32.mrf.mxu3 }
 0x52f   : > { %v6589_v19 = vmul.f32 %v6547_v31, %v6505_v10  ;;  %v5918_v34 = vunpack.c.l.bf16 %v5834_v5  ;;  %v5709_v59 = vadd.f32 %v11338_v46, %v5664_v44  ;;  %v5384_v35 = vadd.f32 %v5383_v38, %v5270_v18  ;;  %v12070_v31 = vld [vmem:[#allocation54_spill] sm:$0xff]  ;;  %v5276_v10 = vpop.f32.mrf.mxu2 }
 0x530   : > { %v5049_v18 = vadd.f32 %v12070_v31, %v12069_v13  ;;  %v7688_v44 = vunpack.c.l.bf16 %v7863_v33 }
 0x531   : > { %v7781_v54 = vpack.c.bf16 %v6589_v19, %v6588_v45  ;;  %v5751_v49 = vmul.f32 0.1, %v5709_v59  ;;  %v5498_v39 = vadd.f32 %v5497_v42, %v5384_v35  ;;  %v6002_v12 = vadd.f32 %v7684_v14, %v5918_v34  ;;  %v12071_v35 = vld [vmem:[#allocation59_spill] sm:$0xff] }
 0x532   : > { %v5047_v42 = vadd.f32 %v12067_v55, %v12066_v56 }
 0x533   : > { %7881 = vst [vmem:[#allocation2 + $0x80] sm:$0xff] %v7781_v54   ;;  %v5793_v43 = vmax.f32 %v5709_v59, %v5751_v49  ;;  %v5612_v24 = vadd.f32 %v5611_v51, %v5498_v39  ;;  %v6044_v61 = vpack.c.bf16 %v6002_v12, %v6002_v12  ;;  %v5504_v39 = vpop.f32.mrf.mxu0  ;;  %v6421_v12 = vpop.permute.xlu0 %6420 }
 0x534   : > { %v5161_v51 = vadd.f32 %v12068_v23, %v5047_v42  ;;  %v6426_v55 = vperm.slane %v6421_v12, %v11985_v29 }
 0x535   : > { %v5835_v17 = vpack.c.bf16 %v5793_v43, %v5793_v43  ;;  %v5665_v47 = vmul.f32 %v11330_v1, %v5612_v24  ;;  %v6506_v3 = vunpack.c.l.bf16 %v6044_v61  ;;  %v7689_v43 = vunpack.c.h.bf16 %v7863_v33 }
 0x536   : > { %v5385_v11 = vpop.f32.mrf.mxu3  ;;  %v5275_v30 = vadd.f32 %v5274_v63, %v5161_v51  ;;  %v5618_v63 = vpop.f32.mrf.mxu1  ;;  %v6550_v51 = vunpack.c.l.bf16 %v6426_v55 }
 0x537   : > { %v5919_v32 = vunpack.c.l.bf16 %v5835_v17  ;;  %v5710_v25 = vadd.f32 %v11338_v46, %v5665_v47  ;;  %v5386_v50 = vadd.f32 %v5385_v11, %v5272_v21  ;;  %v6590_v5 = vmul.f32 %v6548_v7, %v6506_v3  ;;  %v12073_v47 = vld [vmem:[#allocation23_spill] sm:$0xff]  ;;  %v5279_v42 = vpop.f32.mrf.mxu2  ;;  %v12076_v7 = vld [vmem:[#allocation24_spill] sm:$0xff] }
 0x539   : > { %v6003_v26 = vadd.f32 %v7685_v37, %v5919_v32  ;;  %v5752_v15 = vmul.f32 0.1, %v5710_v25  ;;  %v5500_v16 = vadd.f32 %v5499_v48, %v5386_v50  ;;  %v5163_v48 = vadd.f32 %v12071_v35, %v5049_v18  ;;  %v12072_v37 = vld [vmem:[#allocation75_spill] sm:$0xff] }
 0x53a   : > { %v5052_v61 = vadd.f32 %v12073_v47, %v12072_v37 }
 0x53b   : > { %v6045_v36 = vpack.c.bf16 %v6003_v26, %v6003_v26  ;;  %v5794_v6 = vmax.f32 %v5710_v25, %v5752_v15  ;;  %v5614_v60 = vadd.f32 %v5613_v53, %v5500_v16  ;;  %v6430_v53 = vpop.permute.xlu1 %6429  ;;  %v5277_v20 = vadd.f32 %v5276_v10, %v5163_v48 }
 0x53c   : > { %v6435_v56 = vperm.slane %v6430_v53, %v11985_v29  ;;  %v5166_v26 = vadd.f32 %v12074_v62, %v5052_v61  ;;  %v6439_v53 = vpop.permute.xlu2 %6438 }
 0x53d   : > { %v6507_v22 = vunpack.c.l.bf16 %v6045_v36  ;;  %v5836_v4 = vpack.c.bf16 %v5794_v6, %v5794_v6  ;;  %v5666_v57 = vmul.f32 %v11330_v1, %v5614_v60 }
 0x53e   : > { %v5388_v41 = vpop.f32.mrf.mxu3  ;;  %v6551_v23 = vunpack.c.l.bf16 %v6435_v56  ;;  %v5280_v36 = vadd.f32 %v5279_v42, %v5166_v26  ;;  %v7865_v56 = vld [vmem:[#allocation2 + $0xa0] sm:$0xff]  }
 0x53f   : > { %v6591_v52 = vmul.f32 %v6549_v2, %v6507_v22  ;;  %v5920_v9 = vunpack.c.l.bf16 %v5836_v4  ;;  %v5711_v45 = vadd.f32 %v11338_v46, %v5666_v57  ;;  %v5389_v14 = vadd.f32 %v5388_v41, %v5275_v30  ;;  %v12075_v2 = vld [vmem:[#allocation78_spill] sm:$0xff]  ;;  %v5507_v30 = vpop.f32.mrf.mxu0 }
 0x540   : > { %v7696_v62 = vunpack.c.l.bf16 %v7865_v56 }
 0x541   : > { %v7786_v38 = vpack.c.bf16 %v6591_v52, %v6590_v5  ;;  %v5753_v19 = vmul.f32 0.1, %v5711_v45  ;;  %v5503_v34 = vadd.f32 %v5502_v8, %v5389_v14  ;;  %v6004_v59 = vadd.f32 %v7688_v44, %v5920_v9  ;;  %v7864_v8 = vld [vmem:[#allocation2 + $0x98] sm:$0xff]   ;;  %v5621_v5 = vpop.f32.mrf.mxu1  ;;  %v5281_v9 = vpop.f32.mrf.mxu2 }
 0x542   : > { %v7692_v4 = vunpack.c.l.bf16 %v7864_v8  ;;  %v7693_v48 = vunpack.c.h.bf16 %v7864_v8 }
 0x543   : > { %7882 = vst [vmem:[#allocation2 + $0x88] sm:$0xff] %v7786_v38   ;;  %v5795_v54 = vmax.f32 %v5711_v45, %v5753_v19  ;;  %v5617_v49 = vadd.f32 %v5616_v40, %v5503_v34  ;;  %v6046_v21 = vpack.c.bf16 %v6004_v59, %v6004_v59  ;;  %v5054_v40 = vadd.f32 %v12076_v7, %v12075_v2  ;;  %v12077_v45 = vld [vmem:[#allocation94_spill] sm:$0xff]  ;;  %v6457_v2 = vpop.permute.xlu1 %6456 }
 0x545   : > { %v5837_v27 = vpack.c.bf16 %v5795_v54, %v5795_v54  ;;  %v5667_v24 = vmul.f32 %v11330_v1, %v5617_v49  ;;  %v6508_v28 = vunpack.c.l.bf16 %v6046_v21  ;;  %v5168_v14 = vadd.f32 %v12077_v45, %v5054_v40  ;;  %v6448_v49 = vpop.permute.xlu0 %6447 }
 0x546   : > { %v5390_v17 = vpop.f32.mrf.mxu3  ;;  %v6453_v21 = vperm.slane %v6448_v49, %v11985_v29 }
 0x547   : > { %v5921_v11 = vunpack.c.l.bf16 %v5837_v27  ;;  %v5712_v0 = vadd.f32 %v11338_v46, %v5667_v24  ;;  %v5391_v58 = vadd.f32 %v5390_v17, %v5277_v20  ;;  %v6592_v22 = vmul.f32 %v6550_v51, %v6508_v28 }
 0x548   : > { %v5282_v59 = vadd.f32 %v5281_v9, %v5168_v14  ;;  %v6444_v24 = vperm.slane %v6439_v53, %v11985_v29 }
 0x549   : > { %v6005_v32 = vadd.f32 %v7689_v43, %v5921_v11  ;;  %v5754_v25 = vmul.f32 0.1, %v5712_v0  ;;  %v5505_v50 = vadd.f32 %v5504_v39, %v5391_v58  ;;  %v5623_v61 = vpop.f32.mrf.mxu1 }
 0x54a   : > { %v6552_v42 = vunpack.c.l.bf16 %v6444_v24 }
 0x54b   : > { %v6047_v15 = vpack.c.bf16 %v6005_v32, %v6005_v32  ;;  %v5796_v16 = vmax.f32 %v5712_v0, %v5754_v25  ;;  %v5619_v3 = vadd.f32 %v5618_v63, %v5505_v50  ;;  %v5509_v63 = vpop.f32.mrf.mxu0  ;;  %v6553_v32 = vunpack.c.l.bf16 %v6453_v21 }
 0x54d   : > { %v6509_v6 = vunpack.c.l.bf16 %v6047_v15  ;;  %v5838_v33 = vpack.c.bf16 %v5796_v16, %v5796_v16  ;;  %v5668_v60 = vmul.f32 %v11330_v1, %v5619_v3 }
 0x54e   : > { %v5393_v57 = vpop.f32.mrf.mxu3 }
 0x54f   : > { %v6593_v13 = vmul.f32 %v6551_v23, %v6509_v6  ;;  %v5922_v31 = vunpack.c.l.bf16 %v5838_v33  ;;  %v5713_v18 = vadd.f32 %v11338_v46, %v5668_v60  ;;  %v5394_v10 = vadd.f32 %v5393_v57, %v5280_v36  ;;  %v6466_v60 = vpop.permute.xlu2 %6465 }
 0x550   : > { %v7697_v33 = vunpack.c.h.bf16 %v7865_v56 }
 0x551   : > { %v7791_v44 = vpack.c.bf16 %v6593_v13, %v6592_v22  ;;  %v5755_v41 = vmul.f32 0.1, %v5713_v18  ;;  %v5508_v52 = vadd.f32 %v5507_v30, %v5394_v10  ;;  %v6006_v38 = vadd.f32 %v7692_v4, %v5922_v31 }
 0x552   : > { %v6471_v30 = vperm.slane %v6466_v60, %v11985_v29 }
 0x553   : > { %7883 = vst [vmem:[#allocation2 + $0x90] sm:$0xff] %v7791_v44   ;;  %v5797_v19 = vmax.f32 %v5713_v18, %v5755_v41  ;;  %v5622_v34 = vadd.f32 %v5621_v5, %v5508_v52  ;;  %v6048_v12 = vpack.c.bf16 %v6006_v38, %v6006_v38 }
 0x554   : > { %v6555_v13 = vunpack.c.l.bf16 %v6471_v30 }
 0x555   : > { %v5839_v35 = vpack.c.bf16 %v5797_v19, %v5797_v19  ;;  %v5669_v54 = vmul.f32 %v11330_v1, %v5622_v34  ;;  %v6510_v11 = vunpack.c.l.bf16 %v6048_v12 }
 0x556   : > { %v5395_v39 = vpop.f32.mrf.mxu3 }
 0x557   : > { %v5923_v20 = vunpack.c.l.bf16 %v5839_v35  ;;  %v5714_v27 = vadd.f32 %v11338_v46, %v5669_v54  ;;  %v5396_v43 = vadd.f32 %v5395_v39, %v5282_v59  ;;  %v6594_v26 = vmul.f32 %v6552_v42, %v6510_v11 }
 0x559   : > { %v6007_v17 = vadd.f32 %v7693_v48, %v5923_v20  ;;  %v5756_v37 = vmul.f32 0.1, %v5714_v27  ;;  %v5510_v47 = vadd.f32 %v5509_v63, %v5396_v43 }
 0x55b   : > { %v6049_v0 = vpack.c.bf16 %v6007_v17, %v6007_v17  ;;  %v5798_v58 = vmax.f32 %v5714_v27, %v5756_v37  ;;  %v5624_v55 = vadd.f32 %v5623_v61, %v5510_v47 }
 0x55d   : > { %v6511_v25 = vunpack.c.l.bf16 %v6049_v0  ;;  %v5840_v50 = vpack.c.bf16 %v5798_v58, %v5798_v58  ;;  %v5670_v28 = vmul.f32 %v11330_v1, %v5624_v55  ;;  %v6462_v1 = vperm.slane %v6457_v2, %v11985_v29 }
 0x55f   : > { %v6595_v15 = vmul.f32 %v6553_v32, %v6511_v25  ;;  %v5924_v16 = vunpack.c.l.bf16 %v5840_v50  ;;  %v5715_v8 = vadd.f32 %v11338_v46, %v5670_v28  ;;  %v6554_v46 = vunpack.c.l.bf16 %v6462_v1 }
 0x561   : > { %v7796_v3 = vpack.c.bf16 %v6595_v15, %v6594_v26  ;;  %v5757_v23 = vmul.f32 0.1, %v5715_v8  ;;  %v6008_v51 = vadd.f32 %v7696_v62, %v5924_v16 }
 0x563   : > { %7884 = vst [vmem:[#allocation2 + $0x98] sm:$0xff] %v7796_v3   ;;  %v5799_v36 = vmax.f32 %v5715_v8, %v5757_v23  ;;  %v6050_v7 = vpack.c.bf16 %v6008_v51, %v6008_v51 }
 0x565   : > { %v5841_v6 = vpack.c.bf16 %v5799_v36, %v5799_v36  ;;  %v6512_v4 = vunpack.c.l.bf16 %v6050_v7 }
 0x567   : > { %v5925_v40 = vunpack.c.l.bf16 %v5841_v6  ;;  %v6596_v18 = vmul.f32 %v6554_v46, %v6512_v4 }
 0x569   : > { %v6009_v22 = vadd.f32 %v7697_v33, %v5925_v40 }
 0x56b   : > { %v6051_v57 = vpack.c.bf16 %v6009_v22, %v6009_v22 }
 0x56d   : > { %v6513_v31 = vunpack.c.l.bf16 %v6051_v57 }
 0x56f   : > { %v6597_v10 = vmul.f32 %v6555_v13, %v6513_v31  ;;  %6685 = sbr.rel (%p7315_p8) target bundleno = 1418 (0x58a), region = 60 }
 0x571   : > { %v7801_v5 = vpack.c.bf16 %v6597_v10, %v6596_v18 }
 0x573   : > { %7885 = vst [vmem:[#allocation2 + $0xa0] sm:$0xff] %v7801_v5  }
 0x574   : > { %v6686_v44 = vld [vmem:[#allocation2] sm:$0xff]   ;;  %v6688_v29 = vld [vmem:[#allocation2 + $0x8] sm:$0xff]   ;;  %v6690_v41 = vld [vmem:[#allocation2 + $0x10] sm:$0xff]  }
 0x575   : > { %6728 = vst [vmem:[%s8269_s25] sm:$0xff] %v6686_v44   ;;  %v6692_v52 = vld [vmem:[#allocation2 + $0x18] sm:$0xff]   ;;  %v6694_v9 = vld [vmem:[#allocation2 + $0x20] sm:$0xff]   ;;  %v6696_v45 = vld [vmem:[#allocation2 + $0x28] sm:$0xff]  }
 0x576   : > { %6730 = vst [vmem:[%s8269_s25 + $0x8] sm:$0xff] %v6688_v29   ;;  %v6698_v14 = vld [vmem:[#allocation2 + $0x30] sm:$0xff]   ;;  %v6700_v38 = vld [vmem:[#allocation2 + $0x38] sm:$0xff]   ;;  %v6702_v19 = vld [vmem:[#allocation2 + $0x40] sm:$0xff]  }
 0x577   : > { %6732 = vst [vmem:[%s8269_s25 + $0x10] sm:$0xff] %v6690_v41   ;;  %v6704_v34 = vld [vmem:[#allocation2 + $0x48] sm:$0xff]   ;;  %v6706_v59 = vld [vmem:[#allocation2 + $0x50] sm:$0xff]   ;;  %v6708_v35 = vld [vmem:[#allocation2 + $0x58] sm:$0xff]  }
 0x578   : > { %6734 = vst [vmem:[%s8269_s25 + $0x18] sm:$0xff] %v6692_v52   ;;  %v6710_v48 = vld [vmem:[#allocation2 + $0x60] sm:$0xff]   ;;  %v6712_v54 = vld [vmem:[#allocation2 + $0x68] sm:$0xff]   ;;  %v6714_v49 = vld [vmem:[#allocation2 + $0x70] sm:$0xff]  }
 0x579   : > { %6736 = vst [vmem:[%s8269_s25 + $0x20] sm:$0xff] %v6694_v9   ;;  %v6716_v39 = vld [vmem:[#allocation2 + $0x78] sm:$0xff]   ;;  %v6718_v53 = vld [vmem:[#allocation2 + $0x80] sm:$0xff]   ;;  %v6720_v12 = vld [vmem:[#allocation2 + $0x88] sm:$0xff]  }
 0x57a   : > { %6738 = vst [vmem:[%s8269_s25 + $0x28] sm:$0xff] %v6696_v45   ;;  %v6722_v20 = vld [vmem:[#allocation2 + $0x90] sm:$0xff]   ;;  %v6724_v27 = vld [vmem:[#allocation2 + $0x98] sm:$0xff]   ;;  %v6726_v43 = vld [vmem:[#allocation2 + $0xa0] sm:$0xff]  }
 0x57b   : > { %6740 = vst [vmem:[%s8269_s25 + $0x30] sm:$0xff] %v6698_v14  }
 0x57c   : > { %6742 = vst [vmem:[%s8269_s25 + $0x38] sm:$0xff] %v6700_v38  }
 0x57d   : > { %6744 = vst [vmem:[%s8269_s25 + $0x40] sm:$0xff] %v6702_v19  }
 0x57e   : > { %6746 = vst [vmem:[%s8269_s25 + $0x48] sm:$0xff] %v6704_v34  }
 0x57f   : > { %6748 = vst [vmem:[%s8269_s25 + $0x50] sm:$0xff] %v6706_v59  }
 0x580   : > { %6750 = vst [vmem:[%s8269_s25 + $0x58] sm:$0xff] %v6708_v35  }
 0x581   : > { %6752 = vst [vmem:[%s8269_s25 + $0x60] sm:$0xff] %v6710_v48  }
 0x582   : > { %6754 = vst [vmem:[%s8269_s25 + $0x68] sm:$0xff] %v6712_v54  }
 0x583   : > { %6756 = vst [vmem:[%s8269_s25 + $0x70] sm:$0xff] %v6714_v49  }
 0x584   : > { %6758 = vst [vmem:[%s8269_s25 + $0x78] sm:$0xff] %v6716_v39  }
 0x585   : > { %6760 = vst [vmem:[%s8269_s25 + $0x80] sm:$0xff] %v6718_v53  }
 0x586   : > { %6762 = vst [vmem:[%s8269_s25 + $0x88] sm:$0xff] %v6720_v12  }
 0x587   : > { %6764 = vst [vmem:[%s8269_s25 + $0x90] sm:$0xff] %v6722_v20  }
 0x588   : > { %6766 = vst [vmem:[%s8269_s25 + $0x98] sm:$0xff] %v6724_v27  }
 0x589   : > { %6768 = vst [vmem:[%s8269_s25 + $0xa0] sm:$0xff] %v6726_v43  }
 0x58a PF: > { %s18_s9 = sadd.s32 1, %s8148_s9   ;;  %s12078_s24 = sld [smem:[#allocation4_spill]] }
 0x58b   : > { %p15_p9 = scmp.ge.s32.totalorder %s18_s9, 6   ;;  %s12079_s16 = sld [smem:[#allocation5_spill]] }
 0x58c   : > { %s12080_s27 = smov %s8140_s29  ;;  %s12081_s28 = smov %s8144_s30 }
 0x58d   :  { %17 = sbr.rel (!%p15_p9) target bundleno = 3 (0x3), region = 108 }
 0x590   : > { %s12082_s29 = smov %s12078_s24 }
 0x591   : > { %s12083_s30 = smov %s12079_s16 }

</bundles_post_ra>
